<compile_context>
chip_gen: v5e
topology: v5e:2x2
jax: 0.10.0
libtpu: 0.0.40
codegen_flags: <defaults>
</compile_context>

<pallas_src>
import functools

import numpy as np
import jax
import jax.numpy as jnp
from jax import lax
from jax.experimental import pallas as pl
from jax.experimental.pallas import tpu as pltpu


def _round_up(x, m):
    return (x + m - 1) // m * m


# ---------------------------------------------------------------------------
# Fused Conv2d(3x3, s=1, p=1) + ReLU + MaxPool2d(2) kernel.
# ---------------------------------------------------------------------------
def _conv_relu_pool_kernel(x_ref, w_ref, b_ref, o_ref, acc_ref, *, wq):
    """One row-tile of pooled outputs.

    x_ref:   (Lt, 4*Cin) bf16.  Row p = u*wq + v holds the 4 parity slabs
             (lane-concatenated) of the zero-padded input at slab position
             (u, v) of this tile (u includes a 1-row halo).
    w_ref:   (4, 4*Cin, 4*Cout) bf16 block weight; group g=(qr,qc), K index
             (sr*2+sc)*Cin + cin, N index (oy*2+ox)*Cout + cout.
    b_ref:   (1, Cout) f32.
    o_ref:   (L, Cout) bf16; row i*wq + j is pooled output (i, j).  Rows with
             j == wq-1 are seam garbage and are cropped by the host.
    acc_ref: (L, 4*Cout) f32 VMEM scratch accumulator.
    """
    L, cout = o_ref.shape
    # 4 accumulating dots: one per tap-parity group (qr, qc).
    for g, (qr, qc) in enumerate(((0, 0), (0, 1), (1, 0), (1, 1))):
        start = qr * wq + qc                          # static row offset
        tap = x_ref[pl.ds(start, L), :]               # (L, 4*Cin) bf16
        d = jnp.dot(tap, w_ref[g], preferred_element_type=jnp.float32)
        if g == 0:
            acc_ref[...] = d
        else:
            acc_ref[...] += d
    # 2x2 max-pool = max over the 4 pooling-offset lane groups, then bias+ReLU.
    m = jnp.maximum(
        jnp.maximum(acc_ref[:, 0 * cout:1 * cout], acc_ref[:, 1 * cout:2 * cout]),
        jnp.maximum(acc_ref[:, 2 * cout:3 * cout], acc_ref[:, 3 * cout:4 * cout]))
    o_ref[...] = jnp.maximum(m + b_ref[...], 0.0).astype(o_ref.dtype)


def conv_relu_pool(x_nhwc, w_blk, b_row, *, row_tile=32):
    """x (N,H,W,Cin) bf16, w_blk (4,4*Cin,4*Cout) bf16, b (1,Cout) f32
    -> (N, H/2, W/2, Cout) bf16."""
    N, H, W, cin = x_nhwc.shape
    cout4 = w_blk.shape[-1]
    cout = cout4 // 4
    assert w_blk.shape == (4, 4 * cin, cout4) and H % 2 == 0 and W % 2 == 0
    Ho, Wo = H // 2, W // 2
    Hq, Wq = Ho + 1, Wo + 1

    TR = min(row_tile, Ho)                 # pooled-row tile
    while Ho % TR:
        TR -= 1
    T = Ho // TR
    L = TR * Wq                            # output rows per tile (incl. seam col)
    Lt = _round_up((TR + 1) * Wq + 1, 8)   # input rows per tile (incl. halo)

    # ---- host layout pass (single fused pad/parity/window transform) ----
    xp = jnp.pad(x_nhwc, ((0, 0), (1, 1), (1, 1), (0, 0)))          # zero pad
    x4 = xp.reshape(N, Hq, 2, Wq, 2, cin)
    x4 = jnp.transpose(x4, (0, 1, 3, 2, 4, 5)).reshape(N, Hq, Wq, 4 * cin)
    # per-row-tile windows with a 1-slab-row halo, flattened row-major.
    tiles = jnp.stack([x4[:, t * TR: t * TR + TR + 1] for t in range(T)], axis=1)
    tiles = tiles.reshape(N * T, (TR + 1) * Wq, 4 * cin)
    tiles = jnp.pad(tiles, ((0, 0), (0, Lt - (TR + 1) * Wq), (0, 0)))

    out = pl.pallas_call(
        functools.partial(_conv_relu_pool_kernel, wq=Wq),
        out_shape=jax.ShapeDtypeStruct((N * T, L, cout), jnp.bfloat16),
        grid=(N * T,),
        in_specs=[
            pl.BlockSpec((None, Lt, 4 * cin), lambda g: (g, 0, 0)),
            pl.BlockSpec((4, 4 * cin, cout4), lambda g: (0, 0, 0)),
            pl.BlockSpec((1, cout), lambda g: (0, 0)),
        ],
        out_specs=pl.BlockSpec((None, L, cout), lambda g: (g, 0, 0)),
        scratch_shapes=[pltpu.VMEM((L, cout4), jnp.float32)],
        compiler_params=pltpu.CompilerParams(
            dimension_semantics=("parallel",),
            vmem_limit_bytes=32 * 1024 * 1024),
    )(tiles, w_blk, b_row)

    # crop the per-row seam column and restore (N, Ho, Wo, Cout)
    out = out.reshape(N, T, TR, Wq, cout)[:, :, :, :Wo, :]
    return out.reshape(N, Ho, Wo, cout)


# ---------------------------------------------------------------------------
# Linear layer: K-tiled reduction grid, (O, F) lane-dense weight stream.
# ---------------------------------------------------------------------------
def _linear_kernel(x_ref, w_ref, b_ref, o_ref, acc_ref):
    k = pl.program_id(0)

    @pl.when(k == 0)
    def _():
        acc_ref[...] = jnp.zeros_like(acc_ref)

    # x (N, TK) . w (O, TK)^T  -- contraction on the (lane-dense) last dims.
    acc_ref[...] += lax.dot_general(
        x_ref[...], w_ref[...],
        dimension_numbers=(((1,), (1,)), ((), ())),
        preferred_element_type=jnp.float32)

    o_ref[...] = (acc_ref[...] + b_ref[...]).astype(o_ref.dtype)


def _pick_k_tile(F, cap=4096):
    cands = [t for t in range(128, min(cap, F) + 1, 128) if F % t == 0]
    if not cands:
        return F
    two_step = [t for t in cands if F // t >= 2]
    return max(two_step) if two_step else max(cands)


def linear(x, w_of, b_row):
    """x (N,F) bf16 @ w_of (O,F) bf16 ^T + b (1,O) f32 -> (N,O) f32."""
    N, F = x.shape
    O = w_of.shape[0]
    tk = _pick_k_tile(F)
    KT = F // tk
    return pl.pallas_call(
        _linear_kernel,
        out_shape=jax.ShapeDtypeStruct((N, O), jnp.float32),
        grid=(KT,),
        in_specs=[
            pl.BlockSpec((N, tk), lambda k: (0, k)),
            pl.BlockSpec((O, tk), lambda k: (0, k)),
            pl.BlockSpec((1, O), lambda k: (0, 0)),
        ],
        out_specs=pl.BlockSpec((N, O), lambda k: (0, 0)),
        scratch_shapes=[pltpu.VMEM((N, O), jnp.float32)],
        compiler_params=pltpu.CompilerParams(
            dimension_semantics=("arbitrary",),
            vmem_limit_bytes=32 * 1024 * 1024),
    )(x, w_of, b_row)


# ---------------------------------------------------------------------------
# Parameters (PyTorch-default-style init), pre-packed into kernel layouts.
# ---------------------------------------------------------------------------
def _conv_block_params(key, cin, cout):
    kw, kb = jax.random.split(key)
    s = 1.0 / np.sqrt(cin * 9.0)
    w = jax.random.uniform(kw, (cout, cin, 3, 3), jnp.float32, -s, s)
    b = jax.random.uniform(kb, (cout,), jnp.float32, -s, s)

    # Block weight: [group g=(qr,qc)] x [K = (sr,sc,cin)] x [N = (oy,ox,cout)];
    # zero where tap (2qr+sr, 2qc+sc) is outside the 3x3 window of offset (oy,ox).
    wn = np.asarray(w)
    wb = np.zeros((4, 4, cin, 4, cout), np.float32)
    for qr in (0, 1):
        for qc in (0, 1):
            for sr in (0, 1):
                for sc in (0, 1):
                    rr, cc = 2 * qr + sr, 2 * qc + sc
                    for oy in (0, 1):
                        for ox in (0, 1):
                            ky, kx = rr - oy, cc - ox
                            if 0 <= ky < 3 and 0 <= kx < 3:
                                wb[2 * qr + qc, 2 * sr + sc, :, 2 * oy + ox, :] = \
                                    wn[:, :, ky, kx].T
    return {
        "w_blk": jnp.asarray(wb.reshape(4, 4 * cin, 4 * cout), jnp.bfloat16),
        "b": b.reshape(1, cout).astype(jnp.float32),
        "w_hwio": jnp.transpose(w, (2, 3, 1, 0)),   # f32, reference only
    }


def init_params(key, output_dim, lin_in_features):
    k1, k2, k3, k4, k5 = jax.random.split(key, 5)
    params = {
        "conv1": _conv_block_params(k1, 1, 16),
        "conv2": _conv_block_params(k2, 16, 32),
        "conv3": _conv_block_params(k3, 32, 32),
        "conv4": _conv_block_params(k4, 32, 32),
    }
    kw, kb = jax.random.split(k5)
    s = 1.0 / np.sqrt(float(lin_in_features))
    w = jax.random.uniform(kw, (output_dim, lin_in_features), jnp.float32, -s, s)
    b = jax.random.uniform(kb, (output_dim,), jnp.float32, -s, s)
    params["out"] = {"w": w.astype(jnp.bfloat16),                 # (O, F)
                     "b": b.reshape(1, output_dim).astype(jnp.float32)}
    return params


# ---------------------------------------------------------------------------
# Forward pass (Pallas) and pure-JAX reference.
# ---------------------------------------------------------------------------
@jax.jit
def cnn_forward(params, x_nchw):
    # NCHW (PyTorch) -> NHWC; bf16 feeds the MXU, accumulation stays f32.
    x = jnp.transpose(x_nchw, (0, 2, 3, 1)).astype(jnp.bfloat16)
    for name in ("conv1", "conv2", "conv3", "conv4"):
        x = conv_relu_pool(x, params[name]["w_blk"], params[name]["b"])
    # PyTorch flattens in NCHW order.
    x = jnp.transpose(x, (0, 3, 1, 2)).reshape(x.shape[0], -1)
    return linear(x, params["out"]["w"], params["out"]["b"])


@jax.jit
def reference_forward(params, x_nchw):
    """Pure-JAX reference with matching bf16 rounding points."""
    x = jnp.transpose(x_nchw, (0, 2, 3, 1)).astype(jnp.bfloat16).astype(jnp.float32)
    for name in ("conv1", "conv2", "conv3", "conv4"):
        w = params[name]["w_hwio"].astype(jnp.bfloat16).astype(jnp.float32)
        b = params[name]["b"]
        y = lax.conv_general_dilated(
            x, w, window_strides=(1, 1), padding=((1, 1), (1, 1)),
            dimension_numbers=("NHWC", "HWIO", "NHWC"))
        y = jnp.maximum(y + b.reshape(1, 1, 1, -1), 0.0)
        y = lax.reduce_window(y, -jnp.inf, lax.max,
                              (1, 2, 2, 1), (1, 2, 2, 1), "VALID")
        x = y.astype(jnp.bfloat16).astype(jnp.float32)
    x = jnp.transpose(x, (0, 3, 1, 2)).reshape(x.shape[0], -1)
    w = params["out"]["w"].astype(jnp.float32)
    return x @ w.T + params["out"]["b"]


if __name__ == "__main__":
    key = jax.random.PRNGKey(0)
    k_param, k_x = jax.random.split(key)

    N, H, W = 2, 64, 64                     # small stand-in for 992x992
    OUTPUT_DIM = 10
    LIN_IN = 32 * (H // 16) * (W // 16)     # 32 * 4 * 4 = 512

    params = init_params(k_param, OUTPUT_DIM, LIN_IN)
    x = jax.random.normal(k_x, (N, 1, H, W), jnp.float32)   # NCHW like PyTorch

    out = jax.block_until_ready(cnn_forward(params, x))
    assert out.shape == (N, OUTPUT_DIM), out.shape
    assert bool(jnp.all(jnp.isfinite(out)))

    ref = jax.block_until_ready(reference_forward(params, x))
    max_err = float(np.abs(np.asarray(out) - np.asarray(ref)).max())
    assert np.allclose(np.asarray(out), np.asarray(ref), atol=2e-2, rtol=2e-2), max_err

    print("KERNEL_OK")
</pallas_src>

<mosaic_0001>
module attributes {stable_mosaic.version = 11 : i64} {
  func.func @_conv_relu_pool_kernel(%arg0: i32, %arg1: memref<1x1096x4xbf16, #tpu.memory_space<vmem>>, %arg2: memref<4x4x64xbf16, #tpu.memory_space<vmem>>, %arg3: memref<1x16xf32, #tpu.memory_space<vmem>>, %arg4: memref<1x1056x16xbf16, #tpu.memory_space<vmem>>, %arg5: memref<1056x64xf32, #tpu.memory_space<vmem>>) attributes {dimension_semantics = [#tpu.dimension_semantics<parallel>], iteration_bounds = array<i64: 2>, scalar_prefetch = 0 : i64, scratch_operands = 1 : i64, tpu.core_type = #tpu.core_type<tc>, window_params = [{transform_indices = @transform_0, window_bounds = array<i64: 1, 1096, 4>}, {pipeline_mode = #tpu.pipeline_mode<synchronous>, transform_indices = @transform_1, window_bounds = array<i64: 4, 4, 64>}, {pipeline_mode = #tpu.pipeline_mode<synchronous>, transform_indices = @transform_2, window_bounds = array<i64: 1, 16>}, {transform_indices = @transform_3, window_bounds = array<i64: 1, 1056, 16>}]} {
    %c0 = arith.constant 0 : index
    %c0_0 = arith.constant 0 : index
    %c0_1 = arith.constant 0 : index
    %0 = vector.load %arg1[%c0, %c0_0, %c0_1] : memref<1x1096x4xbf16, #tpu.memory_space<vmem>>, vector<1x1056x4xbf16>
    %1 = vector.shape_cast %0 : vector<1x1056x4xbf16> to vector<1056x4xbf16>
    %c0_2 = arith.constant 0 : index
    %c0_3 = arith.constant 0 : index
    %c0_4 = arith.constant 0 : index
    %2 = vector.load %arg2[%c0_2, %c0_3, %c0_4] : memref<4x4x64xbf16, #tpu.memory_space<vmem>>, vector<1x4x64xbf16>
    %3 = vector.shape_cast %2 : vector<1x4x64xbf16> to vector<4x64xbf16>
    %cst = arith.constant dense<0.000000e+00> : vector<1056x64xf32>
    %4 = tpu.matmul %1, %3, %cst {dimension_numbers = #tpu.dot_dimension_numbers<[1], [0], [0], [1], [0, 0, 1, 1], [], []>} : vector<1056x4xbf16>, vector<4x64xbf16>, vector<1056x64xf32> -> vector<1056x64xf32>
    %c0_5 = arith.constant 0 : index
    %c0_6 = arith.constant 0 : index
    %5 = vector.load %arg5[%c0_5, %c0_6] : memref<1056x64xf32, #tpu.memory_space<vmem>>, vector<1056x64xf32>
    tpu.vector_store %arg5[%c0_5, %c0_6], %4 {strides = array<i32>} : memref<1056x64xf32, #tpu.memory_space<vmem>>, vector<1056x64xf32>,
    %c0_7 = arith.constant 0 : index
    %c1 = arith.constant 1 : index
    %c0_8 = arith.constant 0 : index
    %6 = vector.load %arg1[%c0_7, %c1, %c0_8] : memref<1x1096x4xbf16, #tpu.memory_space<vmem>>, vector<1x1056x4xbf16>
    %7 = vector.shape_cast %6 : vector<1x1056x4xbf16> to vector<1056x4xbf16>
    %c1_9 = arith.constant 1 : index
    %c0_10 = arith.constant 0 : index
    %c0_11 = arith.constant 0 : index
    %8 = vector.load %arg2[%c1_9, %c0_10, %c0_11] : memref<4x4x64xbf16, #tpu.memory_space<vmem>>, vector<1x4x64xbf16>
    %9 = vector.shape_cast %8 : vector<1x4x64xbf16> to vector<4x64xbf16>
    %cst_12 = arith.constant dense<0.000000e+00> : vector<1056x64xf32>
    %10 = tpu.matmul %7, %9, %cst_12 {dimension_numbers = #tpu.dot_dimension_numbers<[1], [0], [0], [1], [0, 0, 1, 1], [], []>} : vector<1056x4xbf16>, vector<4x64xbf16>, vector<1056x64xf32> -> vector<1056x64xf32>
    %c0_13 = arith.constant 0 : index
    %c0_14 = arith.constant 0 : index
    %11 = vector.load %arg5[%c0_13, %c0_14] : memref<1056x64xf32, #tpu.memory_space<vmem>>, vector<1056x64xf32>
    %12 = arith.addf %11, %10 : vector<1056x64xf32>
    %c0_15 = arith.constant 0 : index
    %c0_16 = arith.constant 0 : index
    %13 = vector.load %arg5[%c0_15, %c0_16] : memref<1056x64xf32, #tpu.memory_space<vmem>>, vector<1056x64xf32>
    tpu.vector_store %arg5[%c0_15, %c0_16], %12 {strides = array<i32>} : memref<1056x64xf32, #tpu.memory_space<vmem>>, vector<1056x64xf32>,
    %c0_17 = arith.constant 0 : index
    %c33 = arith.constant 33 : index
    %c0_18 = arith.constant 0 : index
    %14 = vector.load %arg1[%c0_17, %c33, %c0_18] : memref<1x1096x4xbf16, #tpu.memory_space<vmem>>, vector<1x1056x4xbf16>
    %15 = vector.shape_cast %14 : vector<1x1056x4xbf16> to vector<1056x4xbf16>
    %c2 = arith.constant 2 : index
    %c0_19 = arith.constant 0 : index
    %c0_20 = arith.constant 0 : index
    %16 = vector.load %arg2[%c2, %c0_19, %c0_20] : memref<4x4x64xbf16, #tpu.memory_space<vmem>>, vector<1x4x64xbf16>
    %17 = vector.shape_cast %16 : vector<1x4x64xbf16> to vector<4x64xbf16>
    %cst_21 = arith.constant dense<0.000000e+00> : vector<1056x64xf32>
    %18 = tpu.matmul %15, %17, %cst_21 {dimension_numbers = #tpu.dot_dimension_numbers<[1], [0], [0], [1], [0, 0, 1, 1], [], []>} : vector<1056x4xbf16>, vector<4x64xbf16>, vector<1056x64xf32> -> vector<1056x64xf32>
    %c0_22 = arith.constant 0 : index
    %c0_23 = arith.constant 0 : index
    %19 = vector.load %arg5[%c0_22, %c0_23] : memref<1056x64xf32, #tpu.memory_space<vmem>>, vector<1056x64xf32>
    %20 = arith.addf %19, %18 : vector<1056x64xf32>
    %c0_24 = arith.constant 0 : index
    %c0_25 = arith.constant 0 : index
    %21 = vector.load %arg5[%c0_24, %c0_25] : memref<1056x64xf32, #tpu.memory_space<vmem>>, vector<1056x64xf32>
    tpu.vector_store %arg5[%c0_24, %c0_25], %20 {strides = array<i32>} : memref<1056x64xf32, #tpu.memory_space<vmem>>, vector<1056x64xf32>,
    %c0_26 = arith.constant 0 : index
    %c34 = arith.constant 34 : index
    %c0_27 = arith.constant 0 : index
    %22 = vector.load %arg1[%c0_26, %c34, %c0_27] : memref<1x1096x4xbf16, #tpu.memory_space<vmem>>, vector<1x1056x4xbf16>
    %23 = vector.shape_cast %22 : vector<1x1056x4xbf16> to vector<1056x4xbf16>
    %c3 = arith.constant 3 : index
    %c0_28 = arith.constant 0 : index
    %c0_29 = arith.constant 0 : index
    %24 = vector.load %arg2[%c3, %c0_28, %c0_29] : memref<4x4x64xbf16, #tpu.memory_space<vmem>>, vector<1x4x64xbf16>
    %25 = vector.shape_cast %24 : vector<1x4x64xbf16> to vector<4x64xbf16>
    %cst_30 = arith.constant dense<0.000000e+00> : vector<1056x64xf32>
    %26 = tpu.matmul %23, %25, %cst_30 {dimension_numbers = #tpu.dot_dimension_numbers<[1], [0], [0], [1], [0, 0, 1, 1], [], []>} : vector<1056x4xbf16>, vector<4x64xbf16>, vector<1056x64xf32> -> vector<1056x64xf32>
    %c0_31 = arith.constant 0 : index
    %c0_32 = arith.constant 0 : index
    %27 = vector.load %arg5[%c0_31, %c0_32] : memref<1056x64xf32, #tpu.memory_space<vmem>>, vector<1056x64xf32>
    %28 = arith.addf %27, %26 : vector<1056x64xf32>
    %c0_33 = arith.constant 0 : index
    %c0_34 = arith.constant 0 : index
    %29 = vector.load %arg5[%c0_33, %c0_34] : memref<1056x64xf32, #tpu.memory_space<vmem>>, vector<1056x64xf32>
    tpu.vector_store %arg5[%c0_33, %c0_34], %28 {strides = array<i32>} : memref<1056x64xf32, #tpu.memory_space<vmem>>, vector<1056x64xf32>,
    %c0_35 = arith.constant 0 : index
    %c0_36 = arith.constant 0 : index
    %30 = vector.load %arg5[%c0_35, %c0_36] : memref<1056x64xf32, #tpu.memory_space<vmem>>, vector<1056x16xf32>
    %c0_37 = arith.constant 0 : index
    %c16 = arith.constant 16 : index
    %31 = vector.load %arg5[%c0_37, %c16] : memref<1056x64xf32, #tpu.memory_space<vmem>>, vector<1056x16xf32>
    %32 = arith.maximumf %30, %31 : vector<1056x16xf32>
    %c0_38 = arith.constant 0 : index
    %c32 = arith.constant 32 : index
    %33 = vector.load %arg5[%c0_38, %c32] : memref<1056x64xf32, #tpu.memory_space<vmem>>, vector<1056x16xf32>
    %c0_39 = arith.constant 0 : index
    %c48 = arith.constant 48 : index
    %34 = vector.load %arg5[%c0_39, %c48] : memref<1056x64xf32, #tpu.memory_space<vmem>>, vector<1056x16xf32>
    %35 = arith.maximumf %33, %34 : vector<1056x16xf32>
    %36 = arith.maximumf %32, %35 : vector<1056x16xf32>
    %c0_40 = arith.constant 0 : index
    %c0_41 = arith.constant 0 : index
    %37 = vector.load %arg3[%c0_40, %c0_41] : memref<1x16xf32, #tpu.memory_space<vmem>>, vector<1x16xf32>
    %38 = vector.broadcast %37 : vector<1x16xf32> to vector<1056x16xf32>
    %39 = arith.addf %36, %38 : vector<1056x16xf32>
    %cst_42 = arith.constant 0.000000e+00 : f32
    %40 = vector.broadcast %cst_42 : f32 to vector<1056x16xf32>
    %41 = arith.maximumf %39, %40 : vector<1056x16xf32>
    %42 = arith.truncf %41 : vector<1056x16xf32> to vector<1056x16xbf16>
    %c0_43 = arith.constant 0 : index
    %c0_44 = arith.constant 0 : index
    %c0_45 = arith.constant 0 : index
    %43 = vector.load %arg4[%c0_43, %c0_44, %c0_45] : memref<1x1056x16xbf16, #tpu.memory_space<vmem>>, vector<1x1056x16xbf16>
    %44 = vector.shape_cast %43 : vector<1x1056x16xbf16> to vector<1056x16xbf16>
    %45 = vector.shape_cast %42 : vector<1056x16xbf16> to vector<1x1056x16xbf16>
    tpu.vector_store %arg4[%c0_43, %c0_44, %c0_45], %45 {strides = array<i32>} : memref<1x1056x16xbf16, #tpu.memory_space<vmem>>, vector<1x1056x16xbf16>,
    return
  }
  func.func @transform_0(%arg0: i32) -> (i32, i32, i32) {
    %c0_i32 = arith.constant 0 : i32
    %c0_i32_0 = arith.constant 0 : i32
    %c0_i32_1 = arith.constant 0 : i32
    return %arg0, %c0_i32, %c0_i32_0 : i32, i32, i32
  }
  func.func @transform_1(%arg0: i32) -> (i32, i32, i32) {
    %c0_i32 = arith.constant 0 : i32
    %c0_i32_0 = arith.constant 0 : i32
    %c0_i32_1 = arith.constant 0 : i32
    %c0_i32_2 = arith.constant 0 : i32
    return %c0_i32, %c0_i32_0, %c0_i32_1 : i32, i32, i32
  }
  func.func @transform_2(%arg0: i32) -> (i32, i32) {
    %c0_i32 = arith.constant 0 : i32
    %c0_i32_0 = arith.constant 0 : i32
    %c0_i32_1 = arith.constant 0 : i32
    return %c0_i32, %c0_i32_0 : i32, i32
  }
  func.func @transform_3(%arg0: i32) -> (i32, i32, i32) {
    %c0_i32 = arith.constant 0 : i32
    %c0_i32_0 = arith.constant 0 : i32
    %c0_i32_1 = arith.constant 0 : i32
    return %arg0, %c0_i32, %c0_i32_0 : i32, i32, i32
  }
}

module attributes {stable_mosaic.version = 11 : i64} {
  func.func @_conv_relu_pool_kernel(%arg0: i32, %arg1: memref<1x296x64xbf16, #tpu.memory_space<vmem>>, %arg2: memref<4x64x128xbf16, #tpu.memory_space<vmem>>, %arg3: memref<1x32xf32, #tpu.memory_space<vmem>>, %arg4: memref<1x272x32xbf16, #tpu.memory_space<vmem>>, %arg5: memref<272x128xf32, #tpu.memory_space<vmem>>) attributes {dimension_semantics = [#tpu.dimension_semantics<parallel>], iteration_bounds = array<i64: 2>, scalar_prefetch = 0 : i64, scratch_operands = 1 : i64, tpu.core_type = #tpu.core_type<tc>, window_params = [{transform_indices = @transform_0, window_bounds = array<i64: 1, 296, 64>}, {pipeline_mode = #tpu.pipeline_mode<synchronous>, transform_indices = @transform_1, window_bounds = array<i64: 4, 64, 128>}, {pipeline_mode = #tpu.pipeline_mode<synchronous>, transform_indices = @transform_2, window_bounds = array<i64: 1, 32>}, {transform_indices = @transform_3, window_bounds = array<i64: 1, 272, 32>}]} {
    %c0 = arith.constant 0 : index
    %c0_0 = arith.constant 0 : index
    %c0_1 = arith.constant 0 : index
    %0 = vector.load %arg1[%c0, %c0_0, %c0_1] : memref<1x296x64xbf16, #tpu.memory_space<vmem>>, vector<1x272x64xbf16>
    %1 = vector.shape_cast %0 : vector<1x272x64xbf16> to vector<272x64xbf16>
    %c0_2 = arith.constant 0 : index
    %c0_3 = arith.constant 0 : index
    %c0_4 = arith.constant 0 : index
    %2 = vector.load %arg2[%c0_2, %c0_3, %c0_4] : memref<4x64x128xbf16, #tpu.memory_space<vmem>>, vector<1x64x128xbf16>
    %3 = vector.shape_cast %2 : vector<1x64x128xbf16> to vector<64x128xbf16>
    %cst = arith.constant dense<0.000000e+00> : vector<272x128xf32>
    %4 = tpu.matmul %1, %3, %cst {dimension_numbers = #tpu.dot_dimension_numbers<[1], [0], [0], [1], [0, 0, 1, 1], [], []>} : vector<272x64xbf16>, vector<64x128xbf16>, vector<272x128xf32> -> vector<272x128xf32>
    %c0_5 = arith.constant 0 : index
    %c0_6 = arith.constant 0 : index
    %5 = vector.load %arg5[%c0_5, %c0_6] : memref<272x128xf32, #tpu.memory_space<vmem>>, vector<272x128xf32>
    tpu.vector_store %arg5[%c0_5, %c0_6], %4 {strides = array<i32>} : memref<272x128xf32, #tpu.memory_space<vmem>>, vector<272x128xf32>,
    %c0_7 = arith.constant 0 : index
    %c1 = arith.constant 1 : index
    %c0_8 = arith.constant 0 : index
    %6 = vector.load %arg1[%c0_7, %c1, %c0_8] : memref<1x296x64xbf16, #tpu.memory_space<vmem>>, vector<1x272x64xbf16>
    %7 = vector.shape_cast %6 : vector<1x272x64xbf16> to vector<272x64xbf16>
    %c1_9 = arith.constant 1 : index
    %c0_10 = arith.constant 0 : index
    %c0_11 = arith.constant 0 : index
    %8 = vector.load %arg2[%c1_9, %c0_10, %c0_11] : memref<4x64x128xbf16, #tpu.memory_space<vmem>>, vector<1x64x128xbf16>
    %9 = vector.shape_cast %8 : vector<1x64x128xbf16> to vector<64x128xbf16>
    %cst_12 = arith.constant dense<0.000000e+00> : vector<272x128xf32>
    %10 = tpu.matmul %7, %9, %cst_12 {dimension_numbers = #tpu.dot_dimension_numbers<[1], [0], [0], [1], [0, 0, 1, 1], [], []>} : vector<272x64xbf16>, vector<64x128xbf16>, vector<272x128xf32> -> vector<272x128xf32>
    %c0_13 = arith.constant 0 : index
    %c0_14 = arith.constant 0 : index
    %11 = vector.load %arg5[%c0_13, %c0_14] : memref<272x128xf32, #tpu.memory_space<vmem>>, vector<272x128xf32>
    %12 = arith.addf %11, %10 : vector<272x128xf32>
    %c0_15 = arith.constant 0 : index
    %c0_16 = arith.constant 0 : index
    %13 = vector.load %arg5[%c0_15, %c0_16] : memref<272x128xf32, #tpu.memory_space<vmem>>, vector<272x128xf32>
    tpu.vector_store %arg5[%c0_15, %c0_16], %12 {strides = array<i32>} : memref<272x128xf32, #tpu.memory_space<vmem>>, vector<272x128xf32>,
    %c0_17 = arith.constant 0 : index
    %c17 = arith.constant 17 : index
    %c0_18 = arith.constant 0 : index
    %14 = vector.load %arg1[%c0_17, %c17, %c0_18] : memref<1x296x64xbf16, #tpu.memory_space<vmem>>, vector<1x272x64xbf16>
    %15 = vector.shape_cast %14 : vector<1x272x64xbf16> to vector<272x64xbf16>
    %c2 = arith.constant 2 : index
    %c0_19 = arith.constant 0 : index
    %c0_20 = arith.constant 0 : index
    %16 = vector.load %arg2[%c2, %c0_19, %c0_20] : memref<4x64x128xbf16, #tpu.memory_space<vmem>>, vector<1x64x128xbf16>
    %17 = vector.shape_cast %16 : vector<1x64x128xbf16> to vector<64x128xbf16>
    %cst_21 = arith.constant dense<0.000000e+00> : vector<272x128xf32>
    %18 = tpu.matmul %15, %17, %cst_21 {dimension_numbers = #tpu.dot_dimension_numbers<[1], [0], [0], [1], [0, 0, 1, 1], [], []>} : vector<272x64xbf16>, vector<64x128xbf16>, vector<272x128xf32> -> vector<272x128xf32>
    %c0_22 = arith.constant 0 : index
    %c0_23 = arith.constant 0 : index
    %19 = vector.load %arg5[%c0_22, %c0_23] : memref<272x128xf32, #tpu.memory_space<vmem>>, vector<272x128xf32>
    %20 = arith.addf %19, %18 : vector<272x128xf32>
    %c0_24 = arith.constant 0 : index
    %c0_25 = arith.constant 0 : index
    %21 = vector.load %arg5[%c0_24, %c0_25] : memref<272x128xf32, #tpu.memory_space<vmem>>, vector<272x128xf32>
    tpu.vector_store %arg5[%c0_24, %c0_25], %20 {strides = array<i32>} : memref<272x128xf32, #tpu.memory_space<vmem>>, vector<272x128xf32>,
    %c0_26 = arith.constant 0 : index
    %c18 = arith.constant 18 : index
    %c0_27 = arith.constant 0 : index
    %22 = vector.load %arg1[%c0_26, %c18, %c0_27] : memref<1x296x64xbf16, #tpu.memory_space<vmem>>, vector<1x272x64xbf16>
    %23 = vector.shape_cast %22 : vector<1x272x64xbf16> to vector<272x64xbf16>
    %c3 = arith.constant 3 : index
    %c0_28 = arith.constant 0 : index
    %c0_29 = arith.constant 0 : index
    %24 = vector.load %arg2[%c3, %c0_28, %c0_29] : memref<4x64x128xbf16, #tpu.memory_space<vmem>>, vector<1x64x128xbf16>
    %25 = vector.shape_cast %24 : vector<1x64x128xbf16> to vector<64x128xbf16>
    %cst_30 = arith.constant dense<0.000000e+00> : vector<272x128xf32>
    %26 = tpu.matmul %23, %25, %cst_30 {dimension_numbers = #tpu.dot_dimension_numbers<[1], [0], [0], [1], [0, 0, 1, 1], [], []>} : vector<272x64xbf16>, vector<64x128xbf16>, vector<272x128xf32> -> vector<272x128xf32>
    %c0_31 = arith.constant 0 : index
    %c0_32 = arith.constant 0 : index
    %27 = vector.load %arg5[%c0_31, %c0_32] : memref<272x128xf32, #tpu.memory_space<vmem>>, vector<272x128xf32>
    %28 = arith.addf %27, %26 : vector<272x128xf32>
    %c0_33 = arith.constant 0 : index
    %c0_34 = arith.constant 0 : index
    %29 = vector.load %arg5[%c0_33, %c0_34] : memref<272x128xf32, #tpu.memory_space<vmem>>, vector<272x128xf32>
    tpu.vector_store %arg5[%c0_33, %c0_34], %28 {strides = array<i32>} : memref<272x128xf32, #tpu.memory_space<vmem>>, vector<272x128xf32>,
    %c0_35 = arith.constant 0 : index
    %c0_36 = arith.constant 0 : index
    %30 = vector.load %arg5[%c0_35, %c0_36] : memref<272x128xf32, #tpu.memory_space<vmem>>, vector<272x32xf32>
    %c0_37 = arith.constant 0 : index
    %c32 = arith.constant 32 : index
    %31 = vector.load %arg5[%c0_37, %c32] : memref<272x128xf32, #tpu.memory_space<vmem>>, vector<272x32xf32>
    %32 = arith.maximumf %30, %31 : vector<272x32xf32>
    %c0_38 = arith.constant 0 : index
    %c64 = arith.constant 64 : index
    %33 = vector.load %arg5[%c0_38, %c64] : memref<272x128xf32, #tpu.memory_space<vmem>>, vector<272x32xf32>
    %c0_39 = arith.constant 0 : index
    %c96 = arith.constant 96 : index
    %34 = vector.load %arg5[%c0_39, %c96] : memref<272x128xf32, #tpu.memory_space<vmem>>, vector<272x32xf32>
    %35 = arith.maximumf %33, %34 : vector<272x32xf32>
    %36 = arith.maximumf %32, %35 : vector<272x32xf32>
    %c0_40 = arith.constant 0 : index
    %c0_41 = arith.constant 0 : index
    %37 = vector.load %arg3[%c0_40, %c0_41] : memref<1x32xf32, #tpu.memory_space<vmem>>, vector<1x32xf32>
    %38 = vector.broadcast %37 : vector<1x32xf32> to vector<272x32xf32>
    %39 = arith.addf %36, %38 : vector<272x32xf32>
    %cst_42 = arith.constant 0.000000e+00 : f32
    %40 = vector.broadcast %cst_42 : f32 to vector<272x32xf32>
    %41 = arith.maximumf %39, %40 : vector<272x32xf32>
    %42 = arith.truncf %41 : vector<272x32xf32> to vector<272x32xbf16>
    %c0_43 = arith.constant 0 : index
    %c0_44 = arith.constant 0 : index
    %c0_45 = arith.constant 0 : index
    %43 = vector.load %arg4[%c0_43, %c0_44, %c0_45] : memref<1x272x32xbf16, #tpu.memory_space<vmem>>, vector<1x272x32xbf16>
    %44 = vector.shape_cast %43 : vector<1x272x32xbf16> to vector<272x32xbf16>
    %45 = vector.shape_cast %42 : vector<272x32xbf16> to vector<1x272x32xbf16>
    tpu.vector_store %arg4[%c0_43, %c0_44, %c0_45], %45 {strides = array<i32>} : memref<1x272x32xbf16, #tpu.memory_space<vmem>>, vector<1x272x32xbf16>,
    return
  }
  func.func @transform_0(%arg0: i32) -> (i32, i32, i32) {
    %c0_i32 = arith.constant 0 : i32
    %c0_i32_0 = arith.constant 0 : i32
    %c0_i32_1 = arith.constant 0 : i32
    return %arg0, %c0_i32, %c0_i32_0 : i32, i32, i32
  }
  func.func @transform_1(%arg0: i32) -> (i32, i32, i32) {
    %c0_i32 = arith.constant 0 : i32
    %c0_i32_0 = arith.constant 0 : i32
    %c0_i32_1 = arith.constant 0 : i32
    %c0_i32_2 = arith.constant 0 : i32
    return %c0_i32, %c0_i32_0, %c0_i32_1 : i32, i32, i32
  }
  func.func @transform_2(%arg0: i32) -> (i32, i32) {
    %c0_i32 = arith.constant 0 : i32
    %c0_i32_0 = arith.constant 0 : i32
    %c0_i32_1 = arith.constant 0 : i32
    return %c0_i32, %c0_i32_0 : i32, i32
  }
  func.func @transform_3(%arg0: i32) -> (i32, i32, i32) {
    %c0_i32 = arith.constant 0 : i32
    %c0_i32_0 = arith.constant 0 : i32
    %c0_i32_1 = arith.constant 0 : i32
    return %arg0, %c0_i32, %c0_i32_0 : i32, i32, i32
  }
}

module attributes {stable_mosaic.version = 11 : i64} {
  func.func @_conv_relu_pool_kernel(%arg0: i32, %arg1: memref<1x88x128xbf16, #tpu.memory_space<vmem>>, %arg2: memref<4x128x128xbf16, #tpu.memory_space<vmem>>, %arg3: memref<1x32xf32, #tpu.memory_space<vmem>>, %arg4: memref<1x72x32xbf16, #tpu.memory_space<vmem>>, %arg5: memref<72x128xf32, #tpu.memory_space<vmem>>) attributes {dimension_semantics = [#tpu.dimension_semantics<parallel>], iteration_bounds = array<i64: 2>, scalar_prefetch = 0 : i64, scratch_operands = 1 : i64, tpu.core_type = #tpu.core_type<tc>, window_params = [{transform_indices = @transform_0, window_bounds = array<i64: 1, 88, 128>}, {pipeline_mode = #tpu.pipeline_mode<synchronous>, transform_indices = @transform_1, window_bounds = array<i64: 4, 128, 128>}, {pipeline_mode = #tpu.pipeline_mode<synchronous>, transform_indices = @transform_2, window_bounds = array<i64: 1, 32>}, {transform_indices = @transform_3, window_bounds = array<i64: 1, 72, 32>}]} {
    %c0 = arith.constant 0 : index
    %c0_0 = arith.constant 0 : index
    %c0_1 = arith.constant 0 : index
    %0 = vector.load %arg1[%c0, %c0_0, %c0_1] : memref<1x88x128xbf16, #tpu.memory_space<vmem>>, vector<1x72x128xbf16>
    %1 = vector.shape_cast %0 : vector<1x72x128xbf16> to vector<72x128xbf16>
    %c0_2 = arith.constant 0 : index
    %c0_3 = arith.constant 0 : index
    %c0_4 = arith.constant 0 : index
    %2 = vector.load %arg2[%c0_2, %c0_3, %c0_4] : memref<4x128x128xbf16, #tpu.memory_space<vmem>>, vector<1x128x128xbf16>
    %3 = vector.shape_cast %2 : vector<1x128x128xbf16> to vector<128x128xbf16>
    %cst = arith.constant dense<0.000000e+00> : vector<72x128xf32>
    %4 = tpu.matmul %1, %3, %cst {dimension_numbers = #tpu.dot_dimension_numbers<[1], [0], [0], [1], [0, 0, 1, 1], [], []>} : vector<72x128xbf16>, vector<128x128xbf16>, vector<72x128xf32> -> vector<72x128xf32>
    %c0_5 = arith.constant 0 : index
    %c0_6 = arith.constant 0 : index
    %5 = vector.load %arg5[%c0_5, %c0_6] : memref<72x128xf32, #tpu.memory_space<vmem>>, vector<72x128xf32>
    tpu.vector_store %arg5[%c0_5, %c0_6], %4 {strides = array<i32>} : memref<72x128xf32, #tpu.memory_space<vmem>>, vector<72x128xf32>,
    %c0_7 = arith.constant 0 : index
    %c1 = arith.constant 1 : index
    %c0_8 = arith.constant 0 : index
    %6 = vector.load %arg1[%c0_7, %c1, %c0_8] : memref<1x88x128xbf16, #tpu.memory_space<vmem>>, vector<1x72x128xbf16>
    %7 = vector.shape_cast %6 : vector<1x72x128xbf16> to vector<72x128xbf16>
    %c1_9 = arith.constant 1 : index
    %c0_10 = arith.constant 0 : index
    %c0_11 = arith.constant 0 : index
    %8 = vector.load %arg2[%c1_9, %c0_10, %c0_11] : memref<4x128x128xbf16, #tpu.memory_space<vmem>>, vector<1x128x128xbf16>
    %9 = vector.shape_cast %8 : vector<1x128x128xbf16> to vector<128x128xbf16>
    %cst_12 = arith.constant dense<0.000000e+00> : vector<72x128xf32>
    %10 = tpu.matmul %7, %9, %cst_12 {dimension_numbers = #tpu.dot_dimension_numbers<[1], [0], [0], [1], [0, 0, 1, 1], [], []>} : vector<72x128xbf16>, vector<128x128xbf16>, vector<72x128xf32> -> vector<72x128xf32>
    %c0_13 = arith.constant 0 : index
    %c0_14 = arith.constant 0 : index
    %11 = vector.load %arg5[%c0_13, %c0_14] : memref<72x128xf32, #tpu.memory_space<vmem>>, vector<72x128xf32>
    %12 = arith.addf %11, %10 : vector<72x128xf32>
    %c0_15 = arith.constant 0 : index
    %c0_16 = arith.constant 0 : index
    %13 = vector.load %arg5[%c0_15, %c0_16] : memref<72x128xf32, #tpu.memory_space<vmem>>, vector<72x128xf32>
    tpu.vector_store %arg5[%c0_15, %c0_16], %12 {strides = array<i32>} : memref<72x128xf32, #tpu.memory_space<vmem>>, vector<72x128xf32>,
    %c0_17 = arith.constant 0 : index
    %c9 = arith.constant 9 : index
    %c0_18 = arith.constant 0 : index
    %14 = vector.load %arg1[%c0_17, %c9, %c0_18] : memref<1x88x128xbf16, #tpu.memory_space<vmem>>, vector<1x72x128xbf16>
    %15 = vector.shape_cast %14 : vector<1x72x128xbf16> to vector<72x128xbf16>
    %c2 = arith.constant 2 : index
    %c0_19 = arith.constant 0 : index
    %c0_20 = arith.constant 0 : index
    %16 = vector.load %arg2[%c2, %c0_19, %c0_20] : memref<4x128x128xbf16, #tpu.memory_space<vmem>>, vector<1x128x128xbf16>
    %17 = vector.shape_cast %16 : vector<1x128x128xbf16> to vector<128x128xbf16>
    %cst_21 = arith.constant dense<0.000000e+00> : vector<72x128xf32>
    %18 = tpu.matmul %15, %17, %cst_21 {dimension_numbers = #tpu.dot_dimension_numbers<[1], [0], [0], [1], [0, 0, 1, 1], [], []>} : vector<72x128xbf16>, vector<128x128xbf16>, vector<72x128xf32> -> vector<72x128xf32>
    %c0_22 = arith.constant 0 : index
    %c0_23 = arith.constant 0 : index
    %19 = vector.load %arg5[%c0_22, %c0_23] : memref<72x128xf32, #tpu.memory_space<vmem>>, vector<72x128xf32>
    %20 = arith.addf %19, %18 : vector<72x128xf32>
    %c0_24 = arith.constant 0 : index
    %c0_25 = arith.constant 0 : index
    %21 = vector.load %arg5[%c0_24, %c0_25] : memref<72x128xf32, #tpu.memory_space<vmem>>, vector<72x128xf32>
    tpu.vector_store %arg5[%c0_24, %c0_25], %20 {strides = array<i32>} : memref<72x128xf32, #tpu.memory_space<vmem>>, vector<72x128xf32>,
    %c0_26 = arith.constant 0 : index
    %c10 = arith.constant 10 : index
    %c0_27 = arith.constant 0 : index
    %22 = vector.load %arg1[%c0_26, %c10, %c0_27] : memref<1x88x128xbf16, #tpu.memory_space<vmem>>, vector<1x72x128xbf16>
    %23 = vector.shape_cast %22 : vector<1x72x128xbf16> to vector<72x128xbf16>
    %c3 = arith.constant 3 : index
    %c0_28 = arith.constant 0 : index
    %c0_29 = arith.constant 0 : index
    %24 = vector.load %arg2[%c3, %c0_28, %c0_29] : memref<4x128x128xbf16, #tpu.memory_space<vmem>>, vector<1x128x128xbf16>
    %25 = vector.shape_cast %24 : vector<1x128x128xbf16> to vector<128x128xbf16>
    %cst_30 = arith.constant dense<0.000000e+00> : vector<72x128xf32>
    %26 = tpu.matmul %23, %25, %cst_30 {dimension_numbers = #tpu.dot_dimension_numbers<[1], [0], [0], [1], [0, 0, 1, 1], [], []>} : vector<72x128xbf16>, vector<128x128xbf16>, vector<72x128xf32> -> vector<72x128xf32>
    %c0_31 = arith.constant 0 : index
    %c0_32 = arith.constant 0 : index
    %27 = vector.load %arg5[%c0_31, %c0_32] : memref<72x128xf32, #tpu.memory_space<vmem>>, vector<72x128xf32>
    %28 = arith.addf %27, %26 : vector<72x128xf32>
    %c0_33 = arith.constant 0 : index
    %c0_34 = arith.constant 0 : index
    %29 = vector.load %arg5[%c0_33, %c0_34] : memref<72x128xf32, #tpu.memory_space<vmem>>, vector<72x128xf32>
    tpu.vector_store %arg5[%c0_33, %c0_34], %28 {strides = array<i32>} : memref<72x128xf32, #tpu.memory_space<vmem>>, vector<72x128xf32>,
    %c0_35 = arith.constant 0 : index
    %c0_36 = arith.constant 0 : index
    %30 = vector.load %arg5[%c0_35, %c0_36] : memref<72x128xf32, #tpu.memory_space<vmem>>, vector<72x32xf32>
    %c0_37 = arith.constant 0 : index
    %c32 = arith.constant 32 : index
    %31 = vector.load %arg5[%c0_37, %c32] : memref<72x128xf32, #tpu.memory_space<vmem>>, vector<72x32xf32>
    %32 = arith.maximumf %30, %31 : vector<72x32xf32>
    %c0_38 = arith.constant 0 : index
    %c64 = arith.constant 64 : index
    %33 = vector.load %arg5[%c0_38, %c64] : memref<72x128xf32, #tpu.memory_space<vmem>>, vector<72x32xf32>
    %c0_39 = arith.constant 0 : index
    %c96 = arith.constant 96 : index
    %34 = vector.load %arg5[%c0_39, %c96] : memref<72x128xf32, #tpu.memory_space<vmem>>, vector<72x32xf32>
    %35 = arith.maximumf %33, %34 : vector<72x32xf32>
    %36 = arith.maximumf %32, %35 : vector<72x32xf32>
    %c0_40 = arith.constant 0 : index
    %c0_41 = arith.constant 0 : index
    %37 = vector.load %arg3[%c0_40, %c0_41] : memref<1x32xf32, #tpu.memory_space<vmem>>, vector<1x32xf32>
    %38 = vector.broadcast %37 : vector<1x32xf32> to vector<72x32xf32>
    %39 = arith.addf %36, %38 : vector<72x32xf32>
    %cst_42 = arith.constant 0.000000e+00 : f32
    %40 = vector.broadcast %cst_42 : f32 to vector<72x32xf32>
    %41 = arith.maximumf %39, %40 : vector<72x32xf32>
    %42 = arith.truncf %41 : vector<72x32xf32> to vector<72x32xbf16>
    %c0_43 = arith.constant 0 : index
    %c0_44 = arith.constant 0 : index
    %c0_45 = arith.constant 0 : index
    %43 = vector.load %arg4[%c0_43, %c0_44, %c0_45] : memref<1x72x32xbf16, #tpu.memory_space<vmem>>, vector<1x72x32xbf16>
    %44 = vector.shape_cast %43 : vector<1x72x32xbf16> to vector<72x32xbf16>
    %45 = vector.shape_cast %42 : vector<72x32xbf16> to vector<1x72x32xbf16>
    tpu.vector_store %arg4[%c0_43, %c0_44, %c0_45], %45 {strides = array<i32>} : memref<1x72x32xbf16, #tpu.memory_space<vmem>>, vector<1x72x32xbf16>,
    return
  }
  func.func @transform_0(%arg0: i32) -> (i32, i32, i32) {
    %c0_i32 = arith.constant 0 : i32
    %c0_i32_0 = arith.constant 0 : i32
    %c0_i32_1 = arith.constant 0 : i32
    return %arg0, %c0_i32, %c0_i32_0 : i32, i32, i32
  }
  func.func @transform_1(%arg0: i32) -> (i32, i32, i32) {
    %c0_i32 = arith.constant 0 : i32
    %c0_i32_0 = arith.constant 0 : i32
    %c0_i32_1 = arith.constant 0 : i32
    %c0_i32_2 = arith.constant 0 : i32
    return %c0_i32, %c0_i32_0, %c0_i32_1 : i32, i32, i32
  }
  func.func @transform_2(%arg0: i32) -> (i32, i32) {
    %c0_i32 = arith.constant 0 : i32
    %c0_i32_0 = arith.constant 0 : i32
    %c0_i32_1 = arith.constant 0 : i32
    return %c0_i32, %c0_i32_0 : i32, i32
  }
  func.func @transform_3(%arg0: i32) -> (i32, i32, i32) {
    %c0_i32 = arith.constant 0 : i32
    %c0_i32_0 = arith.constant 0 : i32
    %c0_i32_1 = arith.constant 0 : i32
    return %arg0, %c0_i32, %c0_i32_0 : i32, i32, i32
  }
}

module attributes {stable_mosaic.version = 11 : i64} {
  func.func @_conv_relu_pool_kernel(%arg0: i32, %arg1: memref<1x32x128xbf16, #tpu.memory_space<vmem>>, %arg2: memref<4x128x128xbf16, #tpu.memory_space<vmem>>, %arg3: memref<1x32xf32, #tpu.memory_space<vmem>>, %arg4: memref<1x20x32xbf16, #tpu.memory_space<vmem>>, %arg5: memref<20x128xf32, #tpu.memory_space<vmem>>) attributes {dimension_semantics = [#tpu.dimension_semantics<parallel>], iteration_bounds = array<i64: 2>, scalar_prefetch = 0 : i64, scratch_operands = 1 : i64, tpu.core_type = #tpu.core_type<tc>, window_params = [{transform_indices = @transform_0, window_bounds = array<i64: 1, 32, 128>}, {pipeline_mode = #tpu.pipeline_mode<synchronous>, transform_indices = @transform_1, window_bounds = array<i64: 4, 128, 128>}, {pipeline_mode = #tpu.pipeline_mode<synchronous>, transform_indices = @transform_2, window_bounds = array<i64: 1, 32>}, {transform_indices = @transform_3, window_bounds = array<i64: 1, 20, 32>}]} {
    %c0 = arith.constant 0 : index
    %c0_0 = arith.constant 0 : index
    %c0_1 = arith.constant 0 : index
    %0 = vector.load %arg1[%c0, %c0_0, %c0_1] : memref<1x32x128xbf16, #tpu.memory_space<vmem>>, vector<1x20x128xbf16>
    %1 = vector.shape_cast %0 : vector<1x20x128xbf16> to vector<20x128xbf16>
    %c0_2 = arith.constant 0 : index
    %c0_3 = arith.constant 0 : index
    %c0_4 = arith.constant 0 : index
    %2 = vector.load %arg2[%c0_2, %c0_3, %c0_4] : memref<4x128x128xbf16, #tpu.memory_space<vmem>>, vector<1x128x128xbf16>
    %3 = vector.shape_cast %2 : vector<1x128x128xbf16> to vector<128x128xbf16>
    %cst = arith.constant dense<0.000000e+00> : vector<20x128xf32>
    %4 = tpu.matmul %1, %3, %cst {dimension_numbers = #tpu.dot_dimension_numbers<[1], [0], [0], [1], [0, 0, 1, 1], [], []>} : vector<20x128xbf16>, vector<128x128xbf16>, vector<20x128xf32> -> vector<20x128xf32>
    %c0_5 = arith.constant 0 : index
    %c0_6 = arith.constant 0 : index
    %5 = vector.load %arg5[%c0_5, %c0_6] : memref<20x128xf32, #tpu.memory_space<vmem>>, vector<20x128xf32>
    tpu.vector_store %arg5[%c0_5, %c0_6], %4 {strides = array<i32>} : memref<20x128xf32, #tpu.memory_space<vmem>>, vector<20x128xf32>,
    %c0_7 = arith.constant 0 : index
    %c1 = arith.constant 1 : index
    %c0_8 = arith.constant 0 : index
    %6 = vector.load %arg1[%c0_7, %c1, %c0_8] : memref<1x32x128xbf16, #tpu.memory_space<vmem>>, vector<1x20x128xbf16>
    %7 = vector.shape_cast %6 : vector<1x20x128xbf16> to vector<20x128xbf16>
    %c1_9 = arith.constant 1 : index
    %c0_10 = arith.constant 0 : index
    %c0_11 = arith.constant 0 : index
    %8 = vector.load %arg2[%c1_9, %c0_10, %c0_11] : memref<4x128x128xbf16, #tpu.memory_space<vmem>>, vector<1x128x128xbf16>
    %9 = vector.shape_cast %8 : vector<1x128x128xbf16> to vector<128x128xbf16>
    %cst_12 = arith.constant dense<0.000000e+00> : vector<20x128xf32>
    %10 = tpu.matmul %7, %9, %cst_12 {dimension_numbers = #tpu.dot_dimension_numbers<[1], [0], [0], [1], [0, 0, 1, 1], [], []>} : vector<20x128xbf16>, vector<128x128xbf16>, vector<20x128xf32> -> vector<20x128xf32>
    %c0_13 = arith.constant 0 : index
    %c0_14 = arith.constant 0 : index
    %11 = vector.load %arg5[%c0_13, %c0_14] : memref<20x128xf32, #tpu.memory_space<vmem>>, vector<20x128xf32>
    %12 = arith.addf %11, %10 : vector<20x128xf32>
    %c0_15 = arith.constant 0 : index
    %c0_16 = arith.constant 0 : index
    %13 = vector.load %arg5[%c0_15, %c0_16] : memref<20x128xf32, #tpu.memory_space<vmem>>, vector<20x128xf32>
    tpu.vector_store %arg5[%c0_15, %c0_16], %12 {strides = array<i32>} : memref<20x128xf32, #tpu.memory_space<vmem>>, vector<20x128xf32>,
    %c0_17 = arith.constant 0 : index
    %c5 = arith.constant 5 : index
    %c0_18 = arith.constant 0 : index
    %14 = vector.load %arg1[%c0_17, %c5, %c0_18] : memref<1x32x128xbf16, #tpu.memory_space<vmem>>, vector<1x20x128xbf16>
    %15 = vector.shape_cast %14 : vector<1x20x128xbf16> to vector<20x128xbf16>
    %c2 = arith.constant 2 : index
    %c0_19 = arith.constant 0 : index
    %c0_20 = arith.constant 0 : index
    %16 = vector.load %arg2[%c2, %c0_19, %c0_20] : memref<4x128x128xbf16, #tpu.memory_space<vmem>>, vector<1x128x128xbf16>
    %17 = vector.shape_cast %16 : vector<1x128x128xbf16> to vector<128x128xbf16>
    %cst_21 = arith.constant dense<0.000000e+00> : vector<20x128xf32>
    %18 = tpu.matmul %15, %17, %cst_21 {dimension_numbers = #tpu.dot_dimension_numbers<[1], [0], [0], [1], [0, 0, 1, 1], [], []>} : vector<20x128xbf16>, vector<128x128xbf16>, vector<20x128xf32> -> vector<20x128xf32>
    %c0_22 = arith.constant 0 : index
    %c0_23 = arith.constant 0 : index
    %19 = vector.load %arg5[%c0_22, %c0_23] : memref<20x128xf32, #tpu.memory_space<vmem>>, vector<20x128xf32>
    %20 = arith.addf %19, %18 : vector<20x128xf32>
    %c0_24 = arith.constant 0 : index
    %c0_25 = arith.constant 0 : index
    %21 = vector.load %arg5[%c0_24, %c0_25] : memref<20x128xf32, #tpu.memory_space<vmem>>, vector<20x128xf32>
    tpu.vector_store %arg5[%c0_24, %c0_25], %20 {strides = array<i32>} : memref<20x128xf32, #tpu.memory_space<vmem>>, vector<20x128xf32>,
    %c0_26 = arith.constant 0 : index
    %c6 = arith.constant 6 : index
    %c0_27 = arith.constant 0 : index
    %22 = vector.load %arg1[%c0_26, %c6, %c0_27] : memref<1x32x128xbf16, #tpu.memory_space<vmem>>, vector<1x20x128xbf16>
    %23 = vector.shape_cast %22 : vector<1x20x128xbf16> to vector<20x128xbf16>
    %c3 = arith.constant 3 : index
    %c0_28 = arith.constant 0 : index
    %c0_29 = arith.constant 0 : index
    %24 = vector.load %arg2[%c3, %c0_28, %c0_29] : memref<4x128x128xbf16, #tpu.memory_space<vmem>>, vector<1x128x128xbf16>
    %25 = vector.shape_cast %24 : vector<1x128x128xbf16> to vector<128x128xbf16>
    %cst_30 = arith.constant dense<0.000000e+00> : vector<20x128xf32>
    %26 = tpu.matmul %23, %25, %cst_30 {dimension_numbers = #tpu.dot_dimension_numbers<[1], [0], [0], [1], [0, 0, 1, 1], [], []>} : vector<20x128xbf16>, vector<128x128xbf16>, vector<20x128xf32> -> vector<20x128xf32>
    %c0_31 = arith.constant 0 : index
    %c0_32 = arith.constant 0 : index
    %27 = vector.load %arg5[%c0_31, %c0_32] : memref<20x128xf32, #tpu.memory_space<vmem>>, vector<20x128xf32>
    %28 = arith.addf %27, %26 : vector<20x128xf32>
    %c0_33 = arith.constant 0 : index
    %c0_34 = arith.constant 0 : index
    %29 = vector.load %arg5[%c0_33, %c0_34] : memref<20x128xf32, #tpu.memory_space<vmem>>, vector<20x128xf32>
    tpu.vector_store %arg5[%c0_33, %c0_34], %28 {strides = array<i32>} : memref<20x128xf32, #tpu.memory_space<vmem>>, vector<20x128xf32>,
    %c0_35 = arith.constant 0 : index
    %c0_36 = arith.constant 0 : index
    %30 = vector.load %arg5[%c0_35, %c0_36] : memref<20x128xf32, #tpu.memory_space<vmem>>, vector<20x32xf32>
    %c0_37 = arith.constant 0 : index
    %c32 = arith.constant 32 : index
    %31 = vector.load %arg5[%c0_37, %c32] : memref<20x128xf32, #tpu.memory_space<vmem>>, vector<20x32xf32>
    %32 = arith.maximumf %30, %31 : vector<20x32xf32>
    %c0_38 = arith.constant 0 : index
    %c64 = arith.constant 64 : index
    %33 = vector.load %arg5[%c0_38, %c64] : memref<20x128xf32, #tpu.memory_space<vmem>>, vector<20x32xf32>
    %c0_39 = arith.constant 0 : index
    %c96 = arith.constant 96 : index
    %34 = vector.load %arg5[%c0_39, %c96] : memref<20x128xf32, #tpu.memory_space<vmem>>, vector<20x32xf32>
    %35 = arith.maximumf %33, %34 : vector<20x32xf32>
    %36 = arith.maximumf %32, %35 : vector<20x32xf32>
    %c0_40 = arith.constant 0 : index
    %c0_41 = arith.constant 0 : index
    %37 = vector.load %arg3[%c0_40, %c0_41] : memref<1x32xf32, #tpu.memory_space<vmem>>, vector<1x32xf32>
    %38 = vector.broadcast %37 : vector<1x32xf32> to vector<20x32xf32>
    %39 = arith.addf %36, %38 : vector<20x32xf32>
    %cst_42 = arith.constant 0.000000e+00 : f32
    %40 = vector.broadcast %cst_42 : f32 to vector<20x32xf32>
    %41 = arith.maximumf %39, %40 : vector<20x32xf32>
    %42 = arith.truncf %41 : vector<20x32xf32> to vector<20x32xbf16>
    %c0_43 = arith.constant 0 : index
    %c0_44 = arith.constant 0 : index
    %c0_45 = arith.constant 0 : index
    %43 = vector.load %arg4[%c0_43, %c0_44, %c0_45] : memref<1x20x32xbf16, #tpu.memory_space<vmem>>, vector<1x20x32xbf16>
    %44 = vector.shape_cast %43 : vector<1x20x32xbf16> to vector<20x32xbf16>
    %45 = vector.shape_cast %42 : vector<20x32xbf16> to vector<1x20x32xbf16>
    tpu.vector_store %arg4[%c0_43, %c0_44, %c0_45], %45 {strides = array<i32>} : memref<1x20x32xbf16, #tpu.memory_space<vmem>>, vector<1x20x32xbf16>,
    return
  }
  func.func @transform_0(%arg0: i32) -> (i32, i32, i32) {
    %c0_i32 = arith.constant 0 : i32
    %c0_i32_0 = arith.constant 0 : i32
    %c0_i32_1 = arith.constant 0 : i32
    return %arg0, %c0_i32, %c0_i32_0 : i32, i32, i32
  }
  func.func @transform_1(%arg0: i32) -> (i32, i32, i32) {
    %c0_i32 = arith.constant 0 : i32
    %c0_i32_0 = arith.constant 0 : i32
    %c0_i32_1 = arith.constant 0 : i32
    %c0_i32_2 = arith.constant 0 : i32
    return %c0_i32, %c0_i32_0, %c0_i32_1 : i32, i32, i32
  }
  func.func @transform_2(%arg0: i32) -> (i32, i32) {
    %c0_i32 = arith.constant 0 : i32
    %c0_i32_0 = arith.constant 0 : i32
    %c0_i32_1 = arith.constant 0 : i32
    return %c0_i32, %c0_i32_0 : i32, i32
  }
  func.func @transform_3(%arg0: i32) -> (i32, i32, i32) {
    %c0_i32 = arith.constant 0 : i32
    %c0_i32_0 = arith.constant 0 : i32
    %c0_i32_1 = arith.constant 0 : i32
    return %arg0, %c0_i32, %c0_i32_0 : i32, i32, i32
  }
}

module attributes {stable_mosaic.version = 11 : i64} {
  func.func @_linear_kernel(%arg0: i32, %arg1: memref<2x256xbf16, #tpu.memory_space<vmem>>, %arg2: memref<10x256xbf16, #tpu.memory_space<vmem>>, %arg3: memref<1x10xf32, #tpu.memory_space<vmem>>, %arg4: memref<2x10xf32, #tpu.memory_space<vmem>>, %arg5: memref<2x10xf32, #tpu.memory_space<vmem>>) attributes {dimension_semantics = [#tpu.dimension_semantics<arbitrary>], iteration_bounds = array<i64: 2>, scalar_prefetch = 0 : i64, scratch_operands = 1 : i64, tpu.core_type = #tpu.core_type<tc>, window_params = [{transform_indices = @transform_0, window_bounds = array<i64: 2, 256>}, {transform_indices = @transform_1, window_bounds = array<i64: 10, 256>}, {pipeline_mode = #tpu.pipeline_mode<synchronous>, transform_indices = @transform_2, window_bounds = array<i64: 1, 10>}, {pipeline_mode = #tpu.pipeline_mode<synchronous>, transform_indices = @transform_3, window_bounds = array<i64: 2, 10>}]} {
    %c0_i32 = arith.constant 0 : i32
    %0 = arith.cmpi eq, %arg0, %c0_i32 : i32
    %1 = arith.extui %0 : i1 to i32
    %c0_i32_0 = arith.constant 0 : i32
    %2 = arith.cmpi ne, %1, %c0_i32_0 : i32
    scf.if %2 {
      %cst_14 = arith.constant 0.000000e+00 : f32
      %14 = vector.broadcast %cst_14 : f32 to vector<2x10xf32>
      %c0_15 = arith.constant 0 : index
      %c0_16 = arith.constant 0 : index
      %15 = vector.load %arg5[%c0_15, %c0_16] : memref<2x10xf32, #tpu.memory_space<vmem>>, vector<2x10xf32>
      tpu.vector_store %arg5[%c0_15, %c0_16], %14 {strides = array<i32>} : memref<2x10xf32, #tpu.memory_space<vmem>>, vector<2x10xf32>,
    } else {
    }
    %c0 = arith.constant 0 : index
    %c0_1 = arith.constant 0 : index
    %3 = vector.load %arg5[%c0, %c0_1] : memref<2x10xf32, #tpu.memory_space<vmem>>, vector<2x10xf32>
    %c0_2 = arith.constant 0 : index
    %c0_3 = arith.constant 0 : index
    %4 = vector.load %arg1[%c0_2, %c0_3] : memref<2x256xbf16, #tpu.memory_space<vmem>>, vector<2x256xbf16>
    %c0_4 = arith.constant 0 : index
    %c0_5 = arith.constant 0 : index
    %5 = vector.load %arg2[%c0_4, %c0_5] : memref<10x256xbf16, #tpu.memory_space<vmem>>, vector<10x256xbf16>
    %cst = arith.constant dense<0.000000e+00> : vector<2x10xf32>
    %6 = tpu.matmul %4, %5, %cst {dimension_numbers = #tpu.dot_dimension_numbers<[1], [1], [0], [0], [0, 0, 1, 0], [], []>} : vector<2x256xbf16>, vector<10x256xbf16>, vector<2x10xf32> -> vector<2x10xf32>
    %7 = arith.addf %3, %6 : vector<2x10xf32>
    %c0_6 = arith.constant 0 : index
    %c0_7 = arith.constant 0 : index
    %8 = vector.load %arg5[%c0_6, %c0_7] : memref<2x10xf32, #tpu.memory_space<vmem>>, vector<2x10xf32>
    tpu.vector_store %arg5[%c0_6, %c0_7], %7 {strides = array<i32>} : memref<2x10xf32, #tpu.memory_space<vmem>>, vector<2x10xf32>,
    %c0_8 = arith.constant 0 : index
    %c0_9 = arith.constant 0 : index
    %9 = vector.load %arg5[%c0_8, %c0_9] : memref<2x10xf32, #tpu.memory_space<vmem>>, vector<2x10xf32>
    %c0_10 = arith.constant 0 : index
    %c0_11 = arith.constant 0 : index
    %10 = vector.load %arg3[%c0_10, %c0_11] : memref<1x10xf32, #tpu.memory_space<vmem>>, vector<1x10xf32>
    %11 = vector.broadcast %10 : vector<1x10xf32> to vector<2x10xf32>
    %12 = arith.addf %9, %11 : vector<2x10xf32>
    %c0_12 = arith.constant 0 : index
    %c0_13 = arith.constant 0 : index
    %13 = vector.load %arg4[%c0_12, %c0_13] : memref<2x10xf32, #tpu.memory_space<vmem>>, vector<2x10xf32>
    tpu.vector_store %arg4[%c0_12, %c0_13], %12 {strides = array<i32>} : memref<2x10xf32, #tpu.memory_space<vmem>>, vector<2x10xf32>,
    return
  }
  func.func @transform_0(%arg0: i32) -> (i32, i32) {
    %c0_i32 = arith.constant 0 : i32
    %c0_i32_0 = arith.constant 0 : i32
    return %c0_i32, %arg0 : i32, i32
  }
  func.func @transform_1(%arg0: i32) -> (i32, i32) {
    %c0_i32 = arith.constant 0 : i32
    %c0_i32_0 = arith.constant 0 : i32
    return %c0_i32, %arg0 : i32, i32
  }
  func.func @transform_2(%arg0: i32) -> (i32, i32) {
    %c0_i32 = arith.constant 0 : i32
    %c0_i32_0 = arith.constant 0 : i32
    %c0_i32_1 = arith.constant 0 : i32
    return %c0_i32, %c0_i32_0 : i32, i32
  }
  func.func @transform_3(%arg0: i32) -> (i32, i32) {
    %c0_i32 = arith.constant 0 : i32
    %c0_i32_0 = arith.constant 0 : i32
    %c0_i32_1 = arith.constant 0 : i32
    return %c0_i32, %c0_i32_0 : i32, i32
  }
}

</mosaic_0001>

<bundles_post_ra>
// kernel: cnn_forward.5
= control target key start
LH: loop header
LB: loop body
LE: loop exit
PB: predicated region body
PF: predicated region fallthrough
CT: control target
= control target key end

     0   :  { %s10419_s12 = smov 0   ;;  %s14783_s0 = inlined_call_operand.vmem [shape: bf16[2,1096,4], index: 0, kind: input, shape index: {}]   ;;  %s14784_s1 = inlined_call_operand.vmem [shape: bf16[4,4,64], index: 1, kind: input, shape index: {}]   ;;  %s14785_s2 = inlined_call_operand.vmem [shape: f32[1,16], index: 2, kind: input, shape index: {}]   ;;  %s14786_s3 = inlined_call_operand.vmem [shape: bf16[2,1056,16], index: 3, kind: output, shape index: {}]  }
   0x1 LB: > { %s8761_s13 = sadd.s32 4294967295, %s10395_s12   ;;  %p8765_p0 = scmp.ge.s32.totalorder %s10395_s12, 1  ;;  %s10395_s12 = sphi %s10419_s12, %s13_s12  }
   0x2   : > { %p137_p1 = scmp.lt.s32.totalorder %s10395_s12, 3 }
   0x4   : > { %p138_p2 = pnand %p8765_p0, %p137_p1 }
   0x5   : > { %p161_p3 = scmp.lt.s32.totalorder (!%p138_p2), %s8761_s13, 1  ;;  %s10397_s26 = smov (!%p138_p2), 112  }
   0x6   : > { %141 = sbr.rel (%p138_p2) target bundleno = 1486 (0x5ce), region = 32  ;;  %s10398_s27 = smov (!%p138_p2), 96  }
   0xb   : > { %v304_v0 = vld [vmem:[%s14784_s1] sm:$0x3]  ;;  %vm834_vm0 = vcmask 1041408   ;;  %v9098_v2 = vld [vmem:[%s14784_s1 + $0x2] sm:$0x3]  ;;  %s14788_s13 = smov (!%p161_p3, %s8761_s13), 1 }
   0xc   : > { %v836_v1 = vsel %vm834_vm0, %v304_v0, 0  ;;  %v9429_v3 = vld [vmem:[%s14784_s1 + $0x4] sm:$0x3]  ;;  %v2510_v4 = vsel %vm834_vm0, %v9098_v2, 0  ;;  %v9760_v6 = vld [vmem:[%s14784_s1 + $0x6] sm:$0x3] }
   0xd   : > { %845 = vmatpush.bf16.msra.mxu0 %v836_v1  ;;  %v4446_v5 = vsel %vm834_vm0, %v9429_v3, 0  ;;  %2519 = vmatpush.bf16.msra.mxu1 %v2510_v4  ;;  %s10357_s22 = smul.u32 548, %s14788_s13  ;;  %v5984_v7 = vsel %vm834_vm0, %v9760_v6, 0  ;;  %vm635_vm1 = vcmask 31744   ;;  %vm5651_vm2 = vcmask 1046528  }
   0xe   : > { %4455 = vmatpush.bf16.msra.mxu2 %v4446_v5  ;;  %5993 = vmatpush.bf16.msra.mxu3 %v5984_v7  ;;  %vm1778_vm3 = vsmask.f32 7424  ;;  %vm1177_vm4 = vcmask 523264   ;;  %s10358_s30 = smul.u32 528, %s14788_s13  ;;  %vm8573_vm5 = vcmask 125952  }
   0xf   : > { %s10445_s25 = scalar_lea.vmem %s14783_s0, %s10357_s22 }
  0x10   : > { %v10093_v8 = vld [vmem:[%s10445_s25] sm:$0xff]  ;;  %v10160_v10 = vld [vmem:[%s10445_s25 + $0x8] sm:$0xff]  ;;  %v10225_v11 = vld [vmem:[%s10445_s25 + $0x10] sm:$0xff]  ;;  %s11306_s6 = scalar_lea.vmem %s14786_s3, %s10358_s30 }
  0x11   : > { %v10159_v9 = vld [vmem:[%s10445_s25] sm:$0xff]  ;;  %v10226_v12 = vld [vmem:[%s10445_s25 + $0x18] sm:$0xff]  ;;  %v9763_v13 = vld [vmem:[%s10445_s25 + $0x10] sm:$0xe]  ;;  %9032 = vmatmul.msk.bf16.vlgmr.msra.gmra.mxu0 %vm635_vm1, %v10093_v8  ;;  %v1787_v16 = vshll.u32 %v10160_v10, 16  ;;  %v3716_v19 = vshrl.u32 %v10225_v11, 16 }
  0x12   : > { %v1780_v14 = vshrl.u32 %v10159_v9, 16  ;;  %v1782_v15 = vshll.u32 %v10159_v9, 16  ;;  %v10291_v17 = vld [vmem:[%s10445_s25 + $0x10] sm:$0xf0]  ;;  %v10292_v18 = vld [vmem:[%s10445_s25 + $0x18] sm:$0xff]  ;;  %v3718_v20 = vshll.u32 %v10225_v11, 16 }
  0x13   : > { %v3723_v21 = vshll.u32 %v10226_v12, 16  ;;  %v9764_v22 = vor.u32 %v10291_v17, %v9763_v13  ;;  %v1789_v24 = vrot.slane %v1787_v16, 1  ;;  %v5653_v25 = vrot.slane %v10292_v18, 1  ;;  %v10161_v34 = vld [vmem:[%s10445_s25 + $0x10] sm:$0xff]  ;;  %v10227_v35 = vld [vmem:[%s10445_s25 + $0x20] sm:$0xff]  ;;  %v10094_v37 = vld [vmem:[%s10445_s25 + $0x8] sm:$0xff] }
  0x14   : > { %v1784_v23 = vrot.slane %v1782_v15, 1  ;;  %v3720_v26 = vrot.slane %v3718_v20, 1  ;;  %v10293_v36 = vld [vmem:[%s10445_s25 + $0x20] sm:$0xff]  ;;  %v1791_v38 = vshrl.u32 %v10160_v10, 16  ;;  %v1795_v39 = vshll.u32 %v10161_v34, 16  ;;  %v10162_v50 = vld [vmem:[%s10445_s25 + $0x18] sm:$0xff] }
  0x15   : > { %v3725_v27 = vrot.slane %v3723_v21, 1  ;;  %v5652_v28 = vrot.slane %v9764_v22, 1  ;;  %v3727_v40 = vshrl.u32 %v10226_v12, 16  ;;  %v3731_v41 = vshll.u32 %v10227_v35, 16  ;;  %v10228_v51 = vld [vmem:[%s10445_s25 + $0x28] sm:$0xff]  ;;  %v10095_v53 = vld [vmem:[%s10445_s25 + $0x10] sm:$0xff] }
  0x16   : > { %v1785_v29 = vor.u32 %v1784_v23, %v1780_v14  ;;  %v3721_v30 = vor.u32 %v3720_v26, %v3716_v19  ;;  %v5655_v42 = vrot.slane %v10293_v36, 1  ;;  %v1793_v43 = vor.u32 %v1791_v38, %v1789_v24  ;;  %v10294_v52 = vld [vmem:[%s10445_s25 + $0x28] sm:$0xff]  ;;  %v10163_v2 = vld [vmem:[%s10445_s25 + $0x20] sm:$0xff]  ;;  %v10229_v3 = vld [vmem:[%s10445_s25 + $0x30] sm:$0xff] }
  0x17   : > { %v5654_v31 = vsel %vm5651_vm2, %v5652_v28, %v5653_v25  ;;  %v1797_v44 = vrot.slane %v1795_v39, 1  ;;  %v3729_v45 = vor.u32 %v3727_v40, %v3725_v27  ;;  %v3733_v46 = vrot.slane %v3731_v41, 1  ;;  %v10295_v4 = vld [vmem:[%s10445_s25 + $0x30] sm:$0xff]  ;;  %v10096_v5 = vld [vmem:[%s10445_s25 + $0x18] sm:$0xff]  ;;  %v10164_v18 = vld [vmem:[%s10445_s25 + $0x28] sm:$0xff] }
  0x18   : > { %v1790_v32 = vsel %vm1778_vm3, %v1785_v29, %v1789_v24  ;;  %10025 = vmatmul.msk.bf16.vlgmr.msra.gmra.mxu3 %vm635_vm1, %v5654_v31  ;;  %v3726_v33 = vsel %vm1778_vm3, %v3721_v30, %v3725_v27  ;;  %v5656_v47 = vsel %vm5651_vm2, %v5653_v25, %v5655_v42  ;;  %v1799_v54 = vshrl.u32 %v10161_v34, 16  ;;  %v10230_v19 = vld [vmem:[%s10445_s25 + $0x38] sm:$0xff]  ;;  %v10097_v21 = vld [vmem:[%s10445_s25 + $0x20] sm:$0xff]  ;;  %v10165_v34 = vld [vmem:[%s10445_s25 + $0x30] sm:$0xff] }
  0x19   : > { %9363 = vmatmul.msk.bf16.vlgmr.msra.gmra.mxu1 %vm635_vm1, %v1790_v32  ;;  %9694 = vmatmul.msk.bf16.vlgmr.msra.gmra.mxu2 %vm635_vm1, %v3726_v33  ;;  %v1798_v48 = vsel %vm1778_vm3, %v1793_v43, %v1797_v44  ;;  %v3734_v49 = vsel %vm1778_vm3, %v3729_v45, %v3733_v46  ;;  %v1803_v55 = vshll.u32 %v10162_v50, 16  ;;  %v3735_v56 = vshrl.u32 %v10227_v35, 16  ;;  %v10296_v20 = vld [vmem:[%s10445_s25 + $0x38] sm:$0xff]  ;;  %v10231_v35 = vld [vmem:[%s10445_s25 + $0x40] sm:$0xff] }
  0x1a   : > { %v3739_v57 = vshll.u32 %v10228_v51, 16  ;;  %v5657_v58 = vrot.slane %v10294_v52, 1  ;;  %v1801_v59 = vor.u32 %v1799_v54, %v1797_v44  ;;  %v1807_v6 = vshrl.u32 %v10162_v50, 16  ;;  %v10297_v36 = vld [vmem:[%s10445_s25 + $0x40] sm:$0xff]  ;;  %v10166_v50 = vld [vmem:[%s10445_s25 + $0x38] sm:$0xff]  ;;  %v10298_v52 = vld [vmem:[%s10445_s25 + $0x48] sm:$0xff] }
  0x1b   : > { %v1805_v60 = vrot.slane %v1803_v55, 1  ;;  %v3737_v61 = vor.u32 %v3735_v56, %v3733_v46  ;;  %v1811_v7 = vshll.u32 %v10163_v2, 16  ;;  %v3743_v8 = vshrl.u32 %v10228_v51, 16  ;;  %v10232_v51 = vld [vmem:[%s10445_s25 + $0x48] sm:$0xff] }
  0x1c   : > { %v3741_v62 = vrot.slane %v3739_v57, 1  ;;  %v5658_v63 = vsel %vm5651_vm2, %v5655_v42, %v5657_v58  ;;  %v3747_v9 = vshll.u32 %v10229_v3, 16  ;;  %v5659_v10 = vrot.slane %v10295_v4, 1  ;;  %v10299_v4 = vld [vmem:[%s10445_s25 + $0x50] sm:$0xff] }
  0x1d   : > { %v1806_v0 = vsel %vm1778_vm3, %v1801_v59, %v1805_v60  ;;  %v1809_v11 = vor.u32 %v1807_v6, %v1805_v60  ;;  %v1813_v12 = vrot.slane %v1811_v7, 1  ;;  %v1815_v22 = vshrl.u32 %v10163_v2, 16  ;;  %v10167_v2 = vld [vmem:[%s10445_s25 + $0x40] sm:$0xff] }
  0x1e   : > { %v3742_v1 = vsel %vm1778_vm3, %v3737_v61, %v3741_v62  ;;  %v3745_v13 = vor.u32 %v3743_v8, %v3741_v62  ;;  %v3749_v14 = vrot.slane %v3747_v9, 1  ;;  %v5660_v15 = vsel %vm5651_vm2, %v5657_v58, %v5659_v10 }
  0x1f   : > { %v1814_v16 = vsel %vm1778_vm3, %v1809_v11, %v1813_v12  ;;  %v1819_v23 = vshll.u32 %v10164_v18, 16  ;;  %v3751_v24 = vshrl.u32 %v10229_v3, 16  ;;  %v3755_v25 = vshll.u32 %v10230_v19, 16  ;;  %v10233_v3 = vld [vmem:[%s10445_s25 + $0x50] sm:$0xff] }
  0x20   : > { %v3750_v17 = vsel %vm1778_vm3, %v3745_v13, %v3749_v14  ;;  %v5661_v26 = vrot.slane %v10296_v20, 1  ;;  %v1817_v27 = vor.u32 %v1815_v22, %v1813_v12  ;;  %v1823_v38 = vshrl.u32 %v10164_v18, 16  ;;  %v10168_v18 = vld [vmem:[%s10445_s25 + $0x48] sm:$0xff]  ;;  %v10300_v20 = vld [vmem:[%s10445_s25 + $0x58] sm:$0xff] }
  0x21   : > { %9033 = vmatmul.msk.bf16.gmra.mxu0 %vm635_vm1, %v10094_v37  ;;  %v1821_v28 = vrot.slane %v1819_v23, 1  ;;  %v3753_v29 = vor.u32 %v3751_v24, %v3749_v14  ;;  %v3757_v30 = vrot.slane %v3755_v25, 1  ;;  %v10098_v37 = vld [vmem:[%s10445_s25 + $0x28] sm:$0xff]  ;;  %v1827_v39 = vshll.u32 %v10165_v34, 16 }
  0x22   : > { %v5662_v31 = vsel %vm5651_vm2, %v5659_v10, %v5661_v26  ;;  %v3759_v40 = vshrl.u32 %v10230_v19, 16  ;;  %v3763_v41 = vshll.u32 %v10231_v35, 16  ;;  %v5663_v42 = vrot.slane %v10297_v36, 1  ;;  %v10234_v19 = vld [vmem:[%s10445_s25 + $0x58] sm:$0xff] }
  0x23   : > { %v1822_v32 = vsel %vm1778_vm3, %v1817_v27, %v1821_v28  ;;  %v3758_v33 = vsel %vm1778_vm3, %v3753_v29, %v3757_v30  ;;  %v1825_v43 = vor.u32 %v1823_v38, %v1821_v28  ;;  %v1829_v44 = vrot.slane %v1827_v39, 1  ;;  %v10554_v39 = vld [vmem:[%s10445_s25 + $0x50] sm:$0xff] }
  0x24   : > { %v3761_v45 = vor.u32 %v3759_v40, %v3757_v30  ;;  %v3765_v46 = vrot.slane %v3763_v41, 1  ;;  %v1831_v54 = vshrl.u32 %v10165_v34, 16  ;;  %v1835_v55 = vshll.u32 %v10166_v50, 16  ;;  %v10557_v41 = vld [vmem:[%s10445_s25 + $0x60] sm:$0xff] }
  0x25   : > { %v3767_v56 = vshrl.u32 %v10231_v35, 16  ;;  %v3771_v57 = vshll.u32 %v10232_v51, 16  ;;  %v5665_v58 = vrot.slane %v10298_v52, 1  ;;  %v1839_v6 = vshrl.u32 %v10166_v50, 16 }
  0x26   : > { %v1833_v59 = vor.u32 %v1831_v54, %v1829_v44  ;;  %v1837_v60 = vrot.slane %v1835_v55, 1  ;;  %v1843_v7 = vshll.u32 %v10167_v2, 16  ;;  %v3775_v8 = vshrl.u32 %v10232_v51, 16 }
  0x27   : > { %v3769_v61 = vor.u32 %v3767_v56, %v3765_v46  ;;  %v3773_v62 = vrot.slane %v3771_v57, 1  ;;  %v3779_v9 = vshll.u32 %v10233_v3, 16  ;;  %v5667_v10 = vrot.slane %v10299_v4, 1 }
  0x28   : > { %10026 = vmatmul.msk.bf16.gmra.mxu3 %vm635_vm1, %v5656_v47  ;;  %v5664_v47 = vsel %vm5651_vm2, %v5661_v26, %v5663_v42  ;;  %v1841_v11 = vor.u32 %v1839_v6, %v1837_v60  ;;  %v1845_v12 = vrot.slane %v1843_v7, 1  ;;  %v1847_v22 = vshrl.u32 %v10167_v2, 16  ;;  %v10579_v7 = vld [vmem:[%s10445_s25 + $0x58] sm:$0xff] }
  0x29   : > { %9364 = vmatmul.msk.bf16.gmra.mxu1 %vm635_vm1, %v1798_v48  ;;  %9695 = vmatmul.msk.bf16.gmra.mxu2 %vm635_vm1, %v3734_v49  ;;  %v1830_v48 = vsel %vm1778_vm3, %v1825_v43, %v1829_v44  ;;  %v3766_v49 = vsel %vm1778_vm3, %v3761_v45, %v3765_v46  ;;  %v3777_v13 = vor.u32 %v3775_v8, %v3773_v62  ;;  %v3781_v14 = vrot.slane %v3779_v9, 1  ;;  %v10560_v43 = vld [vmem:[%s10445_s25 + $0x60] sm:$0xff]  ;;  %v10102_v45 = vld [vmem:[%s10445_s25 + $0x48] sm:$0xff] }
  0x2a   : > { %v1851_v23 = vshll.u32 %v10168_v18, 16  ;;  %v3783_v25 = vshrl.u32 %v10233_v3, 16  ;;  %v3787_v26 = vshll.u32 %v10234_v19, 16  ;;  %v5669_v27 = vrot.slane %v10300_v20, 1 }
  0x2b   : > { %v1849_v28 = vor.u32 %v1847_v22, %v1845_v12  ;;  %v1855_v46 = vshrl.u32 %v10168_v18, 16  ;;  %v3791_v50 = vshrl.u32 %v10234_v19, 16  ;;  %v3795_v51 = vshll.u32 %v10557_v41, 16 }
  0x2c   : > { %v1853_v29 = vrot.slane %v1851_v23, 1  ;;  %v3785_v30 = vor.u32 %v3783_v25, %v3781_v14  ;;  %v5671_v54 = vrot.slane %v10560_v43, 1  ;;  %v3799_v20 = vshrl.u32 %v10557_v41, 16 }
  0x2e   : > { %v1854_v34 = vsel %vm1778_vm3, %v1849_v28, %v1853_v29  ;;  %v1857_v56 = vor.u32 %v1855_v46, %v1853_v29 }
  0x31   : > { %9034 = vmatmul.msk.bf16.gmra.mxu0 %vm635_vm1, %v10095_v53  ;;  %v10099_v53 = vld [vmem:[%s10445_s25 + $0x30] sm:$0xff] }
  0x38   : > { %10027 = vmatmul.msk.bf16.gmra.mxu3 %vm635_vm1, %v5658_v63  ;;  %v5666_v63 = vsel %vm5651_vm2, %v5663_v42, %v5665_v58 }
  0x39   : > { %9365 = vmatmul.msk.bf16.gmra.mxu1 %vm635_vm1, %v1806_v0  ;;  %9696 = vmatmul.msk.bf16.gmra.mxu2 %vm635_vm1, %v3742_v1  ;;  %v1838_v0 = vsel %vm1778_vm3, %v1833_v59, %v1837_v60  ;;  %v3774_v1 = vsel %vm1778_vm3, %v3769_v61, %v3773_v62  ;;  %v3797_v59 = vrot.slane %v3795_v51, 1  ;;  %v5672_v62 = vsel %vm5651_vm2, %v5669_v27, %v5671_v54  ;;  %v10624_v51 = vld [vmem:[%s10445_s25 + $0x70] sm:$0xff] }
  0x3b   : > { %v3801_v29 = vor.u32 %v3799_v20, %v3797_v59 }
  0x41   : > { %9035 = vmatmul.msk.bf16.gmra.mxu0 %vm635_vm1, %v10096_v5  ;;  %v10100_v5 = vld [vmem:[%s10445_s25 + $0x38] sm:$0xff] }
  0x48   : > { %10028 = vmatmul.msk.bf16.gmra.mxu3 %vm635_vm1, %v5660_v15  ;;  %v5668_v15 = vsel %vm5651_vm2, %v5665_v58, %v5667_v10 }
  0x49   : > { %9366 = vmatmul.msk.bf16.gmra.mxu1 %vm635_vm1, %v1814_v16  ;;  %9697 = vmatmul.msk.bf16.gmra.mxu2 %vm635_vm1, %v3750_v17  ;;  %v1846_v16 = vsel %vm1778_vm3, %v1841_v11, %v1845_v12  ;;  %v3782_v17 = vsel %vm1778_vm3, %v3777_v13, %v3781_v14  ;;  %v10586_v13 = vld [vmem:[%s10445_s25 + $0x68] sm:$0xff] }
  0x51   : > { %9036 = vmatmul.msk.bf16.gmra.mxu0 %vm635_vm1, %v10097_v21  ;;  %v10101_v21 = vld [vmem:[%s10445_s25 + $0x40] sm:$0xff] }
  0x58   : > { %10029 = vmatmul.msk.bf16.gmra.mxu3 %vm635_vm1, %v5662_v31  ;;  %v3789_v31 = vrot.slane %v3787_v26, 1 }
  0x59   : > { %9367 = vmatmul.msk.bf16.gmra.mxu1 %vm635_vm1, %v1822_v32  ;;  %9698 = vmatmul.msk.bf16.gmra.mxu2 %vm635_vm1, %v3758_v33  ;;  %v5670_v32 = vsel %vm5651_vm2, %v5667_v10, %v5669_v27  ;;  %v10582_v10 = vld [vmem:[%s10445_s25 + $0x68] sm:$0xff] }
  0x5a   : > { %v3793_v58 = vor.u32 %v3791_v50, %v3789_v31 }
  0x5c   : > { %v3798_v3 = vsel %vm1778_vm3, %v3793_v58, %v3797_v59  ;;  %v3807_v58 = vshrl.u32 %v10582_v10, 16 }
  0x61   : > { %9037 = vmatmul.msk.bf16.gmra.mxu0 %vm635_vm1, %v10098_v37  ;;  %v3790_v37 = vsel %vm1778_vm3, %v3785_v30, %v3789_v31 }
  0x68   : > { %10030 = vmatmul.msk.bf16.gmra.mxu3 %vm635_vm1, %v5664_v47  ;;  %v1859_v47 = vshll.u32 %v10554_v39, 16 }
  0x69   : > { %9368 = vmatmul.msk.bf16.gmra.mxu1 %vm635_vm1, %v1830_v48  ;;  %9699 = vmatmul.msk.bf16.gmra.mxu2 %vm635_vm1, %v3766_v49 }
  0x6a   : > { %v1861_v57 = vrot.slane %v1859_v47, 1  ;;  %v10618_v47 = vld [vmem:[%s10445_s25 + $0x70] sm:$0xff] }
  0x6b   : > { %v3811_v59 = vshll.u32 %v10618_v47, 16 }
  0x71   : > { %9038 = vmatmul.msk.bf16.gmra.mxu0 %vm635_vm1, %v10099_v53 }
  0x78   : > { %10031 = vmatmul.msk.bf16.gmra.mxu3 %vm635_vm1, %v5666_v63 }
  0x79   : > { %9369 = vmatmul.msk.bf16.gmra.mxu1 %vm635_vm1, %v1838_v0  ;;  %9700 = vmatmul.msk.bf16.gmra.mxu2 %vm635_vm1, %v3774_v1  ;;  %v1862_v0 = vsel %vm1778_vm3, %v1857_v56, %v1861_v57 }
  0x81   : > { %9039 = vmatmul.msk.bf16.gmra.mxu0 %vm635_vm1, %v10100_v5 }
  0x88   : > { %10032 = vmatmul.msk.bf16.gmra.mxu3 %vm635_vm1, %v5668_v15  ;;  %v10103_v15 = vld [vmem:[%s10445_s25 + $0x50] sm:$0xff] }
  0x89   : > { %9370 = vmatmul.msk.bf16.gmra.mxu1 %vm635_vm1, %v1846_v16  ;;  %9701 = vmatmul.msk.bf16.gmra.mxu2 %vm635_vm1, %v3782_v17  ;;  %v1863_v16 = vshrl.u32 %v10554_v39, 16  ;;  %v1867_v17 = vshll.u32 %v10579_v7, 16 }
  0x8b   : > { %v1865_v26 = vor.u32 %v1863_v16, %v1861_v57  ;;  %v1869_v27 = vrot.slane %v1867_v17, 1 }
  0x8e   : > { %v847_v24 = vpop.f32.mrf.mxu0 }
  0x8f   : > { %1178 = vst.msk [vmem:[#allocation2] sm:$0xff] %vm1177_vm4, %v847_v24  ;;  %v5673_v24 = vrot.slane %v10586_v13, 1 }
  0x91   : > { %9040 = vmatmul.msk.bf16.gmra.mxu0 %vm635_vm1, %v10101_v21  ;;  %v3803_v21 = vshll.u32 %v10582_v10, 16 }
  0x93   : > { %v3805_v30 = vrot.slane %v3803_v21, 1  ;;  %v10660_v21 = vld [vmem:[%s10445_s25 + $0x78] sm:$0xff] }
  0x96   : > { %v2521_v33 = vpop.f32.mrf.mxu1  ;;  %v2851_v35 = vld [vmem:[#allocation2] sm:$0xff]  ;;  %v849_v36 = vpop.f32.mrf.mxu0 }
  0x97   : > { %v2983_v38 = vadd.f32 %v2851_v35, %v2521_v33  ;;  %1179 = vst.msk [vmem:[#allocation2 + $0x8] sm:$0xff] %vm1177_vm4, %v849_v36  ;;  %v5674_v35 = vsel %vm5651_vm2, %v5671_v54, %v5673_v24  ;;  %v1871_v54 = vshrl.u32 %v10579_v7, 16 }
  0x98   : > { %10033 = vmatmul.msk.bf16.gmra.mxu3 %vm635_vm1, %v5670_v32 }
  0x99   : > { %9371 = vmatmul.msk.bf16.gmra.mxu1 %vm635_vm1, %v1854_v34  ;;  %3115 = vst.msk [vmem:[#allocation2] sm:$0xff] %vm1177_vm4, %v2983_v38  ;;  %9702 = vmatmul.msk.bf16.gmra.mxu2 %vm635_vm1, %v3790_v37  ;;  %v1870_v37 = vsel %vm1778_vm3, %v1865_v26, %v1869_v27 }
  0x9b   : > { %v5995_v40 = vpop.f32.mrf.mxu3 }
  0x9c   : > { %v4457_v42 = vpop.f32.mrf.mxu2 }
  0x9e   : > { %v2523_v44 = vpop.f32.mrf.mxu1  ;;  %v2852_v48 = vld [vmem:[#allocation2 + $0x8] sm:$0xff]  ;;  %v852_v49 = vpop.f32.mrf.mxu0 }
  0x9f   : > { %v2984_v52 = vadd.f32 %v2852_v48, %v2523_v44  ;;  %1180 = vst.msk [vmem:[#allocation2 + $0x10] sm:$0xff] %vm1177_vm4, %v852_v49  ;;  %v10615_v44 = vld [vmem:[%s10445_s25 + $0x60] sm:$0xff] }
  0xa0   : > { %v4787_v53 = vld [vmem:[#allocation2] sm:$0xff] }
  0xa1   : > { %v4919_v55 = vadd.f32 %v4787_v53, %v4457_v42  ;;  %3116 = vst.msk [vmem:[#allocation2 + $0x8] sm:$0xff] %vm1177_vm4, %v2984_v52  ;;  %9041 = vmatmul.msk.bf16.gmra.mxu0 %vm635_vm1, %v10102_v45  ;;  %v10104_v53 = vld [vmem:[%s10445_s25 + $0x58] sm:$0xff] }
  0xa3   : > { %v5997_v60 = vpop.f32.mrf.mxu3  ;;  %5051 = vst.msk [vmem:[#allocation2] sm:$0xff] %vm1177_vm4, %v4919_v55  ;;  %v1875_v55 = vshll.u32 %v10615_v44, 16 }
  0xa4   : > { %v4459_v61 = vpop.f32.mrf.mxu2 }
  0xa6   : > { %v2526_v63 = vpop.f32.mrf.mxu1  ;;  %v2853_v1 = vld [vmem:[#allocation2 + $0x10] sm:$0xff]  ;;  %v854_v2 = vpop.f32.mrf.mxu0 }
  0xa7   : > { %v2985_v4 = vadd.f32 %v2853_v1, %v2526_v63  ;;  %1181 = vst.msk [vmem:[#allocation2 + $0x18] sm:$0xff] %vm1177_vm4, %v854_v2  ;;  %v1877_v1 = vrot.slane %v1875_v55, 1 }
  0xa8   : > { %10034 = vmatmul.msk.bf16.gmra.mxu3 %vm635_vm1, %v5672_v62  ;;  %v4788_v5 = vld [vmem:[#allocation2 + $0x8] sm:$0xff]  ;;  %v5675_v62 = vrot.slane %v10624_v51, 1 }
  0xa9   : > { %9372 = vmatmul.msk.bf16.gmra.mxu1 %vm635_vm1, %v1862_v0  ;;  %v4920_v6 = vadd.f32 %v4788_v5, %v4459_v61  ;;  %3117 = vst.msk [vmem:[#allocation2 + $0x10] sm:$0xff] %vm1177_vm4, %v2985_v4  ;;  %9703 = vmatmul.msk.bf16.gmra.mxu2 %vm635_vm1, %v3798_v3  ;;  %v1873_v0 = vor.u32 %v1871_v54, %v1869_v27  ;;  %v3813_v4 = vrot.slane %v3811_v59, 1  ;;  %v10105_v27 = vld [vmem:[%s10445_s25 + $0x60] sm:$0xff] }
  0xaa   : > { %v6325_v8 = vld [vmem:[#allocation2] sm:$0xff]  ;;  %v3809_v3 = vor.u32 %v3807_v58, %v3805_v30  ;;  %v10699_v58 = vld [vmem:[%s10445_s25 + $0x70] sm:$0xff] }
  0xab   : > { %v6000_v9 = vpop.f32.mrf.mxu3  ;;  %v6457_v11 = vadd.f32 %v6325_v8, %v5995_v40  ;;  %5052 = vst.msk [vmem:[#allocation2 + $0x8] sm:$0xff] %vm1177_vm4, %v4920_v6  ;;  %v3806_v40 = vsel %vm1778_vm3, %v3801_v29, %v3805_v30 }
  0xac   : > { %v4462_v12 = vpop.f32.mrf.mxu2 }
  0xad   : > { %6589 = vst.msk [vmem:[#allocation2] sm:$0xff] %vm1177_vm4, %v6457_v11  ;;  %v1878_v11 = vsel %vm1778_vm3, %v1873_v0, %v1877_v1 }
  0xae   : > { %v2528_v14 = vpop.f32.mrf.mxu1  ;;  %v2854_v18 = vld [vmem:[#allocation2 + $0x18] sm:$0xff]  ;;  %v857_v19 = vpop.f32.mrf.mxu0 }
  0xaf   : > { %v2986_v22 = vadd.f32 %v2854_v18, %v2528_v14  ;;  %1182 = vst.msk [vmem:[#allocation2 + $0x20] sm:$0xff] %vm1177_vm4, %v857_v19  ;;  %v10657_v18 = vld [vmem:[%s10445_s25 + $0x68] sm:$0xff] }
  0xb0   : > { %v4789_v23 = vld [vmem:[#allocation2 + $0x10] sm:$0xff]  ;;  %v1883_v29 = vshll.u32 %v10657_v18, 16 }
  0xb1   : > { %v4921_v25 = vadd.f32 %v4789_v23, %v4462_v12  ;;  %3118 = vst.msk [vmem:[#allocation2 + $0x18] sm:$0xff] %vm1177_vm4, %v2986_v22  ;;  %9042 = vmatmul.msk.bf16.gmra.mxu0 %vm635_vm1, %v10103_v15  ;;  %v3814_v15 = vsel %vm1778_vm3, %v3809_v3, %v3813_v4  ;;  %v10106_v3 = vld [vmem:[%s10445_s25 + $0x68] sm:$0xff] }
  0xb2   : > { %v6326_v28 = vld [vmem:[#allocation2 + $0x8] sm:$0xff] }
  0xb3   : > { %v6002_v31 = vpop.f32.mrf.mxu3  ;;  %v6458_v32 = vadd.f32 %v6326_v28, %v5997_v60  ;;  %5053 = vst.msk [vmem:[#allocation2 + $0x10] sm:$0xff] %vm1177_vm4, %v4921_v25  ;;  %v10666_v25 = vld [vmem:[%s10445_s25 + $0x78] sm:$0xff]  ;;  %v1879_v28 = vshrl.u32 %v10615_v44, 16 }
  0xb4   : > { %v4464_v33 = vpop.f32.mrf.mxu2  ;;  %v10599_v34 = vld [vmem:[#allocation2] sm:$0xff] }
  0xb5   : > { %6590 = vst.msk [vmem:[#allocation2 + $0x8] sm:$0xff] %vm1177_vm4, %v6458_v32  ;;  %6985 = vrot.lane.b32.xlu0 %v10599_v34, %s10397_s26  ;;  %v3815_v32 = vshrl.u32 %v10618_v47, 16 }
  0xb6   : > { %v2531_v36 = vpop.f32.mrf.mxu1  ;;  %v2855_v38 = vld [vmem:[#allocation2 + $0x20] sm:$0xff]  ;;  %v859_v39 = vpop.f32.mrf.mxu0 }
  0xb7   : > { %v2987_v41 = vadd.f32 %v2855_v38, %v2531_v36  ;;  %1183 = vst.msk [vmem:[#allocation2 + $0x28] sm:$0xff] %vm1177_vm4, %v859_v39  ;;  %v1881_v39 = vor.u32 %v1879_v28, %v1877_v1  ;;  %v10708_v1 = vld [vmem:[%s10445_s25 + $0x80] sm:$0xff] }
  0xb8   : > { %10035 = vmatmul.msk.bf16.gmra.mxu3 %vm635_vm1, %v5674_v35  ;;  %v4790_v42 = vld [vmem:[#allocation2 + $0x18] sm:$0xff] }
  0xb9   : > { %9373 = vmatmul.msk.bf16.gmra.mxu1 %vm635_vm1, %v1870_v37  ;;  %v4922_v43 = vadd.f32 %v4790_v42, %v4464_v33  ;;  %3119 = vst.msk [vmem:[#allocation2 + $0x20] sm:$0xff] %vm1177_vm4, %v2987_v41  ;;  %9704 = vmatmul.msk.bf16.gmra.mxu2 %vm635_vm1, %v3806_v40  ;;  %v3819_v33 = vshll.u32 %v10660_v21, 16  ;;  %v5677_v37 = vrot.slane %v10666_v25, 1  ;;  %v1885_v40 = vrot.slane %v1883_v29, 1 }
  0xba   : > { %v6327_v45 = vld [vmem:[#allocation2 + $0x10] sm:$0xff] }
  0xbb   : > { %v6005_v46 = vpop.f32.mrf.mxu3  ;;  %v6459_v48 = vadd.f32 %v6327_v45, %v6000_v9  ;;  %5054 = vst.msk [vmem:[#allocation2 + $0x18] sm:$0xff] %vm1177_vm4, %v4922_v43  ;;  %v5676_v9 = vsel %vm5651_vm2, %v5673_v24, %v5675_v62  ;;  %v3817_v43 = vor.u32 %v3815_v32, %v3813_v4  ;;  %v3821_v44 = vrot.slane %v3819_v33, 1 }
  0xbc   : > { %v4467_v49 = vpop.f32.mrf.mxu2  ;;  %v10621_v50 = vld [vmem:[#allocation2 + $0x8] sm:$0xff]  ;;  %v1887_v4 = vshrl.u32 %v10657_v18, 16 }
  0xbd   : > { %6591 = vst.msk [vmem:[#allocation2 + $0x10] sm:$0xff] %vm1177_vm4, %v6459_v48  ;;  %6987 = vrot.lane.b32.xlu0 %v10621_v50, %s10397_s26  ;;  %v5678_v48 = vsel %vm5651_vm2, %v5675_v62, %v5677_v37  ;;  %v3822_v55 = vsel %vm1778_vm3, %v3817_v43, %v3821_v44 }
  0xbe   : > { %v2533_v52 = vpop.f32.mrf.mxu1  ;;  %v2856_v56 = vld [vmem:[#allocation2 + $0x28] sm:$0xff]  ;;  %v862_v57 = vpop.f32.mrf.mxu0 }
  0xbf   : > { %v2988_v60 = vadd.f32 %v2856_v56, %v2533_v52  ;;  %1184 = vst.msk [vmem:[#allocation2 + $0x30] sm:$0xff] %vm1177_vm4, %v862_v57  ;;  %v1886_v52 = vsel %vm1778_vm3, %v1881_v39, %v1885_v40 }
  0xc0   : > { %v4791_v61 = vld [vmem:[#allocation2 + $0x20] sm:$0xff] }
  0xc1   : > { %v4923_v63 = vadd.f32 %v4791_v61, %v4467_v49  ;;  %3120 = vst.msk [vmem:[#allocation2 + $0x28] sm:$0xff] %vm1177_vm4, %v2988_v60  ;;  %9043 = vmatmul.msk.bf16.gmra.mxu0 %vm635_vm1, %v10104_v53  ;;  %v10702_v61 = vld [vmem:[%s10445_s25 + $0x80] sm:$0xff] }
  0xc2   : > { %v6328_v2 = vld [vmem:[#allocation2 + $0x18] sm:$0xff] }
  0xc3   : > { %v6007_v5 = vpop.f32.mrf.mxu3  ;;  %v6460_v6 = vadd.f32 %v6328_v2, %v6002_v31  ;;  %5055 = vst.msk [vmem:[#allocation2 + $0x20] sm:$0xff] %vm1177_vm4, %v4923_v63 }
  0xc4   : > { %v4469_v7 = vpop.f32.mrf.mxu2  ;;  %v10639_v8 = vld [vmem:[#allocation2 + $0x10] sm:$0xff] }
  0xc5   : > { %6592 = vst.msk [vmem:[#allocation2 + $0x18] sm:$0xff] %vm1177_vm4, %v6460_v6  ;;  %6989 = vrot.lane.b32.xlu1 %v10639_v8, %s10397_s26 }
  0xc6   : > { %v2536_v10 = vpop.f32.mrf.mxu1  ;;  %v2857_v12 = vld [vmem:[#allocation2 + $0x30] sm:$0xff]  ;;  %v864_v14 = vpop.f32.mrf.mxu0 }
  0xc7   : > { %v2989_v16 = vadd.f32 %v2857_v12, %v2536_v10  ;;  %1185 = vst.msk [vmem:[#allocation2 + $0x38] sm:$0xff] %vm1177_vm4, %v864_v14  ;;  %v3827_v10 = vshll.u32 %v10702_v61, 16  ;;  %v5679_v14 = vrot.slane %v10708_v1, 1 }
  0xc8   : > { %10036 = vmatmul.msk.bf16.gmra.mxu3 %vm635_vm1, %v5676_v9  ;;  %v4792_v13 = vld [vmem:[#allocation2 + $0x28] sm:$0xff]  ;;  %v3823_v9 = vshrl.u32 %v10660_v21, 16 }
  0xc9   : > { %9374 = vmatmul.msk.bf16.gmra.mxu1 %vm635_vm1, %v1878_v11  ;;  %v4924_v17 = vadd.f32 %v4792_v13, %v4469_v7  ;;  %3121 = vst.msk [vmem:[#allocation2 + $0x30] sm:$0xff] %vm1177_vm4, %v2989_v16  ;;  %9705 = vmatmul.msk.bf16.gmra.mxu2 %vm635_vm1, %v3814_v15  ;;  %v1889_v16 = vor.u32 %v1887_v4, %v1885_v40 }
  0xca   : > { %v6329_v19 = vld [vmem:[#allocation2 + $0x20] sm:$0xff]  ;;  %v3825_v18 = vor.u32 %v3823_v9, %v3821_v44  ;;  %v10107_v44 = vld [vmem:[%s10445_s25 + $0x70] sm:$0xff] }
  0xcb   : > { %v6010_v20 = vpop.f32.mrf.mxu3  ;;  %v6461_v22 = vadd.f32 %v6329_v19, %v6005_v46  ;;  %5056 = vst.msk [vmem:[#allocation2 + $0x28] sm:$0xff] %vm1177_vm4, %v4924_v17  ;;  %v3829_v19 = vrot.slane %v3827_v10, 1 }
  0xcc   : > { %v4472_v23 = vpop.f32.mrf.mxu2  ;;  %v10663_v24 = vld [vmem:[#allocation2 + $0x18] sm:$0xff] }
  0xcd   : > { %6593 = vst.msk [vmem:[#allocation2 + $0x20] sm:$0xff] %vm1177_vm4, %v6461_v22  ;;  %6991 = vrot.lane.b32.xlu1 %v10663_v24, %s10397_s26 }
  0xce   : > { %v2538_v26 = vpop.f32.mrf.mxu1  ;;  %v2858_v30 = vld [vmem:[#allocation2 + $0x38] sm:$0xff]  ;;  %v867_v31 = vpop.f32.mrf.mxu0 }
  0xcf   : > { %v2990_v35 = vadd.f32 %v2858_v30, %v2538_v26  ;;  %1186 = vst.msk [vmem:[#allocation2 + $0x40] sm:$0xff] %vm1177_vm4, %v867_v31  ;;  %v5680_v26 = vsel %vm5651_vm2, %v5677_v37, %v5679_v14  ;;  %v3830_v31 = vsel %vm1778_vm3, %v3825_v18, %v3829_v19 }
  0xd0   : > { %v4793_v36 = vld [vmem:[#allocation2 + $0x30] sm:$0xff] }
  0xd1   : > { %v4925_v38 = vadd.f32 %v4793_v36, %v4472_v23  ;;  %3122 = vst.msk [vmem:[#allocation2 + $0x38] sm:$0xff] %vm1177_vm4, %v2990_v35  ;;  %9044 = vmatmul.msk.bf16.gmra.mxu0 %vm635_vm1, %v10105_v27  ;;  %v10741_v35 = vld [vmem:[%s10445_s25 + $0x78] sm:$0xff] }
  0xd2   : > { %v6330_v41 = vld [vmem:[#allocation2 + $0x28] sm:$0xff] }
  0xd3   : > { %v6012_v42 = vpop.f32.mrf.mxu3  ;;  %v6462_v45 = vadd.f32 %v6330_v41, %v6007_v5  ;;  %5057 = vst.msk [vmem:[#allocation2 + $0x30] sm:$0xff] %vm1177_vm4, %v4925_v38  ;;  %v1891_v5 = vshll.u32 %v10699_v58, 16  ;;  %v10744_v38 = vld [vmem:[%s10445_s25 + $0x88] sm:$0xff] }
  0xd4   : > { %v4474_v46 = vpop.f32.mrf.mxu2  ;;  %v10681_v47 = vld [vmem:[#allocation2 + $0x20] sm:$0xff] }
  0xd5   : > { %6594 = vst.msk [vmem:[#allocation2 + $0x28] sm:$0xff] %vm1177_vm4, %v6462_v45  ;;  %6993 = vrot.lane.b32.xlu2 %v10681_v47, %s10397_s26  ;;  %v1893_v13 = vrot.slane %v1891_v5, 1  ;;  %v1895_v45 = vshrl.u32 %v10699_v58, 16 }
  0xd6   : > { %v2541_v49 = vpop.f32.mrf.mxu1  ;;  %v2859_v53 = vld [vmem:[#allocation2 + $0x40] sm:$0xff]  ;;  %v869_v54 = vpop.f32.mrf.mxu0 }
  0xd7   : > { %v2991_v56 = vadd.f32 %v2859_v53, %v2541_v49  ;;  %1187 = vst.msk [vmem:[#allocation2 + $0x48] sm:$0xff] %vm1177_vm4, %v869_v54  ;;  %v1894_v28 = vsel %vm1778_vm3, %v1889_v16, %v1893_v13  ;;  %v3835_v53 = vshll.u32 %v10744_v38, 16 }
  0xd8   : > { %10037 = vmatmul.msk.bf16.gmra.mxu3 %vm635_vm1, %v5678_v48  ;;  %v4794_v51 = vld [vmem:[#allocation2 + $0x38] sm:$0xff] }
  0xd9   : > { %9375 = vmatmul.msk.bf16.gmra.mxu1 %vm635_vm1, %v1886_v52  ;;  %v4926_v57 = vadd.f32 %v4794_v51, %v4474_v46  ;;  %3123 = vst.msk [vmem:[#allocation2 + $0x40] sm:$0xff] %vm1177_vm4, %v2991_v56  ;;  %9706 = vmatmul.msk.bf16.gmra.mxu2 %vm635_vm1, %v3822_v55  ;;  %v1899_v46 = vshll.u32 %v10741_v35, 16  ;;  %v3831_v52 = vshrl.u32 %v10702_v61, 16 }
  0xda   : > { %v6331_v59 = vld [vmem:[#allocation2 + $0x30] sm:$0xff] }
  0xdb   : > { %v6015_v60 = vpop.f32.mrf.mxu3  ;;  %v6463_v62 = vadd.f32 %v6331_v59, %v6010_v20  ;;  %5058 = vst.msk [vmem:[#allocation2 + $0x38] sm:$0xff] %vm1177_vm4, %v4926_v57  ;;  %v1897_v57 = vor.u32 %v1895_v45, %v1893_v13  ;;  %v1901_v58 = vrot.slane %v1899_v46, 1  ;;  %v10786_v13 = vld [vmem:[%s10445_s25 + $0x90] sm:$0xff] }
  0xdc   : > { %v4477_v63 = vpop.f32.mrf.mxu2  ;;  %v10705_v0 = vld [vmem:[#allocation2 + $0x28] sm:$0xff] }
  0xdd   : > { %6595 = vst.msk [vmem:[#allocation2 + $0x30] sm:$0xff] %vm1177_vm4, %v6463_v62  ;;  %6995 = vrot.lane.b32.xlu2 %v10705_v0, %s10397_s26  ;;  %v3837_v62 = vrot.slane %v3835_v53, 1 }
  0xde   : > { %v2543_v2 = vpop.f32.mrf.mxu1  ;;  %v2860_v6 = vld [vmem:[#allocation2 + $0x48] sm:$0xff]  ;;  %v872_v7 = vpop.f32.mrf.mxu0 }
  0xdf   : > { %v2992_v11 = vadd.f32 %v2860_v6, %v2543_v2  ;;  %1188 = vst.msk [vmem:[#allocation2 + $0x50] sm:$0xff] %vm1177_vm4, %v872_v7  ;;  %v1902_v6 = vsel %vm1778_vm3, %v1897_v57, %v1901_v58  ;;  %v10825_v57 = vld [vmem:[%s10445_s25 + $0x88] sm:$0xff] }
  0xe0   : > { %v4795_v12 = vld [vmem:[#allocation2 + $0x40] sm:$0xff] }
  0xe1   : > { %3124 = vst.msk [vmem:[#allocation2 + $0x48] sm:$0xff] %vm1177_vm4, %v2992_v11  ;;  %v4927_v15 = vadd.f32 %v4795_v12, %v4477_v63  ;;  %9045 = vmatmul.msk.bf16.gmra.mxu0 %vm635_vm1, %v10106_v3 }
  0xe2   : > { %v6332_v17 = vld [vmem:[#allocation2 + $0x38] sm:$0xff] }
  0xe3   : > { %v6017_v20 = vpop.f32.mrf.mxu3  ;;  %v6464_v21 = vadd.f32 %v6332_v17, %v6012_v42  ;;  %5059 = vst.msk [vmem:[#allocation2 + $0x40] sm:$0xff] %vm1177_vm4, %v4927_v15  ;;  %v10750_v42 = vld [vmem:[%s10445_s25 + $0x88] sm:$0xff] }
  0xe4   : > { %v4479_v22 = vpop.f32.mrf.mxu2  ;;  %v10723_v23 = vld [vmem:[#allocation2 + $0x30] sm:$0xff]  ;;  %v5681_v56 = vrot.slane %v10750_v42, 1 }
  0xe5   : > { %6596 = vst.msk [vmem:[#allocation2 + $0x38] sm:$0xff] %vm1177_vm4, %v6464_v21  ;;  %6997 = vrot.lane.b32.xlu0 %v10723_v23, %s10397_s26 }
  0xe6   : > { %v2546_v27 = vpop.f32.mrf.mxu1  ;;  %v2861_v29 = vld [vmem:[#allocation2 + $0x50] sm:$0xff]  ;;  %v874_v30 = vpop.f32.mrf.mxu0  ;;  %v5682_v4 = vsel %vm5651_vm2, %v5679_v14, %v5681_v56  ;;  %v10783_v14 = vld [vmem:[%s10445_s25 + $0x80] sm:$0xff] }
  0xe7   : > { %v2993_v32 = vadd.f32 %v2861_v29, %v2546_v27  ;;  %1189 = vst.msk [vmem:[#allocation2 + $0x58] sm:$0xff] %vm1177_vm4, %v874_v30  ;;  %v1907_v27 = vshll.u32 %v10783_v14, 16  ;;  %v3839_v30 = vshrl.u32 %v10744_v38, 16 }
  0xe8   : > { %10038 = vmatmul.msk.bf16.gmra.mxu3 %vm635_vm1, %v5680_v26  ;;  %v4796_v25 = vld [vmem:[#allocation2 + $0x48] sm:$0xff]  ;;  %v1903_v26 = vshrl.u32 %v10741_v35, 16 }
  0xe9   : > { %9376 = vmatmul.msk.bf16.gmra.mxu1 %vm635_vm1, %v1894_v28  ;;  %3125 = vst.msk [vmem:[#allocation2 + $0x50] sm:$0xff] %vm1177_vm4, %v2993_v32  ;;  %v4928_v33 = vadd.f32 %v4796_v25, %v4479_v22  ;;  %9707 = vmatmul.msk.bf16.gmra.mxu2 %vm635_vm1, %v3830_v31  ;;  %v10108_v22 = vld [vmem:[%s10445_s25 + $0x78] sm:$0xff]  ;;  %v3843_v31 = vshll.u32 %v10786_v13, 16 }
  0xea   : > { %v6333_v36 = vld [vmem:[#allocation2 + $0x40] sm:$0xff]  ;;  %v1905_v35 = vor.u32 %v1903_v26, %v1901_v58 }
  0xeb   : > { %v6020_v37 = vpop.f32.mrf.mxu3  ;;  %5060 = vst.msk [vmem:[#allocation2 + $0x48] sm:$0xff] %vm1177_vm4, %v4928_v33  ;;  %v6465_v39 = vadd.f32 %v6333_v36, %v6015_v60  ;;  %v3833_v60 = vor.u32 %v3831_v52, %v3829_v19 }
  0xec   : > { %v4482_v40 = vpop.f32.mrf.mxu2  ;;  %v10747_v41 = vld [vmem:[#allocation2 + $0x38] sm:$0xff] }
  0xed   : > { %6597 = vst.msk [vmem:[#allocation2 + $0x40] sm:$0xff] %vm1177_vm4, %v6465_v39  ;;  %6999 = vrot.lane.b32.xlu1 %v10747_v41, %s10397_s26  ;;  %v3838_v10 = vsel %vm1778_vm3, %v3833_v60, %v3837_v62  ;;  %v10828_v60 = vld [vmem:[%s10445_s25 + $0x98] sm:$0xff] }
  0xee   : > { %v2548_v43 = vpop.f32.mrf.mxu1  ;;  %v2862_v48 = vld [vmem:[#allocation2 + $0x58] sm:$0xff]  ;;  %v877_v49 = vpop.f32.mrf.mxu0 }
  0xef   : > { %v2994_v54 = vadd.f32 %v2862_v48, %v2548_v43  ;;  %1190 = vst.msk [vmem:[#allocation2 + $0x60] sm:$0xff] %vm1177_vm4, %v877_v49  ;;  %v3845_v43 = vrot.slane %v3843_v31, 1 }
  0xf0   : > { %v4797_v55 = vld [vmem:[#allocation2 + $0x50] sm:$0xff] }
  0xf1   : > { %3126 = vst.msk [vmem:[#allocation2 + $0x58] sm:$0xff] %vm1177_vm4, %v2994_v54  ;;  %v4929_v51 = vadd.f32 %v4797_v55, %v4482_v40  ;;  %9046 = vmatmul.msk.bf16.gmra.mxu0 %vm635_vm1, %v10107_v44  ;;  %v3841_v40 = vor.u32 %v3839_v30, %v3837_v62 }
  0xf2   : > { %v6334_v59 = vld [vmem:[#allocation2 + $0x48] sm:$0xff] }
  0xf3   : > { %v6022_v63 = vpop.f32.mrf.mxu3  ;;  %5061 = vst.msk [vmem:[#allocation2 + $0x50] sm:$0xff] %vm1177_vm4, %v4929_v51  ;;  %v6466_v61 = vadd.f32 %v6334_v59, %v6017_v20  ;;  %v10792_v20 = vld [vmem:[%s10445_s25 + $0x90] sm:$0xff]  ;;  %v3846_v55 = vsel %vm1778_vm3, %v3841_v40, %v3845_v43 }
  0xf4   : > { %v4484_v2 = vpop.f32.mrf.mxu2  ;;  %v10765_v3 = vld [vmem:[#allocation2 + $0x40] sm:$0xff]  ;;  %v5683_v33 = vrot.slane %v10792_v20, 1 }
  0xf5   : > { %6598 = vst.msk [vmem:[#allocation2 + $0x48] sm:$0xff] %vm1177_vm4, %v6466_v61  ;;  %7001 = vrot.lane.b32.xlu2 %v10765_v3, %s10397_s26 }
  0xf6   : > { %v2551_v5 = vpop.f32.mrf.mxu1  ;;  %v2863_v7 = vld [vmem:[#allocation2 + $0x60] sm:$0xff]  ;;  %v879_v9 = vpop.f32.mrf.mxu0  ;;  %v5684_v48 = vsel %vm5651_vm2, %v5681_v56, %v5683_v33 }
  0xf7   : > { %v2995_v11 = vadd.f32 %v2863_v7, %v2551_v5  ;;  %1191 = vst.msk [vmem:[#allocation2 + $0x68] sm:$0xff] %vm1177_vm4, %v879_v9  ;;  %v10109_v5 = vld [vmem:[%s10445_s25 + $0x80] sm:$0xff]  ;;  %v1915_v7 = vshll.u32 %v10825_v57, 16 }
  0xf8   : > { %10039 = vmatmul.msk.bf16.gmra.mxu3 %vm635_vm1, %v5682_v4  ;;  %v4798_v1 = vld [vmem:[#allocation2 + $0x58] sm:$0xff] }
  0xf9   : > { %9377 = vmatmul.msk.bf16.gmra.mxu1 %vm635_vm1, %v1902_v6  ;;  %3127 = vst.msk [vmem:[#allocation2 + $0x60] sm:$0xff] %vm1177_vm4, %v2995_v11  ;;  %v4930_v12 = vadd.f32 %v4798_v1, %v4484_v2  ;;  %9708 = vmatmul.msk.bf16.gmra.mxu2 %vm635_vm1, %v3838_v10  ;;  %v10834_v2 = vld [vmem:[%s10445_s25 + $0x98] sm:$0xff]  ;;  %v1911_v6 = vshrl.u32 %v10783_v14, 16  ;;  %v3847_v11 = vshrl.u32 %v10786_v13, 16  ;;  %v3851_v1 = vshll.u32 %v10828_v60, 16 }
  0xfa   : > { %v6335_v15 = vld [vmem:[#allocation2 + $0x50] sm:$0xff] }
  0xfb   : > { %v6025_v16 = vpop.f32.mrf.mxu3  ;;  %5062 = vst.msk [vmem:[#allocation2 + $0x58] sm:$0xff] %vm1177_vm4, %v4930_v12  ;;  %v6467_v17 = vadd.f32 %v6335_v15, %v6020_v37  ;;  %v1909_v37 = vrot.slane %v1907_v27, 1  ;;  %v3853_v26 = vrot.slane %v3851_v1, 1 }
  0xfc   : > { %v4487_v18 = vpop.f32.mrf.mxu2  ;;  %v10789_v19 = vld [vmem:[#allocation2 + $0x48] sm:$0xff] }
  0xfd   : > { %6599 = vst.msk [vmem:[#allocation2 + $0x50] sm:$0xff] %vm1177_vm4, %v6467_v17  ;;  %7003 = vrot.lane.b32.xlu0 %v10789_v19, %s10397_s26  ;;  %v1910_v52 = vsel %vm1778_vm3, %v1905_v35, %v1909_v37  ;;  %v1913_v14 = vor.u32 %v1911_v6, %v1909_v37 }
  0xfe   : > { %v2553_v21 = vpop.f32.mrf.mxu1  ;;  %v2864_v28 = vld [vmem:[#allocation2 + $0x68] sm:$0xff]  ;;  %v882_v29 = vpop.f32.mrf.mxu0 }
  0xff   : > { %v2996_v32 = vadd.f32 %v2864_v28, %v2553_v21  ;;  %1192 = vst.msk [vmem:[#allocation2 + $0x70] sm:$0xff] %vm1177_vm4, %v882_v29 }
 0x100   : > { %v4799_v25 = vld [vmem:[#allocation2 + $0x60] sm:$0xff] }
 0x101   : > { %3128 = vst.msk [vmem:[#allocation2 + $0x68] sm:$0xff] %vm1177_vm4, %v2996_v32  ;;  %v4931_v36 = vadd.f32 %v4799_v25, %v4487_v18  ;;  %9047 = vmatmul.msk.bf16.gmra.mxu0 %vm635_vm1, %v10108_v22  ;;  %v1917_v18 = vrot.slane %v1915_v7, 1  ;;  %v3849_v22 = vor.u32 %v3847_v11, %v3845_v43 }
 0x102   : > { %v6336_v39 = vld [vmem:[#allocation2 + $0x58] sm:$0xff] }
 0x103   : > { %v6027_v44 = vpop.f32.mrf.mxu3  ;;  %5063 = vst.msk [vmem:[#allocation2 + $0x60] sm:$0xff] %vm1177_vm4, %v4931_v36  ;;  %v6468_v38 = vadd.f32 %v6336_v39, %v6022_v63  ;;  %v1918_v32 = vsel %vm1778_vm3, %v1913_v14, %v1917_v18  ;;  %v3854_v35 = vsel %vm1778_vm3, %v3849_v22, %v3853_v26  ;;  %v10867_v39 = vld [vmem:[%s10445_s25 + $0x90] sm:$0xff] }
 0x104   : > { %v4489_v45 = vpop.f32.mrf.mxu2  ;;  %v10807_v46 = vld [vmem:[#allocation2 + $0x50] sm:$0xff] }
 0x105   : > { %6600 = vst.msk [vmem:[#allocation2 + $0x58] sm:$0xff] %vm1177_vm4, %v6468_v38  ;;  %7005 = vrot.lane.b32.xlu1 %v10807_v46, %s10397_s26 }
 0x106   : > { %v2556_v49 = vpop.f32.mrf.mxu1  ;;  %v2865_v53 = vld [vmem:[#allocation2 + $0x70] sm:$0xff]  ;;  %v884_v54 = vpop.f32.mrf.mxu0 }
 0x107   : > { %v2997_v51 = vadd.f32 %v2865_v53, %v2556_v49  ;;  %1193 = vst.msk [vmem:[#allocation2 + $0x78] sm:$0xff] %vm1177_vm4, %v884_v54  ;;  %v10876_v49 = vld [vmem:[%s10445_s25 + $0xa0] sm:$0xff]  ;;  %v10110_v53 = vld [vmem:[%s10445_s25 + $0x88] sm:$0xff]  ;;  %v1919_v54 = vshrl.u32 %v10825_v57, 16 }
 0x108   : > { %10040 = vmatmul.msk.bf16.gmra.mxu3 %vm635_vm1, %v5684_v48  ;;  %v4800_v42 = vld [vmem:[#allocation2 + $0x68] sm:$0xff] }
 0x109   : > { %9378 = vmatmul.msk.bf16.gmra.mxu1 %vm635_vm1, %v1910_v52  ;;  %3129 = vst.msk [vmem:[#allocation2 + $0x70] sm:$0xff] %vm1177_vm4, %v2997_v51  ;;  %v4932_v56 = vadd.f32 %v4800_v42, %v4489_v45  ;;  %9709 = vmatmul.msk.bf16.gmra.mxu2 %vm635_vm1, %v3846_v55  ;;  %v1923_v55 = vshll.u32 %v10867_v39, 16  ;;  %v1921_v57 = vor.u32 %v1919_v54, %v1917_v18 }
 0x10a   : > { %v6337_v58 = vld [vmem:[#allocation2 + $0x60] sm:$0xff] }
 0x10b   : > { %v6030_v59 = vpop.f32.mrf.mxu3  ;;  %5064 = vst.msk [vmem:[#allocation2 + $0x68] sm:$0xff] %vm1177_vm4, %v4932_v56  ;;  %v6469_v62 = vadd.f32 %v6337_v58, %v6025_v16  ;;  %v5685_v16 = vrot.slane %v10834_v2, 1  ;;  %v3855_v56 = vshrl.u32 %v10828_v60, 16 }
 0x10c   : > { %v4492_v63 = vpop.f32.mrf.mxu2  ;;  %v10831_v61 = vld [vmem:[#allocation2 + $0x58] sm:$0xff] }
 0x10d   : > { %6601 = vst.msk [vmem:[#allocation2 + $0x60] sm:$0xff] %vm1177_vm4, %v6469_v62  ;;  %7007 = vrot.lane.b32.xlu2 %v10831_v61, %s10397_s26  ;;  %v5686_v30 = vsel %vm5651_vm2, %v5683_v33, %v5685_v16  ;;  %v3857_v7 = vor.u32 %v3855_v56, %v3853_v26 }
 0x10e   : > { %v2558_v4 = vpop.f32.mrf.mxu1  ;;  %v2866_v9 = vld [vmem:[#allocation2 + $0x78] sm:$0xff]  ;;  %v887_v10 = vpop.f32.mrf.mxu0 }
 0x10f   : > { %v2998_v12 = vadd.f32 %v2866_v9, %v2558_v4  ;;  %1194 = vst.msk [vmem:[#allocation2 + $0x80] sm:$0xff] %vm1177_vm4, %v887_v10 }
 0x110   : > { %v4801_v15 = vld [vmem:[#allocation2 + $0x70] sm:$0xff] }
 0x111   : > { %3130 = vst.msk [vmem:[#allocation2 + $0x78] sm:$0xff] %vm1177_vm4, %v2998_v12  ;;  %v4933_v17 = vadd.f32 %v4801_v15, %v4492_v63  ;;  %9048 = vmatmul.msk.bf16.gmra.mxu0 %vm635_vm1, %v10109_v5  ;;  %v5687_v63 = vrot.slane %v10876_v49, 1  ;;  %v1925_v5 = vrot.slane %v1923_v55, 1 }
 0x112   : > { %v6338_v21 = vld [vmem:[#allocation2 + $0x68] sm:$0xff] }
 0x113   : > { %v6032_v27 = vpop.f32.mrf.mxu3  ;;  %5065 = vst.msk [vmem:[#allocation2 + $0x70] sm:$0xff] %vm1177_vm4, %v4933_v17  ;;  %v6470_v13 = vadd.f32 %v6338_v21, %v6027_v44  ;;  %v10870_v44 = vld [vmem:[%s10445_s25 + $0xa0] sm:$0xff]  ;;  %v5688_v12 = vsel %vm5651_vm2, %v5685_v16, %v5687_v63  ;;  %v1926_v17 = vsel %vm1778_vm3, %v1921_v57, %v1925_v5 }
 0x114   : > { %v4494_v28 = vpop.f32.mrf.mxu2  ;;  %v10849_v29 = vld [vmem:[#allocation2 + $0x60] sm:$0xff]  ;;  %v3859_v58 = vshll.u32 %v10870_v44, 16 }
 0x115   : > { %6602 = vst.msk [vmem:[#allocation2 + $0x68] sm:$0xff] %vm1177_vm4, %v6470_v13  ;;  %7009 = vrot.lane.b32.xlu0 %v10849_v29, %s10397_s26  ;;  %v10912_v13 = vld [vmem:[%s10445_s25 + $0x98] sm:$0xff] }
 0x116   : > { %v2561_v31 = vpop.f32.mrf.mxu1  ;;  %v2867_v25 = vld [vmem:[#allocation2 + $0x80] sm:$0xff]  ;;  %v889_v36 = vpop.f32.mrf.mxu0  ;;  %v3861_v9 = vrot.slane %v3859_v58, 1 }
 0x117   : > { %v2999_v37 = vadd.f32 %v2867_v25, %v2561_v31  ;;  %1195 = vst.msk [vmem:[#allocation2 + $0x88] sm:$0xff] %vm1177_vm4, %v889_v36  ;;  %v10917_v31 = vld [vmem:[%s10445_s25 + $0xa8] sm:$0xff] }
 0x118   : > { %10041 = vmatmul.msk.bf16.gmra.mxu3 %vm635_vm1, %v5686_v30  ;;  %v4802_v20 = vld [vmem:[#allocation2 + $0x78] sm:$0xff]  ;;  %v3862_v21 = vsel %vm1778_vm3, %v3857_v7, %v3861_v9  ;;  %v10921_v25 = vld [vmem:[%s10445_s25 + $0xa8] sm:$0xff] }
 0x119   : > { %9379 = vmatmul.msk.bf16.gmra.mxu1 %vm635_vm1, %v1918_v32  ;;  %3131 = vst.msk [vmem:[#allocation2 + $0x80] sm:$0xff] %vm1177_vm4, %v2999_v37  ;;  %v4934_v33 = vadd.f32 %v4802_v20, %v4494_v28  ;;  %9710 = vmatmul.msk.bf16.gmra.mxu2 %vm635_vm1, %v3854_v35  ;;  %v10111_v35 = vld [vmem:[%s10445_s25 + $0x90] sm:$0xff]  ;;  %v1927_v37 = vshrl.u32 %v10867_v39, 16  ;;  %v1931_v20 = vshll.u32 %v10912_v13, 16  ;;  %v5689_v55 = vrot.slane %v10921_v25, 1 }
 0x11a   : > { %v6339_v40 = vld [vmem:[#allocation2 + $0x70] sm:$0xff] }
 0x11b   : > { %v6035_v43 = vpop.f32.mrf.mxu3  ;;  %5066 = vst.msk [vmem:[#allocation2 + $0x78] sm:$0xff] %vm1177_vm4, %v4934_v33  ;;  %v6471_v38 = vadd.f32 %v6339_v40, %v6030_v59  ;;  %v5690_v57 = vsel %vm5651_vm2, %v5687_v63, %v5689_v55 }
 0x11c   : > { %v4497_v45 = vpop.f32.mrf.mxu2  ;;  %v10873_v48 = vld [vmem:[#allocation2 + $0x68] sm:$0xff] }
 0x11d   : > { %6603 = vst.msk [vmem:[#allocation2 + $0x70] sm:$0xff] %vm1177_vm4, %v6471_v38  ;;  %7011 = vrot.lane.b32.xlu1 %v10873_v48, %s10397_s26  ;;  %v3863_v38 = vshrl.u32 %v10870_v44, 16  ;;  %v1929_v44 = vor.u32 %v1927_v37, %v1925_v5  ;;  %v3871_v37 = vshrl.u32 %v10917_v31, 16 }
 0x11e   : > { %v2563_v52 = vpop.f32.mrf.mxu1  ;;  %v2868_v51 = vld [vmem:[#allocation2 + $0x88] sm:$0xff]  ;;  %v892_v42 = vpop.f32.mrf.mxu0 }
 0x11f   : > { %v3000_v59 = vadd.f32 %v2868_v51, %v2563_v52  ;;  %1196 = vst.msk [vmem:[#allocation2 + $0x90] sm:$0xff] %vm1177_vm4, %v892_v42  ;;  %v1933_v42 = vrot.slane %v1931_v20, 1 }
 0x120   : > { %v4803_v62 = vld [vmem:[#allocation2 + $0x80] sm:$0xff] }
 0x121   : > { %3132 = vst.msk [vmem:[#allocation2 + $0x88] sm:$0xff] %vm1177_vm4, %v3000_v59  ;;  %v4935_v4 = vadd.f32 %v4803_v62, %v4497_v45  ;;  %9049 = vmatmul.msk.bf16.gmra.mxu0 %vm635_vm1, %v10110_v53  ;;  %v3867_v45 = vshll.u32 %v10917_v31, 16 }
 0x122   : > { %v6340_v6 = vld [vmem:[#allocation2 + $0x78] sm:$0xff] }
 0x123   : > { %v6037_v10 = vpop.f32.mrf.mxu3  ;;  %5067 = vst.msk [vmem:[#allocation2 + $0x80] sm:$0xff] %vm1177_vm4, %v4935_v4  ;;  %v6472_v60 = vadd.f32 %v6340_v6, %v6032_v27  ;;  %v3869_v58 = vrot.slane %v3867_v45, 1  ;;  %v1934_v6 = vsel %vm1778_vm3, %v1929_v44, %v1933_v42 }
 0x124   : > { %v4499_v11 = vpop.f32.mrf.mxu2  ;;  %v10891_v1 = vld [vmem:[#allocation2 + $0x70] sm:$0xff] }
 0x125   : > { %6604 = vst.msk [vmem:[#allocation2 + $0x78] sm:$0xff] %vm1177_vm4, %v6472_v60  ;;  %7013 = vrot.lane.b32.xlu2 %v10891_v1, %s10397_s26 }
 0x126   : > { %v2566_v15 = vpop.f32.mrf.mxu1  ;;  %v2869_v14 = vld [vmem:[#allocation2 + $0x90] sm:$0xff]  ;;  %v894_v18 = vpop.f32.mrf.mxu0 }
 0x127   : > { %v3001_v22 = vadd.f32 %v2869_v14, %v2566_v15  ;;  %1197 = vst.msk [vmem:[#allocation2 + $0x98] sm:$0xff] %vm1177_vm4, %v894_v18  ;;  %v6986_v2 = vpop.permute.xlu0 %6985 }
 0x128   : > { %10042 = vmatmul.msk.bf16.gmra.mxu3 %vm635_vm1, %v5688_v12  ;;  %v4804_v16 = vld [vmem:[#allocation2 + $0x88] sm:$0xff]  ;;  %v10906_v26 = vmax.f32 %v10599_v34, %v6986_v2 }
 0x129   : > { %9380 = vmatmul.msk.bf16.gmra.mxu1 %vm635_vm1, %v1926_v17  ;;  %3133 = vst.msk [vmem:[#allocation2 + $0x90] sm:$0xff] %vm1177_vm4, %v3001_v22  ;;  %v4936_v27 = vadd.f32 %v4804_v16, %v4499_v11  ;;  %9711 = vmatmul.msk.bf16.gmra.mxu2 %vm635_vm1, %v3862_v21  ;;  %v10962_v17 = vld [vmem:[%s10445_s25 + $0xa0] sm:$0xff]  ;;  %v10975_v16 = vld [vmem:[%s10445_s25 + $0xb0] sm:$0xff] }
 0x12a   : > { %v6341_v28 = vld [vmem:[#allocation2 + $0x80] sm:$0xff]  ;;  %7645 = vrot.lane.b32.xlu0 %v10906_v26, %s10398_s27 }
 0x12b   : > { %v6040_v30 = vpop.f32.mrf.mxu3  ;;  %5068 = vst.msk [vmem:[#allocation2 + $0x88] sm:$0xff] %vm1177_vm4, %v4936_v27  ;;  %v6473_v34 = vadd.f32 %v6341_v28, %v6035_v43  ;;  %v10112_v28 = vld [vmem:[%s10445_s25 + $0x98] sm:$0xff] }
 0x12c   : > { %v4502_v32 = vpop.f32.mrf.mxu2  ;;  %v10936_v51 = vld [vmem:[#allocation2 + $0x78] sm:$0xff] }
 0x12d   : > { %6605 = vst.msk [vmem:[#allocation2 + $0x80] sm:$0xff] %vm1177_vm4, %v6473_v34  ;;  %v1935_v34 = vshrl.u32 %v10912_v13, 16  ;;  %v5691_v13 = vrot.slane %v10975_v16, 1 }
 0x12e   : > { %v2568_v36 = vpop.f32.mrf.mxu1  ;;  %v2870_v33 = vld [vmem:[#allocation2 + $0x98] sm:$0xff]  ;;  %v897_v40 = vpop.f32.mrf.mxu0 }
 0x12f   : > { %v3002_v52 = vadd.f32 %v2870_v33, %v2568_v36  ;;  %1198 = vst.msk [vmem:[#allocation2 + $0xa0] sm:$0xff] %vm1177_vm4, %v897_v40  ;;  %v6988_v43 = vpop.permute.xlu0 %6987  ;;  %v6994_v22 = vpop.permute.xlu2 %6993  ;;  %v1937_v31 = vor.u32 %v1935_v34, %v1933_v42 }
 0x130   : > { %v4805_v53 = vld [vmem:[#allocation2 + $0x90] sm:$0xff]  ;;  %v10931_v54 = vmax.f32 %v10621_v50, %v6988_v43  ;;  %v3865_v50 = vor.u32 %v3863_v38, %v3861_v9  ;;  %v10985_v40 = vmax.f32 %v10681_v47, %v6994_v22 }
 0x131   : > { %3134 = vst.msk [vmem:[#allocation2 + $0x98] sm:$0xff] %vm1177_vm4, %v3002_v52  ;;  %v4937_v39 = vadd.f32 %v4805_v53, %v4502_v32  ;;  %9050 = vmatmul.msk.bf16.gmra.mxu0 %vm635_vm1, %v10111_v35  ;;  %v1939_v32 = vshll.u32 %v10962_v17, 16 }
 0x132   : > { %v6342_v56 = vld [vmem:[#allocation2 + $0x88] sm:$0xff]  ;;  %7647 = vrot.lane.b32.xlu1 %v10931_v54, %s10398_s27  ;;  %7015 = vrot.lane.b32.xlu0 %v10936_v51, %s10397_s26  ;;  %v3870_v60 = vsel %vm1778_vm3, %v3865_v50, %v3869_v58  ;;  %v5692_v50 = vsel %vm5651_vm2, %v5689_v55, %v5691_v13 }
 0x133   : > { %v6042_v59 = vpop.f32.mrf.mxu3  ;;  %5069 = vst.msk [vmem:[#allocation2 + $0x90] sm:$0xff] %vm1177_vm4, %v4937_v39  ;;  %v6474_v62 = vadd.f32 %v6342_v56, %v6037_v10  ;;  %v1941_v43 = vrot.slane %v1939_v32, 1 }
 0x134   : > { %v4504_v4 = vpop.f32.mrf.mxu2  ;;  %v10952_v12 = vld [vmem:[#allocation2 + $0x80] sm:$0xff] }
 0x135   : > { %6606 = vst.msk [vmem:[#allocation2 + $0x88] sm:$0xff] %vm1177_vm4, %v6474_v62 }
 0x136   : > { %v2571_v5 = vpop.f32.mrf.mxu1  ;;  %v2871_v7 = vld [vmem:[#allocation2 + $0xa0] sm:$0xff]  ;;  %v899_v9 = vpop.f32.mrf.mxu0 }
 0x137   : > { %v3003_v11 = vadd.f32 %v2871_v7, %v2571_v5  ;;  %1199 = vst.msk [vmem:[#allocation2 + $0xa8] sm:$0xff] %vm1177_vm4, %v899_v9  ;;  %v6990_v10 = vpop.permute.xlu1 %6989 }
 0x138   : > { %10043 = vmatmul.msk.bf16.gmra.mxu3 %vm635_vm1, %v5690_v57  ;;  %v4806_v49 = vld [vmem:[#allocation2 + $0x98] sm:$0xff]  ;;  %v10956_v63 = vmax.f32 %v10639_v8, %v6990_v10  ;;  %v10971_v8 = vld [vmem:[%s10445_s25 + $0xb0] sm:$0xff] }
 0x139   : > { %9381 = vmatmul.msk.bf16.gmra.mxu1 %vm635_vm1, %v1934_v6  ;;  %3135 = vst.msk [vmem:[#allocation2 + $0xa0] sm:$0xff] %vm1177_vm4, %v3003_v11  ;;  %v4938_v15 = vadd.f32 %v4806_v49, %v4504_v4  ;;  %9712 = vmatmul.msk.bf16.gmra.mxu2 %vm635_vm1, %v3870_v60  ;;  %v3875_v20 = vshll.u32 %v10971_v8, 16  ;;  %v6996_v4 = vpop.permute.xlu2 %6995  ;;  %v11021_v60 = vld [vmem:[%s10445_s25 + $0xa8] sm:$0xff]  ;;  %v11026_v49 = vld [vmem:[%s10445_s25 + $0xb8] sm:$0xff]  ;;  %v3879_v32 = vshrl.u32 %v10971_v8, 16 }
 0x13a   : > { %v6343_v14 = vld [vmem:[#allocation2 + $0x90] sm:$0xff]  ;;  %7649 = vrot.lane.b32.xlu2 %v10956_v63, %s10398_s27  ;;  %7017 = vrot.lane.b32.xlu1 %v10952_v12, %s10397_s26  ;;  %v11016_v55 = vmax.f32 %v10705_v0, %v6996_v4 }
 0x13b   : > { %v10968_v18 = vpop.f32.mrf.mxu3  ;;  %5070 = vst.msk [vmem:[#allocation2 + $0x98] sm:$0xff] %vm1177_vm4, %v4938_v15  ;;  %v6475_v21 = vadd.f32 %v6343_v14, %v6040_v30  ;;  %v3877_v39 = vrot.slane %v3875_v20, 1 }
 0x13c   : > { %v4507_v2 = vpop.f32.mrf.mxu2  ;;  %v10997_v47 = vld [vmem:[#allocation2 + $0x88] sm:$0xff] }
 0x13d   : > { %6607 = vst.msk [vmem:[#allocation2 + $0x90] sm:$0xff] %vm1177_vm4, %v6475_v21  ;;  %v11035_v21 = vld [vmem:[%s10445_s25 + $0xb8] sm:$0xff] }
 0x13e   : > { %v2573_v27 = vpop.f32.mrf.mxu1  ;;  %v2872_v36 = vld [vmem:[#allocation2 + $0xa8] sm:$0xff]  ;;  %v902_v35 = vpop.f32.mrf.mxu0  ;;  %v5693_v20 = vrot.slane %v11035_v21, 1 }
 0x13f   : > { %v3004_v33 = vadd.f32 %v2872_v36, %v2573_v27  ;;  %1200 = vst.msk [vmem:[#allocation2 + $0xb0] sm:$0xff] %vm1177_vm4, %v902_v35  ;;  %v6992_v30 = vpop.permute.xlu1 %6991  ;;  %v1943_v27 = vshrl.u32 %v10962_v17, 16  ;;  %v3883_v36 = vshll.u32 %v11026_v49, 16 }
 0x140   : > { %v4807_v38 = vld [vmem:[#allocation2 + $0xa0] sm:$0xff]  ;;  %v10988_v45 = vmax.f32 %v10663_v24, %v6992_v30  ;;  %v3873_v24 = vor.u32 %v3871_v37, %v3869_v58  ;;  %v1942_v58 = vsel %vm1778_vm3, %v1937_v31, %v1941_v43 }
 0x141   : > { %3136 = vst.msk [vmem:[#allocation2 + $0xa8] sm:$0xff] %vm1177_vm4, %v3004_v33  ;;  %v4939_v52 = vadd.f32 %v4807_v38, %v4507_v2  ;;  %9051 = vmatmul.msk.bf16.gmra.mxu0 %vm635_vm1, %v10112_v28  ;;  %v10113_v2 = vld [vmem:[%s10445_s25 + $0xa0] sm:$0xff]  ;;  %v1947_v28 = vshll.u32 %v11021_v60, 16  ;;  %v1945_v17 = vor.u32 %v1943_v27, %v1941_v43  ;;  %v3885_v31 = vrot.slane %v3883_v36, 1 }
 0x142   : > { %v6344_v53 = vld [vmem:[#allocation2 + $0x98] sm:$0xff]  ;;  %7651 = vrot.lane.b32.xlu0 %v10988_v45, %s10398_s27  ;;  %7653 = vrot.lane.b32.xlu1 %v10985_v40, %s10398_s27  ;;  %v1951_v27 = vshrl.u32 %v11021_v60, 16 }
 0x143   : > { %v6047_v44 = vpop.f32.mrf.mxu3  ;;  %5071 = vst.msk [vmem:[#allocation2 + $0xa0] sm:$0xff] %vm1177_vm4, %v4939_v52  ;;  %v6476_v56 = vadd.f32 %v6344_v53, %v6042_v59  ;;  %7019 = vrot.lane.b32.xlu2 %v10997_v47, %s10397_s26  ;;  %v3878_v59 = vsel %vm1778_vm3, %v3873_v24, %v3877_v39  ;;  %v1949_v30 = vrot.slane %v1947_v28, 1  ;;  %v3881_v52 = vor.u32 %v3879_v32, %v3877_v39 }
 0x144   : > { %v4509_v42 = vpop.f32.mrf.mxu2  ;;  %v11011_v7 = vld [vmem:[#allocation2 + $0x90] sm:$0xff] }
 0x145   : > { %6608 = vst.msk [vmem:[#allocation2 + $0x98] sm:$0xff] %vm1177_vm4, %v6476_v56  ;;  %v1950_v39 = vsel %vm1778_vm3, %v1945_v17, %v1949_v30 }
 0x146   : > { %v2576_v62 = vpop.f32.mrf.mxu1  ;;  %v2873_v57 = vld [vmem:[#allocation2 + $0xb0] sm:$0xff]  ;;  %v904_v5 = vpop.f32.mrf.mxu0 }
 0x147   : > { %v3005_v6 = vadd.f32 %v2873_v57, %v2576_v62  ;;  %1201 = vst.msk [vmem:[#allocation2 + $0xb8] sm:$0xff] %vm1177_vm4, %v904_v5  ;;  %v3886_v62 = vsel %vm1778_vm3, %v3881_v52, %v3885_v31 }
 0x148   : > { %10044 = vmatmul.msk.bf16.gmra.mxu3 %vm635_vm1, %v5692_v50  ;;  %v4808_v25 = vld [vmem:[#allocation2 + $0xa8] sm:$0xff] }
 0x149   : > { %9382 = vmatmul.msk.bf16.gmra.mxu1 %vm635_vm1, %v1942_v58  ;;  %3137 = vst.msk [vmem:[#allocation2 + $0xb0] sm:$0xff] %vm1177_vm4, %v3005_v6  ;;  %v4940_v9 = vadd.f32 %v4808_v25, %v4509_v42  ;;  %9713 = vmatmul.msk.bf16.gmra.mxu2 %vm635_vm1, %v3878_v59  ;;  %v5694_v42 = vsel %vm5651_vm2, %v5691_v13, %v5693_v20  ;;  %v11071_v59 = vld [vmem:[%s10445_s25 + $0xb0] sm:$0xff] }
 0x14a   : > { %v6345_v11 = vld [vmem:[#allocation2 + $0xa0] sm:$0xff]  ;;  %7021 = vrot.lane.b32.xlu0 %v11011_v7, %s10397_s26  ;;  %v1955_v28 = vshll.u32 %v11071_v59, 16 }
 0x14b   : > { %v6050_v10 = vpop.f32.mrf.mxu3  ;;  %5072 = vst.msk [vmem:[#allocation2 + $0xa8] sm:$0xff] %vm1177_vm4, %v4940_v9  ;;  %v6477_v0 = vadd.f32 %v6345_v11, %v10968_v18  ;;  %7655 = vrot.lane.b32.xlu2 %v11016_v55, %s10398_s27  ;;  %v11076_v9 = vld [vmem:[%s10445_s25 + $0xc0] sm:$0xff] }
 0x14c   : > { %v4512_v15 = vpop.f32.mrf.mxu2  ;;  %v11032_v14 = vld [vmem:[#allocation2 + $0x98] sm:$0xff] }
 0x14d   : > { %6609 = vst.msk [vmem:[#allocation2 + $0xa0] sm:$0xff] %vm1177_vm4, %v6477_v0  ;;  %7023 = vrot.lane.b32.xlu1 %v11032_v14, %s10397_s26 }
 0x14e   : > { %v2578_v22 = vpop.f32.mrf.mxu1  ;;  %v2874_v18 = vld [vmem:[#allocation2 + $0xb8] sm:$0xff]  ;;  %v907_v34 = vpop.f32.mrf.mxu0 }
 0x14f   : > { %v3006_v35 = vadd.f32 %v2874_v18, %v2578_v22  ;;  %1202 = vst.msk [vmem:[#allocation2 + $0xc0] sm:$0xff] %vm1177_vm4, %v907_v34  ;;  %v7002_v13 = vpop.permute.xlu2 %7001  ;;  %v3887_v34 = vshrl.u32 %v11026_v49, 16  ;;  %v1953_v49 = vor.u32 %v1951_v27, %v1949_v30  ;;  %v10115_v27 = vld [vmem:[%s10445_s25 + $0xb0] sm:$0xff] }
 0x150   : > { %v4809_v37 = vld [vmem:[#allocation2 + $0xb0] sm:$0xff] }
 0x151   : > { %3138 = vst.msk [vmem:[#allocation2 + $0xb8] sm:$0xff] %vm1177_vm4, %v3006_v35  ;;  %v4941_v33 = vadd.f32 %v4809_v37, %v4512_v15  ;;  %9052 = vmatmul.msk.bf16.gmra.mxu0 %vm635_vm1, %v10113_v2  ;;  %v11083_v15 = vld [vmem:[%s10445_s25 + $0xc0] sm:$0xff]  ;;  %v10114_v2 = vld [vmem:[%s10445_s25 + $0xa8] sm:$0xff] }
 0x152   : > { %v6346_v38 = vld [vmem:[#allocation2 + $0xa8] sm:$0xff] }
 0x153   : > { %v6052_v53 = vpop.f32.mrf.mxu3  ;;  %5073 = vst.msk [vmem:[#allocation2 + $0xb0] sm:$0xff] %vm1177_vm4, %v4941_v33  ;;  %v6478_v8 = vadd.f32 %v6346_v38, %v6047_v44  ;;  %v5695_v33 = vrot.slane %v11083_v15, 1  ;;  %v1957_v38 = vrot.slane %v1955_v28, 1  ;;  %v1959_v28 = vshrl.u32 %v11071_v59, 16 }
 0x154   : > { %v4514_v24 = vpop.f32.mrf.mxu2  ;;  %v11050_v56 = vld [vmem:[#allocation2 + $0xa0] sm:$0xff] }
 0x155   : > { %6610 = vst.msk [vmem:[#allocation2 + $0xa8] sm:$0xff] %vm1177_vm4, %v6478_v8  ;;  %7025 = vrot.lane.b32.xlu2 %v11050_v56, %s10397_s26  ;;  %v5696_v30 = vsel %vm5651_vm2, %v5693_v20, %v5695_v33 }
 0x156   : > { %v2581_v43 = vpop.f32.mrf.mxu1  ;;  %v909_v50 = vpop.f32.mrf.mxu0  ;;  %v2875_v44 = vld [vmem:[#allocation2 + $0xc0] sm:$0xff] }
 0x157   : > { %1203 = vst.msk [vmem:[#allocation2 + $0xc8] sm:$0xff] %vm1177_vm4, %v909_v50  ;;  %v3007_v58 = vadd.f32 %v2875_v44, %v2581_v43  ;;  %v6998_v16 = vpop.permute.xlu0 %6997  ;;  %v1958_v50 = vsel %vm1778_vm3, %v1953_v49, %v1957_v38 }
 0x158   : > { %10045 = vmatmul.msk.bf16.gmra.mxu3 %vm635_vm1, %v5694_v42  ;;  %v4810_v4 = vld [vmem:[#allocation2 + $0xb8] sm:$0xff]  ;;  %v11065_v57 = vmax.f32 %v10723_v23, %v6998_v16  ;;  %v11079_v23 = vmax.f32 %v10765_v3, %v7002_v13 }
 0x159   : > { %9383 = vmatmul.msk.bf16.gmra.mxu1 %vm635_vm1, %v1950_v39  ;;  %v4942_v5 = vadd.f32 %v4810_v4, %v4514_v24  ;;  %3139 = vst.msk [vmem:[#allocation2 + $0xc0] sm:$0xff] %vm1177_vm4, %v3007_v58  ;;  %9714 = vmatmul.msk.bf16.gmra.mxu2 %vm635_vm1, %v3886_v62  ;;  %v11123_v16 = vld [vmem:[%s10445_s25 + $0xb8] sm:$0xff] }
 0x15a   : > { %v6347_v6 = vld [vmem:[#allocation2 + $0xb0] sm:$0xff]  ;;  %7657 = vrot.lane.b32.xlu0 %v11065_v57, %s10398_s27 }
 0x15b   : > { %v6055_v25 = vpop.f32.mrf.mxu3  ;;  %5074 = vst.msk [vmem:[#allocation2 + $0xb8] sm:$0xff] %vm1177_vm4, %v4942_v5  ;;  %v6479_v11 = vadd.f32 %v6347_v6, %v6050_v10  ;;  %v3891_v10 = vshll.u32 %v11076_v9, 16  ;;  %v11130_v5 = vld [vmem:[%s10445_s25 + $0xc8] sm:$0xff] }
 0x15c   : > { %v4517_v0 = vpop.f32.mrf.mxu2  ;;  %v11100_v17 = vld [vmem:[#allocation2 + $0xa8] sm:$0xff] }
 0x15d   : > { %6611 = vst.msk [vmem:[#allocation2 + $0xb0] sm:$0xff] %vm1177_vm4, %v6479_v11  ;;  %7661 = vrot.lane.b32.xlu2 %v11079_v23, %s10398_s27  ;;  %v3893_v8 = vrot.slane %v3891_v10, 1  ;;  %v3899_v10 = vshll.u32 %v11130_v5, 16 }
 0x15e   : > { %v2583_v22 = vpop.f32.mrf.mxu1  ;;  %v912_v18 = vpop.f32.mrf.mxu0  ;;  %v2876_v3 = vld [vmem:[#allocation2 + $0xc8] sm:$0xff] }
 0x15f   : > { %1204 = vst.msk [vmem:[#allocation2 + $0xd0] sm:$0xff] %vm1177_vm4, %v912_v18  ;;  %v3008_v32 = vadd.f32 %v2876_v3, %v2583_v22  ;;  %v7000_v36 = vpop.permute.xlu1 %6999  ;;  %v11136_v22 = vld [vmem:[%s10445_s25 + $0xc8] sm:$0xff]  ;;  %v1963_v18 = vshll.u32 %v11123_v16, 16 }
 0x160   : > { %v11095_v35 = vmax.f32 %v10747_v41, %v7000_v36  ;;  %v4811_v37 = vld [vmem:[#allocation2 + $0xc0] sm:$0xff]  ;;  %v3889_v41 = vor.u32 %v3887_v34, %v3885_v31 }
 0x161   : > { %3140 = vst.msk [vmem:[#allocation2 + $0xc8] sm:$0xff] %vm1177_vm4, %v3008_v32  ;;  %v4943_v60 = vadd.f32 %v4811_v37, %v4517_v0  ;;  %9053 = vmatmul.msk.bf16.gmra.mxu0 %vm635_vm1, %v10114_v2 }
 0x162   : > { %v6348_v52 = vld [vmem:[#allocation2 + $0xb8] sm:$0xff]  ;;  %7659 = vrot.lane.b32.xlu1 %v11095_v35, %s10398_s27  ;;  %7027 = vrot.lane.b32.xlu0 %v11100_v17, %s10397_s26 }
 0x163   : > { %v6057_v24 = vpop.f32.mrf.mxu3  ;;  %v6480_v42 = vadd.f32 %v6348_v52, %v6052_v53  ;;  %5075 = vst.msk [vmem:[#allocation2 + $0xc0] sm:$0xff] %vm1177_vm4, %v4943_v60  ;;  %v3894_v53 = vsel %vm1778_vm3, %v3889_v41, %v3893_v8  ;;  %v5697_v52 = vrot.slane %v11136_v22, 1  ;;  %v1961_v41 = vor.u32 %v1959_v28, %v1957_v38 }
 0x164   : > { %v4519_v43 = vpop.f32.mrf.mxu2  ;;  %v11116_v58 = vld [vmem:[#allocation2 + $0xb0] sm:$0xff] }
 0x165   : > { %6612 = vst.msk [vmem:[#allocation2 + $0xb8] sm:$0xff] %vm1177_vm4, %v6480_v42  ;;  %v5698_v38 = vsel %vm5651_vm2, %v5695_v33, %v5697_v52 }
 0x166   : > { %v2586_v39 = vpop.f32.mrf.mxu1  ;;  %v914_v44 = vpop.f32.mrf.mxu0  ;;  %v2877_v31 = vld [vmem:[#allocation2 + $0xd0] sm:$0xff] }
 0x167   : > { %1205 = vst.msk [vmem:[#allocation2 + $0xd8] sm:$0xff] %vm1177_vm4, %v914_v44  ;;  %v3009_v62 = vadd.f32 %v2877_v31, %v2586_v39  ;;  %v7008_v37 = vpop.permute.xlu2 %7007 }
 0x168   : > { %10046 = vmatmul.msk.bf16.gmra.mxu3 %vm635_vm1, %v5696_v30  ;;  %v4812_v21 = vld [vmem:[#allocation2 + $0xc8] sm:$0xff]  ;;  %v3901_v30 = vrot.slane %v3899_v10, 1 }
 0x169   : > { %9384 = vmatmul.msk.bf16.gmra.mxu1 %vm635_vm1, %v1958_v50  ;;  %3141 = vst.msk [vmem:[#allocation2 + $0xd0] sm:$0xff] %vm1177_vm4, %v3009_v62  ;;  %v4944_v20 = vadd.f32 %v4812_v21, %v4519_v43  ;;  %9715 = vmatmul.msk.bf16.gmra.mxu2 %vm635_vm1, %v3894_v53 }
 0x16a   : > { %v6349_v13 = vld [vmem:[#allocation2 + $0xc0] sm:$0xff]  ;;  %7029 = vrot.lane.b32.xlu1 %v11116_v58, %s10397_s26 }
 0x16b   : > { %v11127_v4 = vpop.f32.mrf.mxu3  ;;  %5076 = vst.msk [vmem:[#allocation2 + $0xc8] sm:$0xff] %vm1177_vm4, %v4944_v20  ;;  %v6481_v6 = vadd.f32 %v6349_v13, %v6055_v25  ;;  %v3895_v25 = vshrl.u32 %v11076_v9, 16  ;;  %v1965_v9 = vrot.slane %v1963_v18, 1  ;;  %v11192_v18 = vld [vmem:[%s10445_s25 + $0xd0] sm:$0xff] }
 0x16c   : > { %v11133_v11 = vld [vmem:[#allocation2 + $0xb8] sm:$0xff]  ;;  %v4522_v0 = vpop.f32.mrf.mxu2 }
 0x16d   : > { %6613 = vst.msk [vmem:[#allocation2 + $0xc0] sm:$0xff] %vm1177_vm4, %v6481_v6  ;;  %7031 = vrot.lane.b32.xlu2 %v11133_v11, %s10397_s26  ;;  %v3897_v43 = vor.u32 %v3895_v25, %v3893_v8  ;;  %v11180_v6 = vld [vmem:[%s10445_s25 + $0xc0] sm:$0xff]  ;;  %v1967_v25 = vshrl.u32 %v11123_v16, 16 }
 0x16e   : > { %v2588_v2 = vpop.f32.mrf.mxu1  ;;  %v917_v3 = vpop.f32.mrf.mxu0  ;;  %v2878_v34 = vld [vmem:[#allocation2 + $0xd8] sm:$0xff]  ;;  %v1971_v10 = vshll.u32 %v11180_v6, 16 }
 0x16f   : > { %1206 = vst.msk [vmem:[#allocation2 + $0xe0] sm:$0xff] %vm1177_vm4, %v917_v3  ;;  %v3010_v32 = vadd.f32 %v2878_v34, %v2588_v2  ;;  %v7004_v36 = vpop.permute.xlu0 %7003  ;;  %v11187_v2 = vld [vmem:[%s10445_s25 + $0xd0] sm:$0xff]  ;;  %v10116_v34 = vld [vmem:[%s10445_s25 + $0xb8] sm:$0xff] }
 0x170   : > { %v11148_v60 = vmax.f32 %v10789_v19, %v7004_v36  ;;  %v4813_v49 = vld [vmem:[#allocation2 + $0xd0] sm:$0xff]  ;;  %v11156_v19 = vmax.f32 %v10831_v61, %v7008_v37  ;;  %v1966_v61 = vsel %vm1778_vm3, %v1961_v41, %v1965_v9  ;;  %v3903_v37 = vshrl.u32 %v11130_v5, 16 }
 0x171   : > { %3142 = vst.msk [vmem:[#allocation2 + $0xd8] sm:$0xff] %vm1177_vm4, %v3010_v32  ;;  %v4945_v59 = vadd.f32 %v4813_v49, %v4522_v0  ;;  %9054 = vmatmul.msk.bf16.gmra.mxu0 %vm635_vm1, %v10115_v27  ;;  %v3907_v49 = vshll.u32 %v11187_v2, 16  ;;  %v5699_v41 = vrot.slane %v11192_v18, 1 }
 0x172   : > { %v6350_v42 = vld [vmem:[#allocation2 + $0xc8] sm:$0xff]  ;;  %7663 = vrot.lane.b32.xlu0 %v11148_v60, %s10398_s27  ;;  %v3905_v5 = vor.u32 %v3903_v37, %v3901_v30 }
 0x173   : > { %v6062_v39 = vpop.f32.mrf.mxu3  ;;  %5077 = vst.msk [vmem:[#allocation2 + $0xd0] sm:$0xff] %vm1177_vm4, %v4945_v59  ;;  %v6482_v50 = vadd.f32 %v6350_v42, %v6057_v24  ;;  %v3902_v24 = vsel %vm1778_vm3, %v3897_v43, %v3901_v30  ;;  %v1969_v43 = vor.u32 %v1967_v25, %v1965_v9  ;;  %v5700_v9 = vsel %vm5651_vm2, %v5697_v52, %v5699_v41  ;;  %v11239_v25 = vld [vmem:[%s10445_s25 + $0xd8] sm:$0xff] }
 0x174   : > { %v4524_v44 = vpop.f32.mrf.mxu2  ;;  %v11170_v21 = vld [vmem:[#allocation2 + $0xc0] sm:$0xff] }
 0x175   : > { %6614 = vst.msk [vmem:[#allocation2 + $0xc8] sm:$0xff] %vm1177_vm4, %v6482_v50  ;;  %7667 = vrot.lane.b32.xlu2 %v11156_v19, %s10398_s27  ;;  %v1973_v50 = vrot.slane %v1971_v10, 1 }
 0x176   : > { %v2591_v8 = vpop.f32.mrf.mxu1  ;;  %v919_v31 = vpop.f32.mrf.mxu0  ;;  %v2879_v53 = vld [vmem:[#allocation2 + $0xe0] sm:$0xff] }
 0x177   : > { %1207 = vst.msk [vmem:[#allocation2 + $0xe8] sm:$0xff] %vm1177_vm4, %v919_v31  ;;  %v3011_v62 = vadd.f32 %v2879_v53, %v2591_v8  ;;  %v7006_v15 = vpop.permute.xlu1 %7005 }
 0x178   : > { %10047 = vmatmul.msk.bf16.gmra.mxu3 %vm635_vm1, %v5698_v38  ;;  %v11174_v33 = vmax.f32 %v10807_v46, %v7006_v15  ;;  %v4814_v20 = vld [vmem:[#allocation2 + $0xd8] sm:$0xff]  ;;  %v3909_v38 = vrot.slane %v3907_v49, 1  ;;  %v10117_v49 = vld [vmem:[%s10445_s25 + $0xc0] sm:$0xff] }
 0x179   : > { %9385 = vmatmul.msk.bf16.gmra.mxu1 %vm635_vm1, %v1966_v61  ;;  %3143 = vst.msk [vmem:[#allocation2 + $0xe0] sm:$0xff] %vm1177_vm4, %v3011_v62  ;;  %v4946_v13 = vadd.f32 %v4814_v20, %v4524_v44  ;;  %9716 = vmatmul.msk.bf16.gmra.mxu2 %vm635_vm1, %v3902_v24  ;;  %v1974_v24 = vsel %vm1778_vm3, %v1969_v43, %v1973_v50  ;;  %v3911_v43 = vshrl.u32 %v11187_v2, 16 }
 0x17a   : > { %v6351_v0 = vld [vmem:[#allocation2 + $0xd0] sm:$0xff]  ;;  %7665 = vrot.lane.b32.xlu1 %v11174_v33, %s10398_s27  ;;  %7033 = vrot.lane.b32.xlu0 %v11170_v21, %s10397_s26  ;;  %v3910_v15 = vsel %vm1778_vm3, %v3905_v5, %v3909_v38 }
 0x17b   : > { %v6065_v46 = vpop.f32.mrf.mxu3  ;;  %5078 = vst.msk [vmem:[#allocation2 + $0xd8] sm:$0xff] %vm1177_vm4, %v4946_v13  ;;  %v6483_v27 = vadd.f32 %v6351_v0, %v11127_v4 }
 0x17c   : > { %v4527_v28 = vpop.f32.mrf.mxu2  ;;  %v11204_v16 = vld [vmem:[#allocation2 + $0xc8] sm:$0xff] }
 0x17d   : > { %6615 = vst.msk [vmem:[#allocation2 + $0xd0] sm:$0xff] %vm1177_vm4, %v6483_v27 }
 0x17e   : > { %v2593_v3 = vpop.f32.mrf.mxu1  ;;  %v922_v32 = vpop.f32.mrf.mxu0  ;;  %v2880_v36 = vld [vmem:[#allocation2 + $0xe8] sm:$0xff] }
 0x17f   : > { %1208 = vst.msk [vmem:[#allocation2 + $0xf0] sm:$0xff] %vm1177_vm4, %v922_v32  ;;  %v3012_v4 = vadd.f32 %v2880_v36, %v2593_v3  ;;  %v7014_v52 = vpop.permute.xlu2 %7013  ;;  %v11246_v36 = vld [vmem:[%s10445_s25 + $0xd8] sm:$0xff] }
 0x180   : > { %v4815_v59 = vld [vmem:[#allocation2 + $0xe0] sm:$0xff] }
 0x181   : > { %3144 = vst.msk [vmem:[#allocation2 + $0xe8] sm:$0xff] %vm1177_vm4, %v3012_v4  ;;  %v4947_v42 = vadd.f32 %v4815_v59, %v4527_v28  ;;  %9055 = vmatmul.msk.bf16.gmra.mxu0 %vm635_vm1, %v10116_v34  ;;  %v11232_v28 = vld [vmem:[%s10445_s25 + $0xc8] sm:$0xff]  ;;  %v1975_v4 = vshrl.u32 %v11180_v6, 16 }
 0x182   : > { %v6352_v44 = vld [vmem:[#allocation2 + $0xd8] sm:$0xff]  ;;  %7035 = vrot.lane.b32.xlu1 %v11204_v16, %s10397_s26  ;;  %v1979_v59 = vshll.u32 %v11232_v28, 16 }
 0x183   : > { %v11208_v8 = vpop.f32.mrf.mxu3  ;;  %5079 = vst.msk [vmem:[#allocation2 + $0xe0] sm:$0xff] %vm1177_vm4, %v4947_v42  ;;  %v6484_v61 = vadd.f32 %v6352_v44, %v6062_v39  ;;  %v1977_v2 = vor.u32 %v1975_v4, %v1973_v50  ;;  %v11280_v50 = vld [vmem:[%s14785_s2] ss:$0 sm:$0xff] }
 0x184   : > { %v11211_v31 = vld [vmem:[#allocation2 + $0xd0] sm:$0xff]  ;;  %v4529_v53 = vpop.f32.mrf.mxu2 }
 0x185   : > { %6616 = vst.msk [vmem:[#allocation2 + $0xd8] sm:$0xff] %vm1177_vm4, %v6484_v61  ;;  %7037 = vrot.lane.b32.xlu2 %v11211_v31, %s10397_s26 }
 0x186   : > { %v2596_v30 = vpop.f32.mrf.mxu1  ;;  %v924_v62 = vpop.f32.mrf.mxu0  ;;  %v2881_v39 = vld [vmem:[#allocation2 + $0xf0] sm:$0xff] }
 0x187   : > { %1209 = vst.msk [vmem:[#allocation2 + $0xf8] sm:$0xff] %vm1177_vm4, %v924_v62  ;;  %v3013_v20 = vadd.f32 %v2881_v39, %v2596_v30  ;;  %v7010_v22 = vpop.permute.xlu0 %7009 }
 0x188   : > { %10048 = vmatmul.msk.bf16.gmra.mxu3 %vm635_vm1, %v5700_v9  ;;  %v11226_v13 = vmax.f32 %v10849_v29, %v7010_v22  ;;  %v4816_v0 = vld [vmem:[#allocation2 + $0xe8] sm:$0xff]  ;;  %v11242_v29 = vmax.f32 %v10891_v1, %v7014_v52  ;;  %v5701_v9 = vrot.slane %v11246_v36, 1 }
 0x189   : > { %9386 = vmatmul.msk.bf16.gmra.mxu1 %vm635_vm1, %v1974_v24  ;;  %3145 = vst.msk [vmem:[#allocation2 + $0xf0] sm:$0xff] %vm1177_vm4, %v3013_v20  ;;  %v4948_v27 = vadd.f32 %v4816_v0, %v4529_v53  ;;  %9717 = vmatmul.msk.bf16.gmra.mxu2 %vm635_vm1, %v3910_v15  ;;  %v11265_v24 = vrot.slane %v1979_v59, 1  ;;  %v11301_v59 = vld [vmem:[%s10445_s25 + $0xd0] sm:$0xff] }
 0x18a   : > { %v6353_v3 = vld [vmem:[#allocation2 + $0xe0] sm:$0xff]  ;;  %7669 = vrot.lane.b32.xlu0 %v11226_v13, %s10398_s27 }
 0x18b   : > { %v11236_v34 = vpop.f32.mrf.mxu3  ;;  %5080 = vst.msk [vmem:[#allocation2 + $0xe8] sm:$0xff] %vm1177_vm4, %v4948_v27  ;;  %v6485_v10 = vadd.f32 %v6353_v3, %v6065_v46  ;;  %v3915_v46 = vshll.u32 %v11239_v25, 16 }
 0x18c   : > { %v4532_v32 = vpop.f32.mrf.mxu2  ;;  %v11263_v30 = vld [vmem:[#allocation2 + $0xd8] sm:$0xff] }
 0x18d   : > { %6617 = vst.msk [vmem:[#allocation2 + $0xe0] sm:$0xff] %vm1177_vm4, %v6485_v10  ;;  %7673 = vrot.lane.b32.xlu2 %v11242_v29, %s10398_s27  ;;  %v11271_v39 = vrot.slane %v3915_v46, 1 }
 0x18e   : > { %v2598_v37 = vpop.f32.mrf.mxu1  ;;  %v927_v42 = vpop.f32.mrf.mxu0  ;;  %v2882_v1 = vld [vmem:[#allocation2 + $0xf8] sm:$0xff] }
 0x18f   : > { %1210 = vst.msk [vmem:[#allocation2 + $0x100] sm:$0xff] %vm1177_vm4, %v927_v42  ;;  %v3014_v44 = vadd.f32 %v2882_v1, %v2598_v37  ;;  %v7012_v5 = vpop.permute.xlu1 %7011 }
 0x190   : > { %v11258_v61 = vmax.f32 %v10873_v48, %v7012_v5  ;;  %v4817_v53 = vld [vmem:[#allocation2 + $0xf0] sm:$0xff]  ;;  %v3913_v48 = vor.u32 %v3911_v43, %v3909_v38  ;;  %v5702_v38 = vsel %vm5651_vm2, %v5699_v41, %v5701_v9  ;;  %v11312_v43 = vld [vmem:[%s10445_s25 + $0xe0] sm:$0xff] }
 0x191   : > { %3146 = vst.msk [vmem:[#allocation2 + $0xf8] sm:$0xff] %vm1177_vm4, %v3014_v44  ;;  %v4949_v6 = vadd.f32 %v4817_v53, %v4532_v32  ;;  %9056 = vmatmul.msk.bf16.gmra.mxu0 %vm635_vm1, %v10117_v49 }
 0x192   : > { %v6354_v62 = vld [vmem:[#allocation2 + $0xe8] sm:$0xff]  ;;  %7671 = vrot.lane.b32.xlu1 %v11258_v61, %s10398_s27  ;;  %7039 = vrot.lane.b32.xlu0 %v11263_v30, %s10397_s26  ;;  %v3918_v32 = vsel %vm1778_vm3, %v3913_v48, %v11271_v39 }
 0x193   : > { %v11273_v15 = vpop.f32.mrf.mxu3  ;;  %5081 = vst.msk [vmem:[#allocation2 + $0xf0] sm:$0xff] %vm1177_vm4, %v4949_v6  ;;  %v6486_v20 = vadd.f32 %v6354_v62, %v11208_v8  ;;  %v1982_v8 = vsel %vm1778_vm3, %v1977_v2, %v11265_v24  ;;  %v11319_v2 = vld [vmem:[%s10445_s25 + $0xe0] sm:$0xff] }
 0x194   : > { %v7650_v22 = vpop.permute.xlu2 %7649  ;;  %v4534_v52 = vpop.f32.mrf.mxu2  ;;  %v6749_v41 = vld [vmem:[#allocation2 + $0xe0] sm:$0xff] }
 0x195   : > { %6618 = vst.msk [vmem:[#allocation2 + $0xe8] sm:$0xff] %vm1177_vm4, %v6486_v20  ;;  %v8043_v0 = vmax.f32 %v10956_v63, %v7650_v22  ;;  %v10118_v22 = vld [vmem:[%s10445_s25 + $0xc8] sm:$0xff] }
 0x196   : > { %v2601_v27 = vpop.f32.mrf.mxu1  ;;  %v929_v3 = vpop.f32.mrf.mxu0  ;;  %v2883_v10 = vld [vmem:[#allocation2 + $0x100] sm:$0xff] }
 0x197   : > { %v8179_v37 = vadd.f32 %v11280_v50, %v8043_v0  ;;  %1211 = vst.msk [vmem:[#allocation2 + $0x108] sm:$0xff] %vm1177_vm4, %v929_v3  ;;  %v3015_v18 = vadd.f32 %v2883_v10, %v2601_v27  ;;  %v3919_v27 = vshrl.u32 %v11239_v25, 16 }
 0x198   : > { %10049 = vmatmul.msk.bf16.gmra.mxu3 %vm635_vm1, %v5702_v38  ;;  %v4818_v63 = vld [vmem:[#allocation2 + $0xf8] sm:$0xff] }
 0x199   : > { %9387 = vmatmul.msk.bf16.gmra.mxu1 %vm635_vm1, %v1982_v8  ;;  %v8311_v49 = vmax.f32 %v8179_v37, 0.0  ;;  %3147 = vst.msk [vmem:[#allocation2 + $0x100] sm:$0xff] %vm1177_vm4, %v3015_v18  ;;  %v4950_v4 = vadd.f32 %v4818_v63, %v4534_v52  ;;  %9718 = vmatmul.msk.bf16.gmra.mxu2 %vm635_vm1, %v3918_v32  ;;  %v1983_v52 = vshrl.u32 %v11232_v28, 16  ;;  %v3923_v8 = vshll.u32 %v11312_v43, 16 }
 0x19a   : > { %v6355_v42 = vld [vmem:[#allocation2 + $0xf0] sm:$0xff]  ;;  %7041 = vrot.lane.b32.xlu1 %v6749_v41, %s10397_s26  ;;  %v5703_v32 = vrot.slane %v11319_v2, 1  ;;  %v3921_v63 = vor.u32 %v3919_v27, %v11271_v39  ;;  %v11379_v27 = vld [vmem:[%s10445_s25 + $0xd8] sm:$0xff] }
 0x19b   : > { %v11309_v1 = vpop.f32.mrf.mxu3  ;;  %v8443_v46 = vpack.c.bf16 %v8311_v49, %v8311_v49  ;;  %5082 = vst.msk [vmem:[#allocation2 + $0xf8] sm:$0xff] %vm1177_vm4, %v4950_v4  ;;  %v6487_v44 = vadd.f32 %v6355_v42, %v11236_v34  ;;  %v1987_v34 = vshll.u32 %v11301_v59, 16  ;;  %v1985_v18 = vor.u32 %v1983_v52, %v11265_v24 }
 0x19c   : > { %v7646_v5 = vpop.permute.xlu0 %7645  ;;  %v11316_v53 = vld [vmem:[#allocation2 + $0xe8] sm:$0xff]  ;;  %v4537_v6 = vpop.f32.mrf.mxu2  ;;  %v11341_v49 = vrot.slane %v3923_v8, 1  ;;  %v5704_v24 = vsel %vm5651_vm2, %v5701_v9, %v5703_v32 }
 0x19d   : > { %8576 = vst.msk [vmem:[%s11306_s6 + $0x8] sm:$0xf] %vm8573_vm5, %v8443_v46  ;;  %v8041_v62 = vmax.f32 %v10906_v26, %v7646_v5  ;;  %v7020_v48 = vpop.permute.xlu2 %7019  ;;  %7043 = vrot.lane.b32.xlu2 %v11316_v53, %s10397_s26  ;;  %v11338_v25 = vrot.slane %v1987_v34, 1 }
 0x19e   : > { %v2603_v20 = vpop.f32.mrf.mxu1  ;;  %6619 = vst.msk [vmem:[#allocation2 + $0xf0] sm:$0xff] %vm1177_vm4, %v6487_v44  ;;  %v932_v38 = vpop.f32.mrf.mxu0  ;;  %v2884_v0 = vld [vmem:[#allocation2 + $0x108] sm:$0xff]  ;;  %v11346_v46 = vmax.f32 %v10997_v47, %v7020_v48 }
 0x19f   : > { %v8177_v26 = vadd.f32 %v11280_v50, %v8041_v62  ;;  %1212 = vst.msk [vmem:[#allocation2 + $0x110] sm:$0xff] %vm1177_vm4, %v932_v38  ;;  %v3016_v3 = vadd.f32 %v2884_v0, %v2603_v20  ;;  %v1990_v48 = vsel %vm1778_vm3, %v1985_v18, %v11338_v25 }
 0x1a0   : > { %v4819_v10 = vld [vmem:[#allocation2 + $0x100] sm:$0xff] }
 0x1a1   : > { %v8309_v37 = vmax.f32 %v8177_v26, 0.0  ;;  %3148 = vst.msk [vmem:[#allocation2 + $0x108] sm:$0xff] %vm1177_vm4, %v3016_v3  ;;  %v4951_v28 = vadd.f32 %v4819_v10, %v4537_v6  ;;  %9057 = vmatmul.msk.bf16.gmra.mxu0 %vm635_vm1, %v10118_v22  ;;  %v11384_v10 = vld [vmem:[%s10445_s25 + $0xe8] sm:$0xff] }
 0x1a2   : > { %v6356_v41 = vld [vmem:[#allocation2 + $0xf8] sm:$0xff] }
 0x1a3   : > { %v11343_v4 = vpop.f32.mrf.mxu3  ;;  %v8441_v42 = vpack.c.bf16 %v8309_v37, %v8309_v37  ;;  %5083 = vst.msk [vmem:[#allocation2 + $0x100] sm:$0xff] %vm1177_vm4, %v4951_v28  ;;  %v6488_v44 = vadd.f32 %v6356_v41, %v11273_v15 }
 0x1a4   : > { %v7648_v5 = vpop.permute.xlu1 %7647  ;;  %v7016_v6 = vpop.permute.xlu0 %7015 }
 0x1a5   : > { %8574 = vst.msk [vmem:[%s11306_s6] sm:$0xf] %vm8573_vm5, %v8441_v42  ;;  %v8042_v39 = vmax.f32 %v10931_v54, %v7648_v5  ;;  %v11359_v62 = vmax.f32 %v10936_v51, %v7016_v6  ;;  %v7656_v47 = vpop.permute.xlu2 %7655  ;;  %7679 = vrot.lane.b32.xlu2 %v11346_v46, %s10398_s27  ;;  %v4539_v22 = vpop.f32.mrf.mxu2  ;;  %v3926_v54 = vsel %vm1778_vm3, %v3921_v63, %v11341_v49  ;;  %v6751_v63 = vld [vmem:[#allocation2 + $0xf0] sm:$0xff]  ;;  %v1991_v6 = vshrl.u32 %v11301_v59, 16 }
 0x1a6   : > { %v2606_v15 = vpop.f32.mrf.mxu1  ;;  %6620 = vst.msk [vmem:[#allocation2 + $0xf8] sm:$0xff] %vm1177_vm4, %v6488_v44  ;;  %v8046_v36 = vmax.f32 %v11016_v55, %v7656_v47  ;;  %v934_v9 = vpop.f32.mrf.mxu0  ;;  %v2885_v20 = vld [vmem:[#allocation2 + $0x110] sm:$0xff] }
 0x1a7   : > { %v8178_v51 = vadd.f32 %v11280_v50, %v8042_v39  ;;  %1213 = vst.msk [vmem:[#allocation2 + $0x118] sm:$0xff] %vm1177_vm4, %v934_v9  ;;  %v3017_v52 = vadd.f32 %v2885_v20, %v2606_v15  ;;  %7675 = vrot.lane.b32.xlu0 %v11359_v62, %s10398_s27  ;;  %v10119_v5 = vld [vmem:[%s10445_s25 + $0xd0] sm:$0xff]  ;;  %v11397_v39 = vld [vmem:[%s10445_s25 + $0xe8] sm:$0xff] }
 0x1a8   : > { %10050 = vmatmul.msk.bf16.gmra.mxu3 %vm635_vm1, %v5704_v24  ;;  %v8182_v55 = vadd.f32 %v11280_v50, %v8046_v36  ;;  %v4820_v34 = vld [vmem:[#allocation2 + $0x108] sm:$0xff]  ;;  %v1995_v24 = vshll.u32 %v11379_v27, 16  ;;  %v3931_v36 = vshll.u32 %v11384_v10, 16 }
 0x1a9   : > { %9388 = vmatmul.msk.bf16.gmra.mxu1 %vm635_vm1, %v1990_v48  ;;  %v8310_v38 = vmax.f32 %v8178_v51, 0.0  ;;  %3149 = vst.msk [vmem:[#allocation2 + $0x110] sm:$0xff] %vm1177_vm4, %v3017_v52  ;;  %v4952_v0 = vadd.f32 %v4820_v34, %v4539_v22  ;;  %9719 = vmatmul.msk.bf16.gmra.mxu2 %vm635_vm1, %v3926_v54  ;;  %v3927_v48 = vshrl.u32 %v11312_v43, 16  ;;  %v1993_v43 = vor.u32 %v1991_v6, %v11338_v25 }
 0x1aa   : > { %v8314_v8 = vmax.f32 %v8182_v55, 0.0  ;;  %v6357_v26 = vld [vmem:[#allocation2 + $0x100] sm:$0xff]  ;;  %v11411_v22 = vrot.slane %v1995_v24, 1  ;;  %v5705_v54 = vrot.slane %v11397_v39, 1  ;;  %v11415_v55 = vrot.slane %v3931_v36, 1  ;;  %v11518_v39 = vld [vmem:[%s10445_s25 + $0xe8] sm:$0xff] }
 0x1ab   : > { %v11381_v3 = vpop.f32.mrf.mxu3  ;;  %v8442_v37 = vpack.c.bf16 %v8310_v38, %v8310_v38  ;;  %5084 = vst.msk [vmem:[#allocation2 + $0x108] sm:$0xff] %vm1177_vm4, %v4952_v0  ;;  %v6489_v28 = vadd.f32 %v6357_v26, %v11309_v1  ;;  %v3929_v52 = vor.u32 %v3927_v48, %v11341_v49  ;;  %v11449_v48 = vld [vmem:[%s10445_s25 + $0xe0] sm:$0xff] }
 0x1ac   : > { %v8446_v18 = vpack.c.bf16 %v8314_v8, %v8314_v8  ;;  %v7018_v41 = vpop.permute.xlu1 %7017  ;;  %v1998_v49 = vsel %vm1778_vm3, %v1993_v43, %v11411_v22 }
 0x1ad   : > { %8575 = vst.msk [vmem:[%s11306_s6 + $0x4] sm:$0xf] %vm8573_vm5, %v8442_v37  ;;  %v11391_v42 = vmax.f32 %v10952_v12, %v7018_v41  ;;  %v4542_v15 = vpop.f32.mrf.mxu2  ;;  %v11433_v41 = vld [vmem:[#allocation2 + $0xf8] sm:$0xff] }
 0x1ae   : > { %v2608_v44 = vpop.f32.mrf.mxu1  ;;  %8579 = vst.msk [vmem:[%s11306_s6 + $0x14] sm:$0xf] %vm8573_vm5, %v8446_v18  ;;  %v937_v47 = vpop.f32.mrf.mxu0  ;;  %v2886_v1 = vld [vmem:[#allocation2 + $0x118] sm:$0xff] }
 0x1af   : > { %6621 = vst.msk [vmem:[#allocation2 + $0x100] sm:$0xff] %vm1177_vm4, %v6489_v28  ;;  %v3018_v12 = vadd.f32 %v2886_v1, %v2608_v44  ;;  %v7026_v9 = vpop.permute.xlu2 %7025  ;;  %7677 = vrot.lane.b32.xlu1 %v11391_v42, %s10398_s27  ;;  %7045 = vrot.lane.b32.xlu0 %v6751_v63, %s10397_s26  ;;  %v5706_v28 = vsel %vm5651_vm2, %v5703_v32, %v5705_v54 }
 0x1b0   : > { %1214 = vst.msk [vmem:[#allocation2 + $0x120] sm:$0xff] %vm1177_vm4, %v937_v47  ;;  %v4821_v59 = vld [vmem:[#allocation2 + $0x110] sm:$0xff] }
 0x1b1   : > { %3150 = vst.msk [vmem:[#allocation2 + $0x118] sm:$0xff] %vm1177_vm4, %v3018_v12  ;;  %v4953_v20 = vadd.f32 %v4821_v59, %v4542_v15  ;;  %9058 = vmatmul.msk.bf16.gmra.mxu0 %vm635_vm1, %v10119_v5  ;;  %v11456_v59 = vld [vmem:[%s10445_s25 + $0xf0] sm:$0xff] }
 0x1b2   : > { %v6358_v51 = vld [vmem:[#allocation2 + $0x108] sm:$0xff] }
 0x1b3   : > { %v11417_v34 = vpop.f32.mrf.mxu3  ;;  %5085 = vst.msk [vmem:[#allocation2 + $0x110] sm:$0xff] %vm1177_vm4, %v4953_v20  ;;  %v6490_v38 = vadd.f32 %v6358_v51, %v11343_v4 }
 0x1b4   : > { %v7652_v0 = vpop.permute.xlu0 %7651  ;;  %v7654_v8 = vpop.permute.xlu1 %7653 }
 0x1b5   : > { %6622 = vst.msk [vmem:[#allocation2 + $0x108] sm:$0xff] %vm1177_vm4, %v6490_v38  ;;  %v8044_v25 = vmax.f32 %v10988_v45, %v7652_v0  ;;  %v8045_v26 = vmax.f32 %v10985_v40, %v7654_v8  ;;  %v4544_v63 = vpop.f32.mrf.mxu2  ;;  %v3934_v45 = vsel %vm1778_vm3, %v3929_v52, %v11415_v55  ;;  %v11461_v0 = vmax.f32 %v11050_v56, %v7026_v9 }
 0x1b6   : > { %v2611_v37 = vpop.f32.mrf.mxu1  ;;  %v11431_v18 = vld [vmem:[#allocation2 + $0x100] sm:$0xff]  ;;  %v939_v4 = vpop.f32.mrf.mxu0 }
 0x1b7   : > { %v8180_v40 = vadd.f32 %v11280_v50, %v8044_v25  ;;  %v8181_v44 = vadd.f32 %v11280_v50, %v8045_v26  ;;  %7049 = vrot.lane.b32.xlu2 %v11431_v18, %s10397_s26  ;;  %1215 = vst.msk [vmem:[#allocation2 + $0x128] sm:$0xff] %vm1177_vm4, %v939_v4  ;;  %v2887_v2 = vld [vmem:[#allocation2 + $0x120] sm:$0xff]  ;;  %v7662_v32 = vpop.permute.xlu2 %7661  ;;  %7047 = vrot.lane.b32.xlu1 %v11433_v41, %s10397_s26  ;;  %v10120_v26 = vld [vmem:[%s10445_s25 + $0xd8] sm:$0xff] }
 0x1b8   : > { %v3019_v5 = vadd.f32 %v2887_v2, %v2611_v37  ;;  %v8049_v6 = vmax.f32 %v11079_v23, %v7662_v32  ;;  %v4822_v24 = vld [vmem:[#allocation2 + $0x118] sm:$0xff]  ;;  %10051 = vmatmul.msk.bf16.gmra.mxu3 %vm635_vm1, %v5706_v28  ;;  %v1999_v37 = vshrl.u32 %v11379_v27, 16  ;;  %v11472_v28 = vld [vmem:[%s10445_s25 + $0xf0] sm:$0xff] }
 0x1b9   : > { %9389 = vmatmul.msk.bf16.gmra.mxu1 %vm635_vm1, %v1998_v49  ;;  %v8312_v47 = vmax.f32 %v8180_v40, 0.0  ;;  %v8313_v1 = vmax.f32 %v8181_v44, 0.0  ;;  %v4954_v15 = vadd.f32 %v4822_v24, %v4544_v63  ;;  %9720 = vmatmul.msk.bf16.gmra.mxu2 %vm635_vm1, %v3934_v45  ;;  %v2003_v49 = vshll.u32 %v11449_v48, 16 }
 0x1ba   : > { %3151 = vst.msk [vmem:[#allocation2 + $0x120] sm:$0xff] %vm1177_vm4, %v3019_v5  ;;  %v8185_v36 = vadd.f32 %v11280_v50, %v8049_v6  ;;  %v6359_v12 = vld [vmem:[#allocation2 + $0x110] sm:$0xff]  ;;  %v3935_v63 = vshrl.u32 %v11384_v10, 16  ;;  %v2001_v44 = vor.u32 %v1999_v37, %v11411_v22  ;;  %v5707_v32 = vrot.slane %v11472_v28, 1  ;;  %v11526_v37 = vld [vmem:[%s10445_s25 + $0xf8] sm:$0xff] }
 0x1bb   : > { %v11453_v23 = vpop.f32.mrf.mxu3  ;;  %v8444_v20 = vpack.c.bf16 %v8312_v47, %v8312_v47  ;;  %v8445_v43 = vpack.c.bf16 %v8313_v1, %v8313_v1  ;;  %5086 = vst.msk [vmem:[#allocation2 + $0x118] sm:$0xff] %vm1177_vm4, %v4954_v15  ;;  %v6491_v51 = vadd.f32 %v6359_v12, %v11381_v3  ;;  %v2005_v2 = vrot.slane %v2003_v49, 1 }
 0x1bc   : > { %v8317_v52 = vmax.f32 %v8185_v36, 0.0  ;;  %v7022_v38 = vpop.permute.xlu0 %7021  ;;  %v5708_v36 = vsel %vm5651_vm2, %v5705_v54, %v5707_v32  ;;  %v11507_v12 = vld [vmem:[#allocation2 + $0x108] sm:$0xff] }
 0x1bd   : > { %8577 = vst.msk [vmem:[%s11306_s6 + $0xc] sm:$0xf] %vm8573_vm5, %v8444_v20  ;;  %v11466_v8 = vmax.f32 %v11011_v7, %v7022_v38  ;;  %v4547_v9 = vpop.f32.mrf.mxu2  ;;  %v3939_v7 = vshll.u32 %v11456_v59, 16  ;;  %v2006_v15 = vsel %vm1778_vm3, %v2001_v44, %v2005_v2 }
 0x1be   : > { %v2613_v25 = vpop.f32.mrf.mxu1  ;;  %8578 = vst.msk [vmem:[%s11306_s6 + $0x10] sm:$0xf] %vm8573_vm5, %v8445_v43  ;;  %v8449_v3 = vpack.c.bf16 %v8317_v52, %v8317_v52  ;;  %v942_v4 = vpop.f32.mrf.mxu0  ;;  %v2888_v56 = vld [vmem:[#allocation2 + $0x128] sm:$0xff] }
 0x1bf   : > { %6623 = vst.msk [vmem:[#allocation2 + $0x110] sm:$0xff] %vm1177_vm4, %v6491_v51  ;;  %7685 = vrot.lane.b32.xlu2 %v11461_v0, %s10398_s27  ;;  %v3020_v27 = vadd.f32 %v2888_v56, %v2613_v25  ;;  %v7024_v45 = vpop.permute.xlu1 %7023  ;;  %7681 = vrot.lane.b32.xlu0 %v11466_v8, %s10398_s27  ;;  %v3941_v24 = vrot.slane %v3939_v7, 1 }
 0x1c0   : > { %8582 = vst.msk [vmem:[%s11306_s6 + $0x20] sm:$0xf] %vm8573_vm5, %v8449_v3  ;;  %v11486_v40 = vmax.f32 %v11032_v14, %v7024_v45  ;;  %v3937_v14 = vor.u32 %v3935_v63, %v11415_v55  ;;  %v2011_v63 = vshll.u32 %v11518_v39, 16  ;;  %v10121_v45 = vld [vmem:[%s10445_s25 + $0xe0] sm:$0xff] }
 0x1c1   : > { %1216 = vst.msk [vmem:[#allocation2 + $0x130] sm:$0xff] %vm1177_vm4, %v942_v4  ;;  %v4823_v10 = vld [vmem:[#allocation2 + $0x120] sm:$0xff]  ;;  %9059 = vmatmul.msk.bf16.gmra.mxu0 %vm635_vm1, %v10120_v26 }
 0x1c2   : > { %3152 = vst.msk [vmem:[#allocation2 + $0x128] sm:$0xff] %vm1177_vm4, %v3020_v27  ;;  %v4955_v5 = vadd.f32 %v4823_v10, %v4547_v9  ;;  %v6360_v6 = vld [vmem:[#allocation2 + $0x118] sm:$0xff]  ;;  %7683 = vrot.lane.b32.xlu1 %v11486_v40, %s10398_s27  ;;  %v2007_v9 = vshrl.u32 %v11449_v48, 16  ;;  %v3947_v48 = vshll.u32 %v11526_v37, 16 }
 0x1c3   : > { %v11496_v47 = vpop.f32.mrf.mxu3  ;;  %v6492_v1 = vadd.f32 %v6360_v6, %v11417_v34  ;;  %v3942_v34 = vsel %vm1778_vm3, %v3937_v14, %v3941_v24  ;;  %v11540_v10 = vld [vmem:[%s10445_s25 + $0xf8] sm:$0xff]  ;;  %v3943_v6 = vshrl.u32 %v11456_v59, 16 }
 0x1c4   : > { %5087 = vst.msk [vmem:[#allocation2 + $0x120] sm:$0xff] %vm1177_vm4, %v4955_v5  ;;  %v5709_v59 = vrot.slane %v11540_v10, 1 }
 0x1c5   : > { %6624 = vst.msk [vmem:[#allocation2 + $0x118] sm:$0xff] %vm1177_vm4, %v6492_v1  ;;  %v4549_v20 = vpop.f32.mrf.mxu2 }
 0x1c6   : > { %v2616_v22 = vpop.f32.mrf.mxu1  ;;  %v944_v55 = vpop.f32.mrf.mxu0  ;;  %v11513_v51 = vld [vmem:[#allocation2 + $0x110] sm:$0xff] }
 0x1c7   : > { %1217 = vst.msk [vmem:[#allocation2 + $0x138] sm:$0xff] %vm1177_vm4, %v944_v55  ;;  %v7032_v43 = vpop.permute.xlu2 %7031  ;;  %7051 = vrot.lane.b32.xlu0 %v11507_v12, %s10397_s26 }
 0x1c8   : > { %v2889_v52 = vld [vmem:[#allocation2 + $0x130] sm:$0xff]  ;;  %10052 = vmatmul.msk.bf16.gmra.mxu3 %vm635_vm1, %v5708_v36  ;;  %v11548_v36 = vrot.slane %v2011_v63, 1 }
 0x1c9   : > { %9390 = vmatmul.msk.bf16.gmra.mxu1 %vm635_vm1, %v2006_v15  ;;  %v3021_v54 = vadd.f32 %v2889_v52, %v2616_v22  ;;  %v4824_v38 = vld [vmem:[#allocation2 + $0x128] sm:$0xff]  ;;  %9721 = vmatmul.msk.bf16.gmra.mxu2 %vm635_vm1, %v3942_v34  ;;  %v2009_v15 = vor.u32 %v2007_v9, %v2005_v2  ;;  %v3945_v52 = vor.u32 %v3943_v6, %v3941_v24 }
 0x1ca   : > { %v4956_v25 = vadd.f32 %v4824_v38, %v4549_v20  ;;  %7053 = vrot.lane.b32.xlu1 %v11513_v51, %s10397_s26 }
 0x1cb   : > { %v11523_v26 = vpop.f32.mrf.mxu3  ;;  %3153 = vst.msk [vmem:[#allocation2 + $0x130] sm:$0xff] %vm1177_vm4, %v3021_v54  ;;  %v6361_v49 = vld [vmem:[#allocation2 + $0x120] sm:$0xff]  ;;  %v11554_v54 = vrot.slane %v3947_v48, 1  ;;  %v11591_v48 = vld [vmem:[%s10445_s25 + $0xf0] sm:$0xff] }
 0x1cc   : > { %5088 = vst.msk [vmem:[#allocation2 + $0x128] sm:$0xff] %vm1177_vm4, %v4956_v25  ;;  %v6493_v3 = vadd.f32 %v6361_v49, %v11453_v23  ;;  %v7658_v4 = vpop.permute.xlu0 %7657  ;;  %v11531_v56 = vld [vmem:[#allocation2 + $0x118] sm:$0xff] }
 0x1cd   : > { %v8047_v7 = vmax.f32 %v11065_v57, %v7658_v4  ;;  %7055 = vrot.lane.b32.xlu2 %v11531_v56, %s10397_s26  ;;  %v4552_v5 = vpop.f32.mrf.mxu2 }
 0x1ce   : > { %v2618_v27 = vpop.f32.mrf.mxu1  ;;  %6625 = vst.msk [vmem:[#allocation2 + $0x120] sm:$0xff] %vm1177_vm4, %v6493_v3  ;;  %v947_v44 = vpop.f32.mrf.mxu0  ;;  %v2890_v23 = vld [vmem:[#allocation2 + $0x138] sm:$0xff] }
 0x1cf   : > { %v8183_v14 = vadd.f32 %v11280_v50, %v8047_v7  ;;  %1218 = vst.msk [vmem:[#allocation2 + $0x140] sm:$0xff] %vm1177_vm4, %v947_v44  ;;  %v3022_v57 = vadd.f32 %v2890_v23, %v2618_v27  ;;  %v7668_v1 = vpop.permute.xlu2 %7667  ;;  %v2014_v7 = vsel %vm1778_vm3, %v2009_v15, %v11548_v36 }
 0x1d0   : > { %v8052_v22 = vmax.f32 %v11156_v19, %v7668_v1  ;;  %v11559_v19 = vmax.f32 %v11133_v11, %v7032_v43 }
 0x1d1   : > { %v8315_v55 = vmax.f32 %v8183_v14, 0.0  ;;  %3154 = vst.msk [vmem:[#allocation2 + $0x138] sm:$0xff] %vm1177_vm4, %v3022_v57  ;;  %9060 = vmatmul.msk.bf16.gmra.mxu0 %vm635_vm1, %v10121_v45  ;;  %v11597_v57 = vld [vmem:[%s10445_s25 + $0x100] sm:$0xff] }
 0x1d2   : > { %v8188_v20 = vadd.f32 %v11280_v50, %v8052_v22  ;;  %v4825_v34 = vld [vmem:[#allocation2 + $0x130] sm:$0xff] }
 0x1d3   : > { %v11556_v38 = vpop.f32.mrf.mxu3  ;;  %v8447_v2 = vpack.c.bf16 %v8315_v55, %v8315_v55  ;;  %v4957_v25 = vadd.f32 %v4825_v34, %v4552_v5  ;;  %v6362_v49 = vld [vmem:[#allocation2 + $0x128] sm:$0xff] }
 0x1d4   : > { %v8320_v3 = vmax.f32 %v8188_v20, 0.0  ;;  %v6494_v4 = vadd.f32 %v6362_v49, %v11496_v47  ;;  %v7660_v9 = vpop.permute.xlu1 %7659  ;;  %v7028_v63 = vpop.permute.xlu0 %7027  ;;  %v5710_v47 = vsel %vm5651_vm2, %v5707_v32, %v5709_v59 }
 0x1d5   : > { %8580 = vst.msk [vmem:[%s11306_s6 + $0x18] sm:$0xf] %vm8573_vm5, %v8447_v2  ;;  %v8048_v24 = vmax.f32 %v11095_v35, %v7660_v9  ;;  %v11568_v27 = vmax.f32 %v11100_v17, %v7028_v63  ;;  %7691 = vrot.lane.b32.xlu2 %v11559_v19, %s10398_s27  ;;  %v4554_v35 = vpop.f32.mrf.mxu2  ;;  %v3950_v17 = vsel %vm1778_vm3, %v3945_v52, %v11554_v54  ;;  %v6757_v15 = vld [vmem:[#allocation2 + $0x120] sm:$0xff]  ;;  %v10122_v52 = vld [vmem:[%s10445_s25 + $0xe8] sm:$0xff]  ;;  %v2015_v2 = vshrl.u32 %v11518_v39, 16 }
 0x1d6   : > { %v2621_v11 = vpop.f32.mrf.mxu1  ;;  %v8452_v43 = vpack.c.bf16 %v8320_v3, %v8320_v3  ;;  %5089 = vst.msk [vmem:[#allocation2 + $0x130] sm:$0xff] %vm1177_vm4, %v4957_v25  ;;  %v949_v45 = vpop.f32.mrf.mxu0  ;;  %v2891_v44 = vld [vmem:[#allocation2 + $0x140] sm:$0xff]  ;;  %v2019_v25 = vshll.u32 %v11591_v48, 16  ;;  %v3951_v9 = vshrl.u32 %v11526_v37, 16  ;;  %v3955_v63 = vshll.u32 %v11597_v57, 16 }
 0x1d7   : > { %6626 = vst.msk [vmem:[#allocation2 + $0x128] sm:$0xff] %vm1177_vm4, %v6494_v4  ;;  %v8184_v23 = vadd.f32 %v11280_v50, %v8048_v24  ;;  %v3023_v5 = vadd.f32 %v2891_v44, %v2621_v11  ;;  %7687 = vrot.lane.b32.xlu0 %v11568_v27, %s10398_s27  ;;  %v2017_v37 = vor.u32 %v2015_v2, %v11548_v36 }
 0x1d8   : > { %8585 = vst.msk [vmem:[%s11306_s6 + $0x2c] sm:$0xf] %vm8573_vm5, %v8452_v43  ;;  %v4826_v28 = vld [vmem:[#allocation2 + $0x138] sm:$0xff]  ;;  %10053 = vmatmul.msk.bf16.gmra.mxu3 %vm635_vm1, %v5710_v47  ;;  %v11621_v11 = vrot.slane %v2019_v25, 1  ;;  %v11624_v44 = vrot.slane %v3955_v63, 1 }
 0x1d9   : > { %9391 = vmatmul.msk.bf16.gmra.mxu1 %vm635_vm1, %v2014_v7  ;;  %v8316_v32 = vmax.f32 %v8184_v23, 0.0  ;;  %1219 = vst.msk [vmem:[#allocation2 + $0x148] sm:$0xff] %vm1177_vm4, %v949_v45  ;;  %v4958_v6 = vadd.f32 %v4826_v28, %v4554_v35  ;;  %9722 = vmatmul.msk.bf16.gmra.mxu2 %vm635_vm1, %v3950_v17  ;;  %v11612_v7 = vld [vmem:[%s10445_s25 + $0x100] sm:$0xff]  ;;  %v3953_v45 = vor.u32 %v3951_v9, %v11554_v54 }
 0x1da   : > { %3155 = vst.msk [vmem:[#allocation2 + $0x140] sm:$0xff] %vm1177_vm4, %v3023_v5  ;;  %v5711_v17 = vrot.slane %v11612_v7, 1  ;;  %v2022_v54 = vsel %vm1778_vm3, %v2017_v37, %v11621_v11 }
 0x1db   : > { %v11594_v14 = vpop.f32.mrf.mxu3  ;;  %v8448_v1 = vpack.c.bf16 %v8316_v32, %v8316_v32  ;;  %5090 = vst.msk [vmem:[#allocation2 + $0x138] sm:$0xff] %vm1177_vm4, %v4958_v6 }
 0x1dc   : > { %v7030_v22 = vpop.permute.xlu1 %7029 }
 0x1dd   : > { %8581 = vst.msk [vmem:[%s11306_s6 + $0x1c] sm:$0xf] %vm8573_vm5, %v8448_v1  ;;  %v6363_v55 = vld [vmem:[#allocation2 + $0x130] sm:$0xff]  ;;  %v11603_v20 = vmax.f32 %v11116_v58, %v7030_v22  ;;  %v4557_v4 = vpop.f32.mrf.mxu2 }
 0x1de   : > { %v2623_v34 = vpop.f32.mrf.mxu1  ;;  %v6495_v49 = vadd.f32 %v6363_v55, %v11523_v26  ;;  %v952_v3 = vpop.f32.mrf.mxu0  ;;  %v11636_v1 = vld [vmem:[#allocation2 + $0x128] sm:$0xff] }
 0x1df   : > { %1220 = vst.msk [vmem:[#allocation2 + $0x150] sm:$0xff] %vm1177_vm4, %v952_v3  ;;  %v7038_v58 = vpop.permute.xlu2 %7037  ;;  %7689 = vrot.lane.b32.xlu1 %v11603_v20, %s10398_s27  ;;  %7057 = vrot.lane.b32.xlu0 %v6757_v15, %s10397_s26  ;;  %v5712_v15 = vsel %vm5651_vm2, %v5709_v59, %v5711_v17  ;;  %v11659_v59 = vld [vmem:[%s10445_s25 + $0xf8] sm:$0xff] }
 0x1e0   : > { %6627 = vst.msk [vmem:[#allocation2 + $0x130] sm:$0xff] %vm1177_vm4, %v6495_v49  ;;  %v2892_v39 = vld [vmem:[#allocation2 + $0x148] sm:$0xff] }
 0x1e1   : > { %v3024_v26 = vadd.f32 %v2892_v39, %v2623_v34  ;;  %v4827_v24 = vld [vmem:[#allocation2 + $0x140] sm:$0xff]  ;;  %9061 = vmatmul.msk.bf16.gmra.mxu0 %vm635_vm1, %v10122_v52 }
 0x1e2   : > { %v4959_v47 = vadd.f32 %v4827_v24, %v4557_v4  ;;  %v6364_v43 = vld [vmem:[#allocation2 + $0x138] sm:$0xff]  ;;  %v11665_v4 = vld [vmem:[%s10445_s25 + $0x108] sm:$0xff] }
 0x1e3   : > { %v11626_v35 = vpop.f32.mrf.mxu3  ;;  %3156 = vst.msk [vmem:[#allocation2 + $0x148] sm:$0xff] %vm1177_vm4, %v3024_v26  ;;  %v6496_v23 = vadd.f32 %v6364_v43, %v11556_v38  ;;  %v3958_v38 = vsel %vm1778_vm3, %v3953_v45, %v11624_v44 }
 0x1e4   : > { %5091 = vst.msk [vmem:[#allocation2 + $0x140] sm:$0xff] %vm1177_vm4, %v4959_v47  ;;  %v7664_v5 = vpop.permute.xlu0 %7663 }
 0x1e5   : > { %6628 = vst.msk [vmem:[#allocation2 + $0x138] sm:$0xff] %vm1177_vm4, %v6496_v23  ;;  %v8050_v36 = vmax.f32 %v11148_v60, %v7664_v5  ;;  %v4559_v22 = vpop.f32.mrf.mxu2  ;;  %v10123_v23 = vld [vmem:[%s10445_s25 + $0xf0] sm:$0xff]  ;;  %v2023_v5 = vshrl.u32 %v11591_v48, 16 }
 0x1e6   : > { %v2626_v28 = vpop.f32.mrf.mxu1  ;;  %v954_v32 = vpop.f32.mrf.mxu0  ;;  %v2893_v6 = vld [vmem:[#allocation2 + $0x150] sm:$0xff] }
 0x1e7   : > { %v8186_v60 = vadd.f32 %v11280_v50, %v8050_v36  ;;  %v11646_v55 = vld [vmem:[#allocation2 + $0x130] sm:$0xff]  ;;  %1221 = vst.msk [vmem:[#allocation2 + $0x158] sm:$0xff] %vm1177_vm4, %v954_v32  ;;  %v3025_v34 = vadd.f32 %v2893_v6, %v2626_v28  ;;  %v7674_v52 = vpop.permute.xlu2 %7673  ;;  %7059 = vrot.lane.b32.xlu1 %v11636_v1, %s10397_s26  ;;  %v2027_v36 = vshll.u32 %v11659_v59, 16  ;;  %v11678_v28 = vmax.f32 %v11211_v31, %v7038_v58 }
 0x1e8   : > { %7061 = vrot.lane.b32.xlu2 %v11646_v55, %s10397_s26  ;;  %v8055_v2 = vmax.f32 %v11242_v29, %v7674_v52  ;;  %10054 = vmatmul.msk.bf16.gmra.mxu3 %vm635_vm1, %v5712_v15  ;;  %v2025_v15 = vor.u32 %v2023_v5, %v11621_v11 }
 0x1e9   : > { %9392 = vmatmul.msk.bf16.gmra.mxu1 %vm635_vm1, %v2022_v54  ;;  %v8318_v10 = vmax.f32 %v8186_v60, 0.0  ;;  %3157 = vst.msk [vmem:[#allocation2 + $0x150] sm:$0xff] %vm1177_vm4, %v3025_v34  ;;  %9723 = vmatmul.msk.bf16.gmra.mxu2 %vm635_vm1, %v3958_v38  ;;  %v11697_v60 = vrot.slane %v2027_v36, 1 }
 0x1ea   : > { %v8191_v25 = vadd.f32 %v11280_v50, %v8055_v2  ;;  %v4828_v49 = vld [vmem:[#allocation2 + $0x148] sm:$0xff] }
 0x1eb   : > { %v11662_v3 = vpop.f32.mrf.mxu3  ;;  %v8450_v29 = vpack.c.bf16 %v8318_v10, %v8318_v10  ;;  %v4960_v9 = vadd.f32 %v4828_v49, %v4559_v22  ;;  %v6365_v63 = vld [vmem:[#allocation2 + $0x140] sm:$0xff]  ;;  %v11684_v22 = vld [vmem:[%s10445_s25 + $0x108] sm:$0xff] }
 0x1ec   : > { %v8323_v39 = vmax.f32 %v8191_v25, 0.0  ;;  %v6497_v26 = vadd.f32 %v6365_v63, %v11594_v14  ;;  %v7666_v24 = vpop.permute.xlu1 %7665  ;;  %v7034_v37 = vpop.permute.xlu0 %7033  ;;  %v5713_v10 = vrot.slane %v11684_v22, 1 }
 0x1ed   : > { %8583 = vst.msk [vmem:[%s11306_s6 + $0x24] sm:$0xf] %vm8573_vm5, %v8450_v29  ;;  %v8051_v47 = vmax.f32 %v11174_v33, %v7666_v24  ;;  %v11672_v43 = vmax.f32 %v11170_v21, %v7034_v37  ;;  %v4562_v6 = vpop.f32.mrf.mxu2  ;;  %v3959_v33 = vshrl.u32 %v11597_v57, 16  ;;  %v3963_v21 = vshll.u32 %v11665_v4, 16 }
 0x1ee   : > { %v2628_v45 = vpop.f32.mrf.mxu1  ;;  %v8455_v14 = vpack.c.bf16 %v8323_v39, %v8323_v39  ;;  %5092 = vst.msk [vmem:[#allocation2 + $0x148] sm:$0xff] %vm1177_vm4, %v4960_v9  ;;  %v957_v54 = vpop.f32.mrf.mxu0  ;;  %v2894_v32 = vld [vmem:[#allocation2 + $0x158] sm:$0xff] }
 0x1ef   : > { %6629 = vst.msk [vmem:[#allocation2 + $0x140] sm:$0xff] %vm1177_vm4, %v6497_v26  ;;  %v8187_v48 = vadd.f32 %v11280_v50, %v8051_v47  ;;  %v3026_v38 = vadd.f32 %v2894_v32, %v2628_v45  ;;  %7693 = vrot.lane.b32.xlu0 %v11672_v43, %s10398_s27  ;;  %v3961_v34 = vor.u32 %v3959_v33, %v11624_v44  ;;  %v11701_v52 = vrot.slane %v3963_v21, 1  ;;  %v11715_v26 = vld [vmem:[#allocation2 + $0x138] sm:$0xff] }
 0x1f0   : > { %8588 = vst.msk [vmem:[%s11306_s6 + $0x38] sm:$0xf] %vm8573_vm5, %v8455_v14  ;;  %7697 = vrot.lane.b32.xlu2 %v11678_v28, %s10398_s27  ;;  %v4829_v31 = vld [vmem:[#allocation2 + $0x150] sm:$0xff]  ;;  %v2030_v44 = vsel %vm1778_vm3, %v2025_v15, %v11697_v60 }
 0x1f1   : > { %v8319_v57 = vmax.f32 %v8187_v48, 0.0  ;;  %1222 = vst.msk [vmem:[#allocation2 + $0x160] sm:$0xff] %vm1177_vm4, %v957_v54  ;;  %v4961_v58 = vadd.f32 %v4829_v31, %v4562_v6  ;;  %9062 = vmatmul.msk.bf16.gmra.mxu0 %vm635_vm1, %v10123_v23  ;;  %v3966_v37 = vsel %vm1778_vm3, %v3961_v34, %v11701_v52  ;;  %v11741_v14 = vld [vmem:[%s10445_s25 + $0x110] sm:$0xff]  ;;  %v10124_v48 = vld [vmem:[%s10445_s25 + $0xf8] sm:$0xff]  ;;  %v3967_v34 = vshrl.u32 %v11665_v4, 16 }
 0x1f2   : > { %3158 = vst.msk [vmem:[#allocation2 + $0x158] sm:$0xff] %vm1177_vm4, %v3026_v38  ;;  %v2031_v38 = vshrl.u32 %v11659_v59, 16 }
 0x1f3   : > { %v11703_v2 = vpop.f32.mrf.mxu3  ;;  %v8451_v25 = vpack.c.bf16 %v8319_v57, %v8319_v57  ;;  %5093 = vst.msk [vmem:[#allocation2 + $0x150] sm:$0xff] %vm1177_vm4, %v4961_v58 }
 0x1f4   : > { %v7036_v49 = vpop.permute.xlu1 %7035 }
 0x1f5   : > { %8584 = vst.msk [vmem:[%s11306_s6 + $0x28] sm:$0xf] %vm8573_vm5, %v8451_v25  ;;  %v6366_v29 = vld [vmem:[#allocation2 + $0x148] sm:$0xff]  ;;  %v11710_v11 = vmax.f32 %v11204_v16, %v7036_v49  ;;  %v4564_v24 = vpop.f32.mrf.mxu2  ;;  %v5714_v16 = vsel %vm5651_vm2, %v5711_v17, %v5713_v10  ;;  %v11736_v17 = vld [vmem:[%s10445_s25 + $0x100] sm:$0xff]  ;;  %v11754_v25 = vld [vmem:[%s10445_s25 + $0x110] sm:$0xff] }
 0x1f6   : > { %v2631_v9 = vpop.f32.mrf.mxu1  ;;  %v6498_v63 = vadd.f32 %v6366_v29, %v11626_v35  ;;  %v959_v39 = vpop.f32.mrf.mxu0  ;;  %v6761_v6 = vld [vmem:[#allocation2 + $0x140] sm:$0xff]  ;;  %v2035_v31 = vshll.u32 %v11736_v17, 16 }
 0x1f7   : > { %1223 = vst.msk [vmem:[#allocation2 + $0x168] sm:$0xff] %vm1177_vm4, %v959_v39  ;;  %v11725_v47 = vpop.permute.xlu2 %7043  ;;  %7695 = vrot.lane.b32.xlu1 %v11710_v11, %s10398_s27  ;;  %7063 = vrot.lane.b32.xlu0 %v11715_v26, %s10397_s26 }
 0x1f8   : > { %6630 = vst.msk [vmem:[#allocation2 + $0x148] sm:$0xff] %vm1177_vm4, %v6498_v63  ;;  %v2895_v35 = vld [vmem:[#allocation2 + $0x160] sm:$0xff]  ;;  %10055 = vmatmul.msk.bf16.gmra.mxu3 %vm635_vm1, %v5714_v16  ;;  %v11767_v63 = vrot.slane %v2035_v31, 1 }
 0x1f9   : > { %9393 = vmatmul.msk.bf16.gmra.mxu1 %vm635_vm1, %v2030_v44  ;;  %v3027_v45 = vadd.f32 %v2895_v35, %v2631_v9  ;;  %v4830_v7 = vld [vmem:[#allocation2 + $0x158] sm:$0xff]  ;;  %9724 = vmatmul.msk.bf16.gmra.mxu2 %vm635_vm1, %v3966_v37  ;;  %v2033_v44 = vor.u32 %v2031_v38, %v11697_v60  ;;  %v3969_v37 = vor.u32 %v3967_v34, %v11701_v52 }
 0x1fa   : > { %v4962_v23 = vadd.f32 %v4830_v7, %v4564_v24  ;;  %v6367_v5 = vld [vmem:[#allocation2 + $0x150] sm:$0xff]  ;;  %v11816_v34 = vld [vmem:[%s10445_s25 + $0x118] sm:$0xff] }
 0x1fb   : > { %v11738_v36 = vpop.f32.mrf.mxu3  ;;  %3159 = vst.msk [vmem:[#allocation2 + $0x160] sm:$0xff] %vm1177_vm4, %v3027_v45  ;;  %v6499_v54 = vadd.f32 %v6367_v5, %v11662_v3  ;;  %v3971_v3 = vshll.u32 %v11741_v14, 16 }
 0x1fc   : > { %5094 = vst.msk [vmem:[#allocation2 + $0x158] sm:$0xff] %vm1177_vm4, %v4962_v23  ;;  %v7670_v32 = vpop.permute.xlu0 %7669 }
 0x1fd   : > { %6631 = vst.msk [vmem:[#allocation2 + $0x150] sm:$0xff] %vm1177_vm4, %v6499_v54  ;;  %v8053_v33 = vmax.f32 %v11226_v13, %v7670_v32  ;;  %v4567_v15 = vpop.f32.mrf.mxu2  ;;  %v11771_v16 = vrot.slane %v3971_v3, 1 }
 0x1fe   : > { %v2633_v21 = vpop.f32.mrf.mxu1  ;;  %v962_v57 = vpop.f32.mrf.mxu0  ;;  %v2896_v58 = vld [vmem:[#allocation2 + $0x168] sm:$0xff] }
 0x1ff   : > { %v8189_v49 = vadd.f32 %v11280_v50, %v8053_v33  ;;  %v11757_v29 = vld [vmem:[#allocation2 + $0x148] sm:$0xff]  ;;  %1224 = vst.msk [vmem:[#allocation2 + $0x170] sm:$0xff] %vm1177_vm4, %v962_v57  ;;  %v3028_v13 = vadd.f32 %v2896_v58, %v2633_v21  ;;  %v7680_v9 = vpop.permute.xlu2 %7679  ;;  %7065 = vrot.lane.b32.xlu1 %v6761_v6, %s10397_s26  ;;  %v2038_v21 = vsel %vm1778_vm3, %v2033_v44, %v11767_v63 }
 0x200   : > { %7067 = vrot.lane.b32.xlu2 %v11757_v29, %s10397_s26  ;;  %v8058_v59 = vmax.f32 %v11346_v46, %v7680_v9  ;;  %v5715_v46 = vrot.slane %v11754_v25, 1 }
 0x201   : > { %v8321_v4 = vmax.f32 %v8189_v49, 0.0  ;;  %3160 = vst.msk [vmem:[#allocation2 + $0x168] sm:$0xff] %vm1177_vm4, %v3028_v13  ;;  %9063 = vmatmul.msk.bf16.gmra.mxu0 %vm635_vm1, %v10124_v48  ;;  %v11787_v48 = vmax.f32 %v11316_v53, %v11725_v47 }
 0x202   : > { %v8194_v39 = vadd.f32 %v11280_v50, %v8058_v59  ;;  %v4831_v24 = vld [vmem:[#allocation2 + $0x160] sm:$0xff] }
 0x203   : > { %v11773_v35 = vpop.f32.mrf.mxu3  ;;  %v8453_v45 = vpack.c.bf16 %v8321_v4, %v8321_v4  ;;  %v4963_v7 = vadd.f32 %v4831_v24, %v4567_v15  ;;  %v6368_v23 = vld [vmem:[#allocation2 + $0x158] sm:$0xff]  ;;  %v10370_v59 = vld [vmem:[#allocation2 + $0xe0] sm:$0xff]  ;;  %v2039_v24 = vshrl.u32 %v11736_v17, 16 }
 0x204   : > { %v8326_v5 = vmax.f32 %v8194_v39, 0.0  ;;  %v6500_v54 = vadd.f32 %v6368_v23, %v11703_v2  ;;  %v7672_v60 = vpop.permute.xlu1 %7671  ;;  %v7040_v32 = vpop.permute.xlu0 %7039  ;;  %v6763_v13 = vld [vmem:[#allocation2 + $0x150] sm:$0xff]  ;;  %v10125_v39 = vld [vmem:[%s10445_s25 + $0x100] sm:$0xff] }
 0x205   : > { %8586 = vst.msk [vmem:[%s11306_s6 + $0x30] sm:$0xf] %vm8573_vm5, %v8453_v45  ;;  %v8054_v6 = vmax.f32 %v11258_v61, %v7672_v60  ;;  %v11781_v52 = vmax.f32 %v11263_v30, %v7040_v32  ;;  %v4569_v57 = vpop.f32.mrf.mxu2  ;;  %v3974_v61 = vsel %vm1778_vm3, %v3969_v37, %v11771_v16  ;;  %v5716_v30 = vsel %vm5651_vm2, %v5713_v10, %v5715_v46  ;;  %v11830_v60 = vld [vmem:[%s10445_s25 + $0x118] sm:$0xff] }
 0x206   : > { %v2636_v33 = vpop.f32.mrf.mxu1  ;;  %v8458_v38 = vpack.c.bf16 %v8326_v5, %v8326_v5  ;;  %5095 = vst.msk [vmem:[#allocation2 + $0x160] sm:$0xff] %vm1177_vm4, %v4963_v7  ;;  %v964_v2 = vpop.f32.mrf.mxu0  ;;  %v2897_v31 = vld [vmem:[#allocation2 + $0x170] sm:$0xff]  ;;  %v3975_v5 = vshrl.u32 %v11741_v14, 16  ;;  %v2041_v14 = vor.u32 %v2039_v24, %v11767_v63  ;;  %v11881_v24 = vld [vmem:[%s10445_s25 + $0x120] sm:$0xff] }
 0x207   : > { %6632 = vst.msk [vmem:[#allocation2 + $0x158] sm:$0xff] %vm1177_vm4, %v6500_v54  ;;  %v8190_v53 = vadd.f32 %v11280_v50, %v8054_v6  ;;  %v3029_v47 = vadd.f32 %v2897_v31, %v2636_v33  ;;  %7699 = vrot.lane.b32.xlu0 %v11781_v52, %s10398_s27  ;;  %v11810_v50 = vld [vmem:[%s10445_s25 + $0x108] sm:$0xff]  ;;  %v3979_v54 = vshll.u32 %v11816_v34, 16 }
 0x208   : > { %8591 = vst.msk [vmem:[%s11306_s6 + $0x44] sm:$0xf] %vm8573_vm5, %v8458_v38  ;;  %7703 = vrot.lane.b32.xlu2 %v11787_v48, %s10398_s27  ;;  %v4832_v58 = vld [vmem:[#allocation2 + $0x168] sm:$0xff]  ;;  %10056 = vmatmul.msk.bf16.gmra.mxu3 %vm635_vm1, %v5716_v30  ;;  %v2043_v37 = vshll.u32 %v11810_v50, 16 }
 0x209   : > { %9394 = vmatmul.msk.bf16.gmra.mxu1 %vm635_vm1, %v2038_v21  ;;  %v8322_v22 = vmax.f32 %v8190_v53, 0.0  ;;  %1225 = vst.msk [vmem:[#allocation2 + $0x178] sm:$0xff] %vm1177_vm4, %v964_v2  ;;  %v4964_v10 = vadd.f32 %v4832_v58, %v4569_v57  ;;  %9725 = vmatmul.msk.bf16.gmra.mxu2 %vm635_vm1, %v3974_v61  ;;  %v3977_v2 = vor.u32 %v3975_v5, %v11771_v16  ;;  %v11842_v31 = vrot.slane %v3979_v54, 1  ;;  %v10126_v54 = vld [vmem:[%s10445_s25 + $0x108] sm:$0xff] }
 0x20a   : > { %3161 = vst.msk [vmem:[#allocation2 + $0x170] sm:$0xff] %vm1177_vm4, %v3029_v47  ;;  %v11839_v33 = vrot.slane %v2043_v37, 1  ;;  %v5717_v61 = vrot.slane %v11830_v60, 1  ;;  %v11946_v60 = vld [vmem:[%s10445_s25 + $0x118] sm:$0xff] }
 0x20b   : > { %v11813_v15 = vpop.f32.mrf.mxu3  ;;  %v8454_v3 = vpack.c.bf16 %v8322_v22, %v8322_v22  ;;  %5096 = vst.msk [vmem:[#allocation2 + $0x168] sm:$0xff] %vm1177_vm4, %v4964_v10  ;;  %v3982_v10 = vsel %vm1778_vm3, %v3977_v2, %v11842_v31 }
 0x20c   : > { %v7042_v49 = vpop.permute.xlu1 %7041  ;;  %v2046_v53 = vsel %vm1778_vm3, %v2041_v14, %v11839_v33 }
 0x20d   : > { %8587 = vst.msk [vmem:[%s11306_s6 + $0x34] sm:$0xf] %vm8573_vm5, %v8454_v3  ;;  %v6369_v9 = vld [vmem:[#allocation2 + $0x160] sm:$0xff]  ;;  %v11821_v4 = vmax.f32 %v10370_v59, %v7042_v49  ;;  %v4572_v23 = vpop.f32.mrf.mxu2 }
 0x20e   : > { %v2638_v44 = vpop.f32.mrf.mxu1  ;;  %v6501_v45 = vadd.f32 %v6369_v9, %v11738_v36  ;;  %v967_v7 = vpop.f32.mrf.mxu0  ;;  %v11853_v58 = vld [vmem:[#allocation2 + $0x158] sm:$0xff] }
 0x20f   : > { %1226 = vst.msk [vmem:[#allocation2 + $0x180] sm:$0xff] %vm1177_vm4, %v967_v7  ;;  %7701 = vrot.lane.b32.xlu1 %v11821_v4, %s10398_s27  ;;  %7069 = vrot.lane.b32.xlu0 %v6763_v13, %s10397_s26  ;;  %v11886_v7 = vld [vmem:[%s14785_s2] ss:$0 sm:$0xff] }
 0x210   : > { %6633 = vst.msk [vmem:[#allocation2 + $0x160] sm:$0xff] %vm1177_vm4, %v6501_v45  ;;  %v2898_v17 = vld [vmem:[#allocation2 + $0x178] sm:$0xff] }
 0x211   : > { %v3030_v32 = vadd.f32 %v2898_v17, %v2638_v44  ;;  %v7050_v36 = vpop.permute.xlu2 %7049  ;;  %v4833_v6 = vld [vmem:[#allocation2 + $0x170] sm:$0xff]  ;;  %9064 = vmatmul.msk.bf16.gmra.mxu0 %vm635_vm1, %v10125_v39  ;;  %v2047_v17 = vshrl.u32 %v11810_v50, 16 }
 0x212   : > { %v4965_v21 = vadd.f32 %v4833_v6, %v4572_v23  ;;  %v6370_v38 = vld [vmem:[#allocation2 + $0x168] sm:$0xff]  ;;  %v3983_v6 = vshrl.u32 %v11816_v34, 16  ;;  %v11897_v14 = vmax.f32 %v11431_v18, %v7050_v36 }
 0x213   : > { %v11844_v57 = vpop.f32.mrf.mxu3  ;;  %3162 = vst.msk [vmem:[#allocation2 + $0x178] sm:$0xff] %vm1177_vm4, %v3030_v32  ;;  %v6502_v30 = vadd.f32 %v6370_v38, %v11773_v35  ;;  %v5718_v35 = vsel %vm5651_vm2, %v5715_v46, %v5717_v61  ;;  %v11874_v46 = vld [vmem:[%s10445_s25 + $0x110] sm:$0xff] }
 0x214   : > { %5097 = vst.msk [vmem:[#allocation2 + $0x170] sm:$0xff] %vm1177_vm4, %v4965_v21  ;;  %v2051_v32 = vshll.u32 %v11874_v46, 16 }
 0x215   : > { %6634 = vst.msk [vmem:[#allocation2 + $0x168] sm:$0xff] %vm1177_vm4, %v6502_v30  ;;  %v4574_v22 = vpop.f32.mrf.mxu2 }
 0x216   : > { %v2641_v63 = vpop.f32.mrf.mxu1  ;;  %v969_v47 = vpop.f32.mrf.mxu0  ;;  %v2899_v16 = vld [vmem:[#allocation2 + $0x180] sm:$0xff] }
 0x217   : > { %v11862_v3 = vld [vmem:[#allocation2 + $0x160] sm:$0xff]  ;;  %1227 = vst.msk [vmem:[#allocation2 + $0x188] sm:$0xff] %vm1177_vm4, %v969_v47  ;;  %v3031_v49 = vadd.f32 %v2899_v16, %v2641_v63  ;;  %7071 = vrot.lane.b32.xlu1 %v11853_v58, %s10397_s26  ;;  %v3987_v63 = vshll.u32 %v11881_v24, 16 }
 0x218   : > { %7073 = vrot.lane.b32.xlu2 %v11862_v3, %s10397_s26  ;;  %10057 = vmatmul.msk.bf16.gmra.mxu3 %vm635_vm1, %v5718_v35  ;;  %v11910_v35 = vrot.slane %v2051_v32, 1 }
 0x219   : > { %9395 = vmatmul.msk.bf16.gmra.mxu1 %vm635_vm1, %v2046_v53  ;;  %3163 = vst.msk [vmem:[#allocation2 + $0x180] sm:$0xff] %vm1177_vm4, %v3031_v49  ;;  %v7686_v13 = vpop.permute.xlu2 %7685  ;;  %v7676_v25 = vpop.permute.xlu0 %7675  ;;  %9726 = vmatmul.msk.bf16.gmra.mxu2 %vm635_vm1, %v3982_v10  ;;  %v11902_v53 = vld [vmem:[%s10445_s25 + $0x120] sm:$0xff]  ;;  %v2049_v10 = vor.u32 %v2047_v17, %v11839_v33  ;;  %v3985_v49 = vor.u32 %v3983_v6, %v11842_v31 }
 0x21a   : > { %v8061_v9 = vmax.f32 %v11461_v0, %v7686_v13  ;;  %v4834_v59 = vld [vmem:[#allocation2 + $0x178] sm:$0xff]  ;;  %v8056_v44 = vmax.f32 %v11359_v62, %v7676_v25  ;;  %v10372_v25 = vld [vmem:[#allocation2 + $0xf0] sm:$0xff] }
 0x21b   : > { %v11878_v39 = vpop.f32.mrf.mxu3  ;;  %v4966_v37 = vadd.f32 %v4834_v59, %v4574_v22  ;;  %v6371_v45 = vld [vmem:[#allocation2 + $0x170] sm:$0xff]  ;;  %v11918_v59 = vrot.slane %v3987_v63, 1  ;;  %v11956_v63 = vld [vmem:[%s10445_s25 + $0x128] sm:$0xff] }
 0x21c   : > { %v8197_v23 = vadd.f32 %v11886_v7, %v8061_v9  ;;  %v8192_v5 = vadd.f32 %v11886_v7, %v8056_v44  ;;  %v6503_v0 = vadd.f32 %v6371_v45, %v11813_v15 }
 0x21d   : > { %5098 = vst.msk [vmem:[#allocation2 + $0x178] sm:$0xff] %vm1177_vm4, %v4966_v37  ;;  %v4577_v15 = vpop.f32.mrf.mxu2  ;;  %v5719_v37 = vrot.slane %v11902_v53, 1  ;;  %v3990_v17 = vsel %vm1778_vm3, %v3985_v49, %v11918_v59 }
 0x21e   : > { %v2643_v62 = vpop.f32.mrf.mxu1  ;;  %v8329_v21 = vmax.f32 %v8197_v23, 0.0  ;;  %v8324_v38 = vmax.f32 %v8192_v5, 0.0  ;;  %6635 = vst.msk [vmem:[#allocation2 + $0x170] sm:$0xff] %vm1177_vm4, %v6503_v0  ;;  %v972_v2 = vpop.f32.mrf.mxu0  ;;  %v2900_v30 = vld [vmem:[#allocation2 + $0x188] sm:$0xff]  ;;  %v2054_v23 = vsel %vm1778_vm3, %v2049_v10, %v11910_v35 }
 0x21f   : > { %1228 = vst.msk [vmem:[#allocation2 + $0x190] sm:$0xff] %vm1177_vm4, %v972_v2  ;;  %v3032_v50 = vadd.f32 %v2900_v30, %v2643_v62  ;;  %v5720_v32 = vsel %vm5651_vm2, %v5717_v61, %v5719_v37 }
 0x220   : > { %v8461_v47 = vpack.c.bf16 %v8329_v21, %v8329_v21  ;;  %v8456_v34 = vpack.c.bf16 %v8324_v38, %v8324_v38  ;;  %7709 = vrot.lane.b32.xlu2 %v11897_v14, %s10398_s27  ;;  %v4835_v18 = vld [vmem:[#allocation2 + $0x180] sm:$0xff] }
 0x221   : > { %3164 = vst.msk [vmem:[#allocation2 + $0x188] sm:$0xff] %vm1177_vm4, %v3032_v50  ;;  %v4967_v36 = vadd.f32 %v4835_v18, %v4577_v15  ;;  %v7678_v16 = vpop.permute.xlu1 %7677  ;;  %v7046_v22 = vpop.permute.xlu0 %7045  ;;  %9065 = vmatmul.msk.bf16.gmra.mxu0 %vm635_vm1, %v10126_v54  ;;  %v10127_v18 = vld [vmem:[%s10445_s25 + $0x110] sm:$0xff] }
 0x222   : > { %8594 = vst.msk [vmem:[%s11306_s6 + $0x50] sm:$0xf] %vm8573_vm5, %v8461_v47  ;;  %v8057_v13 = vmax.f32 %v11391_v42, %v7678_v16  ;;  %v11916_v9 = vmax.f32 %v10372_v25, %v7046_v22  ;;  %v11959_v47 = vld [vmem:[#allocation2 + $0x168] sm:$0xff]  ;;  %v2059_v16 = vshll.u32 %v11946_v60, 16  ;;  %v3991_v22 = vshrl.u32 %v11881_v24, 16 }
 0x223   : > { %v11920_v44 = vpop.f32.mrf.mxu3  ;;  %8589 = vst.msk [vmem:[%s11306_s6 + $0x3c] sm:$0xf] %vm8573_vm5, %v8456_v34  ;;  %v11975_v25 = vld [vmem:[%s10445_s25 + $0x128] sm:$0xff] }
 0x224   : > { %5099 = vst.msk [vmem:[#allocation2 + $0x180] sm:$0xff] %vm1177_vm4, %v4967_v36  ;;  %v8193_v33 = vadd.f32 %v11886_v7, %v8057_v13  ;;  %v6372_v31 = vld [vmem:[#allocation2 + $0x178] sm:$0xff]  ;;  %7705 = vrot.lane.b32.xlu0 %v11916_v9, %s10398_s27  ;;  %v2055_v36 = vshrl.u32 %v11874_v46, 16  ;;  %v3995_v13 = vshll.u32 %v11956_v63, 16 }
 0x225   : > { %v6504_v42 = vadd.f32 %v6372_v31, %v11844_v57  ;;  %v4579_v54 = vpop.f32.mrf.mxu2 }
 0x226   : > { %v2646_v45 = vpop.f32.mrf.mxu1  ;;  %v8325_v5 = vmax.f32 %v8193_v33, 0.0  ;;  %v974_v0 = vpop.f32.mrf.mxu0  ;;  %v2901_v62 = vld [vmem:[#allocation2 + $0x190] sm:$0xff] }
 0x227   : > { %6636 = vst.msk [vmem:[#allocation2 + $0x178] sm:$0xff] %vm1177_vm4, %v6504_v42  ;;  %v3033_v57 = vadd.f32 %v2901_v62, %v2646_v45  ;;  %v7056_v6 = vpop.permute.xlu2 %7055  ;;  %v11985_v62 = vrot.slane %v2059_v16, 1 }
 0x228   : > { %v8457_v21 = vpack.c.bf16 %v8325_v5, %v8325_v5  ;;  %1229 = vst.msk [vmem:[#allocation2 + $0x198] sm:$0xff] %vm1177_vm4, %v974_v0  ;;  %v4836_v38 = vld [vmem:[#allocation2 + $0x188] sm:$0xff]  ;;  %10058 = vmatmul.msk.bf16.gmra.mxu3 %vm635_vm1, %v5720_v32  ;;  %v11982_v5 = vld [vmem:[#allocation2 + $0x170] sm:$0xff]  ;;  %v2057_v0 = vor.u32 %v2055_v36, %v11910_v35 }
 0x229   : > { %9396 = vmatmul.msk.bf16.gmra.mxu1 %vm635_vm1, %v2054_v23  ;;  %3165 = vst.msk [vmem:[#allocation2 + $0x190] sm:$0xff] %vm1177_vm4, %v3033_v57  ;;  %v4968_v2 = vadd.f32 %v4836_v38, %v4579_v54  ;;  %v7048_v30 = vpop.permute.xlu1 %7047  ;;  %9727 = vmatmul.msk.bf16.gmra.mxu2 %vm635_vm1, %v3990_v17  ;;  %v3993_v54 = vor.u32 %v3991_v22, %v11918_v59  ;;  %v11991_v57 = vrot.slane %v3995_v13, 1  ;;  %v5721_v38 = vrot.slane %v11975_v25, 1  ;;  %v12097_v25 = vld [vmem:[%s10445_s25 + $0x128] sm:$0xff] }
 0x22a   : > { %8590 = vst.msk [vmem:[%s11306_s6 + $0x40] sm:$0xf] %vm8573_vm5, %v8457_v21  ;;  %v11951_v61 = vmax.f32 %v11433_v41, %v7048_v30 }
 0x22b   : > { %v11953_v15 = vpop.f32.mrf.mxu3  ;;  %5100 = vst.msk [vmem:[#allocation2 + $0x188] sm:$0xff] %vm1177_vm4, %v4968_v2  ;;  %v6373_v50 = vld [vmem:[#allocation2 + $0x180] sm:$0xff] }
 0x22c   : > { %v6505_v34 = vadd.f32 %v6373_v50, %v11878_v39  ;;  %7707 = vrot.lane.b32.xlu1 %v11951_v61, %s10398_s27  ;;  %7075 = vrot.lane.b32.xlu0 %v11959_v47, %s10397_s26 }
 0x22d   : > { %v4582_v39 = vpop.f32.mrf.mxu2 }
 0x22e   : > { %v2648_v41 = vpop.f32.mrf.mxu1  ;;  %6637 = vst.msk [vmem:[#allocation2 + $0x180] sm:$0xff] %vm1177_vm4, %v6505_v34  ;;  %v11971_v10 = vld [vmem:[#allocation2 + $0x178] sm:$0xff]  ;;  %v977_v49 = vpop.f32.mrf.mxu0 }
 0x22f   : > { %7079 = vrot.lane.b32.xlu2 %v11971_v10, %s10397_s26  ;;  %1230 = vst.msk [vmem:[#allocation2 + $0x1a0] sm:$0xff] %vm1177_vm4, %v977_v49  ;;  %v2902_v46 = vld [vmem:[#allocation2 + $0x198] sm:$0xff]  ;;  %v7692_v33 = vpop.permute.xlu2 %7691  ;;  %v3998_v49 = vsel %vm1778_vm3, %v3993_v54, %v11991_v57 }
 0x230   : > { %v3034_v31 = vadd.f32 %v2902_v46, %v2648_v41  ;;  %v8064_v24 = vmax.f32 %v11559_v19, %v7692_v33  ;;  %v4837_v42 = vld [vmem:[#allocation2 + $0x190] sm:$0xff]  ;;  %v2062_v41 = vsel %vm1778_vm3, %v2057_v0, %v11985_v62  ;;  %v12026_v46 = vld [vmem:[%s10445_s25 + $0x120] sm:$0xff] }
 0x231   : > { %v4969_v45 = vadd.f32 %v4837_v42, %v4582_v39  ;;  %v7682_v23 = vpop.permute.xlu0 %7681  ;;  %9066 = vmatmul.msk.bf16.gmra.mxu0 %vm635_vm1, %v10127_v18  ;;  %v12034_v42 = vld [vmem:[%s10445_s25 + $0x130] sm:$0xff] }
 0x232   : > { %3166 = vst.msk [vmem:[#allocation2 + $0x198] sm:$0xff] %vm1177_vm4, %v3034_v31  ;;  %v8200_v17 = vadd.f32 %v11886_v7, %v8064_v24  ;;  %v8059_v32 = vmax.f32 %v11466_v8, %v7682_v23  ;;  %v6374_v19 = vld [vmem:[#allocation2 + $0x188] sm:$0xff]  ;;  %v12002_v8 = vmax.f32 %v11531_v56, %v7056_v6 }
 0x233   : > { %v11993_v21 = vpop.f32.mrf.mxu3  ;;  %5101 = vst.msk [vmem:[#allocation2 + $0x190] sm:$0xff] %vm1177_vm4, %v4969_v45  ;;  %v6506_v35 = vadd.f32 %v6374_v19, %v11920_v44  ;;  %v2063_v19 = vshrl.u32 %v11946_v60, 16 }
 0x234   : > { %v8332_v2 = vmax.f32 %v8200_v17, 0.0  ;;  %v8195_v59 = vadd.f32 %v11886_v7, %v8059_v32  ;;  %v7684_v30 = vpop.permute.xlu1 %7683  ;;  %7077 = vrot.lane.b32.xlu1 %v11982_v5, %s10397_s26  ;;  %v10128_v32 = vld [vmem:[%s10445_s25 + $0x118] sm:$0xff] }
 0x235   : > { %6638 = vst.msk [vmem:[#allocation2 + $0x188] sm:$0xff] %vm1177_vm4, %v6506_v35  ;;  %v8060_v50 = vmax.f32 %v11486_v40, %v7684_v30  ;;  %v4584_v22 = vpop.f32.mrf.mxu2  ;;  %v5722_v40 = vsel %vm5651_vm2, %v5719_v37, %v5721_v38  ;;  %v3999_v30 = vshrl.u32 %v11956_v63, 16  ;;  %v2065_v63 = vor.u32 %v2063_v19, %v11985_v62 }
 0x236   : > { %v2651_v34 = vpop.f32.mrf.mxu1  ;;  %v8464_v44 = vpack.c.bf16 %v8332_v2, %v8332_v2  ;;  %v8327_v18 = vmax.f32 %v8195_v59, 0.0  ;;  %v979_v36 = vpop.f32.mrf.mxu0  ;;  %v2903_v16 = vld [vmem:[#allocation2 + $0x1a0] sm:$0xff] }
 0x237   : > { %v8196_v56 = vadd.f32 %v11886_v7, %v8060_v50  ;;  %7715 = vrot.lane.b32.xlu2 %v12002_v8, %s10398_s27  ;;  %1231 = vst.msk [vmem:[#allocation2 + $0x1a8] sm:$0xff] %vm1177_vm4, %v979_v36  ;;  %v3035_v6 = vadd.f32 %v2903_v16, %v2651_v34  ;;  %v4003_v50 = vshll.u32 %v12034_v42, 16  ;;  %v12054_v34 = vld [vmem:[%s10445_s25 + $0x130] sm:$0xff]  ;;  %v4001_v16 = vor.u32 %v3999_v30, %v11991_v57 }
 0x238   : > { %8597 = vst.msk [vmem:[%s11306_s6 + $0x5c] sm:$0xf] %vm8573_vm5, %v8464_v44  ;;  %v8459_v39 = vpack.c.bf16 %v8327_v18, %v8327_v18  ;;  %10059 = vmatmul.msk.bf16.gmra.mxu3 %vm635_vm1, %v5722_v40  ;;  %v12061_v44 = vld [vmem:[#allocation2 + $0x180] sm:$0xff] }
 0x239   : > { %9397 = vmatmul.msk.bf16.gmra.mxu1 %vm635_vm1, %v2062_v41  ;;  %v8328_v13 = vmax.f32 %v8196_v56, 0.0  ;;  %3167 = vst.msk [vmem:[#allocation2 + $0x1a0] sm:$0xff] %vm1177_vm4, %v3035_v6  ;;  %v4838_v53 = vld [vmem:[#allocation2 + $0x198] sm:$0xff]  ;;  %v7052_v37 = vpop.permute.xlu0 %7051  ;;  %9728 = vmatmul.msk.bf16.gmra.mxu2 %vm635_vm1, %v3998_v49  ;;  %v5723_v49 = vrot.slane %v12054_v34, 1  ;;  %v12163_v34 = vld [vmem:[%s10445_s25 + $0x130] sm:$0xff] }
 0x23a   : > { %8592 = vst.msk [vmem:[%s11306_s6 + $0x48] sm:$0xf] %vm8573_vm5, %v8459_v39  ;;  %v4970_v33 = vadd.f32 %v4838_v53, %v4584_v22  ;;  %v12031_v31 = vmax.f32 %v11507_v12, %v7052_v37  ;;  %v6375_v24 = vld [vmem:[#allocation2 + $0x190] sm:$0xff]  ;;  %v12065_v22 = vrot.slane %v4003_v50, 1 }
 0x23b   : > { %v8460_v45 = vpack.c.bf16 %v8328_v13, %v8328_v13  ;;  %v6507_v23 = vadd.f32 %v6375_v24, %v11953_v15  ;;  %v12037_v0 = vpop.f32.mrf.mxu3  ;;  %v2067_v15 = vshll.u32 %v12026_v46, 16  ;;  %v5724_v24 = vsel %vm5651_vm2, %v5721_v38, %v5723_v49 }
 0x23c   : > { %5102 = vst.msk [vmem:[#allocation2 + $0x198] sm:$0xff] %vm1177_vm4, %v4970_v33  ;;  %v7054_v54 = vpop.permute.xlu1 %7053  ;;  %7711 = vrot.lane.b32.xlu0 %v12031_v31, %s10398_s27  ;;  %v12080_v37 = vld [vmem:[#allocation2 + $0x188] sm:$0xff] }
 0x23d   : > { %8593 = vst.msk [vmem:[%s11306_s6 + $0x4c] sm:$0xf] %vm8573_vm5, %v8460_v45  ;;  %v12045_v12 = vmax.f32 %v11513_v51, %v7054_v54  ;;  %v4587_v59 = vpop.f32.mrf.mxu2  ;;  %v2069_v18 = vrot.slane %v2067_v15, 1  ;;  %v12101_v15 = vld [vmem:[%s10445_s25 + $0x138] sm:$0xff] }
 0x23e   : > { %v2653_v17 = vpop.f32.mrf.mxu1  ;;  %6639 = vst.msk [vmem:[#allocation2 + $0x190] sm:$0xff] %vm1177_vm4, %v6507_v23  ;;  %v982_v35 = vpop.f32.mrf.mxu0  ;;  %v2904_v2 = vld [vmem:[#allocation2 + $0x1a8] sm:$0xff] }
 0x23f   : > { %1232 = vst.msk [vmem:[#allocation2 + $0x1b0] sm:$0xff] %vm1177_vm4, %v982_v35  ;;  %v3036_v51 = vadd.f32 %v2904_v2, %v2653_v17  ;;  %7713 = vrot.lane.b32.xlu1 %v12045_v12, %s10398_s27  ;;  %v2070_v13 = vsel %vm1778_vm3, %v2065_v63, %v2069_v18 }
 0x240   : > { %v4839_v60 = vld [vmem:[#allocation2 + $0x1a0] sm:$0xff] }
 0x241   : > { %3168 = vst.msk [vmem:[#allocation2 + $0x1a8] sm:$0xff] %vm1177_vm4, %v3036_v51  ;;  %v4971_v41 = vadd.f32 %v4839_v60, %v4587_v59  ;;  %9067 = vmatmul.msk.bf16.gmra.mxu0 %vm635_vm1, %v10128_v32  ;;  %v2071_v51 = vshrl.u32 %v12026_v46, 16  ;;  %v12122_v46 = vld [vmem:[%s10445_s25 + $0x138] sm:$0xff] }
 0x242   : > { %v7062_v36 = vpop.permute.xlu2 %7061 }
 0x243   : > { %5103 = vst.msk [vmem:[#allocation2 + $0x1a0] sm:$0xff] %vm1177_vm4, %v4971_v41  ;;  %v6376_v40 = vld [vmem:[#allocation2 + $0x198] sm:$0xff]  ;;  %v12069_v56 = vpop.f32.mrf.mxu3  ;;  %v12109_v30 = vmax.f32 %v11646_v55, %v7062_v36  ;;  %v2075_v41 = vshll.u32 %v12097_v25, 16 }
 0x244   : > { %v6508_v6 = vadd.f32 %v6376_v40, %v11993_v21  ;;  %7081 = vrot.lane.b32.xlu0 %v12061_v44, %s10397_s26  ;;  %v4006_v21 = vsel %vm1778_vm3, %v4001_v16, %v12065_v22  ;;  %v4011_v40 = vshll.u32 %v12101_v15, 16 }
 0x245   : > { %v12074_v39 = vld [vmem:[#allocation2 + $0x190] sm:$0xff]  ;;  %v4589_v33 = vpop.f32.mrf.mxu2 }
 0x246   : > { %v2656_v62 = vpop.f32.mrf.mxu1  ;;  %6640 = vst.msk [vmem:[#allocation2 + $0x198] sm:$0xff] %vm1177_vm4, %v6508_v6  ;;  %7085 = vrot.lane.b32.xlu2 %v12074_v39, %s10397_s26  ;;  %v984_v57 = vpop.f32.mrf.mxu0  ;;  %v2905_v53 = vld [vmem:[#allocation2 + $0x1b0] sm:$0xff] }
 0x247   : > { %1233 = vst.msk [vmem:[#allocation2 + $0x1b8] sm:$0xff] %vm1177_vm4, %v984_v57  ;;  %v3037_v45 = vadd.f32 %v2905_v53, %v2656_v62  ;;  %7083 = vrot.lane.b32.xlu1 %v12080_v37, %s10397_s26  ;;  %v2073_v53 = vor.u32 %v2071_v51, %v2069_v18 }
 0x248   : > { %v4840_v23 = vld [vmem:[#allocation2 + $0x1a8] sm:$0xff]  ;;  %10060 = vmatmul.msk.bf16.gmra.mxu3 %vm635_vm1, %v5724_v24 }
 0x249   : > { %9398 = vmatmul.msk.bf16.gmra.mxu1 %vm635_vm1, %v2070_v13  ;;  %3169 = vst.msk [vmem:[#allocation2 + $0x1b0] sm:$0xff] %vm1177_vm4, %v3037_v45  ;;  %v4972_v54 = vadd.f32 %v4840_v23, %v4589_v33  ;;  %v7688_v17 = vpop.permute.xlu0 %7687  ;;  %9729 = vmatmul.msk.bf16.gmra.mxu2 %vm635_vm1, %v4006_v21  ;;  %v12127_v45 = vrot.slane %v2075_v41, 1 }
 0x24a   : > { %v7698_v38 = vpop.permute.xlu2 %7697  ;;  %v8062_v32 = vmax.f32 %v11568_v27, %v7688_v17  ;;  %v6377_v19 = vld [vmem:[#allocation2 + $0x1a0] sm:$0xff] }
 0x24b   : > { %v8067_v35 = vmax.f32 %v11678_v28, %v7698_v38  ;;  %5104 = vst.msk [vmem:[#allocation2 + $0x1a8] sm:$0xff] %vm1177_vm4, %v4972_v54  ;;  %v6509_v2 = vadd.f32 %v6377_v19, %v12037_v0  ;;  %v12106_v59 = vpop.f32.mrf.mxu3  ;;  %v10129_v28 = vld [vmem:[%s10445_s25 + $0x120] sm:$0xff]  ;;  %v4007_v0 = vshrl.u32 %v12034_v42, 16  ;;  %v5725_v19 = vrot.slane %v12122_v46, 1  ;;  %v12239_v46 = vld [vmem:[%s10445_s25 + $0x138] sm:$0xff] }
 0x24c   : > { %v8198_v50 = vadd.f32 %v11886_v7, %v8062_v32  ;;  %v10373_v17 = vld [vmem:[#allocation2 + $0x120] sm:$0xff]  ;;  %v12135_v32 = vrot.slane %v4011_v40, 1 }
 0x24d   : > { %v8203_v27 = vadd.f32 %v11886_v7, %v8067_v35  ;;  %6641 = vst.msk [vmem:[#allocation2 + $0x1a0] sm:$0xff] %vm1177_vm4, %v6509_v2  ;;  %v4592_v16 = vpop.f32.mrf.mxu2  ;;  %v4009_v23 = vor.u32 %v4007_v0, %v12065_v22  ;;  %v5726_v41 = vsel %vm5651_vm2, %v5723_v49, %v5725_v19 }
 0x24e   : > { %v2658_v60 = vpop.f32.mrf.mxu1  ;;  %v8330_v63 = vmax.f32 %v8198_v50, 0.0  ;;  %7721 = vrot.lane.b32.xlu2 %v12109_v30, %s10398_s27  ;;  %v987_v55 = vpop.f32.mrf.mxu0  ;;  %v2906_v36 = vld [vmem:[#allocation2 + $0x1b8] sm:$0xff]  ;;  %v2078_v50 = vsel %vm1778_vm3, %v2073_v53, %v12127_v45 }
 0x24f   : > { %v8335_v6 = vmax.f32 %v8203_v27, 0.0  ;;  %1234 = vst.msk [vmem:[#allocation2 + $0x1c0] sm:$0xff] %vm1177_vm4, %v987_v55  ;;  %v3038_v62 = vadd.f32 %v2906_v36, %v2658_v60 }
 0x250   : > { %v8462_v13 = vpack.c.bf16 %v8330_v63, %v8330_v63  ;;  %v4841_v57 = vld [vmem:[#allocation2 + $0x1b0] sm:$0xff] }
 0x251   : > { %v8467_v42 = vpack.c.bf16 %v8335_v6, %v8335_v6  ;;  %3170 = vst.msk [vmem:[#allocation2 + $0x1b8] sm:$0xff] %vm1177_vm4, %v3038_v62  ;;  %v4973_v33 = vadd.f32 %v4841_v57, %v4592_v16  ;;  %v7690_v21 = vpop.permute.xlu1 %7689  ;;  %v7058_v24 = vpop.permute.xlu0 %7057  ;;  %9068 = vmatmul.msk.bf16.gmra.mxu0 %vm635_vm1, %v10129_v28  ;;  %v4014_v28 = vsel %vm1778_vm3, %v4009_v23, %v12135_v32  ;;  %v12171_v6 = vld [vmem:[%s10445_s25 + $0x140] sm:$0xff] }
 0x252   : > { %8595 = vst.msk [vmem:[%s11306_s6 + $0x54] sm:$0xf] %vm8573_vm5, %v8462_v13  ;;  %v8063_v54 = vmax.f32 %v11603_v20, %v7690_v21  ;;  %v12133_v38 = vmax.f32 %v10373_v17, %v7058_v24  ;;  %v6378_v18 = vld [vmem:[#allocation2 + $0x1a8] sm:$0xff]  ;;  %v12174_v13 = vld [vmem:[#allocation2 + $0x198] sm:$0xff]  ;;  %v2079_v21 = vshrl.u32 %v12097_v25, 16  ;;  %v2083_v24 = vshll.u32 %v12163_v34, 16 }
 0x253   : > { %8600 = vst.msk [vmem:[%s11306_s6 + $0x68] sm:$0xf] %vm8573_vm5, %v8467_v42  ;;  %v6510_v35 = vadd.f32 %v6378_v18, %v12069_v56  ;;  %v12141_v2 = vpop.f32.mrf.mxu3  ;;  %v4015_v17 = vshrl.u32 %v12101_v15, 16  ;;  %v4019_v18 = vshll.u32 %v12171_v6, 16 }
 0x254   : > { %5105 = vst.msk [vmem:[#allocation2 + $0x1b0] sm:$0xff] %vm1177_vm4, %v4973_v33  ;;  %v8199_v22 = vadd.f32 %v11886_v7, %v8063_v54  ;;  %7717 = vrot.lane.b32.xlu0 %v12133_v38, %s10398_s27  ;;  %v10130_v33 = vld [vmem:[%s10445_s25 + $0x128] sm:$0xff] }
 0x255   : > { %6642 = vst.msk [vmem:[#allocation2 + $0x1a8] sm:$0xff] %vm1177_vm4, %v6510_v35  ;;  %v4594_v60 = vpop.f32.mrf.mxu2  ;;  %v12194_v35 = vld [vmem:[%s10445_s25 + $0x140] sm:$0xff] }
 0x256   : > { %v2661_v20 = vpop.f32.mrf.mxu1  ;;  %v8331_v51 = vmax.f32 %v8199_v22, 0.0  ;;  %v989_v27 = vpop.f32.mrf.mxu0  ;;  %v2907_v56 = vld [vmem:[#allocation2 + $0x1c0] sm:$0xff] }
 0x257   : > { %1235 = vst.msk [vmem:[#allocation2 + $0x1c8] sm:$0xff] %vm1177_vm4, %v989_v27  ;;  %v3039_v0 = vadd.f32 %v2907_v56, %v2661_v20  ;;  %v2081_v27 = vor.u32 %v2079_v21, %v12127_v45  ;;  %v12202_v56 = vrot.slane %v2083_v24, 1 }
 0x258   : > { %v8463_v63 = vpack.c.bf16 %v8331_v51, %v8331_v51  ;;  %v4842_v55 = vld [vmem:[#allocation2 + $0x1b8] sm:$0xff]  ;;  %10061 = vmatmul.msk.bf16.gmra.mxu3 %vm635_vm1, %v5726_v41  ;;  %v12199_v51 = vld [vmem:[#allocation2 + $0x1a0] sm:$0xff]  ;;  %v4017_v41 = vor.u32 %v4015_v17, %v12135_v32 }
 0x259   : > { %9399 = vmatmul.msk.bf16.gmra.mxu1 %vm635_vm1, %v2078_v50  ;;  %3171 = vst.msk [vmem:[#allocation2 + $0x1c0] sm:$0xff] %vm1177_vm4, %v3039_v0  ;;  %v4974_v36 = vadd.f32 %v4842_v55, %v4594_v60  ;;  %v7060_v16 = vpop.permute.xlu1 %7059  ;;  %9730 = vmatmul.msk.bf16.gmra.mxu2 %vm635_vm1, %v4014_v28  ;;  %v12206_v0 = vrot.slane %v4019_v18, 1 }
 0x25a   : > { %8596 = vst.msk [vmem:[%s11306_s6 + $0x58] sm:$0xf] %vm8573_vm5, %v8463_v63  ;;  %v7068_v49 = vpop.permute.xlu2 %7067  ;;  %v12168_v40 = vmax.f32 %v11636_v1, %v7060_v16  ;;  %v5727_v63 = vrot.slane %v12194_v35, 1 }
 0x25b   : > { %5106 = vst.msk [vmem:[#allocation2 + $0x1b8] sm:$0xff] %vm1177_vm4, %v4974_v36  ;;  %v6379_v62 = vld [vmem:[#allocation2 + $0x1b0] sm:$0xff]  ;;  %v12176_v57 = vpop.f32.mrf.mxu3  ;;  %v12210_v55 = vmax.f32 %v11757_v29, %v7068_v49 }
 0x25c   : > { %v6511_v53 = vadd.f32 %v6379_v62, %v12106_v59  ;;  %7719 = vrot.lane.b32.xlu1 %v12168_v40, %s10398_s27  ;;  %7087 = vrot.lane.b32.xlu0 %v12174_v13, %s10397_s26  ;;  %v12183_v1 = vld [vmem:[#allocation2 + $0x1a8] sm:$0xff] }
 0x25d   : > { %7091 = vrot.lane.b32.xlu2 %v12183_v1, %s10397_s26  ;;  %v4597_v54 = vpop.f32.mrf.mxu2 }
 0x25e   : > { %v2663_v42 = vpop.f32.mrf.mxu1  ;;  %6643 = vst.msk [vmem:[#allocation2 + $0x1b0] sm:$0xff] %vm1177_vm4, %v6511_v53  ;;  %v992_v59 = vpop.f32.mrf.mxu0  ;;  %v2908_v23 = vld [vmem:[#allocation2 + $0x1c8] sm:$0xff] }
 0x25f   : > { %1236 = vst.msk [vmem:[#allocation2 + $0x1d0] sm:$0xff] %vm1177_vm4, %v992_v59  ;;  %v3040_v22 = vadd.f32 %v2908_v23, %v2663_v42  ;;  %v4022_v42 = vsel %vm1778_vm3, %v4017_v41, %v12206_v0  ;;  %v2091_v41 = vshll.u32 %v12239_v46, 16 }
 0x260   : > { %v4843_v20 = vld [vmem:[#allocation2 + $0x1c0] sm:$0xff] }
 0x261   : > { %3172 = vst.msk [vmem:[#allocation2 + $0x1c8] sm:$0xff] %vm1177_vm4, %v3040_v22  ;;  %v4975_v25 = vadd.f32 %v4843_v20, %v4597_v54  ;;  %v7694_v50 = vpop.permute.xlu0 %7693  ;;  %9069 = vmatmul.msk.bf16.gmra.mxu0 %vm635_vm1, %v10130_v33  ;;  %v5728_v33 = vsel %vm5651_vm2, %v5725_v19, %v5727_v63 }
 0x262   : > { %v7704_v15 = vpop.permute.xlu2 %7703  ;;  %v8065_v60 = vmax.f32 %v11672_v43, %v7694_v50  ;;  %v6380_v28 = vld [vmem:[#allocation2 + $0x1b8] sm:$0xff]  ;;  %v12248_v50 = vld [vmem:[%s10445_s25 + $0x148] sm:$0xff] }
 0x263   : > { %v8070_v36 = vmax.f32 %v11787_v48, %v7704_v15  ;;  %5107 = vst.msk [vmem:[#allocation2 + $0x1c0] sm:$0xff] %vm1177_vm4, %v4975_v25  ;;  %v6512_v45 = vadd.f32 %v6380_v28, %v12141_v2  ;;  %v12215_v16 = vpop.f32.mrf.mxu3  ;;  %v2086_v48 = vsel %vm1778_vm3, %v2081_v27, %v12202_v56  ;;  %v2087_v28 = vshrl.u32 %v12163_v34, 16 }
 0x264   : > { %v8201_v43 = vadd.f32 %v11886_v7, %v8065_v60  ;;  %7089 = vrot.lane.b32.xlu1 %v12199_v51, %s10397_s26 }
 0x265   : > { %v8206_v32 = vadd.f32 %v11886_v7, %v8070_v36  ;;  %6644 = vst.msk [vmem:[#allocation2 + $0x1b8] sm:$0xff] %vm1177_vm4, %v6512_v45  ;;  %7727 = vrot.lane.b32.xlu2 %v12210_v55, %s10398_s27  ;;  %v4599_v53 = vpop.f32.mrf.mxu2 }
 0x266   : > { %v2666_v29 = vpop.f32.mrf.mxu1  ;;  %v8333_v49 = vmax.f32 %v8201_v43, 0.0  ;;  %v994_v2 = vpop.f32.mrf.mxu0  ;;  %v2909_v62 = vld [vmem:[#allocation2 + $0x1d0] sm:$0xff] }
 0x267   : > { %v8338_v21 = vmax.f32 %v8206_v32, 0.0  ;;  %1237 = vst.msk [vmem:[#allocation2 + $0x1d8] sm:$0xff] %vm1177_vm4, %v994_v2  ;;  %v3041_v24 = vadd.f32 %v2909_v62, %v2666_v29  ;;  %v4023_v32 = vshrl.u32 %v12171_v6, 16  ;;  %v4027_v29 = vshll.u32 %v12248_v50, 16 }
 0x268   : > { %v8465_v59 = vpack.c.bf16 %v8333_v49, %v8333_v49  ;;  %v4844_v23 = vld [vmem:[#allocation2 + $0x1c8] sm:$0xff]  ;;  %10062 = vmatmul.msk.bf16.gmra.mxu3 %vm635_vm1, %v5728_v33  ;;  %v2089_v33 = vor.u32 %v2087_v28, %v12202_v56  ;;  %v12274_v6 = vrot.slane %v2091_v41, 1 }
 0x269   : > { %9400 = vmatmul.msk.bf16.gmra.mxu1 %vm635_vm1, %v2086_v48  ;;  %v8470_v54 = vpack.c.bf16 %v8338_v21, %v8338_v21  ;;  %3173 = vst.msk [vmem:[#allocation2 + $0x1d0] sm:$0xff] %vm1177_vm4, %v3041_v24  ;;  %v4976_v17 = vadd.f32 %v4844_v23, %v4599_v53  ;;  %v7696_v18 = vpop.permute.xlu1 %7695  ;;  %v7064_v22 = vpop.permute.xlu0 %7063  ;;  %9731 = vmatmul.msk.bf16.gmra.mxu2 %vm635_vm1, %v4022_v42  ;;  %v12266_v48 = vld [vmem:[%s10445_s25 + $0x148] sm:$0xff]  ;;  %v12271_v42 = vld [vmem:[#allocation2 + $0x1b0] sm:$0xff]  ;;  %v10374_v24 = vld [vmem:[#allocation2 + $0x140] sm:$0xff] }
 0x26a   : > { %8598 = vst.msk [vmem:[%s11306_s6 + $0x60] sm:$0xf] %vm8573_vm5, %v8465_v59  ;;  %v8066_v19 = vmax.f32 %v11710_v11, %v7696_v18  ;;  %v12245_v20 = vmax.f32 %v11715_v26, %v7064_v22  ;;  %v6381_v25 = vld [vmem:[#allocation2 + $0x1c0] sm:$0xff]  ;;  %v10131_v26 = vld [vmem:[%s10445_s25 + $0x130] sm:$0xff]  ;;  %v4025_v23 = vor.u32 %v4023_v32, %v12206_v0 }
 0x26b   : > { %8603 = vst.msk [vmem:[%s11306_s6 + $0x74] sm:$0xf] %vm8573_vm5, %v8470_v54  ;;  %v6513_v27 = vadd.f32 %v6381_v25, %v12176_v57  ;;  %v12257_v60 = vpop.f32.mrf.mxu3  ;;  %v12281_v54 = vrot.slane %v4027_v29, 1  ;;  %v2094_v25 = vsel %vm1778_vm3, %v2089_v33, %v12274_v6  ;;  %v12316_v32 = vld [vmem:[%s10445_s25 + $0x150] sm:$0xff] }
 0x26c   : > { %5108 = vst.msk [vmem:[#allocation2 + $0x1c8] sm:$0xff] %vm1177_vm4, %v4976_v17  ;;  %v8202_v15 = vadd.f32 %v11886_v7, %v8066_v19  ;;  %7723 = vrot.lane.b32.xlu0 %v12245_v20, %s10398_s27  ;;  %v5729_v17 = vrot.slane %v12266_v48, 1  ;;  %v12381_v48 = vld [vmem:[%s10445_s25 + $0x148] sm:$0xff] }
 0x26d   : > { %6645 = vst.msk [vmem:[#allocation2 + $0x1c0] sm:$0xff] %vm1177_vm4, %v6513_v27  ;;  %v4602_v43 = vpop.f32.mrf.mxu2 }
 0x26e   : > { %v2668_v11 = vpop.f32.mrf.mxu1  ;;  %v8334_v36 = vmax.f32 %v8202_v15, 0.0  ;;  %v997_v57 = vpop.f32.mrf.mxu0  ;;  %v2910_v45 = vld [vmem:[#allocation2 + $0x1d8] sm:$0xff] }
 0x26f   : > { %1238 = vst.msk [vmem:[#allocation2 + $0x1e0] sm:$0xff] %vm1177_vm4, %v997_v57  ;;  %v3042_v49 = vadd.f32 %v2910_v45, %v2668_v11  ;;  %v4030_v11 = vsel %vm1778_vm3, %v4025_v23, %v12281_v54  ;;  %v12312_v45 = vld [vmem:[%s10445_s25 + $0x140] sm:$0xff] }
 0x270   : > { %v8466_v2 = vpack.c.bf16 %v8334_v36, %v8334_v36  ;;  %v4845_v62 = vld [vmem:[#allocation2 + $0x1d0] sm:$0xff]  ;;  %v2099_v33 = vshll.u32 %v12312_v45, 16 }
 0x271   : > { %3174 = vst.msk [vmem:[#allocation2 + $0x1d8] sm:$0xff] %vm1177_vm4, %v3042_v49  ;;  %v4977_v34 = vadd.f32 %v4845_v62, %v4602_v43  ;;  %v7066_v53 = vpop.permute.xlu1 %7065  ;;  %9070 = vmatmul.msk.bf16.gmra.mxu0 %vm635_vm1, %v10131_v26  ;;  %v5730_v26 = vsel %vm5651_vm2, %v5727_v63, %v5729_v17  ;;  %v12324_v62 = vld [vmem:[#allocation2 + $0x1b8] sm:$0xff] }
 0x272   : > { %8599 = vst.msk [vmem:[%s11306_s6 + $0x64] sm:$0xf] %vm8573_vm5, %v8466_v2  ;;  %v7074_v21 = vpop.permute.xlu2 %7073  ;;  %v12278_v59 = vmax.f32 %v10374_v24, %v7066_v53 }
 0x273   : > { %5109 = vst.msk [vmem:[#allocation2 + $0x1d0] sm:$0xff] %vm1177_vm4, %v4977_v34  ;;  %v6382_v18 = vld [vmem:[#allocation2 + $0x1c8] sm:$0xff]  ;;  %v12292_v19 = vpop.f32.mrf.mxu3  ;;  %v12319_v29 = vmax.f32 %v11862_v3, %v7074_v21  ;;  %v4031_v21 = vshrl.u32 %v12248_v50, 16 }
 0x274   : > { %v6514_v22 = vadd.f32 %v6382_v18, %v12215_v16  ;;  %7725 = vrot.lane.b32.xlu1 %v12278_v59, %s10398_s27  ;;  %7093 = vrot.lane.b32.xlu0 %v12271_v42, %s10397_s26  ;;  %v12290_v56 = vld [vmem:[#allocation2 + $0x1c0] sm:$0xff] }
 0x275   : > { %7097 = vrot.lane.b32.xlu2 %v12290_v56, %s10397_s26  ;;  %v4604_v15 = vpop.f32.mrf.mxu2 }
 0x276   : > { %v2671_v0 = vpop.f32.mrf.mxu1  ;;  %6646 = vst.msk [vmem:[#allocation2 + $0x1c8] sm:$0xff] %vm1177_vm4, %v6514_v22  ;;  %v999_v16 = vpop.f32.mrf.mxu0  ;;  %v2911_v27 = vld [vmem:[#allocation2 + $0x1e0] sm:$0xff] }
 0x277   : > { %1239 = vst.msk [vmem:[#allocation2 + $0x1e8] sm:$0xff] %vm1177_vm4, %v999_v16  ;;  %v3043_v28 = vadd.f32 %v2911_v27, %v2671_v0  ;;  %v12341_v0 = vld [vmem:[%s10445_s25 + $0x150] sm:$0xff] }
 0x278   : > { %v4846_v41 = vld [vmem:[#allocation2 + $0x1d8] sm:$0xff]  ;;  %10063 = vmatmul.msk.bf16.gmra.mxu3 %vm635_vm1, %v5730_v26 }
 0x279   : > { %9401 = vmatmul.msk.bf16.gmra.mxu1 %vm635_vm1, %v2094_v25  ;;  %3175 = vst.msk [vmem:[#allocation2 + $0x1e0] sm:$0xff] %vm1177_vm4, %v3043_v28  ;;  %v4978_v36 = vadd.f32 %v4846_v41, %v4604_v15  ;;  %v7700_v57 = vpop.permute.xlu0 %7699  ;;  %9732 = vmatmul.msk.bf16.gmra.mxu2 %vm635_vm1, %v4030_v11 }
 0x27a   : > { %v7710_v43 = vpop.permute.xlu2 %7709  ;;  %v8068_v35 = vmax.f32 %v11781_v52, %v7700_v57  ;;  %v6383_v63 = vld [vmem:[#allocation2 + $0x1d0] sm:$0xff]  ;;  %v2095_v52 = vshrl.u32 %v12239_v46, 16  ;;  %v4035_v46 = vshll.u32 %v12316_v32, 16  ;;  %v4033_v57 = vor.u32 %v4031_v21, %v12281_v54 }
 0x27b   : > { %v8073_v49 = vmax.f32 %v11897_v14, %v7710_v43  ;;  %5110 = vst.msk [vmem:[#allocation2 + $0x1d8] sm:$0xff] %vm1177_vm4, %v4978_v36  ;;  %v6515_v2 = vadd.f32 %v6383_v63, %v12257_v60  ;;  %v12330_v53 = vpop.f32.mrf.mxu3  ;;  %v10132_v60 = vld [vmem:[%s10445_s25 + $0x138] sm:$0xff]  ;;  %v12347_v36 = vrot.slane %v2099_v33, 1 }
 0x27c   : > { %v8204_v34 = vadd.f32 %v11886_v7, %v8068_v35  ;;  %7095 = vrot.lane.b32.xlu1 %v12324_v62, %s10397_s26  ;;  %v2097_v11 = vor.u32 %v2095_v52, %v12274_v6  ;;  %v10375_v35 = vld [vmem:[#allocation2 + $0x150] sm:$0xff] }
 0x27d   : > { %v8209_v3 = vadd.f32 %v11886_v7, %v8073_v49  ;;  %6647 = vst.msk [vmem:[#allocation2 + $0x1d0] sm:$0xff] %vm1177_vm4, %v6515_v2  ;;  %7733 = vrot.lane.b32.xlu2 %v12319_v29, %s10398_s27  ;;  %v4607_v22 = vpop.f32.mrf.mxu2  ;;  %v12355_v49 = vrot.slane %v4035_v46, 1  ;;  %v5731_v2 = vrot.slane %v12341_v0, 1  ;;  %v12459_v0 = vld [vmem:[%s10445_s25 + $0x150] sm:$0xff] }
 0x27e   : > { %v2673_v14 = vpop.f32.mrf.mxu1  ;;  %v8336_v24 = vmax.f32 %v8204_v34, 0.0  ;;  %v1002_v23 = vpop.f32.mrf.mxu0  ;;  %v2912_v18 = vld [vmem:[#allocation2 + $0x1e8] sm:$0xff] }
 0x27f   : > { %v8341_v25 = vmax.f32 %v8209_v3, 0.0  ;;  %1240 = vst.msk [vmem:[#allocation2 + $0x1f0] sm:$0xff] %vm1177_vm4, %v1002_v23  ;;  %v3044_v16 = vadd.f32 %v2912_v18, %v2673_v14  ;;  %v2102_v3 = vsel %vm1778_vm3, %v2097_v11, %v12347_v36  ;;  %v4038_v21 = vsel %vm1778_vm3, %v4033_v57, %v12355_v49 }
 0x280   : > { %v8468_v27 = vpack.c.bf16 %v8336_v24, %v8336_v24  ;;  %v4847_v15 = vld [vmem:[#allocation2 + $0x1e0] sm:$0xff]  ;;  %v2107_v57 = vshll.u32 %v12381_v48, 16 }
 0x281   : > { %v8473_v26 = vpack.c.bf16 %v8341_v25, %v8341_v25  ;;  %3176 = vst.msk [vmem:[#allocation2 + $0x1e8] sm:$0xff] %vm1177_vm4, %v3044_v16  ;;  %v4979_v50 = vadd.f32 %v4847_v15, %v4607_v22  ;;  %v7702_v28 = vpop.permute.xlu1 %7701  ;;  %v7070_v41 = vpop.permute.xlu0 %7069  ;;  %9071 = vmatmul.msk.bf16.gmra.mxu0 %vm635_vm1, %v10132_v60  ;;  %v12389_v16 = vld [vmem:[%s10445_s25 + $0x158] sm:$0xff]  ;;  %v12392_v15 = vld [vmem:[#allocation2 + $0x1c8] sm:$0xff] }
 0x282   : > { %8601 = vst.msk [vmem:[%s11306_s6 + $0x6c] sm:$0xf] %vm8573_vm5, %v8468_v27  ;;  %v8069_v43 = vmax.f32 %v11821_v4, %v7702_v28  ;;  %v12353_v63 = vmax.f32 %v10375_v35, %v7070_v41  ;;  %v6384_v6 = vld [vmem:[#allocation2 + $0x1d8] sm:$0xff]  ;;  %v10133_v28 = vld [vmem:[%s10445_s25 + $0x140] sm:$0xff]  ;;  %v2103_v41 = vshrl.u32 %v12312_v45, 16 }
 0x283   : > { %8606 = vst.msk [vmem:[%s11306_s6 + $0x80] sm:$0xf] %vm8573_vm5, %v8473_v26  ;;  %v6516_v34 = vadd.f32 %v6384_v6, %v12292_v19  ;;  %v6147_v4 = vpop.f32.mrf.mxu3  ;;  %v4039_v6 = vshrl.u32 %v12316_v32, 16 }
 0x284   : > { %5111 = vst.msk [vmem:[#allocation2 + $0x1e0] sm:$0xff] %vm1177_vm4, %v4979_v50  ;;  %v8205_v54 = vadd.f32 %v11886_v7, %v8069_v43  ;;  %7729 = vrot.lane.b32.xlu0 %v12353_v63, %s10398_s27  ;;  %v5732_v7 = vsel %vm5651_vm2, %v5729_v17, %v5731_v2 }
 0x285   : > { %6648 = vst.msk [vmem:[#allocation2 + $0x1d8] sm:$0xff] %vm1177_vm4, %v6516_v34  ;;  %v4609_v19 = vpop.f32.mrf.mxu2  ;;  %v4043_v34 = vshll.u32 %v12389_v16, 16 }
 0x286   : > { %v2676_v52 = vpop.f32.mrf.mxu1  ;;  %v8337_v14 = vmax.f32 %v8205_v54, 0.0  ;;  %v1004_v60 = vpop.f32.mrf.mxu0  ;;  %v2913_v33 = vld [vmem:[#allocation2 + $0x1f0] sm:$0xff]  ;;  %v12410_v54 = vld [vmem:[%s10445_s25 + $0x158] sm:$0xff] }
 0x287   : > { %1241 = vst.msk [vmem:[#allocation2 + $0x1f8] sm:$0xff] %vm1177_vm4, %v1004_v60  ;;  %v3045_v24 = vadd.f32 %v2913_v33, %v2676_v52  ;;  %v12415_v60 = vld [vmem:[#allocation2 + $0x1d0] sm:$0xff]  ;;  %v2105_v33 = vor.u32 %v2103_v41, %v12347_v36  ;;  %v12432_v36 = vld [vmem:[%s14785_s2] ss:$0 sm:$0xff] }
 0x288   : > { %v8469_v23 = vpack.c.bf16 %v8337_v14, %v8337_v14  ;;  %v4848_v18 = vld [vmem:[#allocation2 + $0x1e8] sm:$0xff]  ;;  %10064 = vmatmul.msk.bf16.gmra.mxu3 %vm635_vm1, %v5732_v7  ;;  %v4041_v7 = vor.u32 %v4039_v6, %v12355_v49 }
 0x289   : > { %9402 = vmatmul.msk.bf16.gmra.mxu1 %vm635_vm1, %v2102_v3  ;;  %3177 = vst.msk [vmem:[#allocation2 + $0x1f0] sm:$0xff] %vm1177_vm4, %v3045_v24  ;;  %v7080_v22 = vpop.permute.xlu2 %7079  ;;  %v4980_v46 = vadd.f32 %v4848_v18, %v4609_v19  ;;  %v7072_v25 = vpop.permute.xlu1 %7071  ;;  %9733 = vmatmul.msk.bf16.gmra.mxu2 %vm635_vm1, %v4038_v21  ;;  %v12418_v19 = vrot.slane %v2107_v57, 1  ;;  %v12422_v24 = vrot.slane %v4043_v34, 1 }
 0x28a   : > { %8602 = vst.msk [vmem:[%s11306_s6 + $0x70] sm:$0xf] %vm8573_vm5, %v8469_v23  ;;  %v12386_v17 = vmax.f32 %v11853_v58, %v7072_v25  ;;  %v5733_v23 = vrot.slane %v12410_v54, 1  ;;  %v12426_v18 = vmax.f32 %v11971_v10, %v7080_v22  ;;  %v12530_v54 = vld [vmem:[%s10445_s25 + $0x158] sm:$0xff] }
 0x28b   : > { %5112 = vst.msk [vmem:[#allocation2 + $0x1e8] sm:$0xff] %vm1177_vm4, %v4980_v46  ;;  %v6385_v27 = vld [vmem:[#allocation2 + $0x1e0] sm:$0xff]  ;;  %v6150_v58 = vpop.f32.mrf.mxu3 }
 0x28c   : > { %v6517_v11 = vadd.f32 %v6385_v27, %v12330_v53  ;;  %7731 = vrot.lane.b32.xlu1 %v12386_v17, %s10398_s27  ;;  %7099 = vrot.lane.b32.xlu0 %v12392_v15, %s10397_s26  ;;  %v12399_v26 = vld [vmem:[#allocation2 + $0x1d8] sm:$0xff] }
 0x28d   : > { %7103 = vrot.lane.b32.xlu2 %v12399_v26, %s10397_s26  ;;  %v4612_v35 = vpop.f32.mrf.mxu2 }
 0x28e   : > { %v2678_v50 = vpop.f32.mrf.mxu1  ;;  %6649 = vst.msk [vmem:[#allocation2 + $0x1e0] sm:$0xff] %vm1177_vm4, %v6517_v11  ;;  %v1007_v53 = vpop.f32.mrf.mxu0  ;;  %v2914_v43 = vld [vmem:[#allocation2 + $0x1f8] sm:$0xff] }
 0x28f   : > { %1242 = vst.msk [vmem:[#allocation2 + $0x200] sm:$0xff] %vm1177_vm4, %v1007_v53  ;;  %v3046_v52 = vadd.f32 %v2914_v43, %v2678_v50  ;;  %v4046_v50 = vsel %vm1778_vm3, %v4041_v7, %v12422_v24  ;;  %v2115_v7 = vshll.u32 %v12459_v0, 16 }
 0x290   : > { %v4849_v3 = vld [vmem:[#allocation2 + $0x1f0] sm:$0xff] }
 0x291   : > { %3178 = vst.msk [vmem:[#allocation2 + $0x1f8] sm:$0xff] %vm1177_vm4, %v3046_v52  ;;  %v7716_v45 = vpop.permute.xlu2 %7715  ;;  %v4981_v14 = vadd.f32 %v4849_v3, %v4612_v35  ;;  %9072 = vmatmul.msk.bf16.gmra.mxu0 %vm635_vm1, %v10133_v28  ;;  %v5734_v28 = vsel %vm5651_vm2, %v5731_v2, %v5733_v23  ;;  %v12465_v3 = vld [vmem:[%s10445_s25 + $0x160] sm:$0xff] }
 0x292   : > { %v8076_v32 = vmax.f32 %v12002_v8, %v7716_v45  ;;  %v6386_v21 = vld [vmem:[#allocation2 + $0x1e8] sm:$0xff]  ;;  %v2111_v45 = vshrl.u32 %v12381_v48, 16 }
 0x293   : > { %5113 = vst.msk [vmem:[#allocation2 + $0x1f0] sm:$0xff] %vm1177_vm4, %v4981_v14  ;;  %v6518_v46 = vadd.f32 %v6386_v21, %v6147_v4  ;;  %v12437_v49 = vpop.f32.mrf.mxu3  ;;  %v2110_v4 = vsel %vm1778_vm3, %v2105_v33, %v12418_v19  ;;  %v10134_v21 = vld [vmem:[%s10445_s25 + $0x148] sm:$0xff] }
 0x294   : > { %v8212_v8 = vadd.f32 %v12432_v36, %v8076_v32  ;;  %7101 = vrot.lane.b32.xlu1 %v12415_v60, %s10397_s26 }
 0x295   : > { %6650 = vst.msk [vmem:[#allocation2 + $0x1e8] sm:$0xff] %vm1177_vm4, %v6518_v46  ;;  %7739 = vrot.lane.b32.xlu2 %v12426_v18, %s10398_s27  ;;  %v4614_v53 = vpop.f32.mrf.mxu2 }
 0x296   : > { %v2681_v10 = vpop.f32.mrf.mxu1  ;;  %v8344_v22 = vmax.f32 %v8212_v8, 0.0  ;;  %v2915_v25 = vld [vmem:[#allocation2 + $0x200] sm:$0xff]  ;;  %v7706_v27 = vpop.permute.xlu0 %7705 }
 0x297   : > { %v1009_v11 = vpop.f32.mrf.mxu0  ;;  %v3047_v41 = vadd.f32 %v2915_v25, %v2681_v10  ;;  %v8071_v57 = vmax.f32 %v11916_v9, %v7706_v27 }
 0x298   : > { %1243 = vst.msk [vmem:[#allocation2 + $0x208] sm:$0xff] %vm1177_vm4, %v1009_v11  ;;  %v8476_v43 = vpack.c.bf16 %v8344_v22, %v8344_v22  ;;  %v4850_v35 = vld [vmem:[#allocation2 + $0x1f8] sm:$0xff]  ;;  %10065 = vmatmul.msk.bf16.gmra.mxu3 %vm635_vm1, %v5734_v28  ;;  %v4051_v11 = vshll.u32 %v12465_v3, 16 }
 0x299   : > { %9403 = vmatmul.msk.bf16.gmra.mxu1 %vm635_vm1, %v2110_v4  ;;  %3179 = vst.msk [vmem:[#allocation2 + $0x200] sm:$0xff] %vm1177_vm4, %v3047_v41  ;;  %v8207_v6 = vadd.f32 %v12432_v36, %v8071_v57  ;;  %v4982_v34 = vadd.f32 %v4850_v35, %v4614_v53  ;;  %9734 = vmatmul.msk.bf16.gmra.mxu2 %vm635_vm1, %v4046_v50  ;;  %v4047_v4 = vshrl.u32 %v12389_v16, 16  ;;  %v12482_v50 = vld [vmem:[%s10445_s25 + $0x160] sm:$0xff] }
 0x29a   : > { %8609 = vst.msk [vmem:[%s11306_s6 + $0x8c] sm:$0xf] %vm8573_vm5, %v8476_v43  ;;  %v6387_v9 = vld [vmem:[#allocation2 + $0x1f0] sm:$0xff]  ;;  %v2113_v16 = vor.u32 %v2111_v45, %v12418_v19 }
 0x29b   : > { %v8339_v2 = vmax.f32 %v8207_v6, 0.0  ;;  %5114 = vst.msk [vmem:[#allocation2 + $0x1f8] sm:$0xff] %vm1177_vm4, %v4982_v34  ;;  %v6519_v52 = vadd.f32 %v6387_v9, %v6150_v58  ;;  %v12468_v14 = vpop.f32.mrf.mxu3  ;;  %v4049_v43 = vor.u32 %v4047_v4, %v12422_v24  ;;  %v12496_v6 = vrot.slane %v4051_v11, 1 }
 0x29c   : > { %v5735_v34 = vrot.slane %v12482_v50, 1 }
 0x29d   : > { %v8471_v33 = vpack.c.bf16 %v8339_v2, %v8339_v2  ;;  %6651 = vst.msk [vmem:[#allocation2 + $0x1f0] sm:$0xff] %vm1177_vm4, %v6519_v52  ;;  %v4617_v27 = vpop.f32.mrf.mxu2 }
 0x29e   : > { %v2683_v32 = vpop.f32.mrf.mxu1  ;;  %v7708_v8 = vpop.permute.xlu1 %7707 }
 0x29f   : > { %v2916_v46 = vld [vmem:[#allocation2 + $0x208] sm:$0xff]  ;;  %v7076_v10 = vpop.permute.xlu0 %7075  ;;  %8604 = vst.msk [vmem:[%s11306_s6 + $0x78] sm:$0xf] %vm8573_vm5, %v8471_v33  ;;  %v8072_v48 = vmax.f32 %v11951_v61, %v7708_v8  ;;  %v1012_v25 = vpop.f32.mrf.mxu0  ;;  %v4054_v8 = vsel %vm1778_vm3, %v4049_v43, %v12496_v6 }
 0x2a0   : > { %v3048_v58 = vadd.f32 %v2916_v46, %v2683_v32  ;;  %v12478_v22 = vmax.f32 %v11959_v47, %v7076_v10  ;;  %1244 = vst.msk [vmem:[#allocation2 + $0x210] sm:$0xff] %vm1177_vm4, %v1012_v25  ;;  %v7086_v28 = vpop.permute.xlu2 %7085  ;;  %v4851_v41 = vld [vmem:[#allocation2 + $0x200] sm:$0xff]  ;;  %v12491_v47 = vrot.slane %v2115_v7, 1  ;;  %v5736_v10 = vsel %vm5651_vm2, %v5733_v23, %v5735_v34 }
 0x2a1   : > { %v8208_v57 = vadd.f32 %v12432_v36, %v8072_v48  ;;  %v4983_v61 = vadd.f32 %v4851_v41, %v4617_v27  ;;  %9073 = vmatmul.msk.bf16.gmra.mxu0 %vm635_vm1, %v10134_v21  ;;  %v12536_v27 = vmax.f32 %v12074_v39, %v7086_v28  ;;  %v12542_v41 = vld [vmem:[%s10445_s25 + $0x168] sm:$0xff]  ;;  %v10135_v39 = vld [vmem:[%s10445_s25 + $0x150] sm:$0xff]  ;;  %v2119_v28 = vshrl.u32 %v12459_v0, 16 }
 0x2a2   : > { %3180 = vst.msk [vmem:[#allocation2 + $0x208] sm:$0xff] %vm1177_vm4, %v3048_v58  ;;  %7735 = vrot.lane.b32.xlu0 %v12478_v22, %s10398_s27  ;;  %v6388_v53 = vld [vmem:[#allocation2 + $0x1f8] sm:$0xff]  ;;  %v2118_v45 = vsel %vm1778_vm3, %v2113_v16, %v12491_v47 }
 0x2a3   : > { %v8340_v35 = vmax.f32 %v8208_v57, 0.0  ;;  %5115 = vst.msk [vmem:[#allocation2 + $0x200] sm:$0xff] %vm1177_vm4, %v4983_v61  ;;  %v6520_v19 = vadd.f32 %v6388_v53, %v12437_v49  ;;  %v12501_v2 = vpop.f32.mrf.mxu3  ;;  %v12508_v49 = vld [vmem:[#allocation2 + $0x1e0] sm:$0xff]  ;;  %v2123_v53 = vshll.u32 %v12530_v54, 16 }
 0x2a4   : > { %v12499_v9 = vld [vmem:[#allocation2 + $0x1f0] sm:$0xff] }
 0x2a5   : > { %v8472_v52 = vpack.c.bf16 %v8340_v35, %v8340_v35  ;;  %6652 = vst.msk [vmem:[#allocation2 + $0x1f8] sm:$0xff] %vm1177_vm4, %v6520_v19  ;;  %7109 = vrot.lane.b32.xlu2 %v12499_v9, %s10397_s26  ;;  %v4619_v46 = vpop.f32.mrf.mxu2 }
 0x2a6   : > { %v2686_v24 = vpop.f32.mrf.mxu1  ;;  %v7078_v33 = vpop.permute.xlu1 %7077 }
 0x2a7   : > { %8605 = vst.msk [vmem:[%s11306_s6 + $0x7c] sm:$0xf] %vm8573_vm5, %v8472_v52  ;;  %v2917_v32 = vld [vmem:[#allocation2 + $0x210] sm:$0xff]  ;;  %v12513_v21 = vmax.f32 %v11982_v5, %v7078_v33  ;;  %v1014_v7 = vpop.f32.mrf.mxu0  ;;  %v4059_v33 = vshll.u32 %v12542_v41, 16 }
 0x2a8   : > { %v3049_v4 = vadd.f32 %v2917_v32, %v2686_v24  ;;  %1245 = vst.msk [vmem:[#allocation2 + $0x218] sm:$0xff] %vm1177_vm4, %v1014_v7  ;;  %v7722_v58 = vpop.permute.xlu2 %7721  ;;  %10066 = vmatmul.msk.bf16.gmra.mxu3 %vm635_vm1, %v5736_v10  ;;  %v12556_v32 = vld [vmem:[%s10445_s25 + $0x168] sm:$0xff]  ;;  %v12568_v10 = vrot.slane %v2123_v53, 1 }
 0x2a9   : > { %v4852_v48 = vld [vmem:[#allocation2 + $0x208] sm:$0xff]  ;;  %9404 = vmatmul.msk.bf16.gmra.mxu1 %vm635_vm1, %v2118_v45  ;;  %v8079_v5 = vmax.f32 %v12109_v30, %v7722_v58  ;;  %7737 = vrot.lane.b32.xlu1 %v12513_v21, %s10398_s27 }
 0x2aa   : > { %v4984_v25 = vadd.f32 %v4852_v48, %v4619_v46  ;;  %7105 = vrot.lane.b32.xlu0 %v12508_v49, %s10397_s26  ;;  %3181 = vst.msk [vmem:[#allocation2 + $0x210] sm:$0xff] %vm1177_vm4, %v3049_v4  ;;  %v6389_v23 = vld [vmem:[#allocation2 + $0x200] sm:$0xff]  ;;  %9735 = vmatmul.msk.bf16.gmra.mxu2 %vm635_vm1, %v4054_v8  ;;  %v12559_v46 = vld [vmem:[#allocation2 + $0x1e8] sm:$0xff] }
 0x2ab   : > { %v8215_v30 = vadd.f32 %v12432_v36, %v8079_v5  ;;  %v6521_v11 = vadd.f32 %v6389_v23, %v12468_v14  ;;  %v12544_v16 = vpop.f32.mrf.mxu3  ;;  %v4055_v14 = vshrl.u32 %v12465_v3, 16 }
 0x2ac   : > { %5116 = vst.msk [vmem:[#allocation2 + $0x208] sm:$0xff] %vm1177_vm4, %v4984_v25 }
 0x2ad   : > { %v8347_v57 = vmax.f32 %v8215_v30, 0.0  ;;  %6653 = vst.msk [vmem:[#allocation2 + $0x200] sm:$0xff] %vm1177_vm4, %v6521_v11  ;;  %7745 = vrot.lane.b32.xlu2 %v12536_v27, %s10398_s27  ;;  %v4622_v45 = vpop.f32.mrf.mxu2  ;;  %v4057_v5 = vor.u32 %v4055_v14, %v12496_v6  ;;  %v12574_v30 = vrot.slane %v4059_v33, 1  ;;  %v5737_v11 = vrot.slane %v12556_v32, 1 }
 0x2ae   : > { %v2688_v61 = vpop.f32.mrf.mxu1  ;;  %v7712_v43 = vpop.permute.xlu0 %7711 }
 0x2af   : > { %v8479_v35 = vpack.c.bf16 %v8347_v57, %v8347_v57  ;;  %v2918_v19 = vld [vmem:[#allocation2 + $0x218] sm:$0xff]  ;;  %v8074_v52 = vmax.f32 %v12031_v31, %v7712_v43  ;;  %v1017_v24 = vpop.f32.mrf.mxu0  ;;  %v2121_v31 = vor.u32 %v2119_v28, %v12491_v47 }
 0x2b0   : > { %v3050_v7 = vadd.f32 %v2918_v19, %v2688_v61  ;;  %1246 = vst.msk [vmem:[#allocation2 + $0x220] sm:$0xff] %vm1177_vm4, %v1017_v24  ;;  %v5738_v19 = vsel %vm5651_vm2, %v5735_v34, %v5737_v11 }
 0x2b1   : > { %8612 = vst.msk [vmem:[%s11306_s6 + $0x98] sm:$0xf] %vm8573_vm5, %v8479_v35  ;;  %v8210_v0 = vadd.f32 %v12432_v36, %v8074_v52  ;;  %v4853_v3 = vld [vmem:[#allocation2 + $0x210] sm:$0xff]  ;;  %v7714_v8 = vpop.permute.xlu1 %7713  ;;  %7107 = vrot.lane.b32.xlu1 %v12559_v46, %s10397_s26  ;;  %9074 = vmatmul.msk.bf16.gmra.mxu0 %vm635_vm1, %v10135_v39  ;;  %v2126_v6 = vsel %vm1778_vm3, %v2121_v31, %v12568_v10 }
 0x2b2   : > { %3182 = vst.msk [vmem:[#allocation2 + $0x218] sm:$0xff] %vm1177_vm4, %v3050_v7  ;;  %v4985_v4 = vadd.f32 %v4853_v3, %v4622_v45  ;;  %v8075_v58 = vmax.f32 %v12045_v12, %v7714_v8  ;;  %v4062_v35 = vsel %vm1778_vm3, %v4057_v5, %v12574_v30  ;;  %v12601_v7 = vld [vmem:[%s10445_s25 + $0x160] sm:$0xff]  ;;  %v12612_v3 = vld [vmem:[%s10445_s25 + $0x170] sm:$0xff] }
 0x2b3   : > { %v6390_v48 = vld [vmem:[#allocation2 + $0x208] sm:$0xff]  ;;  %v8342_v25 = vmax.f32 %v8210_v0, 0.0  ;;  %v12579_v57 = vpop.f32.mrf.mxu3  ;;  %v2131_v5 = vshll.u32 %v12601_v7, 16 }
 0x2b4   : > { %v6522_v23 = vadd.f32 %v6390_v48, %v12501_v2  ;;  %5117 = vst.msk [vmem:[#allocation2 + $0x210] sm:$0xff] %vm1177_vm4, %v4985_v4  ;;  %v8211_v47 = vadd.f32 %v12432_v36, %v8075_v58  ;;  %v10136_v58 = vld [vmem:[%s10445_s25 + $0x158] sm:$0xff]  ;;  %v2127_v48 = vshrl.u32 %v12530_v54, 16 }
 0x2b5   : > { %v8474_v61 = vpack.c.bf16 %v8342_v25, %v8342_v25  ;;  %v4624_v45 = vpop.f32.mrf.mxu2  ;;  %v12635_v54 = vld [vmem:[#allocation2 + $0x1f8] sm:$0xff] }
 0x2b6   : > { %6654 = vst.msk [vmem:[#allocation2 + $0x208] sm:$0xff] %vm1177_vm4, %v6522_v23  ;;  %v2691_v12 = vpop.f32.mrf.mxu1  ;;  %v8343_v39 = vmax.f32 %v8211_v47, 0.0  ;;  %v7082_v28 = vpop.permute.xlu0 %7081 }
 0x2b7   : > { %8607 = vst.msk [vmem:[%s11306_s6 + $0x84] sm:$0xf] %vm8573_vm5, %v8474_v61  ;;  %v2919_v2 = vld [vmem:[#allocation2 + $0x220] sm:$0xff]  ;;  %v12587_v53 = vmax.f32 %v12061_v44, %v7082_v28  ;;  %v1019_v43 = vpop.f32.mrf.mxu0  ;;  %v7092_v14 = vpop.permute.xlu2 %7091  ;;  %v4067_v61 = vshll.u32 %v12612_v3, 16 }
 0x2b8   : > { %v8475_v52 = vpack.c.bf16 %v8343_v39, %v8343_v39  ;;  %v3051_v24 = vadd.f32 %v2919_v2, %v2691_v12  ;;  %1247 = vst.msk [vmem:[#allocation2 + $0x228] sm:$0xff] %vm1177_vm4, %v1019_v43  ;;  %10067 = vmatmul.msk.bf16.gmra.mxu3 %vm635_vm1, %v5738_v19  ;;  %v12631_v12 = vld [vmem:[%s10445_s25 + $0x170] sm:$0xff]  ;;  %v2129_v2 = vor.u32 %v2127_v48, %v12568_v10  ;;  %v2133_v43 = vrot.slane %v2131_v5, 1 }
 0x2b9   : > { %9405 = vmatmul.msk.bf16.gmra.mxu1 %vm635_vm1, %v2126_v6  ;;  %v4854_v44 = vld [vmem:[#allocation2 + $0x218] sm:$0xff]  ;;  %v7084_v33 = vpop.permute.xlu1 %7083  ;;  %7741 = vrot.lane.b32.xlu0 %v12587_v53, %s10398_s27 }
 0x2ba   : > { %8608 = vst.msk [vmem:[%s11306_s6 + $0x88] sm:$0xf] %vm8573_vm5, %v8475_v52  ;;  %v4986_v50 = vadd.f32 %v4854_v44, %v4624_v45  ;;  %v12606_v34 = vmax.f32 %v12080_v37, %v7084_v33  ;;  %9736 = vmatmul.msk.bf16.gmra.mxu2 %vm635_vm1, %v4062_v35  ;;  %v12647_v52 = vmax.f32 %v12183_v1, %v7092_v14  ;;  %v12649_v44 = vrot.slane %v4067_v61, 1 }
 0x2bb   : > { %3183 = vst.msk [vmem:[#allocation2 + $0x220] sm:$0xff] %vm1177_vm4, %v3051_v24  ;;  %v6391_v0 = vld [vmem:[#allocation2 + $0x210] sm:$0xff]  ;;  %v12620_v37 = vpop.f32.mrf.mxu3  ;;  %v5739_v33 = vrot.slane %v12631_v12, 1 }
 0x2bc   : > { %5118 = vst.msk [vmem:[#allocation2 + $0x218] sm:$0xff] %vm1177_vm4, %v4986_v50  ;;  %v6523_v8 = vadd.f32 %v6391_v0, %v12544_v16  ;;  %7743 = vrot.lane.b32.xlu1 %v12606_v34, %s10398_s27  ;;  %v4063_v16 = vshrl.u32 %v12542_v41, 16  ;;  %v12640_v41 = vld [vmem:[#allocation2 + $0x200] sm:$0xff]  ;;  %v12747_v12 = vld [vmem:[%s10445_s25 + $0x170] sm:$0xff] }
 0x2bd   : > { %v12618_v31 = vld [vmem:[#allocation2 + $0x208] sm:$0xff]  ;;  %v4627_v28 = vpop.f32.mrf.mxu2  ;;  %v5740_v5 = vsel %vm5651_vm2, %v5737_v11, %v5739_v33  ;;  %v12682_v11 = vld [vmem:[%s10445_s25 + $0x178] sm:$0xff] }
 0x2be   : > { %7115 = vrot.lane.b32.xlu2 %v12618_v31, %s10397_s26  ;;  %v2693_v4 = vpop.f32.mrf.mxu1  ;;  %6655 = vst.msk [vmem:[#allocation2 + $0x210] sm:$0xff] %vm1177_vm4, %v6523_v8 }
 0x2bf   : > { %v1022_v25 = vpop.f32.mrf.mxu0  ;;  %v2920_v23 = vld [vmem:[#allocation2 + $0x228] sm:$0xff]  ;;  %v7728_v47 = vpop.permute.xlu2 %7727 }
 0x2c0   : > { %1248 = vst.msk [vmem:[#allocation2 + $0x230] sm:$0xff] %vm1177_vm4, %v1022_v25  ;;  %v3052_v6 = vadd.f32 %v2920_v23, %v2693_v4  ;;  %v8082_v39 = vmax.f32 %v12210_v55, %v7728_v47  ;;  %v4065_v55 = vor.u32 %v4063_v16, %v12574_v30  ;;  %v2134_v30 = vsel %vm1778_vm3, %v2129_v2, %v2133_v43  ;;  %v12676_v47 = vld [vmem:[%s10445_s25 + $0x168] sm:$0xff] }
 0x2c1   : > { %7111 = vrot.lane.b32.xlu0 %v12635_v54, %s10397_s26  ;;  %9075 = vmatmul.msk.bf16.gmra.mxu0 %vm635_vm1, %v10136_v58 }
 0x2c2   : > { %3184 = vst.msk [vmem:[#allocation2 + $0x228] sm:$0xff] %vm1177_vm4, %v3052_v6  ;;  %v8218_v35 = vadd.f32 %v12432_v36, %v8082_v39  ;;  %v4855_v19 = vld [vmem:[#allocation2 + $0x220] sm:$0xff]  ;;  %v4070_v48 = vsel %vm1778_vm3, %v4065_v55, %v12649_v44  ;;  %v2135_v39 = vshrl.u32 %v12601_v7, 16 }
 0x2c3   : > { %v4987_v24 = vadd.f32 %v4855_v19, %v4627_v28  ;;  %v6392_v45 = vld [vmem:[#allocation2 + $0x218] sm:$0xff]  ;;  %v12655_v0 = vpop.f32.mrf.mxu3  ;;  %v10137_v55 = vld [vmem:[%s10445_s25 + $0x160] sm:$0xff] }
 0x2c4   : > { %v8350_v50 = vmax.f32 %v8218_v35, 0.0  ;;  %v6524_v10 = vadd.f32 %v6392_v45, %v12579_v57  ;;  %7113 = vrot.lane.b32.xlu1 %v12640_v41, %s10397_s26 }
 0x2c5   : > { %5119 = vst.msk [vmem:[#allocation2 + $0x220] sm:$0xff] %vm1177_vm4, %v4987_v24  ;;  %v4629_v25 = vpop.f32.mrf.mxu2  ;;  %v2139_v24 = vshll.u32 %v12676_v47, 16 }
 0x2c6   : > { %7751 = vrot.lane.b32.xlu2 %v12647_v52, %s10398_s27  ;;  %v2696_v1 = vpop.f32.mrf.mxu1  ;;  %v8482_v14 = vpack.c.bf16 %v8350_v50, %v8350_v50  ;;  %6656 = vst.msk [vmem:[#allocation2 + $0x218] sm:$0xff] %vm1177_vm4, %v6524_v10  ;;  %v7718_v8 = vpop.permute.xlu0 %7717 }
 0x2c7   : > { %v2921_v4 = vld [vmem:[#allocation2 + $0x230] sm:$0xff]  ;;  %v8077_v57 = vmax.f32 %v12133_v38, %v7718_v8  ;;  %v1024_v58 = vpop.f32.mrf.mxu0  ;;  %v12702_v8 = vld [vmem:[%s10445_s25 + $0x178] sm:$0xff] }
 0x2c8   : > { %8615 = vst.msk [vmem:[%s11306_s6 + $0xa4] sm:$0xf] %vm8573_vm5, %v8482_v14  ;;  %v3053_v16 = vadd.f32 %v2921_v4, %v2696_v1  ;;  %10068 = vmatmul.msk.bf16.gmra.mxu3 %vm635_vm1, %v5740_v5  ;;  %v4071_v14 = vshrl.u32 %v12612_v3, 16  ;;  %v12710_v3 = vrot.slane %v2139_v24, 1 }
 0x2c9   : > { %9406 = vmatmul.msk.bf16.gmra.mxu1 %vm635_vm1, %v2134_v30  ;;  %v8213_v23 = vadd.f32 %v12432_v36, %v8077_v57  ;;  %1249 = vst.msk [vmem:[#allocation2 + $0x238] sm:$0xff] %vm1177_vm4, %v1024_v58  ;;  %v4856_v38 = vld [vmem:[#allocation2 + $0x228] sm:$0xff]  ;;  %v2137_v58 = vor.u32 %v2135_v39, %v2133_v43 }
 0x2ca   : > { %3185 = vst.msk [vmem:[#allocation2 + $0x230] sm:$0xff] %vm1177_vm4, %v3053_v16  ;;  %v4988_v61 = vadd.f32 %v4856_v38, %v4629_v25  ;;  %9737 = vmatmul.msk.bf16.gmra.mxu2 %vm635_vm1, %v4070_v48  ;;  %v4073_v43 = vor.u32 %v4071_v14, %v12649_v44  ;;  %v5741_v38 = vrot.slane %v12702_v8, 1 }
 0x2cb   : > { %v8345_v32 = vmax.f32 %v8213_v23, 0.0  ;;  %v12686_v28 = vpop.f32.mrf.mxu3 }
 0x2cc   : > { %5120 = vst.msk [vmem:[#allocation2 + $0x228] sm:$0xff] %vm1177_vm4, %v4988_v61  ;;  %v6393_v6 = vld [vmem:[#allocation2 + $0x220] sm:$0xff] }
 0x2cd   : > { %v8477_v2 = vpack.c.bf16 %v8345_v32, %v8345_v32  ;;  %v6525_v35 = vadd.f32 %v6393_v6, %v12620_v37  ;;  %v4075_v37 = vshll.u32 %v12682_v11, 16  ;;  %v4632_v57 = vpop.f32.mrf.mxu2 }
 0x2ce   : > { %v2698_v19 = vpop.f32.mrf.mxu1  ;;  %v7720_v45 = vpop.permute.xlu1 %7719 }
 0x2cf   : > { %v7088_v50 = vpop.permute.xlu0 %7087  ;;  %8610 = vst.msk [vmem:[%s11306_s6 + $0x90] sm:$0xf] %vm8573_vm5, %v8477_v2  ;;  %v8078_v10 = vmax.f32 %v12168_v40, %v7720_v45  ;;  %v1027_v7 = vpop.f32.mrf.mxu0  ;;  %v12714_v23 = vrot.slane %v4075_v37, 1  ;;  %v2142_v2 = vsel %vm1778_vm3, %v2137_v58, %v12710_v3 }
 0x2d0   : > { %v12695_v1 = vmax.f32 %v12174_v13, %v7088_v50  ;;  %v12697_v30 = vpop.permute.xlu2 %7097  ;;  %6657 = vst.msk [vmem:[#allocation2 + $0x220] sm:$0xff] %vm1177_vm4, %v6525_v35  ;;  %v2922_v4 = vld [vmem:[#allocation2 + $0x238] sm:$0xff]  ;;  %v5742_v50 = vsel %vm5651_vm2, %v5739_v33, %v5741_v38 }
 0x2d1   : > { %v3054_v48 = vadd.f32 %v2922_v4, %v2698_v19  ;;  %v8214_v40 = vadd.f32 %v12432_v36, %v8078_v10  ;;  %1250 = vst.msk [vmem:[#allocation2 + $0x240] sm:$0xff] %vm1177_vm4, %v1027_v7  ;;  %v4857_v13 = vld [vmem:[#allocation2 + $0x230] sm:$0xff]  ;;  %9076 = vmatmul.msk.bf16.gmra.mxu0 %vm635_vm1, %v10137_v55  ;;  %v4078_v45 = vsel %vm1778_vm3, %v4073_v43, %v12714_v23 }
 0x2d2   : > { %7747 = vrot.lane.b32.xlu0 %v12695_v1, %s10398_s27  ;;  %v4989_v5 = vadd.f32 %v4857_v13, %v4632_v57  ;;  %v6787_v19 = vld [vmem:[#allocation2 + $0x210] sm:$0xff]  ;;  %v12754_v57 = vld [vmem:[%s10445_s25 + $0x180] sm:$0xff]  ;;  %v12765_v43 = vmax.f32 %v12290_v56, %v12697_v30  ;;  %v12778_v30 = vld [vmem:[#allocation2 + $0x218] sm:$0xff] }
 0x2d3   : > { %3186 = vst.msk [vmem:[#allocation2 + $0x238] sm:$0xff] %vm1177_vm4, %v3054_v48  ;;  %v8346_v16 = vmax.f32 %v8214_v40, 0.0  ;;  %v6394_v25 = vld [vmem:[#allocation2 + $0x228] sm:$0xff]  ;;  %v12719_v32 = vpop.f32.mrf.mxu3 }
 0x2d4   : > { %5121 = vst.msk [vmem:[#allocation2 + $0x230] sm:$0xff] %vm1177_vm4, %v4989_v5  ;;  %v6526_v61 = vadd.f32 %v6394_v25, %v12655_v0  ;;  %v10138_v5 = vld [vmem:[%s10445_s25 + $0x168] sm:$0xff]  ;;  %v2147_v25 = vshll.u32 %v12747_v12, 16 }
 0x2d5   : > { %v8478_v6 = vpack.c.bf16 %v8346_v16, %v8346_v16  ;;  %v4634_v7 = vpop.f32.mrf.mxu2  ;;  %v2143_v16 = vshrl.u32 %v12676_v47, 16 }
 0x2d6   : > { %v2701_v39 = vpop.f32.mrf.mxu1  ;;  %6658 = vst.msk [vmem:[#allocation2 + $0x228] sm:$0xff] %vm1177_vm4, %v6526_v61  ;;  %v7090_v35 = vpop.permute.xlu1 %7089 }
 0x2d7   : > { %8611 = vst.msk [vmem:[%s11306_s6 + $0x94] sm:$0xf] %vm8573_vm5, %v8478_v6  ;;  %v12726_v44 = vld [vmem:[#allocation2 + $0x220] sm:$0xff]  ;;  %v12729_v55 = vmax.f32 %v12199_v51, %v7090_v35  ;;  %v1029_v0 = vpop.f32.mrf.mxu0  ;;  %v4079_v6 = vshrl.u32 %v12682_v11, 16  ;;  %v12786_v11 = vrot.slane %v2147_v25, 1 }
 0x2d8   : > { %v7734_v24 = vpop.permute.xlu2 %7733  ;;  %7121 = vrot.lane.b32.xlu2 %v12726_v44, %s10397_s26  ;;  %v2923_v10 = vld [vmem:[#allocation2 + $0x240] sm:$0xff]  ;;  %1251 = vst.msk [vmem:[#allocation2 + $0x248] sm:$0xff] %vm1177_vm4, %v1029_v0  ;;  %10069 = vmatmul.msk.bf16.gmra.mxu3 %vm635_vm1, %v5742_v50 }
 0x2d9   : > { %v8085_v51 = vmax.f32 %v12319_v29, %v7734_v24  ;;  %9407 = vmatmul.msk.bf16.gmra.mxu1 %vm635_vm1, %v2142_v2  ;;  %v3055_v14 = vadd.f32 %v2923_v10, %v2701_v39  ;;  %7749 = vrot.lane.b32.xlu1 %v12729_v55, %s10398_s27  ;;  %v12772_v0 = vld [vmem:[%s10445_s25 + $0x180] sm:$0xff]  ;;  %v4081_v50 = vor.u32 %v4079_v6, %v12714_v23 }
 0x2da   : > { %7117 = vrot.lane.b32.xlu0 %v6787_v19, %s10397_s26  ;;  %v4858_v37 = vld [vmem:[#allocation2 + $0x238] sm:$0xff]  ;;  %9738 = vmatmul.msk.bf16.gmra.mxu2 %vm635_vm1, %v4078_v45  ;;  %v4083_v19 = vshll.u32 %v12754_v57, 16 }
 0x2db   : > { %v8221_v33 = vadd.f32 %v12432_v36, %v8085_v51  ;;  %3187 = vst.msk [vmem:[#allocation2 + $0x240] sm:$0xff] %vm1177_vm4, %v3055_v14  ;;  %v4990_v29 = vadd.f32 %v4858_v37, %v4634_v7  ;;  %v6395_v4 = vld [vmem:[#allocation2 + $0x230] sm:$0xff]  ;;  %v12757_v40 = vpop.f32.mrf.mxu3  ;;  %v5743_v14 = vrot.slane %v12772_v0, 1  ;;  %v12900_v0 = vld [vmem:[%s10445_s25 + $0x180] sm:$0xff] }
 0x2dc   : > { %v6527_v48 = vadd.f32 %v6395_v4, %v12686_v28  ;;  %v12790_v7 = vrot.slane %v4083_v19, 1 }
 0x2dd   : > { %v8353_v58 = vmax.f32 %v8221_v33, 0.0  ;;  %5122 = vst.msk [vmem:[#allocation2 + $0x238] sm:$0xff] %vm1177_vm4, %v4990_v29  ;;  %v4637_v47 = vpop.f32.mrf.mxu2 }
 0x2de   : > { %v2703_v13 = vpop.f32.mrf.mxu1  ;;  %6659 = vst.msk [vmem:[#allocation2 + $0x230] sm:$0xff] %vm1177_vm4, %v6527_v48  ;;  %v7724_v28 = vpop.permute.xlu0 %7723 }
 0x2df   : > { %v8485_v61 = vpack.c.bf16 %v8353_v58, %v8353_v58  ;;  %v2924_v39 = vld [vmem:[#allocation2 + $0x248] sm:$0xff]  ;;  %v8080_v2 = vmax.f32 %v12245_v20, %v7724_v28  ;;  %v1032_v35 = vpop.f32.mrf.mxu0  ;;  %v2145_v20 = vor.u32 %v2143_v16, %v12710_v3 }
 0x2e0   : > { %7757 = vrot.lane.b32.xlu2 %v12765_v43, %s10398_s27  ;;  %v3056_v56 = vadd.f32 %v2924_v39, %v2703_v13  ;;  %1252 = vst.msk [vmem:[#allocation2 + $0x250] sm:$0xff] %vm1177_vm4, %v1032_v35  ;;  %v12827_v35 = vld [vmem:[%s10445_s25 + $0x188] sm:$0xff] }
 0x2e1   : > { %8618 = vst.msk [vmem:[%s11306_s6 + $0xb0] sm:$0xf] %vm8573_vm5, %v8485_v61  ;;  %v8216_v24 = vadd.f32 %v12432_v36, %v8080_v2  ;;  %7119 = vrot.lane.b32.xlu1 %v12778_v30, %s10397_s26  ;;  %9077 = vmatmul.msk.bf16.gmra.mxu0 %vm635_vm1, %v10138_v5  ;;  %v2150_v58 = vsel %vm1778_vm3, %v2145_v20, %v12786_v11  ;;  %v12821_v2 = vld [vmem:[%s10445_s25 + $0x178] sm:$0xff] }
 0x2e2   : > { %3188 = vst.msk [vmem:[#allocation2 + $0x248] sm:$0xff] %vm1177_vm4, %v3056_v56  ;;  %v4859_v45 = vld [vmem:[#allocation2 + $0x240] sm:$0xff]  ;;  %v5744_v61 = vsel %vm5651_vm2, %v5741_v38, %v5743_v14 }
 0x2e3   : > { %v8348_v10 = vmax.f32 %v8216_v24, 0.0  ;;  %v4991_v51 = vadd.f32 %v4859_v45, %v4637_v47  ;;  %v12793_v37 = vpop.f32.mrf.mxu3  ;;  %v2151_v45 = vshrl.u32 %v12747_v12, 16 }
 0x2e4   : > { %v6396_v33 = vld [vmem:[#allocation2 + $0x238] sm:$0xff] }
 0x2e5   : > { %v8480_v29 = vpack.c.bf16 %v8348_v10, %v8348_v10  ;;  %5123 = vst.msk [vmem:[#allocation2 + $0x240] sm:$0xff] %vm1177_vm4, %v4991_v51  ;;  %v6528_v3 = vadd.f32 %v6396_v33, %v12719_v32  ;;  %v4086_v32 = vsel %vm1778_vm3, %v4081_v50, %v12790_v7  ;;  %v2155_v50 = vshll.u32 %v12821_v2, 16  ;;  %v10139_v51 = vld [vmem:[%s10445_s25 + $0x170] sm:$0xff] }
 0x2e6   : > { %v2706_v4 = vpop.f32.mrf.mxu1  ;;  %v7726_v48 = vpop.permute.xlu1 %7725 }
 0x2e7   : > { %v7094_v23 = vpop.permute.xlu0 %7093  ;;  %8613 = vst.msk [vmem:[%s11306_s6 + $0x9c] sm:$0xf] %vm8573_vm5, %v8480_v29  ;;  %v8081_v13 = vmax.f32 %v12278_v59, %v7726_v48  ;;  %v1034_v16 = vpop.f32.mrf.mxu0  ;;  %v2925_v28 = vld [vmem:[#allocation2 + $0x250] sm:$0xff]  ;;  %v12846_v48 = vld [vmem:[%s10445_s25 + $0x188] sm:$0xff] }
 0x2e8   : > { %v12803_v5 = vmax.f32 %v12271_v42, %v7094_v23  ;;  %v12805_v25 = vpop.permute.xlu2 %7103  ;;  %6660 = vst.msk [vmem:[#allocation2 + $0x238] sm:$0xff] %vm1177_vm4, %v6528_v3  ;;  %v4639_v59 = vpop.f32.mrf.mxu2  ;;  %v3057_v42 = vadd.f32 %v2925_v28, %v2706_v4  ;;  %10070 = vmatmul.msk.bf16.gmra.mxu3 %vm635_vm1, %v5744_v61 }
 0x2e9   : > { %9408 = vmatmul.msk.bf16.gmra.mxu1 %vm635_vm1, %v2150_v58  ;;  %v8217_v6 = vadd.f32 %v12432_v36, %v8081_v13  ;;  %1253 = vst.msk [vmem:[#allocation2 + $0x258] sm:$0xff] %vm1177_vm4, %v1034_v16  ;;  %v4860_v39 = vld [vmem:[#allocation2 + $0x248] sm:$0xff]  ;;  %v4087_v58 = vshrl.u32 %v12754_v57, 16  ;;  %v2153_v57 = vor.u32 %v2151_v45, %v12786_v11  ;;  %v12880_v45 = vld [vmem:[#allocation2 + $0x230] sm:$0xff] }
 0x2ea   : > { %7753 = vrot.lane.b32.xlu0 %v12803_v5, %s10398_s27  ;;  %v4992_v8 = vadd.f32 %v4860_v39, %v4639_v59  ;;  %9739 = vmatmul.msk.bf16.gmra.mxu2 %vm635_vm1, %v4086_v32  ;;  %3189 = vst.msk [vmem:[#allocation2 + $0x250] sm:$0xff] %vm1177_vm4, %v3057_v42  ;;  %v12852_v16 = vld [vmem:[#allocation2 + $0x228] sm:$0xff]  ;;  %v12860_v32 = vrot.slane %v2155_v50, 1  ;;  %v5745_v39 = vrot.slane %v12846_v48, 1 }
 0x2eb   : > { %v8349_v38 = vmax.f32 %v8217_v6, 0.0  ;;  %v12830_v56 = vpop.f32.mrf.mxu3  ;;  %v4089_v42 = vor.u32 %v4087_v58, %v12790_v7  ;;  %v12972_v48 = vld [vmem:[%s10445_s25 + $0x188] sm:$0xff] }
 0x2ec   : > { %5124 = vst.msk [vmem:[#allocation2 + $0x248] sm:$0xff] %vm1177_vm4, %v4992_v8  ;;  %v6397_v19 = vld [vmem:[#allocation2 + $0x240] sm:$0xff] }
 0x2ed   : > { %v8481_v47 = vpack.c.bf16 %v8349_v38, %v8349_v38  ;;  %v6529_v24 = vadd.f32 %v6397_v19, %v12757_v40  ;;  %v4091_v40 = vshll.u32 %v12827_v35, 16 }
 0x2ee   : > { %v2708_v20 = vpop.f32.mrf.mxu1  ;;  %v7096_v10 = vpop.permute.xlu1 %7095 }
 0x2ef   : > { %8614 = vst.msk [vmem:[%s11306_s6 + $0xa0] sm:$0xf] %vm8573_vm5, %v8481_v47  ;;  %v12838_v33 = vld [vmem:[#allocation2 + $0x238] sm:$0xff]  ;;  %v12841_v29 = vmax.f32 %v12324_v62, %v7096_v10  ;;  %v1037_v3 = vpop.f32.mrf.mxu0  ;;  %v12866_v6 = vrot.slane %v4091_v40, 1  ;;  %v2158_v47 = vsel %vm1778_vm3, %v2153_v57, %v12860_v32  ;;  %v12906_v40 = vld [vmem:[%s10445_s25 + $0x190] sm:$0xff] }
 0x2f0   : > { %v7740_v4 = vpop.permute.xlu2 %7739  ;;  %6661 = vst.msk [vmem:[#allocation2 + $0x240] sm:$0xff] %vm1177_vm4, %v6529_v24  ;;  %7127 = vrot.lane.b32.xlu2 %v12838_v33, %s10397_s26  ;;  %v2926_v12 = vld [vmem:[#allocation2 + $0x258] sm:$0xff]  ;;  %v4642_v13 = vpop.f32.mrf.mxu2  ;;  %v12877_v24 = vmax.f32 %v12399_v26, %v12805_v25  ;;  %v5746_v26 = vsel %vm5651_vm2, %v5743_v14, %v5745_v39 }
 0x2f1   : > { %v8088_v23 = vmax.f32 %v12426_v18, %v7740_v4  ;;  %v3058_v62 = vadd.f32 %v2926_v12, %v2708_v20  ;;  %1254 = vst.msk [vmem:[#allocation2 + $0x260] sm:$0xff] %vm1177_vm4, %v1037_v3  ;;  %7755 = vrot.lane.b32.xlu1 %v12841_v29, %s10398_s27  ;;  %v4861_v28 = vld [vmem:[#allocation2 + $0x250] sm:$0xff]  ;;  %9078 = vmatmul.msk.bf16.gmra.mxu0 %vm635_vm1, %v10139_v51 }
 0x2f2   : > { %7123 = vrot.lane.b32.xlu0 %v12852_v16, %s10397_s26  ;;  %v4993_v18 = vadd.f32 %v4861_v28, %v4642_v13  ;;  %v4094_v10 = vsel %vm1778_vm3, %v4089_v42, %v12866_v6  ;;  %v2163_v28 = vshll.u32 %v12900_v0, 16  ;;  %v10140_v42 = vld [vmem:[%s10445_s25 + $0x178] sm:$0xff] }
 0x2f3   : > { %v8224_v61 = vadd.f32 %v12432_v36, %v8088_v23  ;;  %3190 = vst.msk [vmem:[#allocation2 + $0x258] sm:$0xff] %vm1177_vm4, %v3058_v62  ;;  %v6398_v59 = vld [vmem:[#allocation2 + $0x248] sm:$0xff]  ;;  %v12870_v38 = vpop.f32.mrf.mxu3 }
 0x2f4   : > { %v6530_v11 = vadd.f32 %v6398_v59, %v12793_v37  ;;  %5125 = vst.msk [vmem:[#allocation2 + $0x250] sm:$0xff] %vm1177_vm4, %v4993_v18 }
 0x2f5   : > { %v8356_v8 = vmax.f32 %v8224_v61, 0.0  ;;  %v2159_v61 = vshrl.u32 %v12821_v2, 16  ;;  %v12926_v2 = vld [vmem:[%s10445_s25 + $0x190] sm:$0xff] }
 0x2f6   : > { %v2711_v19 = vpop.f32.mrf.mxu1  ;;  %6662 = vst.msk [vmem:[#allocation2 + $0x248] sm:$0xff] %vm1177_vm4, %v6530_v11  ;;  %v7730_v20 = vpop.permute.xlu0 %7729 }
 0x2f7   : > { %v8488_v7 = vpack.c.bf16 %v8356_v8, %v8356_v8  ;;  %v8083_v37 = vmax.f32 %v12353_v63, %v7730_v20  ;;  %v1039_v50 = vpop.f32.mrf.mxu0  ;;  %v4095_v8 = vshrl.u32 %v12827_v35, 16 }
 0x2f8   : > { %7763 = vrot.lane.b32.xlu2 %v12877_v24, %s10398_s27  ;;  %v2927_v25 = vld [vmem:[#allocation2 + $0x260] sm:$0xff]  ;;  %v4644_v51 = vpop.f32.mrf.mxu2  ;;  %1255 = vst.msk [vmem:[#allocation2 + $0x268] sm:$0xff] %vm1177_vm4, %v1039_v50  ;;  %10071 = vmatmul.msk.bf16.gmra.mxu3 %vm635_vm1, %v5746_v26 }
 0x2f9   : > { %8621 = vst.msk [vmem:[%s11306_s6 + $0xbc] sm:$0xf] %vm8573_vm5, %v8488_v7  ;;  %9409 = vmatmul.msk.bf16.gmra.mxu1 %vm635_vm1, %v2158_v47  ;;  %v3059_v63 = vadd.f32 %v2927_v25, %v2711_v19  ;;  %v8219_v3 = vadd.f32 %v12432_v36, %v8083_v37  ;;  %7125 = vrot.lane.b32.xlu1 %v12880_v45, %s10397_s26 }
 0x2fa   : > { %v4862_v14 = vld [vmem:[#allocation2 + $0x258] sm:$0xff]  ;;  %9740 = vmatmul.msk.bf16.gmra.mxu2 %vm635_vm1, %v4094_v10  ;;  %v4097_v26 = vor.u32 %v4095_v8, %v12866_v6 }
 0x2fb   : > { %3191 = vst.msk [vmem:[#allocation2 + $0x260] sm:$0xff] %vm1177_vm4, %v3059_v63  ;;  %v8351_v4 = vmax.f32 %v8219_v3, 0.0  ;;  %v4994_v58 = vadd.f32 %v4862_v14, %v4644_v51  ;;  %v6399_v12 = vld [vmem:[#allocation2 + $0x250] sm:$0xff]  ;;  %v12908_v23 = vpop.f32.mrf.mxu3  ;;  %v5747_v63 = vrot.slane %v12926_v2, 1 }
 0x2fc   : > { %v6531_v62 = vadd.f32 %v6399_v12, %v12830_v56  ;;  %v4099_v56 = vshll.u32 %v12906_v40, 16 }
 0x2fd   : > { %v8483_v13 = vpack.c.bf16 %v8351_v4, %v8351_v4  ;;  %5126 = vst.msk [vmem:[#allocation2 + $0x258] sm:$0xff] %vm1177_vm4, %v4994_v58 }
 0x2fe   : > { %v2713_v57 = vpop.f32.mrf.mxu1  ;;  %v7732_v18 = vpop.permute.xlu1 %7731  ;;  %6663 = vst.msk [vmem:[#allocation2 + $0x250] sm:$0xff] %vm1177_vm4, %v6531_v62 }
 0x2ff   : > { %v7100_v59 = vpop.permute.xlu0 %7099  ;;  %8616 = vst.msk [vmem:[%s11306_s6 + $0xa8] sm:$0xf] %vm8573_vm5, %v8483_v13  ;;  %v8084_v11 = vmax.f32 %v12386_v17, %v7732_v18  ;;  %v1042_v47 = vpop.f32.mrf.mxu0  ;;  %v2928_v20 = vld [vmem:[#allocation2 + $0x268] sm:$0xff]  ;;  %v2161_v17 = vor.u32 %v2159_v61, %v12860_v32  ;;  %v6793_v13 = vld [vmem:[#allocation2 + $0x240] sm:$0xff] }
 0x300   : > { %v12920_v19 = vmax.f32 %v12392_v15, %v7100_v59  ;;  %v12922_v7 = vpop.permute.xlu2 %7109  ;;  %v4647_v37 = vpop.f32.mrf.mxu2  ;;  %v3060_v50 = vadd.f32 %v2928_v20, %v2713_v57  ;;  %1256 = vst.msk [vmem:[#allocation2 + $0x270] sm:$0xff] %vm1177_vm4, %v1042_v47  ;;  %v12934_v15 = vrot.slane %v2163_v28, 1 }
 0x301   : > { %v8220_v35 = vadd.f32 %v12432_v36, %v8084_v11  ;;  %9079 = vmatmul.msk.bf16.gmra.mxu0 %vm635_vm1, %v10140_v42  ;;  %v12939_v36 = vrot.slane %v4099_v56, 1  ;;  %v12984_v56 = vld [vmem:[%s10445_s25 + $0x198] sm:$0xff] }
 0x302   : > { %7759 = vrot.lane.b32.xlu0 %v12920_v19, %s10398_s27  ;;  %v4863_v10 = vld [vmem:[#allocation2 + $0x260] sm:$0xff]  ;;  %3192 = vst.msk [vmem:[#allocation2 + $0x268] sm:$0xff] %vm1177_vm4, %v3060_v50  ;;  %v2166_v6 = vsel %vm1778_vm3, %v2161_v17, %v12934_v15 }
 0x303   : > { %v8352_v25 = vmax.f32 %v8220_v35, 0.0  ;;  %v4995_v51 = vadd.f32 %v4863_v10, %v4647_v37  ;;  %v12942_v14 = vpop.f32.mrf.mxu3  ;;  %v4102_v18 = vsel %vm1778_vm3, %v4097_v26, %v12939_v36  ;;  %v2167_v10 = vshrl.u32 %v12900_v0, 16 }
 0x304   : > { %v6400_v3 = vld [vmem:[#allocation2 + $0x258] sm:$0xff]  ;;  %v2171_v26 = vshll.u32 %v12972_v48, 16 }
 0x305   : > { %v8484_v32 = vpack.c.bf16 %v8352_v25, %v8352_v25  ;;  %5127 = vst.msk [vmem:[#allocation2 + $0x260] sm:$0xff] %vm1177_vm4, %v4995_v51  ;;  %v6532_v4 = vadd.f32 %v6400_v3, %v12870_v38  ;;  %v12950_v62 = vld [vmem:[#allocation2 + $0x250] sm:$0xff]  ;;  %v5748_v38 = vsel %vm5651_vm2, %v5745_v39, %v5747_v63  ;;  %v12977_v39 = vld [vmem:[%s14785_s2] ss:$0 sm:$0xff]  ;;  %v12994_v25 = vmax.f32 %v12499_v9, %v12922_v7  ;;  %v13007_v9 = vld [vmem:[#allocation2 + $0x248] sm:$0xff] }
 0x306   : > { %v2716_v58 = vpop.f32.mrf.mxu1  ;;  %v7102_v12 = vpop.permute.xlu1 %7101  ;;  %7133 = vrot.lane.b32.xlu2 %v12950_v62, %s10397_s26  ;;  %v10141_v3 = vld [vmem:[%s10445_s25 + $0x180] sm:$0xff] }
 0x307   : > { %8617 = vst.msk [vmem:[%s11306_s6 + $0xac] sm:$0xf] %vm8573_vm5, %v8484_v32  ;;  %v12953_v57 = vmax.f32 %v12415_v60, %v7102_v12  ;;  %v1044_v61 = vpop.f32.mrf.mxu0  ;;  %v2929_v59 = vld [vmem:[#allocation2 + $0x270] sm:$0xff]  ;;  %v13013_v12 = vrot.slane %v2171_v26, 1 }
 0x308   : > { %v7746_v28 = vpop.permute.xlu2 %7745  ;;  %6664 = vst.msk [vmem:[#allocation2 + $0x258] sm:$0xff] %vm1177_vm4, %v6532_v4  ;;  %v4649_v42 = vpop.f32.mrf.mxu2  ;;  %v3061_v8 = vadd.f32 %v2929_v59, %v2716_v58  ;;  %10072 = vmatmul.msk.bf16.gmra.mxu3 %vm635_vm1, %v5748_v38  ;;  %v4103_v4 = vshrl.u32 %v12906_v40, 16  ;;  %v4107_v58 = vshll.u32 %v12984_v56, 16  ;;  %v2169_v40 = vor.u32 %v2167_v10, %v12934_v15  ;;  %v13042_v26 = vld [vmem:[%s10445_s25 + $0x190] sm:$0xff] }
 0x309   : > { %v8091_v60 = vmax.f32 %v12536_v27, %v7746_v28  ;;  %9410 = vmatmul.msk.bf16.gmra.mxu1 %vm635_vm1, %v2166_v6  ;;  %1257 = vst.msk [vmem:[#allocation2 + $0x278] sm:$0xff] %vm1177_vm4, %v1044_v61  ;;  %7761 = vrot.lane.b32.xlu1 %v12953_v57, %s10398_s27  ;;  %v4864_v11 = vld [vmem:[#allocation2 + $0x268] sm:$0xff]  ;;  %v13001_v6 = vld [vmem:[%s10445_s25 + $0x198] sm:$0xff] }
 0x30a   : > { %7129 = vrot.lane.b32.xlu0 %v6793_v13, %s10397_s26  ;;  %9741 = vmatmul.msk.bf16.gmra.mxu2 %vm635_vm1, %v4102_v18  ;;  %3193 = vst.msk [vmem:[#allocation2 + $0x270] sm:$0xff] %vm1177_vm4, %v3061_v8  ;;  %v4996_v47 = vadd.f32 %v4864_v11, %v4649_v42  ;;  %v4105_v18 = vor.u32 %v4103_v4, %v12939_v36  ;;  %v13018_v38 = vrot.slane %v4107_v58, 1  ;;  %v5749_v59 = vrot.slane %v13001_v6, 1  ;;  %v13048_v4 = vld [vmem:[%s10445_s25 + $0x1a0] sm:$0xff] }
 0x30b   : > { %v8227_v27 = vadd.f32 %v12977_v39, %v8091_v60  ;;  %v12986_v50 = vpop.f32.mrf.mxu3  ;;  %v2174_v11 = vsel %vm1778_vm3, %v2169_v40, %v13013_v12 }
 0x30c   : > { %v6401_v37 = vld [vmem:[#allocation2 + $0x260] sm:$0xff]  ;;  %5128 = vst.msk [vmem:[#allocation2 + $0x268] sm:$0xff] %vm1177_vm4, %v4996_v47 }
 0x30d   : > { %v8359_v20 = vmax.f32 %v8227_v27, 0.0  ;;  %v6533_v35 = vadd.f32 %v6401_v37, %v12908_v23 }
 0x30e   : > { %v2718_v17 = vpop.f32.mrf.mxu1  ;;  %7769 = vrot.lane.b32.xlu2 %v12994_v25, %s10398_s27 }
 0x30f   : > { %v8491_v51 = vpack.c.bf16 %v8359_v20, %v8359_v20  ;;  %6665 = vst.msk [vmem:[#allocation2 + $0x260] sm:$0xff] %vm1177_vm4, %v6533_v35  ;;  %v1047_v32 = vpop.f32.mrf.mxu0 }
 0x310   : > { %v2930_v0 = vld [vmem:[#allocation2 + $0x278] sm:$0xff]  ;;  %v4652_v23 = vpop.f32.mrf.mxu2  ;;  %1258 = vst.msk [vmem:[#allocation2 + $0x280] sm:$0xff] %vm1177_vm4, %v1047_v32 }
 0x311   : > { %8624 = vst.msk [vmem:[%s11306_s6 + $0xc8] sm:$0xf] %vm8573_vm5, %v8491_v51  ;;  %v3062_v7 = vadd.f32 %v2930_v0, %v2718_v17  ;;  %7131 = vrot.lane.b32.xlu1 %v13007_v9, %s10397_s26  ;;  %v4865_v13 = vld [vmem:[#allocation2 + $0x270] sm:$0xff]  ;;  %9080 = vmatmul.msk.bf16.gmra.mxu0 %vm635_vm1, %v10141_v3 }
 0x312   : > { %v4997_v61 = vadd.f32 %v4865_v13, %v4652_v23 }
 0x313   : > { %3194 = vst.msk [vmem:[#allocation2 + $0x278] sm:$0xff] %vm1177_vm4, %v3062_v7  ;;  %v6402_v60 = vld [vmem:[#allocation2 + $0x268] sm:$0xff]  ;;  %v13022_v8 = vpop.f32.mrf.mxu3 }
 0x314   : > { %v7736_v28 = vpop.permute.xlu0 %7735  ;;  %5129 = vst.msk [vmem:[#allocation2 + $0x270] sm:$0xff] %vm1177_vm4, %v4997_v61  ;;  %v6534_v15 = vadd.f32 %v6402_v60, %v12942_v14  ;;  %v5750_v14 = vsel %vm5651_vm2, %v5747_v63, %v5749_v59  ;;  %v2175_v61 = vshrl.u32 %v12972_v48, 16  ;;  %v4111_v48 = vshrl.u32 %v12984_v56, 16 }
 0x315   : > { %v8086_v42 = vmax.f32 %v12478_v22, %v7736_v28  ;;  %v4110_v22 = vsel %vm1778_vm3, %v4105_v18, %v13018_v38  ;;  %v2179_v28 = vshll.u32 %v13042_v26, 16 }
 0x316   : > { %v2721_v27 = vpop.f32.mrf.mxu1  ;;  %6666 = vst.msk [vmem:[#allocation2 + $0x268] sm:$0xff] %vm1177_vm4, %v6534_v15  ;;  %v4115_v15 = vshll.u32 %v13048_v4, 16 }
 0x317   : > { %v8222_v36 = vadd.f32 %v12977_v39, %v8086_v42  ;;  %v1049_v47 = vpop.f32.mrf.mxu0  ;;  %v2931_v35 = vld [vmem:[#allocation2 + $0x280] sm:$0xff] }
 0x318   : > { %v13030_v20 = vpop.permute.xlu2 %7115  ;;  %1259 = vst.msk [vmem:[#allocation2 + $0x288] sm:$0xff] %vm1177_vm4, %v1049_v47  ;;  %v4654_v17 = vpop.f32.mrf.mxu2  ;;  %v3063_v10 = vadd.f32 %v2931_v35, %v2721_v27  ;;  %10073 = vmatmul.msk.bf16.gmra.mxu3 %vm635_vm1, %v5750_v14  ;;  %v13074_v27 = vld [vmem:[%s10445_s25 + $0x1a0] sm:$0xff]  ;;  %v2177_v14 = vor.u32 %v2175_v61, %v13013_v12 }
 0x319   : > { %v8354_v37 = vmax.f32 %v8222_v36, 0.0  ;;  %9411 = vmatmul.msk.bf16.gmra.mxu1 %vm635_vm1, %v2174_v11 }
 0x31a   : > { %v4866_v3 = vld [vmem:[#allocation2 + $0x278] sm:$0xff]  ;;  %9742 = vmatmul.msk.bf16.gmra.mxu2 %vm635_vm1, %v4110_v22  ;;  %3195 = vst.msk [vmem:[#allocation2 + $0x280] sm:$0xff] %vm1177_vm4, %v3063_v10 }
 0x31b   : > { %v8486_v51 = vpack.c.bf16 %v8354_v37, %v8354_v37  ;;  %v4998_v2 = vadd.f32 %v4866_v3, %v4654_v17  ;;  %v7738_v63 = vpop.permute.xlu1 %7737  ;;  %v6403_v58 = vld [vmem:[#allocation2 + $0x270] sm:$0xff]  ;;  %v13056_v7 = vpop.f32.mrf.mxu3  ;;  %v13079_v37 = vrot.slane %v2179_v28, 1  ;;  %v4113_v3 = vor.u32 %v4111_v48, %v13018_v38  ;;  %v13130_v48 = vld [vmem:[%s10445_s25 + $0x1a8] sm:$0xff] }
 0x31c   : > { %v7106_v32 = vpop.permute.xlu0 %7105  ;;  %v8087_v0 = vmax.f32 %v12513_v21, %v7738_v63  ;;  %v6535_v40 = vadd.f32 %v6403_v58, %v12986_v50 }
 0x31d   : > { %8619 = vst.msk [vmem:[%s11306_s6 + $0xb4] sm:$0xf] %vm8573_vm5, %v8486_v51  ;;  %v13054_v23 = vmax.f32 %v12508_v49, %v7106_v32  ;;  %v13063_v60 = vld [vmem:[#allocation2 + $0x268] sm:$0xff]  ;;  %v2182_v61 = vsel %vm1778_vm3, %v2177_v14, %v13079_v37 }
 0x31e   : > { %5130 = vst.msk [vmem:[#allocation2 + $0x278] sm:$0xff] %vm1177_vm4, %v4998_v2  ;;  %v2723_v13 = vpop.f32.mrf.mxu1  ;;  %v8223_v18 = vadd.f32 %v12977_v39, %v8087_v0  ;;  %v10142_v49 = vld [vmem:[%s10445_s25 + $0x188] sm:$0xff]  ;;  %7139 = vrot.lane.b32.xlu2 %v13063_v60, %s10397_s26  ;;  %v13085_v2 = vrot.slane %v4115_v15, 1  ;;  %v13097_v0 = vmax.f32 %v12618_v31, %v13030_v20 }
 0x31f   : > { %7765 = vrot.lane.b32.xlu0 %v13054_v23, %s10398_s27  ;;  %6667 = vst.msk [vmem:[#allocation2 + $0x270] sm:$0xff] %vm1177_vm4, %v6535_v40  ;;  %v2932_v21 = vld [vmem:[#allocation2 + $0x288] sm:$0xff]  ;;  %v1052_v50 = vpop.f32.mrf.mxu0 }
 0x320   : > { %v7752_v42 = vpop.permute.xlu2 %7751  ;;  %v8355_v11 = vmax.f32 %v8223_v18, 0.0  ;;  %v3064_v36 = vadd.f32 %v2932_v21, %v2723_v13  ;;  %1260 = vst.msk [vmem:[#allocation2 + $0x290] sm:$0xff] %vm1177_vm4, %v1052_v50  ;;  %v4657_v22 = vpop.f32.mrf.mxu2  ;;  %v13101_v13 = vld [vmem:[#allocation2 + $0x258] sm:$0xff]  ;;  %v4118_v20 = vsel %vm1778_vm3, %v4113_v3, %v13085_v2  ;;  %v4123_v3 = vshll.u32 %v13130_v48, 16 }
 0x321   : > { %v8094_v47 = vmax.f32 %v12647_v52, %v7752_v42  ;;  %v4867_v17 = vld [vmem:[#allocation2 + $0x280] sm:$0xff]  ;;  %9081 = vmatmul.msk.bf16.gmra.mxu0 %vm635_vm1, %v10142_v49  ;;  %v5751_v52 = vrot.slane %v13074_v27, 1  ;;  %v13124_v50 = vld [vmem:[%s10445_s25 + $0x198] sm:$0xff] }
 0x322   : > { %v8487_v35 = vpack.c.bf16 %v8355_v11, %v8355_v11  ;;  %3196 = vst.msk [vmem:[#allocation2 + $0x288] sm:$0xff] %vm1177_vm4, %v3064_v36  ;;  %v4999_v10 = vadd.f32 %v4867_v17, %v4657_v22  ;;  %v2183_v22 = vshrl.u32 %v13042_v26, 16  ;;  %v2187_v14 = vshll.u32 %v13124_v50, 16  ;;  %v13147_v26 = vld [vmem:[%s10445_s25 + $0x1a8] sm:$0xff] }
 0x323   : > { %v8230_v56 = vadd.f32 %v12977_v39, %v8094_v47  ;;  %v7108_v51 = vpop.permute.xlu1 %7107  ;;  %v13093_v58 = vpop.f32.mrf.mxu3  ;;  %v5752_v28 = vsel %vm5651_vm2, %v5749_v59, %v5751_v52  ;;  %v6797_v59 = vld [vmem:[#allocation2 + $0x260] sm:$0xff] }
 0x324   : > { %8620 = vst.msk [vmem:[%s11306_s6 + $0xb8] sm:$0xf] %vm8573_vm5, %v8487_v35  ;;  %v13091_v32 = vmax.f32 %v12559_v46, %v7108_v51 }
 0x325   : > { %v8362_v12 = vmax.f32 %v8230_v56, 0.0  ;;  %v6404_v63 = vld [vmem:[#allocation2 + $0x278] sm:$0xff]  ;;  %5131 = vst.msk [vmem:[#allocation2 + $0x280] sm:$0xff] %vm1177_vm4, %v4999_v10  ;;  %v10143_v10 = vld [vmem:[%s10445_s25 + $0x190] sm:$0xff] }
 0x326   : > { %v6536_v38 = vadd.f32 %v6404_v63, %v13022_v8  ;;  %v2726_v40 = vpop.f32.mrf.mxu1  ;;  %7767 = vrot.lane.b32.xlu1 %v13091_v32, %s10398_s27  ;;  %7775 = vrot.lane.b32.xlu2 %v13097_v0, %s10398_s27 }
 0x327   : > { %v8494_v46 = vpack.c.bf16 %v8362_v12, %v8362_v12  ;;  %7135 = vrot.lane.b32.xlu0 %v13101_v13, %s10397_s26  ;;  %v2933_v31 = vld [vmem:[#allocation2 + $0x290] sm:$0xff]  ;;  %v1054_v8 = vpop.f32.mrf.mxu0 }
 0x328   : > { %6668 = vst.msk [vmem:[#allocation2 + $0x278] sm:$0xff] %vm1177_vm4, %v6536_v38  ;;  %v3065_v18 = vadd.f32 %v2933_v31, %v2726_v40  ;;  %v4659_v49 = vpop.f32.mrf.mxu2  ;;  %10074 = vmatmul.msk.bf16.gmra.mxu3 %vm635_vm1, %v5752_v28  ;;  %v2185_v31 = vor.u32 %v2183_v22, %v13079_v37 }
 0x329   : > { %8627 = vst.msk [vmem:[%s11306_s6 + $0xd4] sm:$0xf] %vm8573_vm5, %v8494_v46  ;;  %9412 = vmatmul.msk.bf16.gmra.mxu1 %vm635_vm1, %v2182_v61  ;;  %v4868_v21 = vld [vmem:[#allocation2 + $0x288] sm:$0xff] }
 0x32a   : > { %1261 = vst.msk [vmem:[#allocation2 + $0x298] sm:$0xff] %vm1177_vm4, %v1054_v8  ;;  %v5000_v42 = vadd.f32 %v4868_v21, %v4659_v49  ;;  %9743 = vmatmul.msk.bf16.gmra.mxu2 %vm635_vm1, %v4118_v20 }
 0x32b   : > { %3197 = vst.msk [vmem:[#allocation2 + $0x290] sm:$0xff] %vm1177_vm4, %v3065_v18  ;;  %v7742_v6 = vpop.permute.xlu0 %7741  ;;  %v13137_v35 = vpop.f32.mrf.mxu3 }
 0x32c   : > { %5132 = vst.msk [vmem:[#allocation2 + $0x288] sm:$0xff] %vm1177_vm4, %v5000_v42  ;;  %v6405_v15 = vld [vmem:[#allocation2 + $0x280] sm:$0xff]  ;;  %v8089_v11 = vmax.f32 %v12587_v53, %v7742_v6  ;;  %v13157_v42 = vrot.slane %v4123_v3, 1  ;;  %v5753_v6 = vrot.slane %v13147_v26, 1  ;;  %v6799_v3 = vld [vmem:[#allocation2 + $0x270] sm:$0xff] }
 0x32d   : > { %v6537_v36 = vadd.f32 %v6405_v15, %v13056_v7  ;;  %v4119_v7 = vshrl.u32 %v13048_v4, 16 }
 0x32e   : > { %v2728_v47 = vpop.f32.mrf.mxu1  ;;  %v8225_v56 = vadd.f32 %v12977_v39, %v8089_v11  ;;  %v7744_v17 = vpop.permute.xlu1 %7743  ;;  %7137 = vrot.lane.b32.xlu1 %v6797_v59, %s10397_s26 }
 0x32f   : > { %6669 = vst.msk [vmem:[#allocation2 + $0x280] sm:$0xff] %vm1177_vm4, %v6537_v36  ;;  %v8090_v51 = vmax.f32 %v12606_v34, %v7744_v17  ;;  %v1057_v53 = vpop.f32.mrf.mxu0  ;;  %v13152_v34 = vrot.slane %v2187_v14, 1  ;;  %v4121_v21 = vor.u32 %v4119_v7, %v13085_v2  ;;  %v5754_v17 = vsel %vm5651_vm2, %v5751_v52, %v5753_v6 }
 0x330   : > { %v8357_v12 = vmax.f32 %v8225_v56, 0.0  ;;  %1262 = vst.msk [vmem:[#allocation2 + $0x2a0] sm:$0xff] %vm1177_vm4, %v1057_v53  ;;  %v4662_v38 = vpop.f32.mrf.mxu2 }
 0x331   : > { %v2934_v63 = vld [vmem:[#allocation2 + $0x298] sm:$0xff]  ;;  %v8226_v61 = vadd.f32 %v12977_v39, %v8090_v51  ;;  %9082 = vmatmul.msk.bf16.gmra.mxu0 %vm635_vm1, %v10143_v10  ;;  %v2190_v36 = vsel %vm1778_vm3, %v2185_v31, %v13152_v34  ;;  %v4126_v56 = vsel %vm1778_vm3, %v4121_v21, %v13157_v42 }
 0x332   : > { %v3066_v40 = vadd.f32 %v2934_v63, %v2728_v47  ;;  %v4869_v46 = vld [vmem:[#allocation2 + $0x290] sm:$0xff]  ;;  %v8489_v8 = vpack.c.bf16 %v8357_v12, %v8357_v12  ;;  %v7122_v4 = vpop.permute.xlu2 %7121 }
 0x333   : > { %v5001_v20 = vadd.f32 %v4869_v46, %v4662_v38  ;;  %v8358_v28 = vmax.f32 %v8226_v61, 0.0  ;;  %v6406_v18 = vld [vmem:[#allocation2 + $0x288] sm:$0xff]  ;;  %v7112_v49 = vpop.permute.xlu0 %7111  ;;  %v13169_v47 = vpop.f32.mrf.mxu3  ;;  %v13202_v12 = vld [vmem:[%s10445_s25 + $0x1b0] sm:$0xff]  ;;  %v2191_v38 = vshrl.u32 %v13124_v50, 16 }
 0x334   : > { %3198 = vst.msk [vmem:[#allocation2 + $0x298] sm:$0xff] %vm1177_vm4, %v3066_v40  ;;  %v6538_v37 = vadd.f32 %v6406_v18, %v13093_v58  ;;  %v13164_v59 = vmax.f32 %v12635_v54, %v7112_v49  ;;  %v13206_v40 = vmax.f32 %v12726_v44, %v7122_v4  ;;  %v4127_v4 = vshrl.u32 %v13130_v48, 16  ;;  %v13220_v18 = vld [vmem:[%s10445_s25 + $0x1b0] sm:$0xff] }
 0x335   : > { %8622 = vst.msk [vmem:[%s11306_s6 + $0xc0] sm:$0xf] %vm8573_vm5, %v8489_v8  ;;  %v8490_v15 = vpack.c.bf16 %v8358_v28, %v8358_v28 }
 0x336   : > { %5133 = vst.msk [vmem:[#allocation2 + $0x290] sm:$0xff] %vm1177_vm4, %v5001_v20  ;;  %v2731_v11 = vpop.f32.mrf.mxu1  ;;  %v13172_v2 = vld [vmem:[#allocation2 + $0x280] sm:$0xff]  ;;  %v7114_v22 = vpop.permute.xlu1 %7113  ;;  %7771 = vrot.lane.b32.xlu0 %v13164_v59, %s10398_s27  ;;  %v10144_v20 = vld [vmem:[%s10445_s25 + $0x198] sm:$0xff] }
 0x337   : > { %6670 = vst.msk [vmem:[#allocation2 + $0x288] sm:$0xff] %vm1177_vm4, %v6538_v37  ;;  %7145 = vrot.lane.b32.xlu2 %v13172_v2, %s10397_s26  ;;  %v2935_v54 = vld [vmem:[#allocation2 + $0x2a0] sm:$0xff]  ;;  %v13181_v58 = vmax.f32 %v12640_v41, %v7114_v22  ;;  %v1059_v14 = vpop.f32.mrf.mxu0  ;;  %v13223_v37 = vld [vmem:[#allocation2 + $0x278] sm:$0xff] }
 0x338   : > { %8623 = vst.msk [vmem:[%s11306_s6 + $0xc4] sm:$0xf] %vm8573_vm5, %v8490_v15  ;;  %v3067_v10 = vadd.f32 %v2935_v54, %v2731_v11  ;;  %v4664_v51 = vpop.f32.mrf.mxu2  ;;  %v13195_v41 = vld [vmem:[%s10445_s25 + $0x1a0] sm:$0xff]  ;;  %10075 = vmatmul.msk.bf16.gmra.mxu3 %vm635_vm1, %v5754_v17  ;;  %v5755_v17 = vrot.slane %v13220_v18, 1 }
 0x339   : > { %1263 = vst.msk [vmem:[#allocation2 + $0x2a8] sm:$0xff] %vm1177_vm4, %v1059_v14  ;;  %9413 = vmatmul.msk.bf16.gmra.mxu1 %vm635_vm1, %v2190_v36  ;;  %7773 = vrot.lane.b32.xlu1 %v13181_v58, %s10398_s27  ;;  %v2193_v36 = vor.u32 %v2191_v38, %v13152_v34  ;;  %v4129_v14 = vor.u32 %v4127_v4, %v13157_v42 }
 0x33a   : > { %3199 = vst.msk [vmem:[#allocation2 + $0x2a0] sm:$0xff] %vm1177_vm4, %v3067_v10  ;;  %v7758_v53 = vpop.permute.xlu2 %7757  ;;  %9744 = vmatmul.msk.bf16.gmra.mxu2 %vm635_vm1, %v4126_v56 }
 0x33b   : > { %v4870_v7 = vld [vmem:[#allocation2 + $0x298] sm:$0xff]  ;;  %v8097_v27 = vmax.f32 %v12765_v43, %v7758_v53  ;;  %v2195_v43 = vshll.u32 %v13195_v41, 16  ;;  %v6205_v8 = vpop.f32.mrf.mxu3 }
 0x33c   : > { %v5002_v52 = vadd.f32 %v4870_v7, %v4664_v51 }
 0x33d   : > { %v6407_v63 = vld [vmem:[#allocation2 + $0x290] sm:$0xff]  ;;  %v8233_v61 = vadd.f32 %v12977_v39, %v8097_v27  ;;  %v13228_v22 = vrot.slane %v2195_v43, 1 }
 0x33e   : > { %5134 = vst.msk [vmem:[#allocation2 + $0x298] sm:$0xff] %vm1177_vm4, %v5002_v52  ;;  %v6539_v46 = vadd.f32 %v6407_v63, %v13137_v35  ;;  %v2733_v31 = vpop.f32.mrf.mxu1  ;;  %7141 = vrot.lane.b32.xlu0 %v6799_v3, %s10397_s26  ;;  %v4131_v35 = vshll.u32 %v13202_v12, 16 }
 0x33f   : > { %v8365_v28 = vmax.f32 %v8233_v61, 0.0  ;;  %7781 = vrot.lane.b32.xlu2 %v13206_v40, %s10398_s27  ;;  %v1062_v50 = vpop.f32.mrf.mxu0  ;;  %v2198_v7 = vsel %vm1778_vm3, %v2193_v36, %v13228_v22 }
 0x340   : > { %6671 = vst.msk [vmem:[#allocation2 + $0x290] sm:$0xff] %vm1177_vm4, %v6539_v46  ;;  %v2936_v44 = vld [vmem:[#allocation2 + $0x2a8] sm:$0xff]  ;;  %v4667_v21 = vpop.f32.mrf.mxu2  ;;  %v13235_v56 = vrot.slane %v4131_v35, 1 }
 0x341   : > { %v3068_v49 = vadd.f32 %v2936_v44, %v2733_v31  ;;  %1264 = vst.msk [vmem:[#allocation2 + $0x2b0] sm:$0xff] %vm1177_vm4, %v1062_v50  ;;  %v8497_v15 = vpack.c.bf16 %v8365_v28, %v8365_v28  ;;  %v4871_v11 = vld [vmem:[#allocation2 + $0x2a0] sm:$0xff]  ;;  %7143 = vrot.lane.b32.xlu1 %v13223_v37, %s10397_s26  ;;  %9083 = vmatmul.msk.bf16.gmra.mxu0 %vm635_vm1, %v10144_v20  ;;  %v13257_v31 = vld [vmem:[%s10445_s25 + $0x1a8] sm:$0xff]  ;;  %v13263_v50 = vld [vmem:[%s10445_s25 + $0x1b8] sm:$0xff] }
 0x342   : > { %v5003_v48 = vadd.f32 %v4871_v11, %v4667_v21  ;;  %v4134_v63 = vsel %vm1778_vm3, %v4129_v14, %v13235_v56  ;;  %v2199_v11 = vshrl.u32 %v13195_v41, 16  ;;  %v2203_v36 = vshll.u32 %v13257_v31, 16 }
 0x343   : > { %3200 = vst.msk [vmem:[#allocation2 + $0x2a8] sm:$0xff] %vm1177_vm4, %v3068_v49  ;;  %v13243_v27 = vpop.f32.mrf.mxu3  ;;  %v10378_v49 = vld [vmem:[#allocation2 + $0x210] sm:$0xff]  ;;  %v4135_v41 = vshrl.u32 %v13202_v12, 16 }
 0x344   : > { %8630 = vst.msk [vmem:[%s11306_s6 + $0xe0] sm:$0xf] %vm8573_vm5, %v8497_v15  ;;  %v7748_v54 = vpop.permute.xlu0 %7747 }
 0x345   : > { %5135 = vst.msk [vmem:[#allocation2 + $0x2a0] sm:$0xff] %vm1177_vm4, %v5003_v48  ;;  %v6408_v10 = vld [vmem:[#allocation2 + $0x298] sm:$0xff]  ;;  %v8092_v34 = vmax.f32 %v12695_v1, %v7748_v54  ;;  %v5756_v1 = vsel %vm5651_vm2, %v5753_v6, %v5755_v17 }
 0x346   : > { %v6540_v51 = vadd.f32 %v6408_v10, %v13169_v47  ;;  %v2736_v53 = vpop.f32.mrf.mxu1 }
 0x347   : > { %v8228_v42 = vadd.f32 %v12977_v39, %v8092_v34  ;;  %v1064_v52 = vpop.f32.mrf.mxu0  ;;  %v4139_v34 = vshll.u32 %v13263_v50, 16 }
 0x348   : > { %6672 = vst.msk [vmem:[#allocation2 + $0x298] sm:$0xff] %vm1177_vm4, %v6540_v51  ;;  %v2937_v3 = vld [vmem:[#allocation2 + $0x2b0] sm:$0xff]  ;;  %v4669_v61 = vpop.f32.mrf.mxu2  ;;  %10076 = vmatmul.msk.bf16.gmra.mxu3 %vm635_vm1, %v5756_v1  ;;  %v13287_v51 = vld [vmem:[%s10445_s25 + $0x1b8] sm:$0xff] }
 0x349   : > { %v8360_v47 = vmax.f32 %v8228_v42, 0.0  ;;  %1265 = vst.msk [vmem:[#allocation2 + $0x2b8] sm:$0xff] %vm1177_vm4, %v1064_v52  ;;  %v3069_v38 = vadd.f32 %v2937_v3, %v2736_v53  ;;  %9414 = vmatmul.msk.bf16.gmra.mxu1 %vm635_vm1, %v2198_v7  ;;  %v2201_v3 = vor.u32 %v2199_v11, %v13228_v22 }
 0x34a   : > { %v4872_v46 = vld [vmem:[#allocation2 + $0x2a8] sm:$0xff]  ;;  %v7128_v20 = vpop.permute.xlu2 %7127  ;;  %9745 = vmatmul.msk.bf16.gmra.mxu2 %vm635_vm1, %v4134_v63  ;;  %v13291_v63 = vrot.slane %v2203_v36, 1 }
 0x34b   : > { %v8492_v43 = vpack.c.bf16 %v8360_v47, %v8360_v47  ;;  %3201 = vst.msk [vmem:[#allocation2 + $0x2b0] sm:$0xff] %vm1177_vm4, %v3069_v38  ;;  %v5004_v28 = vadd.f32 %v4872_v46, %v4669_v61  ;;  %v7750_v6 = vpop.permute.xlu1 %7749  ;;  %v13273_v48 = vpop.f32.mrf.mxu3  ;;  %v4137_v46 = vor.u32 %v4135_v41, %v13235_v56  ;;  %v13340_v41 = vld [vmem:[%s10445_s25 + $0x1c0] sm:$0xff] }
 0x34c   : > { %v6409_v26 = vld [vmem:[#allocation2 + $0x2a0] sm:$0xff]  ;;  %v7118_v44 = vpop.permute.xlu0 %7117  ;;  %v8093_v35 = vmax.f32 %v12729_v55, %v7750_v6  ;;  %v13306_v6 = vmax.f32 %v12838_v33, %v7128_v20 }
 0x34d   : > { %8625 = vst.msk [vmem:[%s11306_s6 + $0xcc] sm:$0xf] %vm8573_vm5, %v8492_v43  ;;  %v6541_v4 = vadd.f32 %v6409_v26, %v6205_v8  ;;  %v13268_v21 = vmax.f32 %v10378_v49, %v7118_v44  ;;  %v10145_v55 = vld [vmem:[%s10445_s25 + $0x1a0] sm:$0xff]  ;;  %v13297_v43 = vrot.slane %v4139_v34, 1 }
 0x34e   : > { %5136 = vst.msk [vmem:[#allocation2 + $0x2a8] sm:$0xff] %vm1177_vm4, %v5004_v28  ;;  %v2738_v15 = vpop.f32.mrf.mxu1  ;;  %v8229_v54 = vadd.f32 %v12977_v39, %v8093_v35  ;;  %v5757_v28 = vrot.slane %v13287_v51, 1  ;;  %v2206_v35 = vsel %vm1778_vm3, %v2201_v3, %v13291_v63 }
 0x34f   : > { %6673 = vst.msk [vmem:[#allocation2 + $0x2a0] sm:$0xff] %vm1177_vm4, %v6541_v4  ;;  %v13277_v8 = vld [vmem:[#allocation2 + $0x298] sm:$0xff]  ;;  %7777 = vrot.lane.b32.xlu0 %v13268_v21, %s10398_s27  ;;  %v1067_v10 = vpop.f32.mrf.mxu0  ;;  %v13311_v4 = vld [vmem:[#allocation2 + $0x288] sm:$0xff]  ;;  %v4142_v20 = vsel %vm1778_vm3, %v4137_v46, %v13297_v43  ;;  %v13356_v46 = vld [vmem:[%s10445_s25 + $0x1c0] sm:$0xff] }
 0x350   : > { %7151 = vrot.lane.b32.xlu2 %v13277_v8, %s10397_s26  ;;  %v2938_v14 = vld [vmem:[#allocation2 + $0x2b8] sm:$0xff]  ;;  %v8361_v53 = vmax.f32 %v8229_v54, 0.0  ;;  %1266 = vst.msk [vmem:[#allocation2 + $0x2c0] sm:$0xff] %vm1177_vm4, %v1067_v10  ;;  %v4672_v42 = vpop.f32.mrf.mxu2 }
 0x351   : > { %v3070_v7 = vadd.f32 %v2938_v14, %v2738_v15  ;;  %9084 = vmatmul.msk.bf16.gmra.mxu0 %vm635_vm1, %v10145_v55  ;;  %v5758_v15 = vsel %vm5651_vm2, %v5755_v17, %v5757_v28  ;;  %v13332_v14 = vld [vmem:[%s10445_s25 + $0x1b0] sm:$0xff] }
 0x352   : > { %v4873_v52 = vld [vmem:[#allocation2 + $0x2b0] sm:$0xff]  ;;  %v8493_v1 = vpack.c.bf16 %v8361_v53, %v8361_v53  ;;  %v7764_v47 = vpop.permute.xlu2 %7763  ;;  %v2211_v3 = vshll.u32 %v13332_v14, 16 }
 0x353   : > { %3202 = vst.msk [vmem:[#allocation2 + $0x2b8] sm:$0xff] %vm1177_vm4, %v3070_v7  ;;  %v5005_v12 = vadd.f32 %v4873_v52, %v4672_v42  ;;  %v8100_v38 = vmax.f32 %v12877_v24, %v7764_v47  ;;  %v7120_v61 = vpop.permute.xlu1 %7119  ;;  %v6212_v49 = vpop.f32.mrf.mxu3  ;;  %v6803_v17 = vld [vmem:[#allocation2 + $0x290] sm:$0xff]  ;;  %v2207_v52 = vshrl.u32 %v13257_v31, 16 }
 0x354   : > { %8626 = vst.msk [vmem:[%s11306_s6 + $0xd0] sm:$0xf] %vm8573_vm5, %v8493_v1  ;;  %v13303_v26 = vmax.f32 %v12778_v30, %v7120_v61 }
 0x355   : > { %v6410_v22 = vld [vmem:[#allocation2 + $0x2a8] sm:$0xff]  ;;  %v8236_v44 = vadd.f32 %v12977_v39, %v8100_v38  ;;  %5137 = vst.msk [vmem:[#allocation2 + $0x2b0] sm:$0xff] %vm1177_vm4, %v5005_v12 }
 0x356   : > { %v6542_v24 = vadd.f32 %v6410_v22, %v13243_v27  ;;  %v2741_v56 = vpop.f32.mrf.mxu1  ;;  %7779 = vrot.lane.b32.xlu1 %v13303_v26, %s10398_s27  ;;  %v10146_v12 = vld [vmem:[%s10445_s25 + $0x1a8] sm:$0xff] }
 0x357   : > { %7147 = vrot.lane.b32.xlu0 %v13311_v4, %s10397_s26  ;;  %v8368_v30 = vmax.f32 %v8236_v44, 0.0  ;;  %v2939_v33 = vld [vmem:[#allocation2 + $0x2c0] sm:$0xff]  ;;  %v1069_v27 = vpop.f32.mrf.mxu0 }
 0x358   : > { %6674 = vst.msk [vmem:[#allocation2 + $0x2a8] sm:$0xff] %vm1177_vm4, %v6542_v24  ;;  %7787 = vrot.lane.b32.xlu2 %v13306_v6, %s10398_s27  ;;  %v3071_v11 = vadd.f32 %v2939_v33, %v2741_v56  ;;  %v4674_v36 = vpop.f32.mrf.mxu2  ;;  %10077 = vmatmul.msk.bf16.gmra.mxu3 %vm635_vm1, %v5758_v15  ;;  %v2209_v56 = vor.u32 %v2207_v52, %v13291_v63 }
 0x359   : > { %1267 = vst.msk [vmem:[#allocation2 + $0x2c8] sm:$0xff] %vm1177_vm4, %v1069_v27  ;;  %9415 = vmatmul.msk.bf16.gmra.mxu1 %vm635_vm1, %v2206_v35  ;;  %v8500_v54 = vpack.c.bf16 %v8368_v30, %v8368_v30  ;;  %v13360_v35 = vrot.slane %v2211_v3, 1 }
 0x35a   : > { %v4874_v55 = vld [vmem:[#allocation2 + $0x2b8] sm:$0xff]  ;;  %3203 = vst.msk [vmem:[#allocation2 + $0x2c0] sm:$0xff] %vm1177_vm4, %v3071_v11  ;;  %9746 = vmatmul.msk.bf16.gmra.mxu2 %vm635_vm1, %v4142_v20 }
 0x35b   : > { %v5006_v10 = vadd.f32 %v4874_v55, %v4674_v36  ;;  %8633 = vst.msk [vmem:[%s11306_s6 + $0xec] sm:$0xf] %vm8573_vm5, %v8500_v54  ;;  %v13347_v1 = vpop.f32.mrf.mxu3  ;;  %v5759_v54 = vrot.slane %v13356_v46, 1 }
 0x35c   : > { %v7754_v18 = vpop.permute.xlu0 %7753  ;;  %v6411_v34 = vld [vmem:[#allocation2 + $0x2b0] sm:$0xff] }
 0x35d   : > { %5138 = vst.msk [vmem:[#allocation2 + $0x2b8] sm:$0xff] %vm1177_vm4, %v5006_v10  ;;  %v8095_v53 = vmax.f32 %v12803_v5, %v7754_v18  ;;  %v6543_v7 = vadd.f32 %v6411_v34, %v13273_v48  ;;  %v4143_v5 = vshrl.u32 %v13263_v50, 16  ;;  %v4147_v48 = vshll.u32 %v13340_v41, 16 }
 0x35e   : > { %v2743_v42 = vpop.f32.mrf.mxu1  ;;  %7149 = vrot.lane.b32.xlu1 %v6803_v17, %s10397_s26  ;;  %v2214_v17 = vsel %vm1778_vm3, %v2209_v56, %v13360_v35 }
 0x35f   : > { %v8231_v47 = vadd.f32 %v12977_v39, %v8095_v53  ;;  %6675 = vst.msk [vmem:[#allocation2 + $0x2b0] sm:$0xff] %vm1177_vm4, %v6543_v7  ;;  %v1072_v61 = vpop.f32.mrf.mxu0  ;;  %v4145_v11 = vor.u32 %v4143_v5, %v13297_v43  ;;  %v13365_v36 = vrot.slane %v4147_v48, 1  ;;  %v5760_v7 = vsel %vm5651_vm2, %v5757_v28, %v5759_v54  ;;  %v6805_v48 = vld [vmem:[#allocation2 + $0x2a0] sm:$0xff] }
 0x360   : > { %v2940_v38 = vld [vmem:[#allocation2 + $0x2c8] sm:$0xff]  ;;  %1268 = vst.msk [vmem:[#allocation2 + $0x2d0] sm:$0xff] %vm1177_vm4, %v1072_v61  ;;  %v4677_v44 = vpop.f32.mrf.mxu2  ;;  %v7134_v33 = vpop.permute.xlu2 %7133 }
 0x361   : > { %v8363_v31 = vmax.f32 %v8231_v47, 0.0  ;;  %v3072_v22 = vadd.f32 %v2940_v38, %v2743_v42  ;;  %v4875_v24 = vld [vmem:[#allocation2 + $0x2c0] sm:$0xff]  ;;  %9085 = vmatmul.msk.bf16.gmra.mxu0 %vm635_vm1, %v10146_v12  ;;  %v13397_v12 = vld [vmem:[%s10445_s25 + $0x1b8] sm:$0xff]  ;;  %v13413_v56 = vmax.f32 %v12950_v62, %v7134_v33 }
 0x362   : > { %v5007_v50 = vadd.f32 %v4875_v24, %v4677_v44  ;;  %v2215_v24 = vshrl.u32 %v13332_v14, 16 }
 0x363   : > { %v8495_v30 = vpack.c.bf16 %v8363_v31, %v8363_v31  ;;  %3204 = vst.msk [vmem:[#allocation2 + $0x2c8] sm:$0xff] %vm1177_vm4, %v3072_v22  ;;  %v7756_v20 = vpop.permute.xlu1 %7755  ;;  %v13377_v34 = vpop.f32.mrf.mxu3  ;;  %v13404_v31 = vld [vmem:[%s10445_s25 + $0x1c8] sm:$0xff] }
 0x364   : > { %v6412_v27 = vld [vmem:[#allocation2 + $0x2b8] sm:$0xff]  ;;  %v7124_v15 = vpop.permute.xlu0 %7123  ;;  %v8096_v55 = vmax.f32 %v12841_v29, %v7756_v20  ;;  %5139 = vst.msk [vmem:[#allocation2 + $0x2c0] sm:$0xff] %vm1177_vm4, %v5007_v50 }
 0x365   : > { %8628 = vst.msk [vmem:[%s11306_s6 + $0xd8] sm:$0xf] %vm8573_vm5, %v8495_v30  ;;  %v6544_v63 = vadd.f32 %v6412_v27, %v6212_v49  ;;  %v13372_v10 = vmax.f32 %v12852_v16, %v7124_v15  ;;  %v4150_v49 = vsel %vm1778_vm3, %v4145_v11, %v13365_v36  ;;  %v2219_v27 = vshll.u32 %v13397_v12, 16  ;;  %v13429_v11 = vld [vmem:[%s10445_s25 + $0x1c8] sm:$0xff] }
 0x366   : > { %v2746_v18 = vpop.f32.mrf.mxu1  ;;  %v8232_v43 = vadd.f32 %v12977_v39, %v8096_v55  ;;  %v13381_v53 = vld [vmem:[#allocation2 + $0x2b0] sm:$0xff]  ;;  %v4155_v15 = vshll.u32 %v13404_v31, 16 }
 0x367   : > { %6676 = vst.msk [vmem:[#allocation2 + $0x2b8] sm:$0xff] %vm1177_vm4, %v6544_v63  ;;  %7783 = vrot.lane.b32.xlu0 %v13372_v10, %s10398_s27  ;;  %7157 = vrot.lane.b32.xlu2 %v13381_v53, %s10397_s26  ;;  %v2941_v29 = vld [vmem:[#allocation2 + $0x2d0] sm:$0xff]  ;;  %v1074_v16 = vpop.f32.mrf.mxu0 }
 0x368   : > { %v8364_v42 = vmax.f32 %v8232_v43, 0.0  ;;  %v3073_v52 = vadd.f32 %v2941_v29, %v2746_v18  ;;  %1269 = vst.msk [vmem:[#allocation2 + $0x2d8] sm:$0xff] %vm1177_vm4, %v1074_v16  ;;  %v4679_v3 = vpop.f32.mrf.mxu2  ;;  %v7770_v61 = vpop.permute.xlu2 %7769  ;;  %10078 = vmatmul.msk.bf16.gmra.mxu3 %vm635_vm1, %v5760_v7  ;;  %v2217_v43 = vor.u32 %v2215_v24, %v13360_v35  ;;  %v13433_v29 = vrot.slane %v2219_v27, 1 }
 0x369   : > { %9416 = vmatmul.msk.bf16.gmra.mxu1 %vm635_vm1, %v2214_v17  ;;  %v8103_v51 = vmax.f32 %v12994_v25, %v7770_v61  ;;  %v13440_v7 = vrot.slane %v4155_v15, 1  ;;  %v10379_v15 = vld [vmem:[#allocation2 + $0x240] sm:$0xff] }
 0x36a   : > { %v4876_v47 = vld [vmem:[#allocation2 + $0x2c8] sm:$0xff]  ;;  %v8496_v38 = vpack.c.bf16 %v8364_v42, %v8364_v42  ;;  %3205 = vst.msk [vmem:[#allocation2 + $0x2d0] sm:$0xff] %vm1177_vm4, %v3073_v52  ;;  %9747 = vmatmul.msk.bf16.gmra.mxu2 %vm635_vm1, %v4150_v49  ;;  %v5761_v42 = vrot.slane %v13429_v11, 1  ;;  %v2222_v61 = vsel %vm1778_vm3, %v2217_v43, %v13433_v29 }
 0x36b   : > { %v5008_v5 = vadd.f32 %v4876_v47, %v4679_v3  ;;  %v7126_v28 = vpop.permute.xlu1 %7125  ;;  %v6413_v22 = vld [vmem:[#allocation2 + $0x2c0] sm:$0xff]  ;;  %v8239_v30 = vadd.f32 %v12977_v39, %v8103_v51  ;;  %v6220_v20 = vpop.f32.mrf.mxu3 }
 0x36c   : > { %8629 = vst.msk [vmem:[%s11306_s6 + $0xdc] sm:$0xf] %vm8573_vm5, %v8496_v38  ;;  %v13409_v44 = vmax.f32 %v12880_v45, %v7126_v28  ;;  %v6545_v25 = vadd.f32 %v6413_v22, %v13347_v1  ;;  %v10147_v45 = vld [vmem:[%s10445_s25 + $0x1b0] sm:$0xff]  ;;  %v4151_v1 = vshrl.u32 %v13340_v41, 16  ;;  %v13446_v38 = vld [vmem:[#allocation2 + $0x2a8] sm:$0xff]  ;;  %v5762_v28 = vsel %vm5651_vm2, %v5759_v54, %v5761_v42 }
 0x36d   : > { %5140 = vst.msk [vmem:[#allocation2 + $0x2c8] sm:$0xff] %vm1177_vm4, %v5008_v5  ;;  %v8371_v14 = vmax.f32 %v8239_v30, 0.0 }
 0x36e   : > { %v2748_v50 = vpop.f32.mrf.mxu1  ;;  %7785 = vrot.lane.b32.xlu1 %v13409_v44, %s10398_s27  ;;  %6677 = vst.msk [vmem:[#allocation2 + $0x2c0] sm:$0xff] %vm1177_vm4, %v6545_v25  ;;  %v4153_v49 = vor.u32 %v4151_v1, %v13365_v36 }
 0x36f   : > { %7153 = vrot.lane.b32.xlu0 %v6805_v48, %s10397_s26  ;;  %7793 = vrot.lane.b32.xlu2 %v13413_v56, %s10398_s27  ;;  %v2942_v62 = vld [vmem:[#allocation2 + $0x2d8] sm:$0xff]  ;;  %v1077_v33 = vpop.f32.mrf.mxu0  ;;  %v8503_v18 = vpack.c.bf16 %v8371_v14, %v8371_v14 }
 0x370   : > { %v3074_v63 = vadd.f32 %v2942_v62, %v2748_v50  ;;  %1270 = vst.msk [vmem:[#allocation2 + $0x2e0] sm:$0xff] %vm1177_vm4, %v1077_v33  ;;  %v4682_v55 = vpop.f32.mrf.mxu2  ;;  %v13466_v50 = vld [vmem:[%s10445_s25 + $0x1c0] sm:$0xff]  ;;  %v13472_v62 = vld [vmem:[%s10445_s25 + $0x1d0] sm:$0xff] }
 0x371   : > { %v4877_v17 = vld [vmem:[#allocation2 + $0x2d0] sm:$0xff]  ;;  %9086 = vmatmul.msk.bf16.gmra.mxu0 %vm635_vm1, %v10147_v45  ;;  %8636 = vst.msk [vmem:[%s11306_s6 + $0xf8] sm:$0xf] %vm8573_vm5, %v8503_v18  ;;  %v2223_v18 = vshrl.u32 %v13397_v12, 16  ;;  %v4159_v12 = vshrl.u32 %v13404_v31, 16 }
 0x372   : > { %3206 = vst.msk [vmem:[#allocation2 + $0x2d8] sm:$0xff] %vm1177_vm4, %v3074_v63  ;;  %v5009_v16 = vadd.f32 %v4877_v17, %v4682_v55  ;;  %v2227_v17 = vshll.u32 %v13466_v50, 16 }
 0x373   : > { %v13450_v5 = vpop.f32.mrf.mxu3 }
 0x374   : > { %v7760_v41 = vpop.permute.xlu0 %7759  ;;  %5141 = vst.msk [vmem:[#allocation2 + $0x2d0] sm:$0xff] %vm1177_vm4, %v5009_v16  ;;  %v6414_v52 = vld [vmem:[#allocation2 + $0x2c8] sm:$0xff] }
 0x375   : > { %v8098_v35 = vmax.f32 %v12920_v19, %v7760_v41  ;;  %v6546_v3 = vadd.f32 %v6414_v52, %v13377_v34  ;;  %v4158_v34 = vsel %vm1778_vm3, %v4153_v49, %v13440_v7  ;;  %v4163_v52 = vshll.u32 %v13472_v62, 16  ;;  %v6809_v11 = vld [vmem:[#allocation2 + $0x2c0] sm:$0xff] }
 0x376   : > { %v2751_v47 = vpop.f32.mrf.mxu1  ;;  %7155 = vrot.lane.b32.xlu1 %v13446_v38, %s10397_s26 }
 0x377   : > { %v8234_v36 = vadd.f32 %v12977_v39, %v8098_v35  ;;  %6678 = vst.msk [vmem:[#allocation2 + $0x2c8] sm:$0xff] %vm1177_vm4, %v6546_v3  ;;  %v2943_v51 = vld [vmem:[#allocation2 + $0x2e0] sm:$0xff]  ;;  %v1079_v19 = vpop.f32.mrf.mxu0  ;;  %v13496_v35 = vld [vmem:[%s10445_s25 + $0x1d0] sm:$0xff] }
 0x378   : > { %v3075_v22 = vadd.f32 %v2943_v51, %v2751_v47  ;;  %1271 = vst.msk [vmem:[#allocation2 + $0x2e8] sm:$0xff] %vm1177_vm4, %v1079_v19  ;;  %v4684_v24 = vpop.f32.mrf.mxu2  ;;  %v7140_v30 = vpop.permute.xlu2 %7139  ;;  %10079 = vmatmul.msk.bf16.gmra.mxu3 %vm635_vm1, %v5762_v28  ;;  %v2225_v51 = vor.u32 %v2223_v18, %v13433_v29  ;;  %v13500_v19 = vrot.slane %v2227_v17, 1  ;;  %v13514_v29 = vld [vmem:[%s14785_s2] ss:$0 sm:$0xff] }
 0x379   : > { %v8366_v48 = vmax.f32 %v8234_v36, 0.0  ;;  %9417 = vmatmul.msk.bf16.gmra.mxu1 %vm635_vm1, %v2222_v61  ;;  %v4878_v25 = vld [vmem:[#allocation2 + $0x2d8] sm:$0xff] }
 0x37a   : > { %3207 = vst.msk [vmem:[#allocation2 + $0x2e0] sm:$0xff] %vm1177_vm4, %v3075_v22  ;;  %v5010_v45 = vadd.f32 %v4878_v25, %v4684_v24  ;;  %9748 = vmatmul.msk.bf16.gmra.mxu2 %vm635_vm1, %v4158_v34  ;;  %v4161_v22 = vor.u32 %v4159_v12, %v13440_v7  ;;  %v13506_v24 = vrot.slane %v4163_v52, 1  ;;  %v5763_v25 = vrot.slane %v13496_v35, 1 }
 0x37b   : > { %v8498_v27 = vpack.c.bf16 %v8366_v48, %v8366_v48  ;;  %v6415_v46 = vld [vmem:[#allocation2 + $0x2d0] sm:$0xff]  ;;  %v7762_v54 = vpop.permute.xlu1 %7761  ;;  %v13482_v43 = vpop.f32.mrf.mxu3 }
 0x37c   : > { %v7130_v14 = vpop.permute.xlu0 %7129  ;;  %v6547_v33 = vadd.f32 %v6415_v46, %v6220_v20  ;;  %v8099_v1 = vmax.f32 %v12953_v57, %v7762_v54  ;;  %5142 = vst.msk [vmem:[#allocation2 + $0x2d8] sm:$0xff] %vm1177_vm4, %v5010_v45  ;;  %v10148_v57 = vld [vmem:[%s10445_s25 + $0x1b8] sm:$0xff]  ;;  %v13521_v46 = vmax.f32 %v13063_v60, %v7140_v30  ;;  %v5764_v30 = vsel %vm5651_vm2, %v5761_v42, %v5763_v25 }
 0x37d   : > { %8631 = vst.msk [vmem:[%s11306_s6 + $0xe4] sm:$0xf] %vm8573_vm5, %v8498_v27  ;;  %v13477_v63 = vmax.f32 %v10379_v15, %v7130_v14  ;;  %v13525_v14 = vld [vmem:[#allocation2 + $0x2b8] sm:$0xff] }
 0x37e   : > { %v2753_v55 = vpop.f32.mrf.mxu1  ;;  %6679 = vst.msk [vmem:[#allocation2 + $0x2d0] sm:$0xff] %vm1177_vm4, %v6547_v33  ;;  %v8235_v16 = vadd.f32 %v12977_v39, %v8099_v1  ;;  %v13486_v20 = vld [vmem:[#allocation2 + $0x2c8] sm:$0xff]  ;;  %v2230_v33 = vsel %vm1778_vm3, %v2225_v51, %v13500_v19  ;;  %v13554_v42 = vld [vmem:[%s10445_s25 + $0x1d8] sm:$0xff] }
 0x37f   : > { %7789 = vrot.lane.b32.xlu0 %v13477_v63, %s10398_s27  ;;  %7163 = vrot.lane.b32.xlu2 %v13486_v20, %s10397_s26  ;;  %v2944_v41 = vld [vmem:[#allocation2 + $0x2e8] sm:$0xff]  ;;  %v1082_v49 = vpop.f32.mrf.mxu0 }
 0x380   : > { %v8367_v3 = vmax.f32 %v8235_v16, 0.0  ;;  %v3076_v47 = vadd.f32 %v2944_v41, %v2753_v55  ;;  %1272 = vst.msk [vmem:[#allocation2 + $0x2f0] sm:$0xff] %vm1177_vm4, %v1082_v49  ;;  %v4687_v39 = vpop.f32.mrf.mxu2  ;;  %v7776_v61 = vpop.permute.xlu2 %7775 }
 0x381   : > { %v4879_v36 = vld [vmem:[#allocation2 + $0x2e0] sm:$0xff]  ;;  %v8106_v31 = vmax.f32 %v13097_v0, %v7776_v61  ;;  %9087 = vmatmul.msk.bf16.gmra.mxu0 %vm635_vm1, %v10148_v57  ;;  %v13546_v57 = vld [vmem:[%s10445_s25 + $0x1c8] sm:$0xff] }
 0x382   : > { %v8499_v34 = vpack.c.bf16 %v8367_v3, %v8367_v3  ;;  %3208 = vst.msk [vmem:[#allocation2 + $0x2e8] sm:$0xff] %vm1177_vm4, %v3076_v47  ;;  %v5011_v28 = vadd.f32 %v4879_v36, %v4687_v39  ;;  %v2231_v3 = vshrl.u32 %v13466_v50, 16  ;;  %v2235_v47 = vshll.u32 %v13546_v57, 16  ;;  %v10149_v61 = vld [vmem:[%s10445_s25 + $0x1c0] sm:$0xff] }
 0x383   : > { %v7132_v48 = vpop.permute.xlu1 %7131  ;;  %v8242_v27 = vadd.f32 %v13514_v29, %v8106_v31  ;;  %v6416_v0 = vld [vmem:[#allocation2 + $0x2d8] sm:$0xff]  ;;  %v6227_v1 = vpop.f32.mrf.mxu3  ;;  %v4167_v36 = vshrl.u32 %v13472_v62, 16  ;;  %v4171_v31 = vshll.u32 %v13554_v42, 16 }
 0x384   : > { %8632 = vst.msk [vmem:[%s11306_s6 + $0xe8] sm:$0xf] %vm8573_vm5, %v8499_v34  ;;  %v13518_v45 = vmax.f32 %v13007_v9, %v7132_v48  ;;  %v6548_v7 = vadd.f32 %v6416_v0, %v13450_v5  ;;  %v4166_v5 = vsel %vm1778_vm3, %v4161_v22, %v13506_v24  ;;  %v2233_v0 = vor.u32 %v2231_v3, %v13500_v19 }
 0x385   : > { %5143 = vst.msk [vmem:[#allocation2 + $0x2e0] sm:$0xff] %vm1177_vm4, %v5011_v28  ;;  %v8374_v15 = vmax.f32 %v8242_v27, 0.0  ;;  %v13568_v28 = vld [vmem:[%s10445_s25 + $0x1d8] sm:$0xff] }
 0x386   : > { %v2756_v54 = vpop.f32.mrf.mxu1  ;;  %7791 = vrot.lane.b32.xlu1 %v13518_v45, %s10398_s27  ;;  %6680 = vst.msk [vmem:[#allocation2 + $0x2d8] sm:$0xff] %vm1177_vm4, %v6548_v7  ;;  %v13573_v7 = vrot.slane %v2235_v47, 1 }
 0x387   : > { %7159 = vrot.lane.b32.xlu0 %v13525_v14, %s10397_s26  ;;  %7799 = vrot.lane.b32.xlu2 %v13521_v46, %s10398_s27  ;;  %v2945_v9 = vld [vmem:[#allocation2 + $0x2f0] sm:$0xff]  ;;  %v1084_v60 = vpop.f32.mrf.mxu0  ;;  %v8506_v55 = vpack.c.bf16 %v8374_v15, %v8374_v15 }
 0x388   : > { %v3077_v18 = vadd.f32 %v2945_v9, %v2756_v54  ;;  %1273 = vst.msk [vmem:[#allocation2 + $0x2f8] sm:$0xff] %vm1177_vm4, %v1084_v60  ;;  %v4689_v17 = vpop.f32.mrf.mxu2  ;;  %10080 = vmatmul.msk.bf16.gmra.mxu3 %vm635_vm1, %v5764_v30  ;;  %v4169_v54 = vor.u32 %v4167_v36, %v13506_v24  ;;  %v13579_v60 = vrot.slane %v4171_v31, 1 }
 0x389   : > { %9418 = vmatmul.msk.bf16.gmra.mxu1 %vm635_vm1, %v2230_v33  ;;  %v4880_v16 = vld [vmem:[#allocation2 + $0x2e8] sm:$0xff]  ;;  %8639 = vst.msk [vmem:[%s11306_s6 + $0x104] sm:$0xf] %vm8573_vm5, %v8506_v55  ;;  %v2238_v55 = vsel %vm1778_vm3, %v2233_v0, %v13573_v7 }
 0x38a   : > { %v5012_v41 = vadd.f32 %v4880_v16, %v4689_v17  ;;  %9749 = vmatmul.msk.bf16.gmra.mxu2 %vm635_vm1, %v4166_v5  ;;  %3209 = vst.msk [vmem:[#allocation2 + $0x2f0] sm:$0xff] %vm1177_vm4, %v3077_v18  ;;  %v5765_v5 = vrot.slane %v13568_v28, 1 }
 0x38b   : > { %v13560_v39 = vpop.f32.mrf.mxu3 }
 0x38c   : > { %5144 = vst.msk [vmem:[#allocation2 + $0x2e8] sm:$0xff] %vm1177_vm4, %v5012_v41  ;;  %v6417_v49 = vld [vmem:[#allocation2 + $0x2e0] sm:$0xff]  ;;  %v4174_v41 = vsel %vm1778_vm3, %v4169_v54, %v13579_v60 }
 0x38d   : > { %v6549_v12 = vadd.f32 %v6417_v49, %v13482_v43 }
 0x38e   : > { %v2758_v52 = vpop.f32.mrf.mxu1  ;;  %7161 = vrot.lane.b32.xlu1 %v6809_v11, %s10397_s26  ;;  %v5766_v11 = vsel %vm5651_vm2, %v5763_v25, %v5765_v5 }
 0x38f   : > { %6681 = vst.msk [vmem:[#allocation2 + $0x2e0] sm:$0xff] %vm1177_vm4, %v6549_v12  ;;  %v2946_v51 = vld [vmem:[#allocation2 + $0x2f8] sm:$0xff]  ;;  %v1087_v34 = vpop.f32.mrf.mxu0 }
 0x390   : > { %v3078_v43 = vadd.f32 %v2946_v51, %v2758_v52  ;;  %1274 = vst.msk [vmem:[#allocation2 + $0x300] sm:$0xff] %vm1177_vm4, %v1087_v34  ;;  %v4692_v50 = vpop.f32.mrf.mxu2  ;;  %v13605_v51 = vld [vmem:[%s10445_s25 + $0x1d0] sm:$0xff] }
 0x391   : > { %v7766_v48 = vpop.permute.xlu0 %7765  ;;  %v7146_v22 = vpop.permute.xlu2 %7145  ;;  %v4881_v62 = vld [vmem:[#allocation2 + $0x2f0] sm:$0xff]  ;;  %9088 = vmatmul.msk.bf16.gmra.mxu0 %vm635_vm1, %v10149_v61 }
 0x392   : > { %v8101_v27 = vmax.f32 %v13054_v23, %v7766_v48  ;;  %3210 = vst.msk [vmem:[#allocation2 + $0x2f8] sm:$0xff] %vm1177_vm4, %v3078_v43  ;;  %v5013_v33 = vadd.f32 %v4881_v62, %v4692_v50  ;;  %v13616_v43 = vld [vmem:[%s10445_s25 + $0x1e0] sm:$0xff]  ;;  %v2243_v62 = vshll.u32 %v13605_v51, 16 }
 0x393   : > { %v6418_v9 = vld [vmem:[#allocation2 + $0x2e8] sm:$0xff]  ;;  %v13585_v18 = vpop.f32.mrf.mxu3 }
 0x394   : > { %v8237_v15 = vadd.f32 %v13514_v29, %v8101_v27  ;;  %v6550_v23 = vadd.f32 %v6418_v9, %v6227_v1  ;;  %5145 = vst.msk [vmem:[#allocation2 + $0x2f0] sm:$0xff] %vm1177_vm4, %v5013_v33 }
 0x396   : > { %v8369_v19 = vmax.f32 %v8237_v15, 0.0  ;;  %v2761_v30 = vpop.f32.mrf.mxu1  ;;  %6682 = vst.msk [vmem:[#allocation2 + $0x2e8] sm:$0xff] %vm1177_vm4, %v6550_v23  ;;  %v13588_v24 = vld [vmem:[#allocation2 + $0x2e0] sm:$0xff]  ;;  %v10150_v15 = vld [vmem:[%s10445_s25 + $0x1c8] sm:$0xff] }
 0x397   : > { %7169 = vrot.lane.b32.xlu2 %v13588_v24, %s10397_s26  ;;  %v1089_v1 = vpop.f32.mrf.mxu0  ;;  %v2947_v16 = vld [vmem:[#allocation2 + $0x300] sm:$0xff] }
 0x398   : > { %v8501_v17 = vpack.c.bf16 %v8369_v19, %v8369_v19  ;;  %1275 = vst.msk [vmem:[#allocation2 + $0x308] sm:$0xff] %vm1177_vm4, %v1089_v1  ;;  %v3079_v49 = vadd.f32 %v2947_v16, %v2761_v30  ;;  %v4694_v12 = vpop.f32.mrf.mxu2  ;;  %v7768_v52 = vpop.permute.xlu1 %7767  ;;  %10081 = vmatmul.msk.bf16.gmra.mxu3 %vm635_vm1, %v5766_v11  ;;  %v13635_v23 = vld [vmem:[%s10445_s25 + $0x1e0] sm:$0xff] }
 0x399   : > { %9419 = vmatmul.msk.bf16.gmra.mxu1 %vm635_vm1, %v2238_v55  ;;  %v7782_v3 = vpop.permute.xlu2 %7781  ;;  %v4882_v47 = vld [vmem:[#allocation2 + $0x2f8] sm:$0xff]  ;;  %v8102_v61 = vmax.f32 %v13091_v32, %v7768_v52  ;;  %v7136_v36 = vpop.permute.xlu0 %7135  ;;  %v10381_v16 = vld [vmem:[#allocation2 + $0x260] sm:$0xff]  ;;  %v13651_v52 = vld [vmem:[#allocation2 + $0x2d0] sm:$0xff] }
 0x39a   : > { %8634 = vst.msk [vmem:[%s11306_s6 + $0xf0] sm:$0xf] %vm8573_vm5, %v8501_v17  ;;  %v8109_v35 = vmax.f32 %v13206_v40, %v7782_v3  ;;  %v5014_v25 = vadd.f32 %v4882_v47, %v4694_v12  ;;  %v13610_v34 = vmax.f32 %v13101_v13, %v7136_v36  ;;  %9750 = vmatmul.msk.bf16.gmra.mxu2 %vm635_vm1, %v4174_v41  ;;  %v2239_v13 = vshrl.u32 %v13546_v57, 16 }
 0x39b   : > { %3211 = vst.msk [vmem:[#allocation2 + $0x300] sm:$0xff] %vm1177_vm4, %v3079_v49  ;;  %v8238_v31 = vadd.f32 %v13514_v29, %v8102_v61  ;;  %v6419_v50 = vld [vmem:[#allocation2 + $0x2f0] sm:$0xff]  ;;  %v13624_v40 = vmax.f32 %v13172_v2, %v7146_v22  ;;  %v6235_v54 = vpop.f32.mrf.mxu3  ;;  %v4175_v22 = vshrl.u32 %v13554_v42, 16  ;;  %v13643_v49 = vrot.slane %v2243_v62, 1  ;;  %v13677_v62 = vld [vmem:[%s10445_s25 + $0x1d8] sm:$0xff] }
 0x39c   : > { %v8245_v32 = vadd.f32 %v13514_v29, %v8109_v35  ;;  %5146 = vst.msk [vmem:[#allocation2 + $0x2f8] sm:$0xff] %vm1177_vm4, %v5014_v25  ;;  %7795 = vrot.lane.b32.xlu0 %v13610_v34, %s10398_s27  ;;  %v6551_v27 = vadd.f32 %v6419_v50, %v13560_v39  ;;  %v4179_v39 = vshll.u32 %v13616_v43, 16  ;;  %v2241_v11 = vor.u32 %v2239_v13, %v13573_v7 }
 0x39d   : > { %v8370_v48 = vmax.f32 %v8238_v31, 0.0  ;;  %v4177_v3 = vor.u32 %v4175_v22, %v13579_v60  ;;  %v5767_v7 = vrot.slane %v13635_v23, 1 }
 0x39e   : > { %v2763_v0 = vpop.f32.mrf.mxu1  ;;  %v8377_v33 = vmax.f32 %v8245_v32, 0.0  ;;  %6683 = vst.msk [vmem:[#allocation2 + $0x2f0] sm:$0xff] %vm1177_vm4, %v6551_v27  ;;  %v13654_v47 = vrot.slane %v4179_v39, 1  ;;  %v2246_v35 = vsel %vm1778_vm3, %v2241_v11, %v13643_v49 }
 0x39f   : > { %v8502_v9 = vpack.c.bf16 %v8370_v48, %v8370_v48  ;;  %7805 = vrot.lane.b32.xlu2 %v13624_v40, %s10398_s27  ;;  %v1092_v57 = vpop.f32.mrf.mxu0  ;;  %v2948_v2 = vld [vmem:[#allocation2 + $0x308] sm:$0xff] }
 0x3a0   : > { %v8509_v19 = vpack.c.bf16 %v8377_v33, %v8377_v33  ;;  %1276 = vst.msk [vmem:[#allocation2 + $0x310] sm:$0xff] %vm1177_vm4, %v1092_v57  ;;  %v3080_v30 = vadd.f32 %v2948_v2, %v2763_v0  ;;  %v4697_v55 = vpop.f32.mrf.mxu2  ;;  %v7138_v17 = vpop.permute.xlu1 %7137  ;;  %v4182_v32 = vsel %vm1778_vm3, %v4177_v3, %v13654_v47  ;;  %v13706_v3 = vld [vmem:[%s10445_s25 + $0x1e8] sm:$0xff] }
 0x3a1   : > { %8635 = vst.msk [vmem:[%s11306_s6 + $0xf4] sm:$0xf] %vm8573_vm5, %v8502_v9  ;;  %v13640_v41 = vmax.f32 %v10381_v16, %v7138_v17  ;;  %9089 = vmatmul.msk.bf16.gmra.mxu0 %vm635_vm1, %v10150_v15  ;;  %v13680_v15 = vld [vmem:[#allocation2 + $0x2d8] sm:$0xff]  ;;  %v2251_v17 = vshll.u32 %v13677_v62, 16 }
 0x3a2   : > { %v4883_v1 = vld [vmem:[#allocation2 + $0x300] sm:$0xff]  ;;  %8642 = vst.msk [vmem:[%s11306_s6 + $0x110] sm:$0xf] %vm8573_vm5, %v8509_v19 }
 0x3a3   : > { %v5015_v42 = vadd.f32 %v4883_v1, %v4697_v55  ;;  %3212 = vst.msk [vmem:[#allocation2 + $0x308] sm:$0xff] %vm1177_vm4, %v3080_v30  ;;  %v6420_v12 = vld [vmem:[#allocation2 + $0x2f8] sm:$0xff]  ;;  %7797 = vrot.lane.b32.xlu1 %v13640_v41, %s10398_s27  ;;  %v13663_v25 = vpop.f32.mrf.mxu3  ;;  %v2247_v55 = vshrl.u32 %v13605_v51, 16 }
 0x3a4   : > { %v6552_v61 = vadd.f32 %v6420_v12, %v13585_v18  ;;  %7165 = vrot.lane.b32.xlu0 %v13651_v52, %s10397_s26  ;;  %v5768_v18 = vsel %vm5651_vm2, %v5765_v5, %v5767_v7  ;;  %v4183_v12 = vshrl.u32 %v13616_v43, 16 }
 0x3a5   : > { %5147 = vst.msk [vmem:[#allocation2 + $0x300] sm:$0xff] %vm1177_vm4, %v5015_v42  ;;  %v2249_v43 = vor.u32 %v2247_v55, %v13643_v49  ;;  %v6815_v23 = vld [vmem:[#allocation2 + $0x2f0] sm:$0xff] }
 0x3a6   : > { %v2766_v36 = vpop.f32.mrf.mxu1  ;;  %6684 = vst.msk [vmem:[#allocation2 + $0x2f8] sm:$0xff] %vm1177_vm4, %v6552_v61 }
 0x3a7   : > { %v1094_v60 = vpop.f32.mrf.mxu0  ;;  %v2949_v31 = vld [vmem:[#allocation2 + $0x310] sm:$0xff] }
 0x3a8   : > { %1277 = vst.msk [vmem:[#allocation2 + $0x318] sm:$0xff] %vm1177_vm4, %v1094_v60  ;;  %v3081_v50 = vadd.f32 %v2949_v31, %v2766_v36  ;;  %v4699_v13 = vpop.f32.mrf.mxu2  ;;  %v7772_v48 = vpop.permute.xlu0 %7771  ;;  %10082 = vmatmul.msk.bf16.gmra.mxu3 %vm635_vm1, %v5768_v18  ;;  %v10382_v18 = vld [vmem:[#allocation2 + $0x270] sm:$0xff] }
 0x3a9   : > { %9420 = vmatmul.msk.bf16.gmra.mxu1 %vm635_vm1, %v2246_v35  ;;  %v8104_v0 = vmax.f32 %v13164_v59, %v7772_v48  ;;  %v13688_v59 = vld [vmem:[%s10445_s25 + $0x1e8] sm:$0xff] }
 0x3aa   : > { %v7152_v27 = vpop.permute.xlu2 %7151  ;;  %3213 = vst.msk [vmem:[#allocation2 + $0x310] sm:$0xff] %vm1177_vm4, %v3081_v50  ;;  %v4884_v33 = vld [vmem:[#allocation2 + $0x308] sm:$0xff]  ;;  %9751 = vmatmul.msk.bf16.gmra.mxu2 %vm635_vm1, %v4182_v32  ;;  %v4187_v51 = vshll.u32 %v13688_v59, 16 }
 0x3ab   : > { %v5016_v28 = vadd.f32 %v4884_v33, %v4699_v13  ;;  %v8240_v5 = vadd.f32 %v13514_v29, %v8104_v0  ;;  %v7774_v57 = vpop.permute.xlu1 %7773  ;;  %7167 = vrot.lane.b32.xlu1 %v13680_v15, %s10397_s26  ;;  %v13696_v1 = vpop.f32.mrf.mxu3  ;;  %v13714_v13 = vrot.slane %v2251_v17, 1  ;;  %v13724_v49 = vmax.f32 %v13277_v8, %v7152_v27 }
 0x3ac   : > { %v6421_v9 = vld [vmem:[#allocation2 + $0x300] sm:$0xff]  ;;  %v8105_v22 = vmax.f32 %v13181_v58, %v7774_v57  ;;  %v10151_v58 = vld [vmem:[%s10445_s25 + $0x1d0] sm:$0xff]  ;;  %v5769_v57 = vrot.slane %v13706_v3, 1 }
 0x3ad   : > { %v6553_v2 = vadd.f32 %v6421_v9, %v6235_v54  ;;  %5148 = vst.msk [vmem:[#allocation2 + $0x308] sm:$0xff] %vm1177_vm4, %v5016_v28  ;;  %v8372_v39 = vmax.f32 %v8240_v5, 0.0  ;;  %v13692_v19 = vld [vmem:[#allocation2 + $0x2f8] sm:$0xff]  ;;  %v4185_v5 = vor.u32 %v4183_v12, %v13654_v47  ;;  %v4189_v9 = vrot.slane %v4187_v51, 1  ;;  %v13754_v51 = vld [vmem:[#allocation2 + $0x2e8] sm:$0xff] }
 0x3ae   : > { %v2768_v30 = vpop.f32.mrf.mxu1  ;;  %v8241_v54 = vadd.f32 %v13514_v29, %v8105_v22  ;;  %7175 = vrot.lane.b32.xlu2 %v13692_v19, %s10397_s26  ;;  %v2254_v47 = vsel %vm1778_vm3, %v2249_v43, %v13714_v13  ;;  %v5770_v17 = vsel %vm5651_vm2, %v5767_v7, %v5769_v57  ;;  %v13762_v7 = vld [vmem:[%s10445_s25 + $0x1f0] sm:$0xff]  ;;  %v4191_v43 = vshrl.u32 %v13688_v59, 16 }
 0x3af   : > { %6685 = vst.msk [vmem:[#allocation2 + $0x300] sm:$0xff] %vm1177_vm4, %v6553_v2  ;;  %v8504_v16 = vpack.c.bf16 %v8372_v39, %v8372_v39  ;;  %v1097_v11 = vpop.f32.mrf.mxu0  ;;  %v2950_v42 = vld [vmem:[#allocation2 + $0x318] sm:$0xff] }
 0x3b0   : > { %v8373_v61 = vmax.f32 %v8241_v54, 0.0  ;;  %1278 = vst.msk [vmem:[#allocation2 + $0x320] sm:$0xff] %vm1177_vm4, %v1097_v11  ;;  %v3082_v36 = vadd.f32 %v2950_v42, %v2768_v30  ;;  %v4702_v35 = vpop.f32.mrf.mxu2  ;;  %v7142_v60 = vpop.permute.xlu0 %7141  ;;  %v13750_v42 = vld [vmem:[%s10445_s25 + $0x1e0] sm:$0xff] }
 0x3b1   : > { %8637 = vst.msk [vmem:[%s11306_s6 + $0xfc] sm:$0xf] %vm8573_vm5, %v8504_v16  ;;  %v4885_v32 = vld [vmem:[#allocation2 + $0x310] sm:$0xff]  ;;  %v13711_v50 = vmax.f32 %v10382_v18, %v7142_v60  ;;  %9090 = vmatmul.msk.bf16.gmra.mxu0 %vm635_vm1, %v10151_v58  ;;  %v2255_v60 = vshrl.u32 %v13677_v62, 16  ;;  %v10152_v18 = vld [vmem:[%s10445_s25 + $0x1d8] sm:$0xff] }
 0x3b2   : > { %v7788_v31 = vpop.permute.xlu2 %7787  ;;  %v8505_v48 = vpack.c.bf16 %v8373_v61, %v8373_v61  ;;  %3214 = vst.msk [vmem:[#allocation2 + $0x318] sm:$0xff] %vm1177_vm4, %v3082_v36  ;;  %v5017_v33 = vadd.f32 %v4885_v32, %v4702_v35 }
 0x3b3   : > { %v8112_v0 = vmax.f32 %v13306_v6, %v7788_v31  ;;  %v7144_v28 = vpop.permute.xlu1 %7143  ;;  %7801 = vrot.lane.b32.xlu0 %v13711_v50, %s10398_s27  ;;  %v6242_v55 = vpop.f32.mrf.mxu3  ;;  %v2259_v31 = vshll.u32 %v13750_v42, 16 }
 0x3b4   : > { %8638 = vst.msk [vmem:[%s11306_s6 + $0x100] sm:$0xf] %vm8573_vm5, %v8505_v48  ;;  %v6422_v6 = vld [vmem:[#allocation2 + $0x308] sm:$0xff]  ;;  %v13730_v22 = vmax.f32 %v13223_v37, %v7144_v28  ;;  %v13776_v28 = vld [vmem:[%s10445_s25 + $0x1f0] sm:$0xff] }
 0x3b5   : > { %v8248_v2 = vadd.f32 %v13514_v29, %v8112_v0  ;;  %5149 = vst.msk [vmem:[#allocation2 + $0x310] sm:$0xff] %vm1177_vm4, %v5017_v33  ;;  %v6554_v39 = vadd.f32 %v6422_v6, %v13663_v25  ;;  %v4190_v25 = vsel %vm1778_vm3, %v4185_v5, %v4189_v9  ;;  %v4195_v33 = vshll.u32 %v13762_v7, 16 }
 0x3b6   : > { %v2771_v30 = vpop.f32.mrf.mxu1  ;;  %7811 = vrot.lane.b32.xlu2 %v13724_v49, %s10398_s27  ;;  %7803 = vrot.lane.b32.xlu1 %v13730_v22, %s10398_s27 }
 0x3b7   : > { %v8380_v8 = vmax.f32 %v8248_v2, 0.0  ;;  %6686 = vst.msk [vmem:[#allocation2 + $0x308] sm:$0xff] %vm1177_vm4, %v6554_v39  ;;  %v2951_v37 = vld [vmem:[#allocation2 + $0x320] sm:$0xff]  ;;  %v1099_v27 = vpop.f32.mrf.mxu0  ;;  %v2257_v39 = vor.u32 %v2255_v60, %v13714_v13 }
 0x3b8   : > { %v3083_v58 = vadd.f32 %v2951_v37, %v2771_v30  ;;  %1279 = vst.msk [vmem:[#allocation2 + $0x328] sm:$0xff] %vm1177_vm4, %v1099_v27  ;;  %v4704_v16 = vpop.f32.mrf.mxu2  ;;  %10083 = vmatmul.msk.bf16.gmra.mxu3 %vm635_vm1, %v5770_v17  ;;  %v13781_v30 = vrot.slane %v2259_v31, 1  ;;  %v5771_v17 = vrot.slane %v13776_v28, 1 }
 0x3b9   : > { %v8512_v54 = vpack.c.bf16 %v8380_v8, %v8380_v8  ;;  %9421 = vmatmul.msk.bf16.gmra.mxu1 %vm635_vm1, %v2254_v47  ;;  %v4886_v11 = vld [vmem:[#allocation2 + $0x318] sm:$0xff]  ;;  %v4193_v47 = vor.u32 %v4191_v43, %v4189_v9 }
 0x3ba   : > { %v5018_v12 = vadd.f32 %v4886_v11, %v4704_v16  ;;  %9752 = vmatmul.msk.bf16.gmra.mxu2 %vm635_vm1, %v4190_v25  ;;  %3215 = vst.msk [vmem:[#allocation2 + $0x320] sm:$0xff] %vm1177_vm4, %v3083_v58  ;;  %v13786_v25 = vrot.slane %v4195_v33, 1  ;;  %v2262_v58 = vsel %vm1778_vm3, %v2257_v39, %v13781_v30 }
 0x3bb   : > { %8645 = vst.msk [vmem:[%s11306_s6 + $0x11c] sm:$0xf] %vm8573_vm5, %v8512_v54  ;;  %7171 = vrot.lane.b32.xlu0 %v13754_v51, %s10397_s26  ;;  %v13768_v32 = vpop.f32.mrf.mxu3 }
 0x3bc   : > { %5150 = vst.msk [vmem:[#allocation2 + $0x318] sm:$0xff] %vm1177_vm4, %v5018_v12  ;;  %v6423_v61 = vld [vmem:[#allocation2 + $0x310] sm:$0xff] }
 0x3bd   : > { %v6555_v36 = vadd.f32 %v6423_v61, %v13696_v1  ;;  %v5772_v61 = vsel %vm5651_vm2, %v5769_v57, %v5771_v17 }
 0x3be   : > { %v2773_v35 = vpop.f32.mrf.mxu1  ;;  %7173 = vrot.lane.b32.xlu1 %v6815_v23, %s10397_s26  ;;  %v4198_v23 = vsel %vm1778_vm3, %v4193_v47, %v13786_v25 }
 0x3bf   : > { %6687 = vst.msk [vmem:[#allocation2 + $0x310] sm:$0xff] %vm1177_vm4, %v6555_v36  ;;  %v2952_v48 = vld [vmem:[#allocation2 + $0x328] sm:$0xff]  ;;  %v1102_v0 = vpop.f32.mrf.mxu0 }
 0x3c0   : > { %v3084_v1 = vadd.f32 %v2952_v48, %v2773_v35  ;;  %1280 = vst.msk [vmem:[#allocation2 + $0x330] sm:$0xff] %vm1177_vm4, %v1102_v0  ;;  %v4707_v62 = vpop.f32.mrf.mxu2  ;;  %v13812_v0 = vld [vmem:[%s10445_s25 + $0x1e8] sm:$0xff] }
 0x3c1   : > { %v7778_v5 = vpop.permute.xlu0 %7777  ;;  %v7158_v2 = vpop.permute.xlu2 %7157  ;;  %v4887_v59 = vld [vmem:[#allocation2 + $0x320] sm:$0xff]  ;;  %9091 = vmatmul.msk.bf16.gmra.mxu0 %vm635_vm1, %v10152_v18  ;;  %v2267_v47 = vshll.u32 %v13812_v0, 16 }
 0x3c2   : > { %v8107_v6 = vmax.f32 %v13268_v21, %v7778_v5  ;;  %3216 = vst.msk [vmem:[#allocation2 + $0x328] sm:$0xff] %vm1177_vm4, %v3084_v1  ;;  %v5019_v8 = vadd.f32 %v4887_v59, %v4707_v62  ;;  %v13823_v62 = vld [vmem:[%s10445_s25 + $0x1f8] sm:$0xff] }
 0x3c3   : > { %v6424_v27 = vld [vmem:[#allocation2 + $0x318] sm:$0xff]  ;;  %v13792_v16 = vpop.f32.mrf.mxu3 }
 0x3c4   : > { %v8243_v37 = vadd.f32 %v13514_v29, %v8107_v6  ;;  %v6556_v54 = vadd.f32 %v6424_v27, %v6242_v55  ;;  %5151 = vst.msk [vmem:[#allocation2 + $0x320] sm:$0xff] %vm1177_vm4, %v5019_v8  ;;  %v10153_v27 = vld [vmem:[%s10445_s25 + $0x1e0] sm:$0xff] }
 0x3c6   : > { %v8375_v21 = vmax.f32 %v8243_v37, 0.0  ;;  %v2776_v13 = vpop.f32.mrf.mxu1  ;;  %6688 = vst.msk [vmem:[#allocation2 + $0x318] sm:$0xff] %vm1177_vm4, %v6556_v54  ;;  %v13795_v9 = vld [vmem:[#allocation2 + $0x310] sm:$0xff] }
 0x3c7   : > { %7181 = vrot.lane.b32.xlu2 %v13795_v9, %s10397_s26  ;;  %v1104_v55 = vpop.f32.mrf.mxu0  ;;  %v2953_v12 = vld [vmem:[#allocation2 + $0x330] sm:$0xff] }
 0x3c8   : > { %v8507_v11 = vpack.c.bf16 %v8375_v21, %v8375_v21  ;;  %1281 = vst.msk [vmem:[#allocation2 + $0x338] sm:$0xff] %vm1177_vm4, %v1104_v55  ;;  %v3085_v36 = vadd.f32 %v2953_v12, %v2776_v13  ;;  %v4709_v35 = vpop.f32.mrf.mxu2  ;;  %v7780_v60 = vpop.permute.xlu1 %7779  ;;  %10084 = vmatmul.msk.bf16.gmra.mxu3 %vm635_vm1, %v5772_v61  ;;  %v13842_v21 = vld [vmem:[%s10445_s25 + $0x1f8] sm:$0xff] }
 0x3c9   : > { %9422 = vmatmul.msk.bf16.gmra.mxu1 %vm635_vm1, %v2262_v58  ;;  %v7794_v31 = vpop.permute.xlu2 %7793  ;;  %v4888_v18 = vld [vmem:[#allocation2 + $0x328] sm:$0xff]  ;;  %v8108_v43 = vmax.f32 %v13303_v26, %v7780_v60  ;;  %v7148_v48 = vpop.permute.xlu0 %7147 }
 0x3ca   : > { %8640 = vst.msk [vmem:[%s11306_s6 + $0x108] sm:$0xf] %vm8573_vm5, %v8507_v11  ;;  %v8115_v3 = vmax.f32 %v13413_v56, %v7794_v31  ;;  %v5020_v57 = vadd.f32 %v4888_v18, %v4709_v35  ;;  %v13817_v33 = vmax.f32 %v13311_v4, %v7148_v48  ;;  %9753 = vmatmul.msk.bf16.gmra.mxu2 %vm635_vm1, %v4198_v23  ;;  %v2263_v4 = vshrl.u32 %v13750_v42, 16  ;;  %v10383_v23 = vld [vmem:[#allocation2 + $0x290] sm:$0xff]  ;;  %v13858_v31 = vld [vmem:[#allocation2 + $0x300] sm:$0xff] }
 0x3cb   : > { %3217 = vst.msk [vmem:[#allocation2 + $0x330] sm:$0xff] %vm1177_vm4, %v3085_v36  ;;  %v8244_v1 = vadd.f32 %v13514_v29, %v8108_v43  ;;  %v6425_v5 = vld [vmem:[#allocation2 + $0x320] sm:$0xff]  ;;  %v13831_v56 = vmax.f32 %v13381_v53, %v7158_v2  ;;  %v6250_v8 = vpop.f32.mrf.mxu3  ;;  %v4199_v2 = vshrl.u32 %v13762_v7, 16  ;;  %v13850_v35 = vrot.slane %v2267_v47, 1 }
 0x3cc   : > { %v8251_v26 = vadd.f32 %v13514_v29, %v8115_v3  ;;  %5152 = vst.msk [vmem:[#allocation2 + $0x328] sm:$0xff] %vm1177_vm4, %v5020_v57  ;;  %7807 = vrot.lane.b32.xlu0 %v13817_v33, %s10398_s27  ;;  %v6557_v39 = vadd.f32 %v6425_v5, %v13768_v32  ;;  %v4203_v32 = vshll.u32 %v13823_v62, 16  ;;  %v2265_v36 = vor.u32 %v2263_v4, %v13781_v30 }
 0x3cd   : > { %v8376_v6 = vmax.f32 %v8244_v1, 0.0  ;;  %v4201_v18 = vor.u32 %v4199_v2, %v13786_v25  ;;  %v5773_v30 = vrot.slane %v13842_v21, 1 }
 0x3ce   : > { %v2778_v59 = vpop.f32.mrf.mxu1  ;;  %v8383_v37 = vmax.f32 %v8251_v26, 0.0  ;;  %6689 = vst.msk [vmem:[#allocation2 + $0x320] sm:$0xff] %vm1177_vm4, %v6557_v39  ;;  %v13861_v43 = vrot.slane %v4203_v32, 1  ;;  %v2270_v57 = vsel %vm1778_vm3, %v2265_v36, %v13850_v35 }
 0x3cf   : > { %v8508_v54 = vpack.c.bf16 %v8376_v6, %v8376_v6  ;;  %7817 = vrot.lane.b32.xlu2 %v13831_v56, %s10398_s27  ;;  %v1107_v42 = vpop.f32.mrf.mxu0  ;;  %v2954_v53 = vld [vmem:[#allocation2 + $0x338] sm:$0xff] }
 0x3d0   : > { %v8515_v13 = vpack.c.bf16 %v8383_v37, %v8383_v37  ;;  %1282 = vst.msk [vmem:[#allocation2 + $0x340] sm:$0xff] %vm1177_vm4, %v1107_v42  ;;  %v3086_v58 = vadd.f32 %v2954_v53, %v2778_v59  ;;  %v4712_v11 = vpop.f32.mrf.mxu2  ;;  %v7150_v55 = vpop.permute.xlu1 %7149  ;;  %v4206_v5 = vsel %vm1778_vm3, %v4201_v18, %v13861_v43  ;;  %v13884_v37 = vld [vmem:[%s10445_s25 + $0x1f0] sm:$0xff]  ;;  %v13911_v18 = vld [vmem:[%s10445_s25 + $0x200] sm:$0xff] }
 0x3d1   : > { %8641 = vst.msk [vmem:[%s11306_s6 + $0x10c] sm:$0xf] %vm8573_vm5, %v8508_v54  ;;  %v13847_v61 = vmax.f32 %v10383_v23, %v7150_v55  ;;  %9092 = vmatmul.msk.bf16.gmra.mxu0 %vm635_vm1, %v10153_v27  ;;  %v13887_v54 = vld [vmem:[#allocation2 + $0x308] sm:$0xff] }
 0x3d2   : > { %v4889_v12 = vld [vmem:[#allocation2 + $0x330] sm:$0xff]  ;;  %8648 = vst.msk [vmem:[%s11306_s6 + $0x128] sm:$0xf] %vm8573_vm5, %v8515_v13 }
 0x3d3   : > { %v5021_v7 = vadd.f32 %v4889_v12, %v4712_v11  ;;  %3218 = vst.msk [vmem:[#allocation2 + $0x338] sm:$0xff] %vm1177_vm4, %v3086_v58  ;;  %v6426_v60 = vld [vmem:[#allocation2 + $0x328] sm:$0xff]  ;;  %7809 = vrot.lane.b32.xlu1 %v13847_v61, %s10398_s27  ;;  %v13870_v1 = vpop.f32.mrf.mxu3  ;;  %v2271_v58 = vshrl.u32 %v13812_v0, 16  ;;  %v2275_v11 = vshll.u32 %v13884_v37, 16 }
 0x3d4   : > { %v6558_v48 = vadd.f32 %v6426_v60, %v13792_v16  ;;  %7177 = vrot.lane.b32.xlu0 %v13858_v31, %s10397_s26  ;;  %v5774_v16 = vsel %vm5651_vm2, %v5771_v17, %v5773_v30 }
 0x3d5   : > { %5153 = vst.msk [vmem:[#allocation2 + $0x330] sm:$0xff] %vm1177_vm4, %v5021_v7  ;;  %v4207_v7 = vshrl.u32 %v13823_v62, 16 }
 0x3d6   : > { %v2781_v3 = vpop.f32.mrf.mxu1  ;;  %6690 = vst.msk [vmem:[#allocation2 + $0x328] sm:$0xff] %vm1177_vm4, %v6558_v48 }
 0x3d7   : > { %v1109_v25 = vpop.f32.mrf.mxu0  ;;  %v2955_v26 = vld [vmem:[#allocation2 + $0x340] sm:$0xff] }
 0x3d8   : > { %1283 = vst.msk [vmem:[#allocation2 + $0x348] sm:$0xff] %vm1177_vm4, %v1109_v25  ;;  %v3087_v4 = vadd.f32 %v2955_v26, %v2781_v3  ;;  %v4714_v6 = vpop.f32.mrf.mxu2  ;;  %10085 = vmatmul.msk.bf16.gmra.mxu3 %vm635_vm1, %v5774_v16  ;;  %v2273_v16 = vor.u32 %v2271_v58, %v13850_v35  ;;  %v5775_v35 = vrot.slane %v13911_v18, 1 }
 0x3d9   : > { %v7784_v39 = vpop.permute.xlu0 %7783  ;;  %9423 = vmatmul.msk.bf16.gmra.mxu1 %vm635_vm1, %v2270_v57  ;;  %v7164_v59 = vpop.permute.xlu2 %7163 }
 0x3da   : > { %v8110_v47 = vmax.f32 %v13372_v10, %v7784_v39  ;;  %3219 = vst.msk [vmem:[#allocation2 + $0x340] sm:$0xff] %vm1177_vm4, %v3087_v4  ;;  %v4890_v27 = vld [vmem:[#allocation2 + $0x338] sm:$0xff]  ;;  %9754 = vmatmul.msk.bf16.gmra.mxu2 %vm635_vm1, %v4206_v5  ;;  %v13895_v10 = vld [vmem:[%s10445_s25 + $0x200] sm:$0xff]  ;;  %v13918_v4 = vrot.slane %v2275_v11, 1 }
 0x3db   : > { %v5022_v28 = vadd.f32 %v4890_v27, %v4714_v6  ;;  %7179 = vrot.lane.b32.xlu1 %v13887_v54, %s10397_s26  ;;  %v13902_v55 = vpop.f32.mrf.mxu3  ;;  %v4211_v60 = vshll.u32 %v13895_v10, 16  ;;  %v10384_v39 = vld [vmem:[#allocation2 + $0x2a0] sm:$0xff] }
 0x3dc   : > { %v8246_v17 = vadd.f32 %v13514_v29, %v8110_v47  ;;  %v6427_v42 = vld [vmem:[#allocation2 + $0x330] sm:$0xff] }
 0x3dd   : > { %v6559_v53 = vadd.f32 %v6427_v42, %v6250_v8  ;;  %5154 = vst.msk [vmem:[#allocation2 + $0x338] sm:$0xff] %vm1177_vm4, %v5022_v28  ;;  %v13898_v32 = vld [vmem:[#allocation2 + $0x328] sm:$0xff]  ;;  %v4209_v28 = vor.u32 %v4207_v7, %v13861_v43  ;;  %v2278_v43 = vsel %vm1778_vm3, %v2273_v16, %v13918_v4 }
 0x3de   : > { %v8378_v2 = vmax.f32 %v8246_v17, 0.0  ;;  %v2783_v13 = vpop.f32.mrf.mxu1  ;;  %7187 = vrot.lane.b32.xlu2 %v13898_v32, %s10397_s26  ;;  %v10154_v8 = vld [vmem:[%s10445_s25 + $0x1e8] sm:$0xff]  ;;  %v13931_v17 = vmax.f32 %v13486_v20, %v7164_v59 }
 0x3df   : > { %6691 = vst.msk [vmem:[#allocation2 + $0x330] sm:$0xff] %vm1177_vm4, %v6559_v53  ;;  %v1112_v23 = vpop.f32.mrf.mxu0  ;;  %v2956_v36 = vld [vmem:[#allocation2 + $0x348] sm:$0xff] }
 0x3e0   : > { %v8510_v12 = vpack.c.bf16 %v8378_v2, %v8378_v2  ;;  %1284 = vst.msk [vmem:[#allocation2 + $0x350] sm:$0xff] %vm1177_vm4, %v1112_v23  ;;  %v3088_v0 = vadd.f32 %v2956_v36, %v2783_v13  ;;  %v4717_v48 = vpop.f32.mrf.mxu2  ;;  %v7786_v3 = vpop.permute.xlu1 %7785 }
 0x3e1   : > { %v7800_v57 = vpop.permute.xlu2 %7799  ;;  %v4891_v25 = vld [vmem:[#allocation2 + $0x340] sm:$0xff]  ;;  %v8111_v26 = vmax.f32 %v13409_v44, %v7786_v3  ;;  %v7154_v5 = vpop.permute.xlu0 %7153  ;;  %9093 = vmatmul.msk.bf16.gmra.mxu0 %vm635_vm1, %v10154_v8  ;;  %v13927_v44 = vrot.slane %v4211_v60, 1  ;;  %v13958_v3 = vld [vmem:[%s10445_s25 + $0x1f8] sm:$0xff] }
 0x3e2   : > { %8643 = vst.msk [vmem:[%s11306_s6 + $0x114] sm:$0xf] %vm8573_vm5, %v8510_v12  ;;  %v8118_v62 = vmax.f32 %v13521_v46, %v7800_v57  ;;  %v5023_v6 = vadd.f32 %v4891_v25, %v4717_v48  ;;  %v13922_v47 = vmax.f32 %v10384_v39, %v7154_v5  ;;  %v5776_v12 = vsel %vm5651_vm2, %v5773_v30, %v5775_v35  ;;  %v13967_v57 = vld [vmem:[#allocation2 + $0x318] sm:$0xff] }
 0x3e3   : > { %3220 = vst.msk [vmem:[#allocation2 + $0x348] sm:$0xff] %vm1177_vm4, %v3088_v0  ;;  %v8247_v27 = vadd.f32 %v13514_v29, %v8111_v26  ;;  %v6257_v58 = vpop.f32.mrf.mxu3  ;;  %v2279_v5 = vshrl.u32 %v13884_v37, 16  ;;  %v2283_v16 = vshll.u32 %v13958_v3, 16  ;;  %v4215_v39 = vshrl.u32 %v13895_v10, 16 }
 0x3e4   : > { %v8254_v42 = vadd.f32 %v13514_v29, %v8118_v62  ;;  %5155 = vst.msk [vmem:[#allocation2 + $0x340] sm:$0xff] %vm1177_vm4, %v5023_v6  ;;  %v6428_v46 = vld [vmem:[#allocation2 + $0x338] sm:$0xff]  ;;  %7813 = vrot.lane.b32.xlu0 %v13922_v47, %s10398_s27  ;;  %v10155_v6 = vld [vmem:[%s10445_s25 + $0x1f0] sm:$0xff] }
 0x3e5   : > { %v8379_v53 = vmax.f32 %v8247_v27, 0.0  ;;  %v6560_v2 = vadd.f32 %v6428_v46, %v13870_v1  ;;  %v4214_v1 = vsel %vm1778_vm3, %v4209_v28, %v13927_v44 }
 0x3e6   : > { %v2786_v13 = vpop.f32.mrf.mxu1  ;;  %v8386_v11 = vmax.f32 %v8254_v42, 0.0  ;;  %7823 = vrot.lane.b32.xlu2 %v13931_v17, %s10398_s27 }
 0x3e7   : > { %v8511_v20 = vpack.c.bf16 %v8379_v53, %v8379_v53  ;;  %6692 = vst.msk [vmem:[#allocation2 + $0x338] sm:$0xff] %vm1177_vm4, %v6560_v2  ;;  %v1114_v59 = vpop.f32.mrf.mxu0  ;;  %v2957_v8 = vld [vmem:[#allocation2 + $0x350] sm:$0xff] }
 0x3e8   : > { %v8518_v23 = vpack.c.bf16 %v8386_v11, %v8386_v11  ;;  %1285 = vst.msk [vmem:[#allocation2 + $0x358] sm:$0xff] %vm1177_vm4, %v1114_v59  ;;  %v3089_v36 = vadd.f32 %v2957_v8, %v2786_v13  ;;  %v4719_v7 = vpop.f32.mrf.mxu2  ;;  %v7156_v60 = vpop.permute.xlu1 %7155  ;;  %10086 = vmatmul.msk.bf16.gmra.mxu3 %vm635_vm1, %v5776_v12  ;;  %v13990_v11 = vrot.slane %v2283_v16, 1  ;;  %v4217_v59 = vor.u32 %v4215_v39, %v13927_v44 }
 0x3e9   : > { %9424 = vmatmul.msk.bf16.gmra.mxu1 %vm635_vm1, %v2278_v43  ;;  %8644 = vst.msk [vmem:[%s11306_s6 + $0x118] sm:$0xf] %vm8573_vm5, %v8511_v20  ;;  %v13955_v48 = vmax.f32 %v13446_v38, %v7156_v60  ;;  %v13970_v38 = vld [vmem:[%s10445_s25 + $0x208] sm:$0xff]  ;;  %v2281_v43 = vor.u32 %v2279_v5, %v13918_v4  ;;  %v13994_v20 = vld [vmem:[#allocation2 + $0x320] sm:$0xff] }
 0x3ea   : > { %v4892_v0 = vld [vmem:[#allocation2 + $0x348] sm:$0xff]  ;;  %8651 = vst.msk [vmem:[%s11306_s6 + $0x134] sm:$0xf] %vm8573_vm5, %v8518_v23  ;;  %9755 = vmatmul.msk.bf16.gmra.mxu2 %vm635_vm1, %v4214_v1  ;;  %v4219_v42 = vshll.u32 %v13970_v38, 16 }
 0x3eb   : > { %v5024_v21 = vadd.f32 %v4892_v0, %v4719_v7  ;;  %3221 = vst.msk [vmem:[#allocation2 + $0x350] sm:$0xff] %vm1177_vm4, %v3089_v36  ;;  %v6429_v30 = vld [vmem:[#allocation2 + $0x340] sm:$0xff]  ;;  %7815 = vrot.lane.b32.xlu1 %v13955_v48, %s10398_s27  ;;  %v13978_v62 = vpop.f32.mrf.mxu3  ;;  %v2286_v44 = vsel %vm1778_vm3, %v2281_v43, %v13990_v11 }
 0x3ec   : > { %v6561_v25 = vadd.f32 %v6429_v30, %v13902_v55  ;;  %7183 = vrot.lane.b32.xlu0 %v13967_v57, %s10397_s26  ;;  %v13985_v55 = vld [vmem:[%s10445_s25 + $0x208] sm:$0xff] }
 0x3ed   : > { %5156 = vst.msk [vmem:[#allocation2 + $0x348] sm:$0xff] %vm1177_vm4, %v5024_v21  ;;  %v5777_v4 = vrot.slane %v13985_v55, 1  ;;  %v14104_v55 = vld [vmem:[%s10445_s25 + $0x218] sm:$0xff] }
 0x3ee   : > { %v2788_v26 = vpop.f32.mrf.mxu1  ;;  %6693 = vst.msk [vmem:[#allocation2 + $0x340] sm:$0xff] %vm1177_vm4, %v6561_v25 }
 0x3ef   : > { %v1117_v27 = vpop.f32.mrf.mxu0  ;;  %v2958_v28 = vld [vmem:[#allocation2 + $0x358] sm:$0xff]  ;;  %v5778_v25 = vsel %vm5651_vm2, %v5775_v35, %v5777_v4 }
 0x3f0   : > { %1286 = vst.msk [vmem:[#allocation2 + $0x360] sm:$0xff] %vm1177_vm4, %v1117_v27  ;;  %v3090_v46 = vadd.f32 %v2958_v28, %v2788_v26  ;;  %v4722_v53 = vpop.f32.mrf.mxu2 }
 0x3f1   : > { %v7790_v37 = vpop.permute.xlu0 %7789  ;;  %v7170_v2 = vpop.permute.xlu2 %7169  ;;  %9094 = vmatmul.msk.bf16.gmra.mxu0 %vm635_vm1, %v10155_v6 }
 0x3f2   : > { %v8113_v13 = vmax.f32 %v13477_v63, %v7790_v37  ;;  %3222 = vst.msk [vmem:[#allocation2 + $0x358] sm:$0xff] %vm1177_vm4, %v3090_v46  ;;  %v4893_v10 = vld [vmem:[#allocation2 + $0x350] sm:$0xff]  ;;  %v14000_v63 = vrot.slane %v4219_v42, 1  ;;  %v14026_v42 = vld [vmem:[%s10445_s25 + $0x200] sm:$0xff] }
 0x3f3   : > { %v5025_v8 = vadd.f32 %v4893_v10, %v4722_v53  ;;  %7185 = vrot.lane.b32.xlu1 %v13994_v20, %s10397_s26  ;;  %v14038_v53 = vld [vmem:[%s14785_s2] ss:$0 sm:$0xff]  ;;  %v14042_v37 = vld [vmem:[%s10445_s25 + $0x210] sm:$0xff] }
 0x3f4   : > { %v8249_v1 = vadd.f32 %v13514_v29, %v8113_v13  ;;  %v6430_v12 = vld [vmem:[#allocation2 + $0x348] sm:$0xff]  ;;  %v14008_v29 = vpop.f32.mrf.mxu3  ;;  %v4222_v30 = vsel %vm1778_vm3, %v4217_v59, %v14000_v63 }
 0x3f5   : > { %v6562_v23 = vadd.f32 %v6430_v12, %v6257_v58  ;;  %5157 = vst.msk [vmem:[#allocation2 + $0x350] sm:$0xff] %vm1177_vm4, %v5025_v8  ;;  %v14004_v7 = vld [vmem:[#allocation2 + $0x340] sm:$0xff]  ;;  %v2287_v8 = vshrl.u32 %v13958_v3, 16  ;;  %v14061_v3 = vld [vmem:[%s10445_s25 + $0x210] sm:$0xff] }
 0x3f6   : > { %v8381_v36 = vmax.f32 %v8249_v1, 0.0  ;;  %v2791_v60 = vpop.f32.mrf.mxu1  ;;  %7193 = vrot.lane.b32.xlu2 %v14004_v7, %s10397_s26  ;;  %v2291_v1 = vshll.u32 %v14026_v42, 16 }
 0x3f7   : > { %6694 = vst.msk [vmem:[#allocation2 + $0x348] sm:$0xff] %vm1177_vm4, %v6562_v23  ;;  %v1119_v58 = vpop.f32.mrf.mxu0  ;;  %v2959_v21 = vld [vmem:[#allocation2 + $0x360] sm:$0xff] }
 0x3f8   : > { %v8513_v0 = vpack.c.bf16 %v8381_v36, %v8381_v36  ;;  %1287 = vst.msk [vmem:[#allocation2 + $0x368] sm:$0xff] %vm1177_vm4, %v1119_v58  ;;  %v3091_v26 = vadd.f32 %v2959_v21, %v2791_v60  ;;  %v4724_v5 = vpop.f32.mrf.mxu2  ;;  %v7792_v16 = vpop.permute.xlu1 %7791  ;;  %10087 = vmatmul.msk.bf16.gmra.mxu3 %vm635_vm1, %v5778_v25 }
 0x3f9   : > { %9425 = vmatmul.msk.bf16.gmra.mxu1 %vm635_vm1, %v2286_v44  ;;  %v7806_v6 = vpop.permute.xlu2 %7805  ;;  %v4894_v39 = vld [vmem:[#allocation2 + $0x358] sm:$0xff]  ;;  %v8114_v27 = vmax.f32 %v13518_v45, %v7792_v16  ;;  %v7160_v28 = vpop.permute.xlu0 %7159  ;;  %v4227_v44 = vshll.u32 %v14042_v37, 16  ;;  %v2289_v16 = vor.u32 %v2287_v8, %v13990_v11 }
 0x3fa   : > { %8646 = vst.msk [vmem:[%s11306_s6 + $0x120] sm:$0xf] %vm8573_vm5, %v8513_v0  ;;  %v8121_v18 = vmax.f32 %v13624_v40, %v7806_v6  ;;  %v5026_v35 = vadd.f32 %v4894_v39, %v4724_v5  ;;  %v14031_v46 = vmax.f32 %v13525_v14, %v7160_v28  ;;  %9756 = vmatmul.msk.bf16.gmra.mxu2 %vm635_vm1, %v4222_v30  ;;  %v2293_v6 = vrot.slane %v2291_v1, 1 }
 0x3fb   : > { %3223 = vst.msk [vmem:[#allocation2 + $0x360] sm:$0xff] %vm1177_vm4, %v3091_v26  ;;  %v8250_v45 = vadd.f32 %v14038_v53, %v8114_v27  ;;  %v14045_v40 = vmax.f32 %v13588_v24, %v7170_v2  ;;  %v10156_v2 = vld [vmem:[%s10445_s25 + $0x1f8] sm:$0xff]  ;;  %v10386_v26 = vld [vmem:[#allocation2 + $0x2c0] sm:$0xff]  ;;  %v14075_v27 = vld [vmem:[#allocation2 + $0x330] sm:$0xff] }
 0x3fc   : > { %v8257_v14 = vadd.f32 %v14038_v53, %v8121_v18  ;;  %5158 = vst.msk [vmem:[#allocation2 + $0x358] sm:$0xff] %vm1177_vm4, %v5026_v35  ;;  %v6431_v13 = vld [vmem:[#allocation2 + $0x350] sm:$0xff]  ;;  %7819 = vrot.lane.b32.xlu0 %v14031_v46, %s10398_s27  ;;  %v6265_v12 = vpop.f32.mrf.mxu3  ;;  %v4229_v18 = vrot.slane %v4227_v44, 1  ;;  %v5779_v35 = vrot.slane %v14061_v3, 1 }
 0x3fd   : > { %v8382_v43 = vmax.f32 %v8250_v45, 0.0  ;;  %v6563_v10 = vadd.f32 %v6431_v13, %v13978_v62  ;;  %v4223_v62 = vshrl.u32 %v13970_v38, 16 }
 0x3fe   : > { %v2793_v59 = vpop.f32.mrf.mxu1  ;;  %v8389_v24 = vmax.f32 %v8257_v14, 0.0  ;;  %7829 = vrot.lane.b32.xlu2 %v14045_v40, %s10398_s27  ;;  %v2294_v14 = vsel %vm1778_vm3, %v2289_v16, %v2293_v6 }
 0x3ff   : > { %v8514_v23 = vpack.c.bf16 %v8382_v43, %v8382_v43  ;;  %6695 = vst.msk [vmem:[#allocation2 + $0x350] sm:$0xff] %vm1177_vm4, %v6563_v10  ;;  %v1122_v36 = vpop.f32.mrf.mxu0  ;;  %v2960_v60 = vld [vmem:[#allocation2 + $0x368] sm:$0xff]  ;;  %v4225_v28 = vor.u32 %v4223_v62, %v14000_v63  ;;  %v2295_v62 = vshrl.u32 %v14026_v42, 16  ;;  %v4235_v42 = vshll.u32 %v14104_v55, 16 }
 0x400   : > { %v8521_v0 = vpack.c.bf16 %v8389_v24, %v8389_v24  ;;  %1288 = vst.msk [vmem:[#allocation2 + $0x370] sm:$0xff] %vm1177_vm4, %v1122_v36  ;;  %v3092_v58 = vadd.f32 %v2960_v60, %v2793_v59  ;;  %v4727_v21 = vpop.f32.mrf.mxu2  ;;  %v7162_v30 = vpop.permute.xlu1 %7161  ;;  %v14096_v24 = vld [vmem:[%s10445_s25 + $0x208] sm:$0xff] }
 0x401   : > { %8647 = vst.msk [vmem:[%s11306_s6 + $0x124] sm:$0xf] %vm8573_vm5, %v8514_v23  ;;  %v14066_v5 = vmax.f32 %v10386_v26, %v7162_v30  ;;  %9095 = vmatmul.msk.bf16.gmra.mxu0 %vm635_vm1, %v10156_v2  ;;  %v4230_v10 = vsel %vm1778_vm3, %v4225_v28, %v4229_v18  ;;  %v14099_v23 = vld [vmem:[#allocation2 + $0x338] sm:$0xff]  ;;  %v2299_v44 = vshll.u32 %v14096_v24, 16 }
 0x402   : > { %v4895_v25 = vld [vmem:[#allocation2 + $0x360] sm:$0xff]  ;;  %8654 = vst.msk [vmem:[%s11306_s6 + $0x140] sm:$0xf] %vm8573_vm5, %v8521_v0 }
 0x403   : > { %v5027_v38 = vadd.f32 %v4895_v25, %v4727_v21  ;;  %3224 = vst.msk [vmem:[#allocation2 + $0x368] sm:$0xff] %vm1177_vm4, %v3092_v58  ;;  %v6432_v39 = vld [vmem:[#allocation2 + $0x358] sm:$0xff]  ;;  %7821 = vrot.lane.b32.xlu1 %v14066_v5, %s10398_s27  ;;  %v10157_v25 = vld [vmem:[%s10445_s25 + $0x200] sm:$0xff] }
 0x404   : > { %v6564_v11 = vadd.f32 %v6432_v39, %v14008_v29  ;;  %7189 = vrot.lane.b32.xlu0 %v14075_v27, %s10397_s26  ;;  %v14084_v13 = vpop.f32.mrf.mxu3  ;;  %v5780_v29 = vsel %vm5651_vm2, %v5777_v4, %v5779_v35  ;;  %v14123_v39 = vld [vmem:[%s10445_s25 + $0x218] sm:$0xff] }
 0x405   : > { %5159 = vst.msk [vmem:[#allocation2 + $0x360] sm:$0xff] %vm1177_vm4, %v5027_v38 }
 0x406   : > { %v2796_v45 = vpop.f32.mrf.mxu1  ;;  %6696 = vst.msk [vmem:[#allocation2 + $0x358] sm:$0xff] %vm1177_vm4, %v6564_v11 }
 0x407   : > { %v1124_v63 = vpop.f32.mrf.mxu0  ;;  %v2961_v43 = vld [vmem:[#allocation2 + $0x370] sm:$0xff] }
 0x408   : > { %1289 = vst.msk [vmem:[#allocation2 + $0x378] sm:$0xff] %vm1177_vm4, %v1124_v63  ;;  %v3093_v59 = vadd.f32 %v2961_v43, %v2796_v45  ;;  %v7176_v8 = vpop.permute.xlu2 %7175  ;;  %v4729_v1 = vpop.f32.mrf.mxu2  ;;  %10088 = vmatmul.msk.bf16.gmra.mxu3 %vm635_vm1, %v5780_v29  ;;  %v14126_v63 = vrot.slane %v2299_v44, 1 }
 0x409   : > { %9426 = vmatmul.msk.bf16.gmra.mxu1 %vm635_vm1, %v2294_v14  ;;  %v2297_v14 = vor.u32 %v2295_v62, %v2293_v6  ;;  %v3379_v62 = vld [vmem:[%s10445_s25 + $0x220] sm:$0x1] }
 0x40a   : > { %3225 = vst.msk [vmem:[#allocation2 + $0x370] sm:$0xff] %vm1177_vm4, %v3093_v59  ;;  %v4896_v2 = vld [vmem:[#allocation2 + $0x368] sm:$0xff]  ;;  %9757 = vmatmul.msk.bf16.gmra.mxu2 %vm635_vm1, %v4230_v10  ;;  %v14132_v59 = vrot.slane %v4235_v42, 1 }
 0x40b   : > { %v5028_v4 = vadd.f32 %v4896_v2, %v4729_v1  ;;  %7191 = vrot.lane.b32.xlu1 %v14099_v23, %s10397_s26  ;;  %v1442_v1 = vld [vmem:[%s10445_s25 + $0x210] sm:$0x1] }
 0x40c   : > { %v6433_v36 = vld [vmem:[#allocation2 + $0x360] sm:$0xff]  ;;  %v14113_v21 = vpop.f32.mrf.mxu3 }
 0x40d   : > { %v6565_v60 = vadd.f32 %v6433_v36, %v6265_v12  ;;  %5160 = vst.msk [vmem:[#allocation2 + $0x368] sm:$0xff] %vm1177_vm4, %v5028_v4  ;;  %v14111_v0 = vld [vmem:[#allocation2 + $0x358] sm:$0xff]  ;;  %v4231_v12 = vshrl.u32 %v14042_v37, 16  ;;  %v5781_v4 = vrot.slane %v14123_v39, 1  ;;  %v14138_v36 = vmax.f32 %v13692_v19, %v7176_v8 }
 0x40e   : > { %v2798_v58 = vpop.f32.mrf.mxu1  ;;  %v7796_v30 = vpop.permute.xlu0 %7795  ;;  %7199 = vrot.lane.b32.xlu2 %v14111_v0, %s10397_s26 }
 0x40f   : > { %6697 = vst.msk [vmem:[#allocation2 + $0x360] sm:$0xff] %vm1177_vm4, %v6565_v60  ;;  %v8116_v26 = vmax.f32 %v13610_v34, %v7796_v30  ;;  %v1127_v16 = vpop.f32.mrf.mxu0  ;;  %v2962_v38 = vld [vmem:[#allocation2 + $0x378] sm:$0xff]  ;;  %v4233_v29 = vor.u32 %v4231_v12, %v4229_v18  ;;  %v2302_v60 = vsel %vm1778_vm3, %v2297_v14, %v14126_v63  ;;  %v1710_v12 = vunpack.c.l.b16 %v1442_v1 }
 0x410   : > { %1290 = vst.msk [vmem:[#allocation2 + $0x380] sm:$0xff] %vm1177_vm4, %v1127_v16  ;;  %v3094_v28 = vadd.f32 %v2962_v38, %v2798_v58  ;;  %v7812_v11 = vpop.permute.xlu2 %7811  ;;  %v4732_v45 = vpop.f32.mrf.mxu2 }
 0x411   : > { %v8252_v43 = vadd.f32 %v14038_v53, %v8116_v26  ;;  %v8124_v37 = vmax.f32 %v13724_v49, %v7812_v11  ;;  %v4897_v10 = vld [vmem:[#allocation2 + $0x370] sm:$0xff]  ;;  %9096 = vmatmul.msk.bf16.gmra.mxu0 %vm635_vm1, %v10157_v25  ;;  %v4238_v19 = vsel %vm1778_vm3, %v4233_v29, %v14132_v59  ;;  %v3647_v11 = vunpack.c.l.b16 %v3379_v62 }
 0x412   : > { %3226 = vst.msk [vmem:[#allocation2 + $0x378] sm:$0xff] %vm1177_vm4, %v3094_v28  ;;  %v5029_v34 = vadd.f32 %v4897_v10, %v4732_v45  ;;  %v1777_v10 = vpack.c.b16 %v1710_v12, %v1710_v12  ;;  %v2303_v62 = vshrl.u32 %v14096_v24, 16  ;;  %v4239_v12 = vshrl.u32 %v14104_v55, 16  ;;  %v14186_v24 = vld [vmem:[#allocation2 + $0x348] sm:$0xff] }
 0x413   : > { %v8384_v2 = vmax.f32 %v8252_v43, 0.0  ;;  %v8260_v6 = vadd.f32 %v14038_v53, %v8124_v37  ;;  %v5315_v37 = vld [vmem:[%s10445_s25 + $0x220] sm:$0x1]  ;;  %v3714_v29 = vpack.c.b16 %v3647_v11, %v3647_v11 }
 0x414   : > { %5161 = vst.msk [vmem:[#allocation2 + $0x370] sm:$0xff] %vm1177_vm4, %v5029_v34  ;;  %v6434_v49 = vld [vmem:[#allocation2 + $0x368] sm:$0xff]  ;;  %v6272_v8 = vpop.f32.mrf.mxu3  ;;  %v5583_v1 = vunpack.c.l.b16 %v5315_v37 }
 0x415   : > { %v8516_v18 = vpack.c.bf16 %v8384_v2, %v8384_v2  ;;  %v8392_v44 = vmax.f32 %v8260_v6, 0.0  ;;  %v6566_v58 = vadd.f32 %v6434_v49, %v14084_v13  ;;  %v7798_v30 = vpop.permute.xlu1 %7797 }
 0x416   : > { %v2801_v25 = vpop.f32.mrf.mxu1  ;;  %v8117_v42 = vmax.f32 %v13640_v41, %v7798_v30  ;;  %v7166_v26 = vpop.permute.xlu0 %7165  ;;  %7835 = vrot.lane.b32.xlu2 %v14138_v36, %s10398_s27  ;;  %v5782_v41 = vsel %vm5651_vm2, %v5779_v35, %v5781_v4 }
 0x417   : > { %8649 = vst.msk [vmem:[%s11306_s6 + $0x12c] sm:$0xf] %vm8573_vm5, %v8516_v18  ;;  %v8524_v16 = vpack.c.bf16 %v8392_v44, %v8392_v44  ;;  %v14153_v13 = vmax.f32 %v13651_v52, %v7166_v26  ;;  %v1129_v38 = vpop.f32.mrf.mxu0  ;;  %v2963_v28 = vld [vmem:[#allocation2 + $0x380] sm:$0xff]  ;;  %v2307_v18 = vshll.u32 %v1777_v10, 16  ;;  %v5650_v26 = vpack.c.b16 %v5583_v1, %v5583_v1  ;;  %v14202_v1 = vld [vmem:[#allocation2 + $0x350] sm:$0xff] }
 0x418   : > { %6698 = vst.msk [vmem:[#allocation2 + $0x368] sm:$0xff] %vm1177_vm4, %v6566_v58  ;;  %v8253_v45 = vadd.f32 %v14038_v53, %v8117_v42  ;;  %v3095_v14 = vadd.f32 %v2963_v28, %v2801_v25  ;;  %v4734_v43 = vpop.f32.mrf.mxu2  ;;  %10089 = vmatmul.msk.bf16.gmra.mxu3 %vm635_vm1, %v5782_v41  ;;  %v10158_v58 = vld [vmem:[%s10445_s25 + $0x208] sm:$0xff]  ;;  %v4243_v42 = vshll.u32 %v3714_v29, 16 }
 0x419   : > { %9427 = vmatmul.msk.bf16.gmra.mxu1 %vm635_vm1, %v2302_v60  ;;  %8657 = vst.msk [vmem:[%s11306_s6 + $0x14c] sm:$0xf] %vm8573_vm5, %v8524_v16  ;;  %v4898_v52 = vld [vmem:[#allocation2 + $0x378] sm:$0xff]  ;;  %7825 = vrot.lane.b32.xlu0 %v14153_v13, %s10398_s27  ;;  %v2305_v16 = vor.u32 %v2303_v62, %v14126_v63 }
 0x41a   : > { %v8385_v3 = vmax.f32 %v8253_v45, 0.0  ;;  %1291 = vst.msk [vmem:[#allocation2 + $0x388] sm:$0xff] %vm1177_vm4, %v1129_v38  ;;  %v5030_v35 = vadd.f32 %v4898_v52, %v4734_v43  ;;  %9758 = vmatmul.msk.bf16.gmra.mxu2 %vm635_vm1, %v4238_v19  ;;  %v2309_v38 = vrot.slane %v2307_v18, 1  ;;  %v4241_v45 = vor.u32 %v4239_v12, %v14132_v59 }
 0x41b   : > { %3227 = vst.msk [vmem:[#allocation2 + $0x380] sm:$0xff] %vm1177_vm4, %v3095_v14  ;;  %v6435_v34 = vld [vmem:[#allocation2 + $0x370] sm:$0xff]  ;;  %v4245_v14 = vrot.slane %v4243_v42, 1  ;;  %v5783_v43 = vrot.slane %v5650_v26, 1 }
 0x41c   : > { %v8517_v2 = vpack.c.bf16 %v8385_v3, %v8385_v3  ;;  %5162 = vst.msk [vmem:[#allocation2 + $0x378] sm:$0xff] %vm1177_vm4, %v5030_v35  ;;  %v6567_v6 = vadd.f32 %v6435_v34, %v14113_v21  ;;  %v6275_v30 = vpop.f32.mrf.mxu3  ;;  %v2310_v63 = vsel %vm1778_vm3, %v2305_v16, %v2309_v38 }
 0x41d   : > { %v7168_v49 = vpop.permute.xlu1 %7167 }
 0x41e   : > { %v2803_v60 = vpop.f32.mrf.mxu1  ;;  %8650 = vst.msk [vmem:[%s11306_s6 + $0x130] sm:$0xf] %vm8573_vm5, %v8517_v2  ;;  %v14178_v44 = vmax.f32 %v13680_v15, %v7168_v49  ;;  %v5784_v2 = vsel %vm5651_vm2, %v5781_v4, %v5783_v43 }
 0x41f   : > { %6699 = vst.msk [vmem:[#allocation2 + $0x370] sm:$0xff] %vm1177_vm4, %v6567_v6  ;;  %v1132_v25 = vpop.f32.mrf.mxu0 }
 0x420   : > { %1292 = vst.msk [vmem:[#allocation2 + $0x390] sm:$0xff] %vm1177_vm4, %v1132_v25  ;;  %v4737_v21 = vpop.f32.mrf.mxu2  ;;  %7827 = vrot.lane.b32.xlu1 %v14178_v44, %s10398_s27 }
 0x421   : > { %v2964_v19 = vld [vmem:[#allocation2 + $0x388] sm:$0xff]  ;;  %v7182_v15 = vpop.permute.xlu2 %7181  ;;  %7195 = vrot.lane.b32.xlu0 %v14186_v24, %s10397_s26  ;;  %9097 = vmatmul.msk.bf16.gmra.mxu0 %vm635_vm1, %v10158_v58 }
 0x422   : > { %v3096_v28 = vadd.f32 %v2964_v19, %v2803_v60  ;;  %v4899_v55 = vld [vmem:[#allocation2 + $0x380] sm:$0xff] }
 0x423   : > { %v5031_v41 = vadd.f32 %v4899_v55, %v4737_v21  ;;  %v6436_v11 = vld [vmem:[#allocation2 + $0x378] sm:$0xff] }
 0x424   : > { %3228 = vst.msk [vmem:[#allocation2 + $0x388] sm:$0xff] %vm1177_vm4, %v3096_v28  ;;  %v6568_v37 = vadd.f32 %v6436_v11, %v6272_v8  ;;  %v6277_v34 = vpop.f32.mrf.mxu3  ;;  %v4246_v8 = vsel %vm1778_vm3, %v4241_v45, %v4245_v14 }
 0x425   : > { %5163 = vst.msk [vmem:[#allocation2 + $0x380] sm:$0xff] %vm1177_vm4, %v5031_v41  ;;  %v7802_v52 = vpop.permute.xlu0 %7801 }
 0x426   : > { %v2806_v10 = vpop.f32.mrf.mxu1  ;;  %6700 = vst.msk [vmem:[#allocation2 + $0x378] sm:$0xff] %vm1177_vm4, %v6568_v37  ;;  %v8119_v3 = vmax.f32 %v13711_v50, %v7802_v52  ;;  %v14198_v35 = vld [vmem:[#allocation2 + $0x370] sm:$0xff] }
 0x427   : > { %7205 = vrot.lane.b32.xlu2 %v14198_v35, %s10397_s26  ;;  %v1134_v59 = vpop.f32.mrf.mxu0  ;;  %v2965_v29 = vld [vmem:[#allocation2 + $0x390] sm:$0xff] }
 0x428   : > { %v8255_v6 = vadd.f32 %v14038_v53, %v8119_v3  ;;  %1293 = vst.msk [vmem:[#allocation2 + $0x398] sm:$0xff] %vm1177_vm4, %v1134_v59  ;;  %v3097_v50 = vadd.f32 %v2965_v29, %v2806_v10  ;;  %v4739_v49 = vpop.f32.mrf.mxu2  ;;  %v7804_v60 = vpop.permute.xlu1 %7803  ;;  %7197 = vrot.lane.b32.xlu1 %v14202_v1, %s10397_s26  ;;  %10090 = vmatmul.msk.bf16.gmra.mxu3 %vm635_vm1, %v5784_v2  ;;  %v10387_v37 = vld [vmem:[#allocation2 + $0x2f0] sm:$0xff]  ;;  %v14245_v2 = vld [vmem:[#allocation2 + $0x360] sm:$0xff] }
 0x429   : > { %9428 = vmatmul.msk.bf16.gmra.mxu1 %vm635_vm1, %v2310_v63  ;;  %v7818_v62 = vpop.permute.xlu2 %7817  ;;  %v8120_v18 = vmax.f32 %v13730_v22, %v7804_v60  ;;  %v14221_v22 = vmax.f32 %v13795_v9, %v7182_v15  ;;  %v14251_v60 = vld [vmem:[#allocation2 + $0x368] sm:$0xff] }
 0x42a   : > { %v8387_v58 = vmax.f32 %v8255_v6, 0.0  ;;  %3229 = vst.msk [vmem:[#allocation2 + $0x390] sm:$0xff] %vm1177_vm4, %v3097_v50  ;;  %v8127_v39 = vmax.f32 %v13831_v56, %v7818_v62  ;;  %9759 = vmatmul.msk.bf16.gmra.mxu2 %vm635_vm1, %v4246_v8 }
 0x42b   : > { %v4900_v4 = vld [vmem:[#allocation2 + $0x388] sm:$0xff]  ;;  %v8256_v25 = vadd.f32 %v14038_v53, %v8120_v18 }
 0x42c   : > { %v8519_v12 = vpack.c.bf16 %v8387_v58, %v8387_v58  ;;  %v8263_v42 = vadd.f32 %v14038_v53, %v8127_v39  ;;  %v5032_v26 = vadd.f32 %v4900_v4, %v4739_v49  ;;  %v6437_v21 = vld [vmem:[#allocation2 + $0x380] sm:$0xff]  ;;  %v6280_v41 = vpop.f32.mrf.mxu3 }
 0x42d   : > { %v8388_v19 = vmax.f32 %v8256_v25, 0.0  ;;  %v6569_v16 = vadd.f32 %v6437_v21, %v6275_v30  ;;  %v7172_v38 = vpop.permute.xlu0 %7171 }
 0x42e   : > { %v2808_v28 = vpop.f32.mrf.mxu1  ;;  %8652 = vst.msk [vmem:[%s11306_s6 + $0x138] sm:$0xf] %vm8573_vm5, %v8519_v12  ;;  %v8395_v56 = vmax.f32 %v8263_v42, 0.0  ;;  %v14226_v55 = vmax.f32 %v13754_v51, %v7172_v38 }
 0x42f   : > { %5164 = vst.msk [vmem:[#allocation2 + $0x388] sm:$0xff] %vm1177_vm4, %v5032_v26  ;;  %v8520_v11 = vpack.c.bf16 %v8388_v19, %v8388_v19  ;;  %7841 = vrot.lane.b32.xlu2 %v14221_v22, %s10398_s27  ;;  %v1137_v9 = vpop.f32.mrf.mxu0  ;;  %v2966_v15 = vld [vmem:[#allocation2 + $0x398] sm:$0xff] }
 0x430   : > { %v8527_v30 = vpack.c.bf16 %v8395_v56, %v8395_v56  ;;  %6701 = vst.msk [vmem:[#allocation2 + $0x380] sm:$0xff] %vm1177_vm4, %v6569_v16  ;;  %v3098_v45 = vadd.f32 %v2966_v15, %v2808_v28  ;;  %v4742_v14 = vpop.f32.mrf.mxu2  ;;  %v7174_v43 = vpop.permute.xlu1 %7173  ;;  %7831 = vrot.lane.b32.xlu0 %v14226_v55, %s10398_s27 }
 0x431   : > { %8653 = vst.msk [vmem:[%s11306_s6 + $0x13c] sm:$0xf] %vm8573_vm5, %v8520_v11  ;;  %v4901_v51 = vld [vmem:[#allocation2 + $0x390] sm:$0xff]  ;;  %v14236_v52 = vmax.f32 %v10387_v37, %v7174_v43 }
 0x432   : > { %8660 = vst.msk [vmem:[%s11306_s6 + $0x158] sm:$0xf] %vm8573_vm5, %v8527_v30  ;;  %v5033_v10 = vadd.f32 %v4901_v51, %v4742_v14 }
 0x433   : > { %1294 = vst.msk [vmem:[#allocation2 + $0x3a0] sm:$0xff] %vm1177_vm4, %v1137_v9  ;;  %7833 = vrot.lane.b32.xlu1 %v14236_v52, %s10398_s27 }
 0x434   : > { %3230 = vst.msk [vmem:[#allocation2 + $0x398] sm:$0xff] %vm1177_vm4, %v3098_v45  ;;  %v6282_v59 = vpop.f32.mrf.mxu3 }
 0x435   : > { %5165 = vst.msk [vmem:[#allocation2 + $0x390] sm:$0xff] %vm1177_vm4, %v5033_v10 }
 0x436   : > { %v2811_v63 = vpop.f32.mrf.mxu1  ;;  %v6438_v3 = vld [vmem:[#allocation2 + $0x388] sm:$0xff] }
 0x437   : > { %v6570_v29 = vadd.f32 %v6438_v3, %v6277_v34  ;;  %v1139_v8 = vpop.f32.mrf.mxu0 }
 0x438   : > { %1295 = vst.msk [vmem:[#allocation2 + $0x3a8] sm:$0xff] %vm1177_vm4, %v1139_v8  ;;  %v7188_v6 = vpop.permute.xlu2 %7187  ;;  %v4744_v50 = vpop.f32.mrf.mxu2  ;;  %7201 = vrot.lane.b32.xlu0 %v14245_v2, %s10397_s26 }
 0x439   : > { %6702 = vst.msk [vmem:[#allocation2 + $0x388] sm:$0xff] %vm1177_vm4, %v6570_v29 }
 0x43a   : > { %v2967_v49 = vld [vmem:[#allocation2 + $0x3a0] sm:$0xff] }
 0x43b   : > { %v3099_v62 = vadd.f32 %v2967_v49, %v2811_v63  ;;  %v4902_v18 = vld [vmem:[#allocation2 + $0x398] sm:$0xff]  ;;  %7203 = vrot.lane.b32.xlu1 %v14251_v60, %s10397_s26 }
 0x43c   : > { %v5034_v34 = vadd.f32 %v4902_v18, %v4744_v50  ;;  %v6439_v58 = vld [vmem:[#allocation2 + $0x390] sm:$0xff]  ;;  %v6285_v12 = vpop.f32.mrf.mxu3 }
 0x43d   : > { %3231 = vst.msk [vmem:[#allocation2 + $0x3a0] sm:$0xff] %vm1177_vm4, %v3099_v62  ;;  %v6571_v39 = vadd.f32 %v6439_v58, %v6280_v41 }
 0x43e   : > { %v2813_v4 = vpop.f32.mrf.mxu1  ;;  %5166 = vst.msk [vmem:[#allocation2 + $0x398] sm:$0xff] %vm1177_vm4, %v5034_v34  ;;  %v7808_v25 = vpop.permute.xlu0 %7807 }
 0x43f   : > { %6703 = vst.msk [vmem:[#allocation2 + $0x390] sm:$0xff] %vm1177_vm4, %v6571_v39  ;;  %v8122_v42 = vmax.f32 %v13817_v33, %v7808_v25  ;;  %v1142_v26 = vpop.f32.mrf.mxu0  ;;  %v2968_v21 = vld [vmem:[#allocation2 + $0x3a8] sm:$0xff] }
 0x440   : > { %v14259_v19 = vld [vmem:[#allocation2 + $0x388] sm:$0xff]  ;;  %1296 = vst.msk [vmem:[#allocation2 + $0x3b0] sm:$0xff] %vm1177_vm4, %v1142_v26  ;;  %v3100_v16 = vadd.f32 %v2968_v21, %v2813_v4  ;;  %v7824_v38 = vpop.permute.xlu2 %7823  ;;  %v4747_v28 = vpop.f32.mrf.mxu2 }
 0x441   : > { %v8258_v56 = vadd.f32 %v14038_v53, %v8122_v42  ;;  %7211 = vrot.lane.b32.xlu2 %v14259_v19, %s10397_s26  ;;  %v8130_v41 = vmax.f32 %v13931_v17, %v7824_v38  ;;  %v14270_v17 = vmax.f32 %v13898_v32, %v7188_v6  ;;  %v14297_v38 = vld [vmem:[#allocation2 + $0x378] sm:$0xff] }
 0x442   : > { %3232 = vst.msk [vmem:[#allocation2 + $0x3a8] sm:$0xff] %vm1177_vm4, %v3100_v16 }
 0x443   : > { %v8390_v33 = vmax.f32 %v8258_v56, 0.0  ;;  %v8266_v11 = vadd.f32 %v14038_v53, %v8130_v41 }
 0x444   : > { %v4903_v9 = vld [vmem:[#allocation2 + $0x3a0] sm:$0xff]  ;;  %v6287_v3 = vpop.f32.mrf.mxu3 }
 0x445   : > { %v8522_v15 = vpack.c.bf16 %v8390_v33, %v8390_v33  ;;  %v8398_v30 = vmax.f32 %v8266_v11, 0.0  ;;  %v5035_v45 = vadd.f32 %v4903_v9, %v4747_v28  ;;  %v6440_v14 = vld [vmem:[#allocation2 + $0x398] sm:$0xff]  ;;  %v7810_v43 = vpop.permute.xlu1 %7809 }
 0x446   : > { %v2816_v51 = vpop.f32.mrf.mxu1  ;;  %v6572_v37 = vadd.f32 %v6440_v14, %v6282_v59  ;;  %v8123_v10 = vmax.f32 %v13847_v61, %v7810_v43  ;;  %v7178_v63 = vpop.permute.xlu0 %7177  ;;  %v14306_v43 = vld [vmem:[#allocation2 + $0x380] sm:$0xff] }
 0x447   : > { %8655 = vst.msk [vmem:[%s11306_s6 + $0x144] sm:$0xf] %vm8573_vm5, %v8522_v15  ;;  %v8530_v29 = vpack.c.bf16 %v8398_v30, %v8398_v30  ;;  %v14275_v8 = vmax.f32 %v13858_v31, %v7178_v63  ;;  %v1144_v50 = vpop.f32.mrf.mxu0  ;;  %v2969_v49 = vld [vmem:[#allocation2 + $0x3b0] sm:$0xff] }
 0x448   : > { %5167 = vst.msk [vmem:[#allocation2 + $0x3a0] sm:$0xff] %vm1177_vm4, %v5035_v45  ;;  %v8259_v62 = vadd.f32 %v14038_v53, %v8123_v10  ;;  %v3101_v59 = vadd.f32 %v2969_v49, %v2816_v51  ;;  %v4749_v61 = vpop.f32.mrf.mxu2 }
 0x449   : > { %8663 = vst.msk [vmem:[%s11306_s6 + $0x164] sm:$0xf] %vm8573_vm5, %v8530_v29  ;;  %7847 = vrot.lane.b32.xlu2 %v14270_v17, %s10398_s27  ;;  %v4904_v32 = vld [vmem:[#allocation2 + $0x3a8] sm:$0xff]  ;;  %7837 = vrot.lane.b32.xlu0 %v14275_v8, %s10398_s27 }
 0x44a   : > { %6704 = vst.msk [vmem:[#allocation2 + $0x398] sm:$0xff] %vm1177_vm4, %v6572_v37  ;;  %v8391_v31 = vmax.f32 %v8259_v62, 0.0  ;;  %v5036_v6 = vadd.f32 %v4904_v32, %v4749_v61 }
 0x44b   : > { %1297 = vst.msk [vmem:[#allocation2 + $0x3b8] sm:$0xff] %vm1177_vm4, %v1144_v50 }
 0x44c   : > { %v8523_v18 = vpack.c.bf16 %v8391_v31, %v8391_v31  ;;  %3233 = vst.msk [vmem:[#allocation2 + $0x3b0] sm:$0xff] %vm1177_vm4, %v3101_v59  ;;  %v6290_v4 = vpop.f32.mrf.mxu3 }
 0x44d   : > { %5168 = vst.msk [vmem:[#allocation2 + $0x3a8] sm:$0xff] %vm1177_vm4, %v5036_v6  ;;  %v7180_v34 = vpop.permute.xlu1 %7179 }
 0x44e   : > { %v2818_v58 = vpop.f32.mrf.mxu1  ;;  %8656 = vst.msk [vmem:[%s11306_s6 + $0x148] sm:$0xf] %vm8573_vm5, %v8523_v18  ;;  %v14292_v39 = vmax.f32 %v13887_v54, %v7180_v34 }
 0x44f   : > { %v6441_v25 = vld [vmem:[#allocation2 + $0x3a0] sm:$0xff]  ;;  %v1147_v42 = vpop.f32.mrf.mxu0 }
 0x450   : > { %v6573_v26 = vadd.f32 %v6441_v25, %v6285_v12  ;;  %1298 = vst.msk [vmem:[#allocation2 + $0x3c0] sm:$0xff] %vm1177_vm4, %v1147_v42  ;;  %v7194_v21 = vpop.permute.xlu2 %7193  ;;  %v4752_v16 = vpop.f32.mrf.mxu2  ;;  %7839 = vrot.lane.b32.xlu1 %v14292_v39, %s10398_s27 }
 0x451   : > { %7207 = vrot.lane.b32.xlu0 %v14297_v38, %s10397_s26 }
 0x452   : > { %6705 = vst.msk [vmem:[#allocation2 + $0x3a0] sm:$0xff] %vm1177_vm4, %v6573_v26  ;;  %v2970_v54 = vld [vmem:[#allocation2 + $0x3b8] sm:$0xff] }
 0x453   : > { %v3102_v28 = vadd.f32 %v2970_v54, %v2818_v58  ;;  %v4905_v56 = vld [vmem:[#allocation2 + $0x3b0] sm:$0xff]  ;;  %v14326_v54 = vmax.f32 %v14004_v7, %v7194_v21 }
 0x454   : > { %v5037_v41 = vadd.f32 %v4905_v56, %v4752_v16  ;;  %v6442_v33 = vld [vmem:[#allocation2 + $0x3a8] sm:$0xff]  ;;  %v6292_v15 = vpop.f32.mrf.mxu3 }
 0x455   : > { %3234 = vst.msk [vmem:[#allocation2 + $0x3b8] sm:$0xff] %vm1177_vm4, %v3102_v28  ;;  %v6574_v12 = vadd.f32 %v6442_v33, %v6287_v3 }
 0x456   : > { %v2821_v11 = vpop.f32.mrf.mxu1  ;;  %5169 = vst.msk [vmem:[#allocation2 + $0x3b0] sm:$0xff] %vm1177_vm4, %v5037_v41  ;;  %v7814_v9 = vpop.permute.xlu0 %7813 }
 0x457   : > { %6706 = vst.msk [vmem:[#allocation2 + $0x3a8] sm:$0xff] %vm1177_vm4, %v6574_v12  ;;  %v8125_v30 = vmax.f32 %v13922_v47, %v7814_v9  ;;  %v1149_v45 = vpop.f32.mrf.mxu0  ;;  %v2971_v14 = vld [vmem:[#allocation2 + $0x3c0] sm:$0xff] }
 0x458   : > { %1299 = vst.msk [vmem:[#allocation2 + $0x3c8] sm:$0xff] %vm1177_vm4, %v1149_v45  ;;  %v3103_v51 = vadd.f32 %v2971_v14, %v2821_v11  ;;  %v7830_v37 = vpop.permute.xlu2 %7829  ;;  %v4754_v10 = vpop.f32.mrf.mxu2  ;;  %7209 = vrot.lane.b32.xlu1 %v14306_v43, %s10397_s26 }
 0x459   : > { %v8261_v63 = vadd.f32 %v14038_v53, %v8125_v30  ;;  %v14312_v3 = vld [vmem:[#allocation2 + $0x3a0] sm:$0xff]  ;;  %v8133_v29 = vmax.f32 %v14045_v40, %v7830_v37  ;;  %v14348_v37 = vld [vmem:[#allocation2 + $0x390] sm:$0xff] }
 0x45a   : > { %7217 = vrot.lane.b32.xlu2 %v14312_v3, %s10397_s26  ;;  %3235 = vst.msk [vmem:[#allocation2 + $0x3c0] sm:$0xff] %vm1177_vm4, %v3103_v51 }
 0x45b   : > { %v8393_v47 = vmax.f32 %v8261_v63, 0.0  ;;  %v8269_v50 = vadd.f32 %v14038_v53, %v8133_v29 }
 0x45c   : > { %v4906_v49 = vld [vmem:[#allocation2 + $0x3b8] sm:$0xff]  ;;  %v6295_v58 = vpop.f32.mrf.mxu3 }
 0x45d   : > { %v8525_v62 = vpack.c.bf16 %v8393_v47, %v8393_v47  ;;  %v8401_v59 = vmax.f32 %v8269_v50, 0.0  ;;  %v5038_v61 = vadd.f32 %v4906_v49, %v4754_v10  ;;  %v6443_v32 = vld [vmem:[#allocation2 + $0x3b0] sm:$0xff]  ;;  %v7816_v31 = vpop.permute.xlu1 %7815 }
 0x45e   : > { %v2823_v6 = vpop.f32.mrf.mxu1  ;;  %v6575_v18 = vadd.f32 %v6443_v32, %v6290_v4  ;;  %v8126_v40 = vmax.f32 %v13955_v48, %v7816_v31  ;;  %v7184_v34 = vpop.permute.xlu0 %7183  ;;  %v14357_v31 = vld [vmem:[#allocation2 + $0x398] sm:$0xff] }
 0x45f   : > { %8658 = vst.msk [vmem:[%s11306_s6 + $0x150] sm:$0xf] %vm8573_vm5, %v8525_v62  ;;  %v8533_v25 = vpack.c.bf16 %v8401_v59, %v8401_v59  ;;  %v14323_v42 = vmax.f32 %v13967_v57, %v7184_v34  ;;  %v1152_v26 = vpop.f32.mrf.mxu0  ;;  %v2972_v16 = vld [vmem:[#allocation2 + $0x3c8] sm:$0xff] }
 0x460   : > { %5170 = vst.msk [vmem:[#allocation2 + $0x3b8] sm:$0xff] %vm1177_vm4, %v5038_v61  ;;  %v8262_v28 = vadd.f32 %v14038_v53, %v8126_v40  ;;  %v3104_v4 = vadd.f32 %v2972_v16, %v2823_v6  ;;  %v4757_v48 = vpop.f32.mrf.mxu2 }
 0x461   : > { %8666 = vst.msk [vmem:[%s11306_s6 + $0x170] sm:$0xf] %vm8573_vm5, %v8533_v25  ;;  %v4907_v56 = vld [vmem:[#allocation2 + $0x3c0] sm:$0xff]  ;;  %7843 = vrot.lane.b32.xlu0 %v14323_v42, %s10398_s27 }
 0x462   : > { %6707 = vst.msk [vmem:[#allocation2 + $0x3b0] sm:$0xff] %vm1177_vm4, %v6575_v18  ;;  %v8394_v57 = vmax.f32 %v8262_v28, 0.0  ;;  %7853 = vrot.lane.b32.xlu2 %v14326_v54, %s10398_s27  ;;  %v5039_v7 = vadd.f32 %v4907_v56, %v4757_v48 }
 0x463   : > { %1300 = vst.msk [vmem:[#allocation2 + $0x3d0] sm:$0xff] %vm1177_vm4, %v1152_v26 }
 0x464   : > { %v8526_v21 = vpack.c.bf16 %v8394_v57, %v8394_v57  ;;  %3236 = vst.msk [vmem:[#allocation2 + $0x3c8] sm:$0xff] %vm1177_vm4, %v3104_v4  ;;  %v6297_v11 = vpop.f32.mrf.mxu3 }
 0x465   : > { %5171 = vst.msk [vmem:[#allocation2 + $0x3c0] sm:$0xff] %vm1177_vm4, %v5039_v7  ;;  %v7186_v41 = vpop.permute.xlu1 %7185 }
 0x466   : > { %v2826_v33 = vpop.f32.mrf.mxu1  ;;  %8659 = vst.msk [vmem:[%s11306_s6 + $0x154] sm:$0xf] %vm8573_vm5, %v8526_v21  ;;  %v14343_v12 = vmax.f32 %v13994_v20, %v7186_v41 }
 0x467   : > { %v6444_v9 = vld [vmem:[#allocation2 + $0x3b8] sm:$0xff]  ;;  %v1154_v30 = vpop.f32.mrf.mxu0 }
 0x468   : > { %v6576_v45 = vadd.f32 %v6444_v9, %v6292_v15  ;;  %1301 = vst.msk [vmem:[#allocation2 + $0x3d8] sm:$0xff] %vm1177_vm4, %v1154_v30  ;;  %v7200_v14 = vpop.permute.xlu2 %7199  ;;  %v4759_v51 = vpop.f32.mrf.mxu2  ;;  %7845 = vrot.lane.b32.xlu1 %v14343_v12, %s10398_s27 }
 0x469   : > { %7213 = vrot.lane.b32.xlu0 %v14348_v37, %s10397_s26 }
 0x46a   : > { %6708 = vst.msk [vmem:[#allocation2 + $0x3b8] sm:$0xff] %vm1177_vm4, %v6576_v45  ;;  %v2973_v20 = vld [vmem:[#allocation2 + $0x3d0] sm:$0xff] }
 0x46b   : > { %v3105_v10 = vadd.f32 %v2973_v20, %v2826_v33  ;;  %v4908_v63 = vld [vmem:[#allocation2 + $0x3c8] sm:$0xff]  ;;  %v14377_v20 = vmax.f32 %v14111_v0, %v7200_v14 }
 0x46c   : > { %v5040_v29 = vadd.f32 %v4908_v63, %v4759_v51  ;;  %v6445_v47 = vld [vmem:[#allocation2 + $0x3c0] sm:$0xff]  ;;  %v6300_v62 = vpop.f32.mrf.mxu3 }
 0x46d   : > { %3237 = vst.msk [vmem:[#allocation2 + $0x3d0] sm:$0xff] %vm1177_vm4, %v3105_v10  ;;  %v6577_v15 = vadd.f32 %v6445_v47, %v6295_v58 }
 0x46e   : > { %v2828_v50 = vpop.f32.mrf.mxu1  ;;  %5172 = vst.msk [vmem:[#allocation2 + $0x3c8] sm:$0xff] %vm1177_vm4, %v5040_v29  ;;  %v7820_v49 = vpop.permute.xlu0 %7819 }
 0x46f   : > { %6709 = vst.msk [vmem:[#allocation2 + $0x3c0] sm:$0xff] %vm1177_vm4, %v6577_v15  ;;  %v8128_v59 = vmax.f32 %v14031_v46, %v7820_v49  ;;  %v1157_v61 = vpop.f32.mrf.mxu0  ;;  %v2974_v32 = vld [vmem:[#allocation2 + $0x3d8] sm:$0xff] }
 0x470   : > { %1302 = vst.msk [vmem:[#allocation2 + $0x3e0] sm:$0xff] %vm1177_vm4, %v1157_v61  ;;  %v3106_v6 = vadd.f32 %v2974_v32, %v2828_v50  ;;  %v7836_v18 = vpop.permute.xlu2 %7835  ;;  %v4762_v40 = vpop.f32.mrf.mxu2  ;;  %7215 = vrot.lane.b32.xlu1 %v14357_v31, %s10397_s26 }
 0x471   : > { %v8264_v34 = vadd.f32 %v14038_v53, %v8128_v59  ;;  %v14363_v58 = vld [vmem:[#allocation2 + $0x3b8] sm:$0xff]  ;;  %v8136_v25 = vmax.f32 %v14138_v36, %v7836_v18 }
 0x472   : > { %7223 = vrot.lane.b32.xlu2 %v14363_v58, %s10397_s26  ;;  %3238 = vst.msk [vmem:[#allocation2 + $0x3d8] sm:$0xff] %vm1177_vm4, %v3106_v6  ;;  %v14399_v6 = vld [vmem:[#allocation2 + $0x3a8] sm:$0xff] }
 0x473   : > { %v8396_v46 = vmax.f32 %v8264_v34, 0.0  ;;  %v8272_v26 = vadd.f32 %v14038_v53, %v8136_v25 }
 0x474   : > { %v4909_v16 = vld [vmem:[#allocation2 + $0x3d0] sm:$0xff]  ;;  %v6302_v33 = vpop.f32.mrf.mxu3 }
 0x475   : > { %v8528_v28 = vpack.c.bf16 %v8396_v46, %v8396_v46  ;;  %v8404_v4 = vmax.f32 %v8272_v26, 0.0  ;;  %v5041_v48 = vadd.f32 %v4909_v16, %v4762_v40  ;;  %v6446_v56 = vld [vmem:[#allocation2 + $0x3c8] sm:$0xff]  ;;  %v7822_v57 = vpop.permute.xlu1 %7821 }
 0x476   : > { %v2831_v7 = vpop.f32.mrf.mxu1  ;;  %v6578_v21 = vadd.f32 %v6446_v56, %v6297_v11  ;;  %v8129_v36 = vmax.f32 %v14066_v5, %v7822_v57  ;;  %v7190_v41 = vpop.permute.xlu0 %7189 }
 0x477   : > { %8661 = vst.msk [vmem:[%s11306_s6 + $0x15c] sm:$0xf] %vm8573_vm5, %v8528_v28  ;;  %v8536_v9 = vpack.c.bf16 %v8404_v4, %v8404_v4  ;;  %v14374_v30 = vmax.f32 %v14075_v27, %v7190_v41  ;;  %v1159_v45 = vpop.f32.mrf.mxu0  ;;  %v2975_v51 = vld [vmem:[#allocation2 + $0x3e0] sm:$0xff] }
 0x478   : > { %5173 = vst.msk [vmem:[#allocation2 + $0x3d0] sm:$0xff] %vm1177_vm4, %v5041_v48  ;;  %v8265_v10 = vadd.f32 %v14038_v53, %v8129_v36  ;;  %v3107_v11 = vadd.f32 %v2975_v51, %v2831_v7  ;;  %v4764_v5 = vpop.f32.mrf.mxu2  ;;  %v14407_v48 = vld [vmem:[#allocation2 + $0x3b0] sm:$0xff] }
 0x479   : > { %8669 = vst.msk [vmem:[%s11306_s6 + $0x17c] sm:$0xf] %vm8573_vm5, %v8536_v9  ;;  %v4910_v63 = vld [vmem:[#allocation2 + $0x3d8] sm:$0xff]  ;;  %7849 = vrot.lane.b32.xlu0 %v14374_v30, %s10398_s27 }
 0x47a   : > { %6710 = vst.msk [vmem:[#allocation2 + $0x3c8] sm:$0xff] %vm1177_vm4, %v6578_v21  ;;  %v8397_v27 = vmax.f32 %v8265_v10, 0.0  ;;  %7859 = vrot.lane.b32.xlu2 %v14377_v20, %s10398_s27  ;;  %v5042_v0 = vadd.f32 %v4910_v63, %v4764_v5 }
 0x47b   : > { %1303 = vst.msk [vmem:[#allocation2 + $0x3e8] sm:$0xff] %vm1177_vm4, %v1159_v45 }
 0x47c   : > { %v8529_v14 = vpack.c.bf16 %v8397_v27, %v8397_v27  ;;  %3239 = vst.msk [vmem:[#allocation2 + $0x3e0] sm:$0xff] %vm1177_vm4, %v3107_v11  ;;  %v6305_v50 = vpop.f32.mrf.mxu3  ;;  %v14423_v27 = vld [vmem:[%s14785_s2] ss:$0 sm:$0xff] }
 0x47d   : > { %5174 = vst.msk [vmem:[#allocation2 + $0x3d8] sm:$0xff] %vm1177_vm4, %v5042_v0  ;;  %v7192_v29 = vpop.permute.xlu1 %7191 }
 0x47e   : > { %v2833_v47 = vpop.f32.mrf.mxu1  ;;  %8662 = vst.msk [vmem:[%s11306_s6 + $0x160] sm:$0xf] %vm8573_vm5, %v8529_v14  ;;  %v14394_v15 = vmax.f32 %v14099_v23, %v7192_v29 }
 0x47f   : > { %v6447_v49 = vld [vmem:[#allocation2 + $0x3d0] sm:$0xff]  ;;  %v1162_v59 = vpop.f32.mrf.mxu0 }
 0x480   : > { %v6579_v61 = vadd.f32 %v6447_v49, %v6300_v62  ;;  %1304 = vst.msk [vmem:[#allocation2 + $0x3f0] sm:$0xff] %vm1177_vm4, %v1162_v59  ;;  %v4767_v32 = vpop.f32.mrf.mxu2  ;;  %7851 = vrot.lane.b32.xlu1 %v14394_v15, %s10398_s27 }
 0x481   : > { %v7206_v18 = vpop.permute.xlu2 %7205  ;;  %7219 = vrot.lane.b32.xlu0 %v14399_v6, %s10397_s26 }
 0x482   : > { %6711 = vst.msk [vmem:[#allocation2 + $0x3d0] sm:$0xff] %vm1177_vm4, %v6579_v61  ;;  %v2976_v23 = vld [vmem:[#allocation2 + $0x3e8] sm:$0xff] }
 0x483   : > { %v3108_v40 = vadd.f32 %v2976_v23, %v2833_v47  ;;  %v4911_v34 = vld [vmem:[#allocation2 + $0x3e0] sm:$0xff] }
 0x484   : > { %v5043_v25 = vadd.f32 %v4911_v34, %v4767_v32  ;;  %v6448_v46 = vld [vmem:[#allocation2 + $0x3d8] sm:$0xff]  ;;  %v6307_v16 = vpop.f32.mrf.mxu3 }
 0x485   : > { %3240 = vst.msk [vmem:[#allocation2 + $0x3e8] sm:$0xff] %vm1177_vm4, %v3108_v40  ;;  %v6580_v62 = vadd.f32 %v6448_v46, %v6302_v33 }
 0x486   : > { %v2836_v26 = vpop.f32.mrf.mxu1  ;;  %5175 = vst.msk [vmem:[#allocation2 + $0x3e0] sm:$0xff] %vm1177_vm4, %v5043_v25 }
 0x487   : > { %6712 = vst.msk [vmem:[#allocation2 + $0x3d8] sm:$0xff] %vm1177_vm4, %v6580_v62  ;;  %v1164_v28 = vpop.f32.mrf.mxu0  ;;  %v2977_v4 = vld [vmem:[#allocation2 + $0x3f0] sm:$0xff] }
 0x488   : > { %1305 = vst.msk [vmem:[#allocation2 + $0x3f8] sm:$0xff] %vm1177_vm4, %v1164_v28  ;;  %v3109_v56 = vadd.f32 %v2977_v4, %v2836_v26  ;;  %v4769_v57 = vpop.f32.mrf.mxu2  ;;  %7221 = vrot.lane.b32.xlu1 %v14407_v48, %s10397_s26 }
 0x489   : > { %v14412_v7 = vld [vmem:[#allocation2 + $0x3d0] sm:$0xff]  ;;  %v7842_v21 = vpop.permute.xlu2 %7841 }
 0x48a   : > { %7229 = vrot.lane.b32.xlu2 %v14412_v7, %s10397_s26  ;;  %3241 = vst.msk [vmem:[#allocation2 + $0x3f0] sm:$0xff] %vm1177_vm4, %v3109_v56  ;;  %v8139_v36 = vmax.f32 %v14221_v22, %v7842_v21 }
 0x48b   : > { %v7826_v41 = vpop.permute.xlu0 %7825 }
 0x48c   : > { %v8275_v33 = vadd.f32 %v14038_v53, %v8139_v36  ;;  %v4912_v9 = vld [vmem:[#allocation2 + $0x3e8] sm:$0xff]  ;;  %v8131_v45 = vmax.f32 %v14153_v13, %v7826_v41  ;;  %v6310_v22 = vpop.f32.mrf.mxu3  ;;  %v14428_v13 = vmax.f32 %v14198_v35, %v7206_v18 }
 0x48d   : > { %v5044_v51 = vadd.f32 %v4912_v9, %v4769_v57  ;;  %v6449_v10 = vld [vmem:[#allocation2 + $0x3e0] sm:$0xff] }
 0x48e   : > { %v2838_v11 = vpop.f32.mrf.mxu1  ;;  %v8407_v5 = vmax.f32 %v8275_v33, 0.0  ;;  %v6581_v63 = vadd.f32 %v6449_v10, %v6305_v50  ;;  %v8267_v0 = vadd.f32 %v14423_v27, %v8131_v45 }
 0x48f   : > { %5176 = vst.msk [vmem:[#allocation2 + $0x3e8] sm:$0xff] %vm1177_vm4, %v5044_v51  ;;  %v1167_v53 = vpop.f32.mrf.mxu0  ;;  %v2978_v14 = vld [vmem:[#allocation2 + $0x3f8] sm:$0xff]  ;;  %v14458_v51 = vld [vmem:[#allocation2 + $0x3c0] sm:$0xff] }
 0x490   : > { %v8539_v29 = vpack.c.bf16 %v8407_v5, %v8407_v5  ;;  %6713 = vst.msk [vmem:[#allocation2 + $0x3e0] sm:$0xff] %vm1177_vm4, %v6581_v63  ;;  %v8399_v47 = vmax.f32 %v8267_v0, 0.0  ;;  %v3110_v50 = vadd.f32 %v2978_v14, %v2838_v11  ;;  %v4772_v49 = vpop.f32.mrf.mxu2 }
 0x491   : > { %1306 = vst.msk [vmem:[#allocation2 + $0x400] sm:$0xff] %vm1177_vm4, %v1167_v53  ;;  %v4913_v59 = vld [vmem:[#allocation2 + $0x3f0] sm:$0xff] }
 0x492   : > { %8672 = vst.msk [vmem:[%s11306_s6 + $0x188] sm:$0xf] %vm8573_vm5, %v8539_v29  ;;  %v8531_v61 = vpack.c.bf16 %v8399_v47, %v8399_v47  ;;  %7865 = vrot.lane.b32.xlu2 %v14428_v13, %s10398_s27  ;;  %v5045_v32 = vadd.f32 %v4913_v59, %v4772_v49  ;;  %v7828_v23 = vpop.permute.xlu1 %7827 }
 0x493   : > { %3242 = vst.msk [vmem:[#allocation2 + $0x3f8] sm:$0xff] %vm1177_vm4, %v3110_v50  ;;  %v8132_v35 = vmax.f32 %v14178_v44, %v7828_v23  ;;  %v7196_v18 = vpop.permute.xlu0 %7195 }
 0x494   : > { %8664 = vst.msk [vmem:[%s11306_s6 + $0x168] sm:$0xf] %vm8573_vm5, %v8531_v61  ;;  %v14441_v40 = vmax.f32 %v14186_v24, %v7196_v18  ;;  %v6312_v56 = vpop.f32.mrf.mxu3  ;;  %v14471_v61 = vld [vmem:[#allocation2 + $0x3c8] sm:$0xff] }
 0x495   : > { %5177 = vst.msk [vmem:[#allocation2 + $0x3f0] sm:$0xff] %vm1177_vm4, %v5045_v32  ;;  %v8268_v34 = vadd.f32 %v14423_v27, %v8132_v35 }
 0x496   : > { %v2841_v25 = vpop.f32.mrf.mxu1  ;;  %v6450_v46 = vld [vmem:[#allocation2 + $0x3e8] sm:$0xff]  ;;  %7855 = vrot.lane.b32.xlu0 %v14441_v40, %s10398_s27 }
 0x497   : > { %v6582_v62 = vadd.f32 %v6450_v46, %v6307_v16  ;;  %v8400_v26 = vmax.f32 %v8268_v34, 0.0  ;;  %v1169_v28 = vpop.f32.mrf.mxu0 }
 0x498   : > { %1307 = vst.msk [vmem:[#allocation2 + $0x408] sm:$0xff] %vm1177_vm4, %v1169_v28  ;;  %v2979_v44 = vld [vmem:[#allocation2 + $0x400] sm:$0xff]  ;;  %v4774_v4 = vpop.f32.mrf.mxu2 }
 0x499   : > { %6714 = vst.msk [vmem:[#allocation2 + $0x3e8] sm:$0xff] %vm1177_vm4, %v6582_v62  ;;  %v8532_v24 = vpack.c.bf16 %v8400_v26, %v8400_v26  ;;  %v3111_v57 = vadd.f32 %v2979_v44, %v2841_v25 }
 0x49a   : > { %v4914_v21 = vld [vmem:[#allocation2 + $0x3f8] sm:$0xff]  ;;  %v7198_v36 = vpop.permute.xlu1 %7197 }
 0x49b   : > { %8665 = vst.msk [vmem:[%s11306_s6 + $0x16c] sm:$0xf] %vm8573_vm5, %v8532_v24  ;;  %v7212_v41 = vpop.permute.xlu2 %7211  ;;  %v5046_v33 = vadd.f32 %v4914_v21, %v4774_v4  ;;  %v14452_v9 = vmax.f32 %v14202_v1, %v7198_v36 }
 0x49c   : > { %3243 = vst.msk [vmem:[#allocation2 + $0x400] sm:$0xff] %vm1177_vm4, %v3111_v57  ;;  %v6451_v16 = vld [vmem:[#allocation2 + $0x3f0] sm:$0xff]  ;;  %v6315_v53 = vpop.f32.mrf.mxu3 }
 0x49d   : > { %5178 = vst.msk [vmem:[#allocation2 + $0x3f8] sm:$0xff] %vm1177_vm4, %v5046_v33  ;;  %v6583_v45 = vadd.f32 %v6451_v16, %v6310_v22  ;;  %7857 = vrot.lane.b32.xlu1 %v14452_v9, %s10398_s27 }
 0x49e   : > { %v2843_v10 = vpop.f32.mrf.mxu1  ;;  %7225 = vrot.lane.b32.xlu0 %v14458_v51, %s10397_s26 }
 0x49f   : > { %6715 = vst.msk [vmem:[#allocation2 + $0x3f0] sm:$0xff] %vm1177_vm4, %v6583_v45  ;;  %v1172_v11 = vpop.f32.mrf.mxu0  ;;  %v2980_v1 = vld [vmem:[#allocation2 + $0x408] sm:$0xff] }
 0x4a0   : > { %v14463_v5 = vld [vmem:[#allocation2 + $0x3e8] sm:$0xff]  ;;  %1308 = vst.msk [vmem:[#allocation2 + $0x410] sm:$0xff] %vm1177_vm4, %v1172_v11  ;;  %v3112_v63 = vadd.f32 %v2980_v1, %v2843_v10  ;;  %v4777_v0 = vpop.f32.mrf.mxu2 }
 0x4a1   : > { %7235 = vrot.lane.b32.xlu2 %v14463_v5, %s10397_s26 }
 0x4a2   : > { %3244 = vst.msk [vmem:[#allocation2 + $0x408] sm:$0xff] %vm1177_vm4, %v3112_v63  ;;  %v7832_v22 = vpop.permute.xlu0 %7831 }
 0x4a3   : > { %v7848_v14 = vpop.permute.xlu2 %7847  ;;  %v4915_v29 = vld [vmem:[#allocation2 + $0x400] sm:$0xff]  ;;  %v8134_v47 = vmax.f32 %v14226_v55, %v7832_v22 }
 0x4a4   : > { %v8142_v50 = vmax.f32 %v14270_v17, %v7848_v14  ;;  %v5047_v49 = vadd.f32 %v4915_v29, %v4777_v0  ;;  %v6452_v59 = vld [vmem:[#allocation2 + $0x3f8] sm:$0xff]  ;;  %v14480_v17 = vmax.f32 %v14259_v19, %v7212_v41  ;;  %v6317_v33 = vpop.f32.mrf.mxu3 }
 0x4a5   : > { %v6584_v32 = vadd.f32 %v6452_v59, %v6312_v56  ;;  %v8270_v23 = vadd.f32 %v14423_v27, %v8134_v47  ;;  %v7834_v35 = vpop.permute.xlu1 %7833  ;;  %7227 = vrot.lane.b32.xlu1 %v14471_v61, %s10397_s26 }
 0x4a6   : > { %v2846_v18 = vpop.f32.mrf.mxu1  ;;  %v8278_v34 = vadd.f32 %v14423_v27, %v8142_v50  ;;  %5179 = vst.msk [vmem:[#allocation2 + $0x400] sm:$0xff] %vm1177_vm4, %v5047_v49  ;;  %v8135_v55 = vmax.f32 %v14236_v52, %v7834_v35  ;;  %v14515_v49 = vld [vmem:[#allocation2 + $0x3e0] sm:$0xff] }
 0x4a7   : > { %6716 = vst.msk [vmem:[#allocation2 + $0x3f8] sm:$0xff] %vm1177_vm4, %v6584_v32  ;;  %v8402_v25 = vmax.f32 %v8270_v23, 0.0  ;;  %v1174_v46 = vpop.f32.mrf.mxu0  ;;  %v2981_v62 = vld [vmem:[#allocation2 + $0x410] sm:$0xff] }
 0x4a8   : > { %v8410_v26 = vmax.f32 %v8278_v34, 0.0  ;;  %v8271_v28 = vadd.f32 %v14423_v27, %v8135_v55  ;;  %1309 = vst.msk [vmem:[#allocation2 + $0x418] sm:$0xff] %vm1177_vm4, %v1174_v46  ;;  %v3113_v44 = vadd.f32 %v2981_v62, %v2846_v18  ;;  %v4779_v4 = vpop.f32.mrf.mxu2 }
 0x4a9   : > { %v8534_v56 = vpack.c.bf16 %v8402_v25, %v8402_v25  ;;  %7871 = vrot.lane.b32.xlu2 %v14480_v17, %s10398_s27  ;;  %v4916_v52 = vld [vmem:[#allocation2 + $0x408] sm:$0xff] }
 0x4aa   : > { %v8542_v19 = vpack.c.bf16 %v8410_v26, %v8410_v26  ;;  %v8403_v24 = vmax.f32 %v8271_v28, 0.0  ;;  %3245 = vst.msk [vmem:[#allocation2 + $0x410] sm:$0xff] %vm1177_vm4, %v3113_v44  ;;  %v5048_v57 = vadd.f32 %v4916_v52, %v4779_v4  ;;  %v7202_v21 = vpop.permute.xlu0 %7201 }
 0x4ab   : > { %8667 = vst.msk [vmem:[%s11306_s6 + $0x174] sm:$0xf] %vm8573_vm5, %v8534_v56  ;;  %v14491_v36 = vmax.f32 %v14245_v2, %v7202_v21 }
 0x4ac   : > { %8675 = vst.msk [vmem:[%s11306_s6 + $0x194] sm:$0xf] %vm8573_vm5, %v8542_v19  ;;  %v8535_v41 = vpack.c.bf16 %v8403_v24, %v8403_v24  ;;  %v6320_v59 = vpop.f32.mrf.mxu3 }
 0x4ad   : > { %5180 = vst.msk [vmem:[#allocation2 + $0x408] sm:$0xff] %vm1177_vm4, %v5048_v57  ;;  %v6453_v16 = vld [vmem:[#allocation2 + $0x400] sm:$0xff]  ;;  %v7204_v45 = vpop.permute.xlu1 %7203  ;;  %7861 = vrot.lane.b32.xlu0 %v14491_v36, %s10398_s27 }
 0x4ae   : > { %v2848_v10 = vpop.f32.mrf.mxu1  ;;  %8668 = vst.msk [vmem:[%s11306_s6 + $0x178] sm:$0xf] %vm8573_vm5, %v8535_v41  ;;  %v6585_v11 = vadd.f32 %v6453_v16, %v6315_v53  ;;  %v14501_v1 = vmax.f32 %v14251_v60, %v7204_v45  ;;  %v14508_v53 = vld [vmem:[#allocation2 + $0x3d8] sm:$0xff] }
 0x4af   : > { %v2982_v2 = vld [vmem:[#allocation2 + $0x418] sm:$0xff] }
 0x4b0   : > { %6717 = vst.msk [vmem:[#allocation2 + $0x400] sm:$0xff] %vm1177_vm4, %v6585_v11  ;;  %v3114_v63 = vadd.f32 %v2982_v2, %v2848_v10  ;;  %v4782_v0 = vpop.f32.mrf.mxu2  ;;  %7863 = vrot.lane.b32.xlu1 %v14501_v1, %s10398_s27 }
 0x4b1   : > { %v4917_v22 = vld [vmem:[#allocation2 + $0x410] sm:$0xff] }
 0x4b2   : > { %3246 = vst.msk [vmem:[#allocation2 + $0x418] sm:$0xff] %vm1177_vm4, %v3114_v63  ;;  %v5049_v14 = vadd.f32 %v4917_v22, %v4782_v0 }
 0x4b4   : > { %v7218_v29 = vpop.permute.xlu2 %7217  ;;  %5181 = vst.msk [vmem:[#allocation2 + $0x410] sm:$0xff] %vm1177_vm4, %v5049_v14  ;;  %v6454_v47 = vld [vmem:[#allocation2 + $0x408] sm:$0xff]  ;;  %v6322_v56 = vpop.f32.mrf.mxu3  ;;  %v14558_v14 = vld [vmem:[#allocation2 + $0x3f8] sm:$0xff] }
 0x4b5   : > { %v6586_v60 = vadd.f32 %v6454_v47, %v6317_v33  ;;  %7231 = vrot.lane.b32.xlu0 %v14508_v53, %s10397_s26  ;;  %v14555_v0 = vmax.f32 %v14312_v3, %v7218_v29 }
 0x4b7   : > { %6718 = vst.msk [vmem:[#allocation2 + $0x408] sm:$0xff] %vm1177_vm4, %v6586_v60  ;;  %v14513_v50 = vld [vmem:[#allocation2 + $0x400] sm:$0xff] }
 0x4b8   : > { %7241 = vrot.lane.b32.xlu2 %v14513_v50, %s10397_s26  ;;  %v4784_v32 = vpop.f32.mrf.mxu2  ;;  %7233 = vrot.lane.b32.xlu1 %v14515_v49, %s10397_s26 }
 0x4b9   : > { %v4918_v23 = vld [vmem:[#allocation2 + $0x418] sm:$0xff] }
 0x4ba   : > { %v5050_v35 = vadd.f32 %v4918_v23, %v4784_v32 }
 0x4bb   : > { %v6455_v18 = vld [vmem:[#allocation2 + $0x410] sm:$0xff]  ;;  %v7838_v34 = vpop.permute.xlu0 %7837 }
 0x4bc   : > { %v7854_v55 = vpop.permute.xlu2 %7853  ;;  %5182 = vst.msk [vmem:[#allocation2 + $0x418] sm:$0xff] %vm1177_vm4, %v5050_v35  ;;  %v6587_v25 = vadd.f32 %v6455_v18, %v6320_v59  ;;  %v8137_v46 = vmax.f32 %v14275_v8, %v7838_v34 }
 0x4bd   : > { %v8145_v62 = vmax.f32 %v14326_v54, %v7854_v55 }
 0x4be   : > { %6719 = vst.msk [vmem:[#allocation2 + $0x410] sm:$0xff] %vm1177_vm4, %v6587_v25  ;;  %v8273_v26 = vadd.f32 %v14423_v27, %v8137_v46  ;;  %v14563_v60 = vld [vmem:[#allocation2 + $0x408] sm:$0xff] }
 0x4bf   : > { %v8281_v28 = vadd.f32 %v14423_v27, %v8145_v62 }
 0x4c0   : > { %v8405_v44 = vmax.f32 %v8273_v26, 0.0 }
 0x4c1   : > { %v8413_v4 = vmax.f32 %v8281_v28, 0.0 }
 0x4c2   : > { %v8537_v52 = vpack.c.bf16 %v8405_v44, %v8405_v44  ;;  %v7840_v19 = vpop.permute.xlu1 %7839 }
 0x4c3   : > { %v8545_v24 = vpack.c.bf16 %v8413_v4, %v8413_v4  ;;  %v6456_v57 = vld [vmem:[#allocation2 + $0x418] sm:$0xff]  ;;  %v8138_v21 = vmax.f32 %v14292_v39, %v7840_v19  ;;  %v7208_v8 = vpop.permute.xlu0 %7207 }
 0x4c4   : > { %8670 = vst.msk [vmem:[%s11306_s6 + $0x180] sm:$0xf] %vm8573_vm5, %v8537_v52  ;;  %v6588_v54 = vadd.f32 %v6456_v57, %v6322_v56  ;;  %v14531_v41 = vmax.f32 %v14297_v38, %v7208_v8  ;;  %v14546_v38 = vld [vmem:[#allocation2 + $0x3f0] sm:$0xff] }
 0x4c5   : > { %8678 = vst.msk [vmem:[%s11306_s6 + $0x1a0] sm:$0xf] %vm8573_vm5, %v8545_v24  ;;  %v8274_v33 = vadd.f32 %v14423_v27, %v8138_v21  ;;  %v14571_v23 = vld [vmem:[#allocation2 + $0x410] sm:$0xff] }
 0x4c6   : > { %6720 = vst.msk [vmem:[#allocation2 + $0x418] sm:$0xff] %vm1177_vm4, %v6588_v54  ;;  %7867 = vrot.lane.b32.xlu0 %v14531_v41, %s10398_s27 }
 0x4c7   : > { %v8406_v16 = vmax.f32 %v8274_v33, 0.0 }
 0x4c9   : > { %v8538_v45 = vpack.c.bf16 %v8406_v16, %v8406_v16 }
 0x4ca   : > { %v7210_v10 = vpop.permute.xlu1 %7209 }
 0x4cb   : > { %8671 = vst.msk [vmem:[%s11306_s6 + $0x184] sm:$0xf] %vm8573_vm5, %v8538_v45  ;;  %v14542_v39 = vmax.f32 %v14306_v43, %v7210_v10 }
 0x4cc   : > { %v7224_v11 = vpop.permute.xlu2 %7223 }
 0x4cd   : > { %7869 = vrot.lane.b32.xlu1 %v14542_v39, %s10398_s27  ;;  %v14548_v2 = vld [vmem:[#allocation2 + $0x418] sm:$0xff]  ;;  %v14575_v55 = vmax.f32 %v14363_v58, %v7224_v11 }
 0x4ce   : > { %7237 = vrot.lane.b32.xlu0 %v14546_v38, %s10397_s26  ;;  %7247 = vrot.lane.b32.xlu2 %v14548_v2, %s10397_s26 }
 0x4d3   : > { %v7844_v63 = vpop.permute.xlu0 %7843 }
 0x4d4   : > { %v7860_v43 = vpop.permute.xlu2 %7859  ;;  %v8140_v22 = vmax.f32 %v14323_v42, %v7844_v63 }
 0x4d5   : > { %v8148_v47 = vmax.f32 %v14377_v20, %v7860_v43  ;;  %7239 = vrot.lane.b32.xlu1 %v14558_v14, %s10397_s26 }
 0x4d6   : > { %v8276_v59 = vadd.f32 %v14423_v27, %v8140_v22  ;;  %7243 = vrot.lane.b32.xlu0 %v14563_v60, %s10397_s26  ;;  %7877 = vrot.lane.b32.xlu2 %v14555_v0, %s10398_s27 }
 0x4d7   : > { %v8284_v3 = vadd.f32 %v14423_v27, %v8148_v47 }
 0x4d8   : > { %v8408_v42 = vmax.f32 %v8276_v59, 0.0 }
 0x4d9   : > { %v8416_v29 = vmax.f32 %v8284_v3, 0.0 }
 0x4da   : > { %v8540_v20 = vpack.c.bf16 %v8408_v42, %v8408_v42  ;;  %v7846_v32 = vpop.permute.xlu1 %7845 }
 0x4db   : > { %v8548_v35 = vpack.c.bf16 %v8416_v29, %v8416_v29  ;;  %v8141_v18 = vmax.f32 %v14343_v12, %v7846_v32  ;;  %v7214_v34 = vpop.permute.xlu0 %7213 }
 0x4dc   : > { %8673 = vst.msk [vmem:[%s11306_s6 + $0x18c] sm:$0xf] %vm8573_vm5, %v8540_v20  ;;  %v14580_v25 = vmax.f32 %v14348_v37, %v7214_v34 }
 0x4dd   : > { %8681 = vst.msk [vmem:[%s11306_s6 + $0x1ac] sm:$0xf] %vm8573_vm5, %v8548_v35  ;;  %v8277_v46 = vadd.f32 %v14423_v27, %v8141_v18  ;;  %7245 = vrot.lane.b32.xlu1 %v14571_v23, %s10397_s26 }
 0x4de   : > { %7873 = vrot.lane.b32.xlu0 %v14580_v25, %s10398_s27  ;;  %7883 = vrot.lane.b32.xlu2 %v14575_v55, %s10398_s27 }
 0x4df   : > { %v8409_v12 = vmax.f32 %v8277_v46, 0.0 }
 0x4e1   : > { %v8541_v58 = vpack.c.bf16 %v8409_v12, %v8409_v12 }
 0x4e2   : > { %v7216_v62 = vpop.permute.xlu1 %7215 }
 0x4e3   : > { %8674 = vst.msk [vmem:[%s11306_s6 + $0x190] sm:$0xf] %vm8573_vm5, %v8541_v58  ;;  %v14594_v37 = vmax.f32 %v14357_v31, %v7216_v62 }
 0x4e4   : > { %v7230_v26 = vpop.permute.xlu2 %7229 }
 0x4e5   : > { %v14597_v28 = vmax.f32 %v14412_v7, %v7230_v26  ;;  %7875 = vrot.lane.b32.xlu1 %v14594_v37, %s10398_s27 }
 0x4e7   : > { %7889 = vrot.lane.b32.xlu2 %v14597_v28, %s10398_s27 }
 0x4eb   : > { %v7850_v44 = vpop.permute.xlu0 %7849 }
 0x4ec   : > { %v7866_v4 = vpop.permute.xlu2 %7865  ;;  %v8143_v56 = vmax.f32 %v14374_v30, %v7850_v44 }
 0x4ed   : > { %v8151_v52 = vmax.f32 %v14428_v13, %v7866_v4 }
 0x4ee   : > { %v8279_v31 = vadd.f32 %v14423_v27, %v8143_v56 }
 0x4ef   : > { %v8287_v19 = vadd.f32 %v14423_v27, %v8151_v52 }
 0x4f0   : > { %v8411_v7 = vmax.f32 %v8279_v31, 0.0 }
 0x4f1   : > { %v8419_v24 = vmax.f32 %v8287_v19, 0.0 }
 0x4f2   : > { %v8543_v57 = vpack.c.bf16 %v8411_v7, %v8411_v7  ;;  %v7852_v21 = vpop.permute.xlu1 %7851 }
 0x4f3   : > { %v8551_v8 = vpack.c.bf16 %v8419_v24, %v8419_v24  ;;  %v8144_v54 = vmax.f32 %v14394_v15, %v7852_v21  ;;  %v7220_v33 = vpop.permute.xlu0 %7219 }
 0x4f4   : > { %8676 = vst.msk [vmem:[%s11306_s6 + $0x198] sm:$0xf] %vm8573_vm5, %v8543_v57  ;;  %v14611_v16 = vmax.f32 %v14399_v6, %v7220_v33 }
 0x4f5   : > { %8684 = vst.msk [vmem:[%s11306_s6 + $0x1b8] sm:$0xf] %vm8573_vm5, %v8551_v8  ;;  %v8280_v30 = vadd.f32 %v14423_v27, %v8144_v54 }
 0x4f6   : > { %7879 = vrot.lane.b32.xlu0 %v14611_v16, %s10398_s27 }
 0x4f7   : > { %v8412_v13 = vmax.f32 %v8280_v30, 0.0 }
 0x4f9   : > { %v8544_v45 = vpack.c.bf16 %v8412_v13, %v8412_v13 }
 0x4fa   : > { %v7222_v10 = vpop.permute.xlu1 %7221 }
 0x4fb   : > { %8677 = vst.msk [vmem:[%s11306_s6 + $0x19c] sm:$0xf] %vm8573_vm5, %v8544_v45  ;;  %v7236_v15 = vpop.permute.xlu2 %7235  ;;  %v14621_v11 = vmax.f32 %v14407_v48, %v7222_v10 }
 0x4fc   : > { %v14624_v6 = vmax.f32 %v14463_v5, %v7236_v15 }
 0x4fd   : > { %7881 = vrot.lane.b32.xlu1 %v14621_v11, %s10398_s27 }
 0x4fe   : > { %7895 = vrot.lane.b32.xlu2 %v14624_v6, %s10398_s27 }
 0x503   : > { %v7872_v63 = vpop.permute.xlu2 %7871 }
 0x504   : > { %v8154_v43 = vmax.f32 %v14480_v17, %v7872_v63 }
 0x506   : > { %v8290_v22 = vadd.f32 %v14423_v27, %v8154_v43 }
 0x508   : > { %v8422_v47 = vmax.f32 %v8290_v22, 0.0  ;;  %v7856_v59 = vpop.permute.xlu0 %7855 }
 0x509   : > { %v8146_v48 = vmax.f32 %v14441_v40, %v7856_v59 }
 0x50a   : > { %v8554_v3 = vpack.c.bf16 %v8422_v47, %v8422_v47 }
 0x50b   : > { %v8282_v5 = vadd.f32 %v14423_v27, %v8146_v48 }
 0x50c   : > { %8687 = vst.msk [vmem:[%s11306_s6 + $0x1c4] sm:$0xf] %vm8573_vm5, %v8554_v3 }
 0x50d   : > { %v8414_v42 = vmax.f32 %v8282_v5, 0.0 }
 0x50f   : > { %v8546_v29 = vpack.c.bf16 %v8414_v42, %v8414_v42  ;;  %v7858_v20 = vpop.permute.xlu1 %7857 }
 0x510   : > { %v8147_v32 = vmax.f32 %v14452_v9, %v7858_v20  ;;  %v7226_v35 = vpop.permute.xlu0 %7225 }
 0x511   : > { %8679 = vst.msk [vmem:[%s11306_s6 + $0x1a4] sm:$0xf] %vm8573_vm5, %v8546_v29  ;;  %v14640_v17 = vmax.f32 %v14458_v51, %v7226_v35 }
 0x512   : > { %v8283_v18 = vadd.f32 %v14423_v27, %v8147_v32  ;;  %v7242_v40 = vpop.permute.xlu2 %7241 }
 0x513   : > { %v14644_v34 = vmax.f32 %v14513_v50, %v7242_v40  ;;  %7885 = vrot.lane.b32.xlu0 %v14640_v17, %s10398_s27 }
 0x514   : > { %v8415_v46 = vmax.f32 %v8283_v18, 0.0 }
 0x515   : > { %7901 = vrot.lane.b32.xlu2 %v14644_v34, %s10398_s27 }
 0x516   : > { %v8547_v9 = vpack.c.bf16 %v8415_v46, %v8415_v46 }
 0x517   : > { %v7228_v12 = vpop.permute.xlu1 %7227 }
 0x518   : > { %8680 = vst.msk [vmem:[%s11306_s6 + $0x1a8] sm:$0xf] %vm8573_vm5, %v8547_v9  ;;  %v14653_v51 = vmax.f32 %v14471_v61, %v7228_v12 }
 0x51a   : > { %7887 = vrot.lane.b32.xlu1 %v14653_v51, %s10398_s27 }
 0x51f   : > { %v7862_v50 = vpop.permute.xlu0 %7861 }
 0x520   : > { %v8149_v58 = vmax.f32 %v14491_v36, %v7862_v50 }
 0x522   : > { %v8285_v62 = vadd.f32 %v14423_v27, %v8149_v58  ;;  %v7864_v26 = vpop.permute.xlu1 %7863 }
 0x523   : > { %v8150_v44 = vmax.f32 %v14501_v1, %v7864_v26 }
 0x524   : > { %v8417_v4 = vmax.f32 %v8285_v62, 0.0 }
 0x525   : > { %v8286_v56 = vadd.f32 %v14423_v27, %v8150_v44 }
 0x526   : > { %v8549_v52 = vpack.c.bf16 %v8417_v4, %v8417_v4 }
 0x527   : > { %v8418_v31 = vmax.f32 %v8286_v56, 0.0  ;;  %v7232_v19 = vpop.permute.xlu0 %7231 }
 0x528   : > { %8682 = vst.msk [vmem:[%s11306_s6 + $0x1b0] sm:$0xf] %vm8573_vm5, %v8549_v52  ;;  %v14664_v61 = vmax.f32 %v14508_v53, %v7232_v19  ;;  %v7248_v7 = vpop.permute.xlu2 %7247 }
 0x529   : > { %v8550_v36 = vpack.c.bf16 %v8418_v31, %v8418_v31  ;;  %v14667_v24 = vmax.f32 %v14548_v2, %v7248_v7 }
 0x52a   : > { %v7234_v57 = vpop.permute.xlu1 %7233  ;;  %7891 = vrot.lane.b32.xlu0 %v14664_v61, %s10398_s27 }
 0x52b   : > { %8683 = vst.msk [vmem:[%s11306_s6 + $0x1b4] sm:$0xf] %vm8573_vm5, %v8550_v36  ;;  %v14674_v1 = vmax.f32 %v14515_v49, %v7234_v57  ;;  %7907 = vrot.lane.b32.xlu2 %v14667_v24, %s10398_s27 }
 0x52d   : > { %7893 = vrot.lane.b32.xlu1 %v14674_v1, %s10398_s27 }
 0x530   : > { %v7878_v53 = vpop.permute.xlu2 %7877 }
 0x531   : > { %v8157_v21 = vmax.f32 %v14555_v0, %v7878_v53 }
 0x533   : > { %v8293_v2 = vadd.f32 %v14423_v27, %v8157_v21 }
 0x535   : > { %v8425_v8 = vmax.f32 %v8293_v2, 0.0 }
 0x537   : > { %v8557_v54 = vpack.c.bf16 %v8425_v8, %v8425_v8 }
 0x538   : > { %v7868_v33 = vpop.permute.xlu0 %7867  ;;  %v7884_v30 = vpop.permute.xlu2 %7883 }
 0x539   : > { %8690 = vst.msk [vmem:[%s11306_s6 + $0x1d0] sm:$0xf] %vm8573_vm5, %v8557_v54  ;;  %v8152_v49 = vmax.f32 %v14531_v41, %v7868_v33  ;;  %v8160_v13 = vmax.f32 %v14575_v55, %v7884_v30 }
 0x53b   : > { %v8288_v45 = vadd.f32 %v14423_v27, %v8152_v49  ;;  %v8296_v10 = vadd.f32 %v14423_v27, %v8160_v13 }
 0x53d   : > { %v8420_v15 = vmax.f32 %v8288_v45, 0.0  ;;  %v8428_v0 = vmax.f32 %v8296_v10, 0.0 }
 0x53f   : > { %v8552_v63 = vpack.c.bf16 %v8420_v15, %v8420_v15  ;;  %v8560_v43 = vpack.c.bf16 %v8428_v0, %v8428_v0  ;;  %v7870_v22 = vpop.permute.xlu1 %7869 }
 0x540   : > { %v8153_v47 = vmax.f32 %v14542_v39, %v7870_v22  ;;  %v7238_v59 = vpop.permute.xlu0 %7237 }
 0x541   : > { %8685 = vst.msk [vmem:[%s11306_s6 + $0x1bc] sm:$0xf] %vm8573_vm5, %v8552_v63  ;;  %v14692_v48 = vmax.f32 %v14546_v38, %v7238_v59  ;;  %v7890_v41 = vpop.permute.xlu2 %7889 }
 0x542   : > { %8693 = vst.msk [vmem:[%s11306_s6 + $0x1dc] sm:$0xf] %vm8573_vm5, %v8560_v43  ;;  %v8289_v55 = vadd.f32 %v14423_v27, %v8153_v47  ;;  %v8163_v3 = vmax.f32 %v14597_v28, %v7890_v41 }
 0x543   : > { %7897 = vrot.lane.b32.xlu0 %v14692_v48, %s10398_s27 }
 0x544   : > { %v8421_v5 = vmax.f32 %v8289_v55, 0.0  ;;  %v8299_v39 = vadd.f32 %v14423_v27, %v8163_v3 }
 0x546   : > { %v8553_v42 = vpack.c.bf16 %v8421_v5, %v8421_v5  ;;  %v8431_v29 = vmax.f32 %v8299_v39, 0.0 }
 0x547   : > { %v7240_v20 = vpop.permute.xlu1 %7239 }
 0x548   : > { %8686 = vst.msk [vmem:[%s11306_s6 + $0x1c0] sm:$0xf] %vm8573_vm5, %v8553_v42  ;;  %v8563_v38 = vpack.c.bf16 %v8431_v29, %v8431_v29  ;;  %v14704_v32 = vmax.f32 %v14558_v14, %v7240_v20  ;;  %v7244_v35 = vpop.permute.xlu0 %7243 }
 0x549   : > { %v14707_v18 = vmax.f32 %v14563_v60, %v7244_v35 }
 0x54a   : > { %8696 = vst.msk [vmem:[%s11306_s6 + $0x1e8] sm:$0xf] %vm8573_vm5, %v8563_v38  ;;  %7899 = vrot.lane.b32.xlu1 %v14704_v32, %s10398_s27 }
 0x54b   : > { %7903 = vrot.lane.b32.xlu0 %v14707_v18, %s10398_s27 }
 0x54f   : > { %v7246_v28 = vpop.permute.xlu1 %7245 }
 0x550   : > { %v7874_v40 = vpop.permute.xlu0 %7873  ;;  %v14716_v46 = vmax.f32 %v14571_v23, %v7246_v28 }
 0x551   : > { %v8155_v14 = vmax.f32 %v14580_v25, %v7874_v40 }
 0x552   : > { %7905 = vrot.lane.b32.xlu1 %v14716_v46, %s10398_s27 }
 0x553   : > { %v8291_v60 = vadd.f32 %v14423_v27, %v8155_v14 }
 0x555   : > { %v8423_v9 = vmax.f32 %v8291_v60, 0.0 }
 0x557   : > { %v8555_v12 = vpack.c.bf16 %v8423_v9, %v8423_v9  ;;  %v7876_v50 = vpop.permute.xlu1 %7875 }
 0x558   : > { %v7896_v58 = vpop.permute.xlu2 %7895  ;;  %v8156_v62 = vmax.f32 %v14594_v37, %v7876_v50 }
 0x559   : > { %8688 = vst.msk [vmem:[%s11306_s6 + $0x1c8] sm:$0xf] %vm8573_vm5, %v8555_v12  ;;  %v8166_v23 = vmax.f32 %v14624_v6, %v7896_v58 }
 0x55a   : > { %v8292_v26 = vadd.f32 %v14423_v27, %v8156_v62 }
 0x55b   : > { %v8302_v25 = vadd.f32 %v14423_v27, %v8166_v23 }
 0x55c   : > { %v8424_v44 = vmax.f32 %v8292_v26, 0.0 }
 0x55d   : > { %v8434_v4 = vmax.f32 %v8302_v25, 0.0 }
 0x55e   : > { %v8556_v56 = vpack.c.bf16 %v8424_v44, %v8424_v44 }
 0x55f   : > { %v8566_v52 = vpack.c.bf16 %v8434_v4, %v8434_v4 }
 0x560   : > { %8689 = vst.msk [vmem:[%s11306_s6 + $0x1cc] sm:$0xf] %vm8573_vm5, %v8556_v56 }
 0x561   : > { %8699 = vst.msk [vmem:[%s11306_s6 + $0x1f4] sm:$0xf] %vm8573_vm5, %v8566_v52 }
 0x568   : > { %v7880_v31 = vpop.permute.xlu0 %7879 }
 0x569   : > { %v8158_v37 = vmax.f32 %v14611_v16, %v7880_v31 }
 0x56b   : > { %v8294_v6 = vadd.f32 %v14423_v27, %v8158_v37 }
 0x56d   : > { %v8426_v19 = vmax.f32 %v8294_v6, 0.0 }
 0x56f   : > { %v8558_v7 = vpack.c.bf16 %v8426_v19, %v8426_v19  ;;  %v7902_v36 = vpop.permute.xlu2 %7901  ;;  %v7882_v57 = vpop.permute.xlu1 %7881 }
 0x570   : > { %v8169_v53 = vmax.f32 %v14644_v34, %v7902_v36  ;;  %v8159_v21 = vmax.f32 %v14621_v11, %v7882_v57 }
 0x571   : > { %8691 = vst.msk [vmem:[%s11306_s6 + $0x1d4] sm:$0xf] %vm8573_vm5, %v8558_v7 }
 0x572   : > { %v8305_v2 = vadd.f32 %v14423_v27, %v8169_v53  ;;  %v8295_v8 = vadd.f32 %v14423_v27, %v8159_v21 }
 0x574   : > { %v8437_v54 = vmax.f32 %v8305_v2, 0.0  ;;  %v8427_v33 = vmax.f32 %v8295_v8, 0.0 }
 0x576   : > { %v8569_v16 = vpack.c.bf16 %v8437_v54, %v8437_v54  ;;  %v8559_v30 = vpack.c.bf16 %v8427_v33, %v8427_v33 }
 0x578   : > { %8702 = vst.msk [vmem:[%s11306_s6 + $0x200] sm:$0xf] %vm8573_vm5, %v8569_v16 }
 0x579   : > { %8692 = vst.msk [vmem:[%s11306_s6 + $0x1d8] sm:$0xf] %vm8573_vm5, %v8559_v30 }
 0x585   : > { %v7886_v49 = vpop.permute.xlu0 %7885  ;;  %v7908_v34 = vpop.permute.xlu2 %7907 }
 0x586   : > { %v8161_v11 = vmax.f32 %v14640_v17, %v7886_v49  ;;  %v8172_v13 = vmax.f32 %v14667_v24, %v7908_v34 }
 0x588   : > { %v8297_v45 = vadd.f32 %v14423_v27, %v8161_v11  ;;  %v8308_v10 = vadd.f32 %v14423_v27, %v8172_v13 }
 0x58a   : > { %v8429_v15 = vmax.f32 %v8297_v45, 0.0  ;;  %v8440_v0 = vmax.f32 %v8308_v10, 0.0 }
 0x58c   : > { %v8561_v63 = vpack.c.bf16 %v8429_v15, %v8429_v15  ;;  %v8572_v43 = vpack.c.bf16 %v8440_v0, %v8440_v0  ;;  %v7888_v22 = vpop.permute.xlu1 %7887 }
 0x58d   : > { %v8162_v47 = vmax.f32 %v14653_v51, %v7888_v22 }
 0x58e   : > { %8694 = vst.msk [vmem:[%s11306_s6 + $0x1e0] sm:$0xf] %vm8573_vm5, %v8561_v63 }
 0x58f   : > { %8705 = vst.msk [vmem:[%s11306_s6 + $0x20c] sm:$0xf] %vm8573_vm5, %v8572_v43  ;;  %v8298_v17 = vadd.f32 %v14423_v27, %v8162_v47 }
 0x591   : > { %v8430_v24 = vmax.f32 %v8298_v17, 0.0 }
 0x593   : > { %v8562_v59 = vpack.c.bf16 %v8430_v24, %v8430_v24 }
 0x595   : > { %8695 = vst.msk [vmem:[%s11306_s6 + $0x1e4] sm:$0xf] %vm8573_vm5, %v8562_v59 }
 0x59c   : > { %v7892_v41 = vpop.permute.xlu0 %7891 }
 0x59d   : > { %v8164_v55 = vmax.f32 %v14664_v61, %v7892_v41 }
 0x59f   : > { %v8300_v3 = vadd.f32 %v14423_v27, %v8164_v55  ;;  %v7894_v5 = vpop.permute.xlu1 %7893 }
 0x5a0   : > { %v8165_v51 = vmax.f32 %v14674_v1, %v7894_v5 }
 0x5a1   : > { %v8432_v39 = vmax.f32 %v8300_v3, 0.0 }
 0x5a2   : > { %v8301_v42 = vadd.f32 %v14423_v27, %v8165_v51 }
 0x5a3   : > { %v8564_v29 = vpack.c.bf16 %v8432_v39, %v8432_v39 }
 0x5a4   : > { %v8433_v20 = vmax.f32 %v8301_v42, 0.0 }
 0x5a5   : > { %8697 = vst.msk [vmem:[%s11306_s6 + $0x1ec] sm:$0xf] %vm8573_vm5, %v8564_v29 }
 0x5a6   : > { %v8565_v38 = vpack.c.bf16 %v8433_v20, %v8433_v20 }
 0x5a8   : > { %8698 = vst.msk [vmem:[%s11306_s6 + $0x1f0] sm:$0xf] %vm8573_vm5, %v8565_v38 }
 0x5b5   : > { %v7898_v35 = vpop.permute.xlu0 %7897 }
 0x5b6   : > { %v8167_v28 = vmax.f32 %v14692_v48, %v7898_v35 }
 0x5b8   : > { %v8303_v61 = vadd.f32 %v14423_v27, %v8167_v28 }
 0x5ba   : > { %v8435_v40 = vmax.f32 %v8303_v61, 0.0 }
 0x5bc   : > { %v8567_v1 = vpack.c.bf16 %v8435_v40, %v8435_v40  ;;  %v7900_v14 = vpop.permute.xlu1 %7899 }
 0x5bd   : > { %v7904_v60 = vpop.permute.xlu0 %7903  ;;  %v8168_v9 = vmax.f32 %v14704_v32, %v7900_v14 }
 0x5be   : > { %8700 = vst.msk [vmem:[%s11306_s6 + $0x1f8] sm:$0xf] %vm8573_vm5, %v8567_v1  ;;  %v8170_v12 = vmax.f32 %v14707_v18, %v7904_v60 }
 0x5bf   : > { %v8304_v50 = vadd.f32 %v14423_v27, %v8168_v9 }
 0x5c0   : > { %v8306_v58 = vadd.f32 %v14423_v27, %v8170_v12 }
 0x5c1   : > { %v8436_v48 = vmax.f32 %v8304_v50, 0.0 }
 0x5c2   : > { %v8438_v62 = vmax.f32 %v8306_v58, 0.0 }
 0x5c3   : > { %v8568_v23 = vpack.c.bf16 %v8436_v48, %v8436_v48 }
 0x5c4   : > { %v8570_v26 = vpack.c.bf16 %v8438_v62, %v8438_v62  ;;  %v7906_v25 = vpop.permute.xlu1 %7905 }
 0x5c5   : > { %8701 = vst.msk [vmem:[%s11306_s6 + $0x1fc] sm:$0xf] %vm8573_vm5, %v8568_v23  ;;  %v8171_v44 = vmax.f32 %v14716_v46, %v7906_v25 }
 0x5c6   : > { %8703 = vst.msk [vmem:[%s11306_s6 + $0x204] sm:$0xf] %vm8573_vm5, %v8570_v26 }
 0x5c7   : > { %v8307_v32 = vadd.f32 %v14423_v27, %v8171_v44 }
 0x5c9   : > { %v8439_v4 = vmax.f32 %v8307_v32, 0.0 }
 0x5cb   : > { %v8571_v56 = vpack.c.bf16 %v8439_v4, %v8439_v4 }
 0x5cd   : > { %8704 = vst.msk [vmem:[%s11306_s6 + $0x208] sm:$0xf] %vm8573_vm5, %v8571_v56 }
 0x5ce PF: > { %s13_s12 = sadd.s32 1, %s10395_s12  }
 0x5cf   : > { %p10_p4 = scmp.ge.s32.totalorder %s13_s12, 4  }
 0x5d1   :  { %12 = sbr.rel (!%p10_p4) target bundleno = 1 (0x1), region = 65 }

// kernel: cnn_forward.6
= control target key start
LH: loop header
LB: loop body
LE: loop exit
PB: predicated region body
PF: predicated region fallthrough
CT: control target
= control target key end

     0   :  { %s3163_s12 = smov 0   ;;  %s3880_s0 = inlined_call_operand.vmem [shape: bf16[2,296,64], index: 0, kind: input, shape index: {}]   ;;  %s3881_s1 = inlined_call_operand.vmem [shape: bf16[4,64,128], index: 1, kind: input, shape index: {}]   ;;  %s3882_s2 = inlined_call_operand.vmem [shape: f32[1,32], index: 2, kind: input, shape index: {}]   ;;  %s3883_s3 = inlined_call_operand.vmem [shape: bf16[2,272,32], index: 3, kind: output, shape index: {}]  }
   0x1 LB: > { %s2599_s13 = sadd.s32 4294967295, %s3139_s12   ;;  %p2603_p0 = scmp.ge.s32.totalorder %s3139_s12, 1  ;;  %s3139_s12 = sphi %s3163_s12, %s13_s12  }
   0x2   : > { %p137_p1 = scmp.lt.s32.totalorder %s3139_s12, 3 }
   0x4   : > { %p138_p2 = pnand %p2603_p0, %p137_p1 }
   0x5   : > { %p161_p3 = scmp.lt.s32.totalorder (!%p138_p2), %s2599_s13, 1  ;;  %s3141_s25 = smov (!%p138_p2), 96  }
   0x6   : > { %141 = sbr.rel (%p138_p2) target bundleno = 670 (0x29e), region = 32  ;;  %s3142_s26 = smov (!%p138_p2), 64  }
   0xb   : > { %v3056_v0 = vld [vmem:[%s3881_s1 + $0x18] sm:$0xff]  ;;  %v3055_v4 = vld [vmem:[%s3881_s1 + $0x10] sm:$0xff]  ;;  %s3885_s13 = smov (!%p161_p3, %s2599_s13), 1  ;;  %v3054_v8 = vld [vmem:[%s3881_s1 + $0x8] sm:$0xff]  ;;  %vm1722_vm0 = vcmask 1046528   ;;  %vm323_vm2 = vcmask 523264  }
   0xc   : > { %v3077_v1 = vld [vmem:[%s3881_s1 + $0x38] sm:$0xff]  ;;  %379 = vmatpush.bf16.msra.mxu0 %v3056_v0  ;;  %v3076_v5 = vld [vmem:[%s3881_s1 + $0x30] sm:$0xff]  ;;  %s3120_s30 = smul.u32 148, %s3885_s13  ;;  %v3075_v9 = vld [vmem:[%s3881_s1 + $0x28] sm:$0xff]  ;;  %vm635_vm1 = vsmask.f32 7424 }
   0xd   : > { %v3098_v2 = vld [vmem:[%s3881_s1 + $0x58] sm:$0xff]  ;;  %855 = vmatpush.bf16.msra.mxu1 %v3077_v1  ;;  %v3097_v6 = vld [vmem:[%s3881_s1 + $0x50] sm:$0xff]  ;;  %v3096_v10 = vld [vmem:[%s3881_s1 + $0x48] sm:$0xff]  ;;  %s3121_s29 = smul.u32 136, %s3885_s13  ;;  %vm2509_vm3 = vcmask 257024  }
   0xe   : > { %v3119_v3 = vld [vmem:[%s3881_s1 + $0x78] sm:$0xff]  ;;  %1398 = vmatpush.bf16.msra.mxu2 %v3098_v2  ;;  %v3118_v7 = vld [vmem:[%s3881_s1 + $0x70] sm:$0xff]  ;;  %s3210_s14 = scalar_lea.vmem %s3880_s0, %s3120_s30  ;;  %v3117_v11 = vld [vmem:[%s3881_s1 + $0x68] sm:$0xff] }
   0xf   : > { %1837 = vmatpush.bf16.msra.mxu3 %v3119_v3  ;;  %v3057_v12 = vld [vmem:[%s3210_s14] sm:$0xff]  ;;  %v3058_v13 = vld [vmem:[%s3210_s14 + $0x8] sm:$0xff]  ;;  %v3079_v15 = vld [vmem:[%s3210_s14 + $0x10] sm:$0xff]  ;;  %s3615_s5 = scalar_lea.vmem %s3883_s3, %s3121_s29 }
  0x10   : > { %380 = vmatpush.bf16.msra.mxu0 %v3055_v4  ;;  %v3078_v14 = vld [vmem:[%s3210_s14 + $0x8] sm:$0xff]  ;;  %v637_v17 = vshrl.u32 %v3057_v12, 16  ;;  %v639_v18 = vshll.u32 %v3057_v12, 16  ;;  %v644_v19 = vshll.u32 %v3058_v13, 16  ;;  %v3100_v21 = vld [vmem:[%s3210_s14 + $0x10] sm:$0xff]  ;;  %v3053_v22 = vld [vmem:[%s3881_s1] sm:$0xff] }
  0x11   : > { %856 = vmatpush.bf16.msra.mxu1 %v3076_v5  ;;  %v2935_v16 = vld [vmem:[%s3210_s14 + $0x8] sm:$0xe]  ;;  %v3099_v20 = vld [vmem:[%s3210_s14 + $0x8] sm:$0xf0]  ;;  %v3074_v23 = vld [vmem:[%s3881_s1 + $0x20] sm:$0xff]  ;;  %v1180_v24 = vshrl.u32 %v3078_v14, 16 }
  0x12   : > { %1399 = vmatpush.bf16.msra.mxu2 %v3097_v6  ;;  %v1182_v25 = vshll.u32 %v3078_v14, 16  ;;  %v1187_v26 = vshll.u32 %v3079_v15, 16  ;;  %v2936_v27 = vor.u32 %v3099_v20, %v2935_v16  ;;  %v3095_v28 = vld [vmem:[%s3881_s1 + $0x40] sm:$0xff]  ;;  %v641_v30 = vrot.slane %v639_v18, 1  ;;  %v3059_v42 = vld [vmem:[%s3210_s14 + $0x10] sm:$0xff]  ;;  %v3080_v43 = vld [vmem:[%s3210_s14 + $0x18] sm:$0xff] }
  0x13   : > { %1838 = vmatpush.bf16.msra.mxu3 %v3118_v7  ;;  %v3116_v29 = vld [vmem:[%s3881_s1 + $0x60] sm:$0xff]  ;;  %v646_v31 = vrot.slane %v644_v19, 1  ;;  %v1724_v32 = vrot.slane %v3100_v21, 1  ;;  %v648_v44 = vshrl.u32 %v3058_v13, 16  ;;  %v652_v45 = vshll.u32 %v3059_v42, 16  ;;  %v3101_v48 = vld [vmem:[%s3210_s14 + $0x18] sm:$0xff] }
  0x14   : > { %381 = vmatpush.bf16.msra.mxu0 %v3054_v8  ;;  %v1184_v33 = vrot.slane %v1182_v25, 1  ;;  %v1189_v34 = vrot.slane %v1187_v26, 1  ;;  %v1723_v35 = vrot.slane %v2936_v27, 1  ;;  %v3036_v36 = vld [vmem:[%s3210_s14] sm:$0xff]  ;;  %v642_v37 = vor.u32 %v641_v30, %v637_v17  ;;  %v3037_v54 = vld [vmem:[%s3210_s14 + $0x8] sm:$0xff]  ;;  %v3060_v58 = vld [vmem:[%s3210_s14 + $0x18] sm:$0xff] }
  0x15   : > { %857 = vmatpush.bf16.msra.mxu1 %v3075_v9  ;;  %v1191_v46 = vshrl.u32 %v3079_v15, 16  ;;  %v1195_v47 = vshll.u32 %v3080_v43, 16  ;;  %v650_v49 = vor.u32 %v648_v44, %v646_v31  ;;  %v654_v50 = vrot.slane %v652_v45, 1  ;;  %v3081_v59 = vld [vmem:[%s3210_s14 + $0x20] sm:$0xff]  ;;  %v3038_v6 = vld [vmem:[%s3210_s14 + $0x10] sm:$0xff]  ;;  %v3103_v16 = vld [vmem:[%s3210_s14 + $0x28] sm:$0xff] }
  0x16   : > { %1400 = vmatpush.bf16.msra.mxu2 %v3096_v10  ;;  %v1185_v38 = vor.u32 %v1184_v33, %v1180_v24  ;;  %v647_v39 = vsel %vm635_vm1, %v642_v37, %v646_v31  ;;  %v1725_v40 = vsel %vm1722_vm0, %v1723_v35, %v1724_v32  ;;  %v1726_v53 = vrot.slane %v3101_v48, 1  ;;  %v3102_v0 = vld [vmem:[%s3210_s14 + $0x20] sm:$0xff]  ;;  %v3062_v26 = vld [vmem:[%s3210_s14 + $0x28] sm:$0xff]  ;;  %v3083_v27 = vld [vmem:[%s3210_s14 + $0x30] sm:$0xff] }
  0x17   : > { %1839 = vmatpush.bf16.msra.mxu3 %v3117_v11  ;;  %v1193_v51 = vor.u32 %v1191_v46, %v1189_v34  ;;  %v1197_v52 = vrot.slane %v1195_v47, 1  ;;  %v655_v55 = vsel %vm635_vm1, %v650_v49, %v654_v50  ;;  %v656_v60 = vshrl.u32 %v3059_v42, 16  ;;  %v3061_v10 = vld [vmem:[%s3210_s14 + $0x20] sm:$0xff]  ;;  %v3082_v11 = vld [vmem:[%s3210_s14 + $0x28] sm:$0xff]  ;;  %v3063_v42 = vld [vmem:[%s3210_s14 + $0x30] sm:$0xff] }
  0x18   : > { %382 = vmatpush.bf16.msra.mxu0 %v3053_v22  ;;  %v1190_v41 = vsel %vm635_vm1, %v1185_v38, %v1189_v34  ;;  %v1727_v57 = vsel %vm1722_vm0, %v1724_v32, %v1726_v53  ;;  %v660_v61 = vshll.u32 %v3060_v58, 16  ;;  %v1199_v62 = vshrl.u32 %v3080_v43, 16  ;;  %v3039_v22 = vld [vmem:[%s3210_s14 + $0x18] sm:$0xff]  ;;  %v3104_v32 = vld [vmem:[%s3210_s14 + $0x30] sm:$0xff]  ;;  %v3040_v38 = vld [vmem:[%s3210_s14 + $0x20] sm:$0xff] }
  0x19   : > { %858 = vmatpush.bf16.msra.mxu1 %v3074_v23  ;;  %v1198_v56 = vsel %vm635_vm1, %v1193_v51, %v1197_v52  ;;  %v1203_v63 = vshll.u32 %v3081_v59, 16  ;;  %v658_v1 = vor.u32 %v656_v60, %v654_v50  ;;  %v1728_v5 = vrot.slane %v3102_v0, 1  ;;  %v3084_v43 = vld [vmem:[%s3210_s14 + $0x38] sm:$0xff]  ;;  %v3106_v0 = vld [vmem:[%s3210_s14 + $0x40] sm:$0xff] }
  0x1a   : > { %1401 = vmatpush.bf16.msra.mxu2 %v3095_v28  ;;  %v662_v2 = vrot.slane %v660_v61, 1  ;;  %v1201_v3 = vor.u32 %v1199_v62, %v1197_v52  ;;  %v664_v12 = vshrl.u32 %v3060_v58, 16  ;;  %v668_v13 = vshll.u32 %v3061_v10, 16  ;;  %v3105_v48 = vld [vmem:[%s3210_s14 + $0x38] sm:$0xff] }
  0x1b   : > { %1840 = vmatpush.bf16.msra.mxu3 %v3116_v29  ;;  %2690 = vmatmul.msk.bf16.vlgmr.msra.gmra.mxu0 %vm323_vm2, %v3036_v36  ;;  %v1205_v4 = vrot.slane %v1203_v63, 1  ;;  %v1729_v9 = vsel %vm1722_vm0, %v1726_v53, %v1728_v5  ;;  %v1207_v14 = vshrl.u32 %v3081_v59, 16  ;;  %v1211_v15 = vshll.u32 %v3082_v11, 16  ;;  %v3064_v58 = vld [vmem:[%s3210_s14 + $0x38] sm:$0xff]  ;;  %v3085_v59 = vld [vmem:[%s3210_s14 + $0x40] sm:$0xff] }
  0x1c   : > { %2799 = vmatmul.msk.bf16.vlgmr.msra.gmra.mxu1 %vm323_vm2, %v647_v39  ;;  %v663_v7 = vsel %vm635_vm1, %v658_v1, %v662_v2  ;;  %v666_v17 = vor.u32 %v664_v12, %v662_v2  ;;  %v670_v18 = vrot.slane %v668_v13, 1  ;;  %v1730_v21 = vrot.slane %v3103_v16, 1  ;;  %v3107_v16 = vld [vmem:[%s3210_s14 + $0x48] sm:$0xff] }
  0x1d   : > { %2908 = vmatmul.msk.bf16.vlgmr.msra.gmra.mxu2 %vm323_vm2, %v1190_v41  ;;  %v1206_v8 = vsel %vm635_vm1, %v1201_v3, %v1205_v4  ;;  %v1209_v19 = vor.u32 %v1207_v14, %v1205_v4  ;;  %v1213_v20 = vrot.slane %v1211_v15, 1  ;;  %v672_v28 = vshrl.u32 %v3061_v10, 16  ;;  %v3065_v10 = vld [vmem:[%s3210_s14 + $0x40] sm:$0xff] }
  0x1e   : > { %3017 = vmatmul.msk.bf16.vlgmr.msra.gmra.mxu3 %vm323_vm2, %v1725_v40  ;;  %v671_v23 = vsel %vm635_vm1, %v666_v17, %v670_v18  ;;  %v1731_v25 = vsel %vm1722_vm0, %v1728_v5, %v1730_v21  ;;  %v676_v29 = vshll.u32 %v3062_v26, 16  ;;  %v1215_v30 = vshrl.u32 %v3082_v11, 16  ;;  %v3086_v11 = vld [vmem:[%s3210_s14 + $0x48] sm:$0xff] }
  0x1f   : > { %v1214_v24 = vsel %vm635_vm1, %v1209_v19, %v1213_v20  ;;  %v1219_v31 = vshll.u32 %v3083_v27, 16  ;;  %v674_v33 = vor.u32 %v672_v28, %v670_v18  ;;  %v1732_v37 = vrot.slane %v3104_v32, 1  ;;  %v3108_v32 = vld [vmem:[%s3210_s14 + $0x50] sm:$0xff] }
  0x20   : > { %v678_v34 = vrot.slane %v676_v29, 1  ;;  %v1217_v35 = vor.u32 %v1215_v30, %v1213_v20  ;;  %v680_v44 = vshrl.u32 %v3062_v26, 16  ;;  %v684_v45 = vshll.u32 %v3063_v42, 16  ;;  %v3066_v26 = vld [vmem:[%s3210_s14 + $0x48] sm:$0xff] }
  0x21   : > { %v1221_v36 = vrot.slane %v1219_v31, 1  ;;  %v1733_v41 = vsel %vm1722_vm0, %v1730_v21, %v1732_v37  ;;  %v1223_v46 = vshrl.u32 %v3083_v27, 16  ;;  %v1227_v47 = vshll.u32 %v3084_v43, 16  ;;  %v3087_v27 = vld [vmem:[%s3210_s14 + $0x50] sm:$0xff] }
  0x22   : > { %v679_v39 = vsel %vm635_vm1, %v674_v33, %v678_v34  ;;  %v682_v49 = vor.u32 %v680_v44, %v678_v34  ;;  %v686_v50 = vrot.slane %v684_v45, 1  ;;  %v1734_v53 = vrot.slane %v3105_v48, 1  ;;  %v3067_v45 = vld [vmem:[%s3210_s14 + $0x50] sm:$0xff] }
  0x23   : > { %v1222_v40 = vsel %vm635_vm1, %v1217_v35, %v1221_v36  ;;  %v1225_v51 = vor.u32 %v1223_v46, %v1221_v36  ;;  %v1229_v52 = vrot.slane %v1227_v47, 1  ;;  %v688_v60 = vshrl.u32 %v3063_v42, 16  ;;  %v3088_v46 = vld [vmem:[%s3210_s14 + $0x58] sm:$0xff] }
  0x24   : > { %v692_v61 = vshll.u32 %v3064_v58, 16  ;;  %v1231_v62 = vshrl.u32 %v3084_v43, 16  ;;  %v1235_v63 = vshll.u32 %v3085_v59, 16  ;;  %v1736_v5 = vrot.slane %v3106_v0, 1 }
  0x25   : > { %v690_v1 = vor.u32 %v688_v60, %v686_v50  ;;  %v696_v12 = vshrl.u32 %v3064_v58, 16  ;;  %v700_v13 = vshll.u32 %v3065_v10, 16  ;;  %v1239_v14 = vshrl.u32 %v3085_v59, 16 }
  0x26   : > { %v694_v2 = vrot.slane %v692_v61, 1  ;;  %v1233_v3 = vor.u32 %v1231_v62, %v1229_v52  ;;  %v1237_v4 = vrot.slane %v1235_v63, 1  ;;  %v1243_v15 = vshll.u32 %v3086_v11, 16 }
  0x27   : > { %v702_v18 = vrot.slane %v700_v13, 1  ;;  %v1738_v21 = vrot.slane %v3107_v16, 1  ;;  %v704_v28 = vshrl.u32 %v3065_v10, 16  ;;  %v708_v29 = vshll.u32 %v3066_v26, 16 }
  0x28   : > { %v698_v17 = vor.u32 %v696_v12, %v694_v2  ;;  %v1241_v19 = vor.u32 %v1239_v14, %v1237_v4  ;;  %v1245_v20 = vrot.slane %v1243_v15, 1  ;;  %v1247_v30 = vshrl.u32 %v3086_v11, 16  ;;  %v3068_v11 = vld [vmem:[%s3210_s14 + $0x58] sm:$0xff]  ;;  %v3089_v12 = vld [vmem:[%s3210_s14 + $0x60] sm:$0xff] }
  0x29   : > { %v1251_v31 = vshll.u32 %v3087_v27, 16  ;;  %v706_v33 = vor.u32 %v704_v28, %v702_v18  ;;  %v710_v34 = vrot.slane %v708_v29, 1 }
  0x2a   : > { %v1249_v35 = vor.u32 %v1247_v30, %v1245_v20 }
  0x2b   : > { %2691 = vmatmul.msk.bf16.gmra.mxu0 %vm323_vm2, %v3037_v54  ;;  %v3041_v54 = vld [vmem:[%s3210_s14 + $0x28] sm:$0xff]  ;;  %v1253_v36 = vrot.slane %v1251_v31, 1 }
  0x2c   : > { %2800 = vmatmul.msk.bf16.gmra.mxu1 %vm323_vm2, %v655_v55  ;;  %v687_v55 = vsel %vm635_vm1, %v682_v49, %v686_v50 }
  0x2d   : > { %2909 = vmatmul.msk.bf16.gmra.mxu2 %vm323_vm2, %v1198_v56  ;;  %v1230_v56 = vsel %vm635_vm1, %v1225_v51, %v1229_v52  ;;  %v1254_v42 = vsel %vm635_vm1, %v1249_v35, %v1253_v36  ;;  %v712_v52 = vshrl.u32 %v3066_v26, 16 }
  0x2e   : > { %3018 = vmatmul.msk.bf16.gmra.mxu3 %vm323_vm2, %v1727_v57  ;;  %v1735_v57 = vsel %vm1722_vm0, %v1732_v37, %v1734_v53  ;;  %v1740_v37 = vrot.slane %v3108_v32, 1  ;;  %v3046_v32 = vld [vmem:[%s3210_s14 + $0x50] sm:$0xff] }
  0x2f   : > { %v714_v58 = vor.u32 %v712_v52, %v710_v34  ;;  %v3111_v52 = vld [vmem:[%s3210_s14 + $0x68] sm:$0xff] }
  0x30   : > { %v1741_v43 = vsel %vm1722_vm0, %v1738_v21, %v1740_v37 }
  0x3b   : > { %2692 = vmatmul.msk.bf16.gmra.mxu0 %vm323_vm2, %v3038_v6  ;;  %v3042_v6 = vld [vmem:[%s3210_s14 + $0x30] sm:$0xff] }
  0x3c   : > { %2801 = vmatmul.msk.bf16.gmra.mxu1 %vm323_vm2, %v663_v7  ;;  %v695_v7 = vsel %vm635_vm1, %v690_v1, %v694_v2  ;;  %v3045_v2 = vld [vmem:[%s3210_s14 + $0x48] sm:$0xff] }
  0x3d   : > { %2910 = vmatmul.msk.bf16.gmra.mxu2 %vm323_vm2, %v1206_v8  ;;  %v1238_v8 = vsel %vm635_vm1, %v1233_v3, %v1237_v4 }
  0x3e   : > { %3019 = vmatmul.msk.bf16.gmra.mxu3 %vm323_vm2, %v1729_v9  ;;  %v1737_v9 = vsel %vm1722_vm0, %v1734_v53, %v1736_v5  ;;  %v716_v53 = vshll.u32 %v3067_v45, 16 }
  0x40   : > { %v718_v59 = vrot.slane %v716_v53, 1 }
  0x4b   : > { %2693 = vmatmul.msk.bf16.gmra.mxu0 %vm323_vm2, %v3039_v22  ;;  %v3043_v22 = vld [vmem:[%s3210_s14 + $0x38] sm:$0xff] }
  0x4c   : > { %2802 = vmatmul.msk.bf16.gmra.mxu1 %vm323_vm2, %v671_v23  ;;  %v703_v23 = vsel %vm635_vm1, %v698_v17, %v702_v18  ;;  %v720_v18 = vshrl.u32 %v3067_v45, 16 }
  0x4d   : > { %2911 = vmatmul.msk.bf16.gmra.mxu2 %vm323_vm2, %v1214_v24  ;;  %v1246_v24 = vsel %vm635_vm1, %v1241_v19, %v1245_v20  ;;  %v724_v19 = vshll.u32 %v3068_v11, 16  ;;  %v1263_v20 = vshrl.u32 %v3088_v46, 16 }
  0x4e   : > { %3020 = vmatmul.msk.bf16.gmra.mxu3 %vm323_vm2, %v1731_v25  ;;  %v1739_v25 = vsel %vm1722_vm0, %v1736_v5, %v1738_v21  ;;  %v1267_v21 = vshll.u32 %v3089_v12, 16 }
  0x5b   : > { %2694 = vmatmul.msk.bf16.gmra.mxu0 %vm323_vm2, %v3040_v38  ;;  %v3044_v38 = vld [vmem:[%s3210_s14 + $0x40] sm:$0xff] }
  0x5c   : > { %2803 = vmatmul.msk.bf16.gmra.mxu1 %vm323_vm2, %v679_v39 }
  0x5d   : > { %2912 = vmatmul.msk.bf16.gmra.mxu2 %vm323_vm2, %v1222_v40 }
  0x5e   : > { %3021 = vmatmul.msk.bf16.gmra.mxu3 %vm323_vm2, %v1733_v41  ;;  %v711_v41 = vsel %vm635_vm1, %v706_v33, %v710_v34 }
  0x6b   : > { %2695 = vmatmul.msk.bf16.gmra.mxu0 %vm323_vm2, %v3041_v54  ;;  %v1255_v54 = vshrl.u32 %v3087_v27, 16  ;;  %v1269_v27 = vrot.slane %v1267_v21, 1 }
  0x6c   : > { %2804 = vmatmul.msk.bf16.gmra.mxu1 %vm323_vm2, %v687_v55  ;;  %v1259_v55 = vshll.u32 %v3088_v46, 16 }
  0x6d   : > { %2913 = vmatmul.msk.bf16.gmra.mxu2 %vm323_vm2, %v1230_v56  ;;  %v3109_v56 = vld [vmem:[%s3210_s14 + $0x58] sm:$0xff]  ;;  %v1257_v60 = vor.u32 %v1255_v54, %v1253_v36 }
  0x6e   : > { %3022 = vmatmul.msk.bf16.gmra.mxu3 %vm323_vm2, %v1735_v57  ;;  %v1261_v61 = vrot.slane %v1259_v55, 1  ;;  %v1742_v62 = vrot.slane %v3109_v56, 1 }
  0x70   : > { %v1265_v26 = vor.u32 %v1263_v20, %v1261_v61  ;;  %v3112_v20 = vld [vmem:[%s3210_s14 + $0x70] sm:$0xff] }
  0x7b   : > { %2696 = vmatmul.msk.bf16.gmra.mxu0 %vm323_vm2, %v3042_v6  ;;  %v719_v6 = vsel %vm635_vm1, %v714_v58, %v718_v59 }
  0x7c   : > { %2805 = vmatmul.msk.bf16.gmra.mxu1 %vm323_vm2, %v695_v7  ;;  %v1262_v7 = vsel %vm635_vm1, %v1257_v60, %v1261_v61 }
  0x7d   : > { %2914 = vmatmul.msk.bf16.gmra.mxu2 %vm323_vm2, %v1238_v8  ;;  %v1743_v8 = vsel %vm1722_vm0, %v1740_v37, %v1742_v62  ;;  %v1270_v37 = vsel %vm635_vm1, %v1265_v26, %v1269_v27 }
  0x7e   : > { %3023 = vmatmul.msk.bf16.gmra.mxu3 %vm323_vm2, %v1737_v9 }
  0x8b   : > { %2697 = vmatmul.msk.bf16.gmra.mxu0 %vm323_vm2, %v3043_v22  ;;  %v3110_v22 = vld [vmem:[%s3210_s14 + $0x60] sm:$0xff] }
  0x8c   : > { %2806 = vmatmul.msk.bf16.gmra.mxu1 %vm323_vm2, %v703_v23  ;;  %v1744_v28 = vrot.slane %v3110_v22, 1 }
  0x8d   : > { %2915 = vmatmul.msk.bf16.gmra.mxu2 %vm323_vm2, %v1246_v24  ;;  %v722_v24 = vor.u32 %v720_v18, %v718_v59  ;;  %v1746_v59 = vrot.slane %v3111_v52, 1  ;;  %v3113_v52 = vld [vmem:[%s3210_s14 + $0x78] sm:$0xff] }
  0x8e   : > { %3024 = vmatmul.msk.bf16.gmra.mxu3 %vm323_vm2, %v1739_v25  ;;  %v726_v25 = vrot.slane %v724_v19, 1 }
  0x90   : > { %v727_v36 = vsel %vm635_vm1, %v722_v24, %v726_v25 }
  0x98   : > { %v384_v39 = vpop.f32.mrf.mxu0 }
  0x99   : > { %v860_v40 = vpop.f32.mrf.mxu1 }
  0x9a   : > { %v979_v44 = vadd.f32 %v860_v40, %v384_v39 }
  0x9b   : > { %2698 = vmatmul.msk.bf16.gmra.mxu0 %vm323_vm2, %v3044_v38  ;;  %v1745_v38 = vsel %vm1722_vm0, %v1742_v62, %v1744_v28 }
  0x9c   : > { %2807 = vmatmul.msk.bf16.gmra.mxu1 %vm323_vm2, %v711_v41  ;;  %v3069_v41 = vld [vmem:[%s3210_s14 + $0x60] sm:$0xff] }
  0x9d   : > { %2916 = vmatmul.msk.bf16.gmra.mxu2 %vm323_vm2, %v1254_v42  ;;  %v3090_v42 = vld [vmem:[%s3210_s14 + $0x68] sm:$0xff] }
  0x9e   : > { %3025 = vmatmul.msk.bf16.gmra.mxu3 %vm323_vm2, %v1741_v43  ;;  %v1279_v18 = vshrl.u32 %v3090_v42, 16 }
  0xa0   : > { %v1403_v47 = vpop.f32.mrf.mxu2  ;;  %v386_v50 = vpop.f32.mrf.mxu0 }
  0xa1   : > { %v1842_v48 = vpop.f32.mrf.mxu3  ;;  %v1522_v49 = vadd.f32 %v1403_v47, %v979_v44  ;;  %v862_v51 = vpop.f32.mrf.mxu1 }
  0xa2   : > { %v980_v63 = vadd.f32 %v862_v51, %v386_v50  ;;  %v1271_v50 = vshrl.u32 %v3089_v12, 16  ;;  %v1275_v51 = vshll.u32 %v3090_v42, 16  ;;  %v3092_v42 = vld [vmem:[%s3210_s14 + $0x78] sm:$0xff] }
  0xa3   : > { %v3333_v57 = vadd.f32 %v1842_v48, %v1522_v49  ;;  %v728_v48 = vshrl.u32 %v3068_v11, 16  ;;  %v732_v49 = vshll.u32 %v3069_v41, 16 }
  0xa4   : > { %v1273_v56 = vor.u32 %v1271_v50, %v1269_v27  ;;  %v1277_v58 = vrot.slane %v1275_v51, 1  ;;  %v1748_v27 = vrot.slane %v3112_v20, 1  ;;  %v1291_v51 = vshll.u32 %v3092_v42, 16 }
  0xa5   : > { %2097 = vrot.lane.b32.xlu0 %v3333_v57, %s3141_s25  ;;  %v730_v54 = vor.u32 %v728_v48, %v726_v25  ;;  %v734_v55 = vrot.slane %v732_v49, 1  ;;  %v1295_v20 = vshrl.u32 %v3092_v42, 16 }
  0xa6   : > { %v1281_v25 = vor.u32 %v1279_v18, %v1277_v58 }
  0xa8   : > { %v1405_v0 = vpop.f32.mrf.mxu2  ;;  %v389_v4 = vpop.f32.mrf.mxu0 }
  0xa9   : > { %v1844_v1 = vpop.f32.mrf.mxu3  ;;  %v1523_v3 = vadd.f32 %v1405_v0, %v980_v63  ;;  %v865_v5 = vpop.f32.mrf.mxu1  ;;  %v3047_v63 = vld [vmem:[%s3210_s14 + $0x58] sm:$0xff] }
  0xaa   : > { %v981_v10 = vadd.f32 %v865_v5, %v389_v4  ;;  %v1278_v4 = vsel %vm635_vm1, %v1273_v56, %v1277_v58  ;;  %v1747_v5 = vsel %vm1722_vm0, %v1744_v28, %v1746_v59 }
  0xab   : > { %v3341_v9 = vadd.f32 %v1844_v1, %v1523_v3  ;;  %2699 = vmatmul.msk.bf16.gmra.mxu0 %vm323_vm2, %v3045_v2  ;;  %v735_v3 = vsel %vm635_vm1, %v730_v54, %v734_v55 }
  0xac   : > { %2808 = vmatmul.msk.bf16.gmra.mxu1 %vm323_vm2, %v719_v6 }
  0xad   : > { %2917 = vmatmul.msk.bf16.gmra.mxu2 %vm323_vm2, %v1262_v7  ;;  %2099 = vrot.lane.b32.xlu0 %v3341_v9, %s3141_s25 }
  0xae   : > { %3026 = vmatmul.msk.bf16.gmra.mxu3 %vm323_vm2, %v1743_v8  ;;  %v3070_v8 = vld [vmem:[%s3210_s14 + $0x68] sm:$0xff] }
  0xaf   : > { %v744_v48 = vshrl.u32 %v3070_v8, 16 }
  0xb0   : > { %v1408_v13 = vpop.f32.mrf.mxu2  ;;  %v391_v16 = vpop.f32.mrf.mxu0 }
  0xb1   : > { %v1847_v14 = vpop.f32.mrf.mxu3  ;;  %v1524_v15 = vadd.f32 %v1408_v13, %v981_v10  ;;  %v867_v17 = vpop.f32.mrf.mxu1  ;;  %v3091_v10 = vld [vmem:[%s3210_s14 + $0x70] sm:$0xff] }
  0xb2   : > { %v982_v29 = vadd.f32 %v867_v17, %v391_v16  ;;  %v736_v16 = vshrl.u32 %v3069_v41, 16  ;;  %v740_v17 = vshll.u32 %v3070_v8, 16  ;;  %v1283_v19 = vshll.u32 %v3091_v10, 16  ;;  %v3071_v41 = vld [vmem:[%s3210_s14 + $0x70] sm:$0xff] }
  0xb3   : > { %v3352_v23 = vadd.f32 %v1847_v14, %v1524_v15  ;;  %v748_v49 = vshll.u32 %v3071_v41, 16  ;;  %v1287_v50 = vshrl.u32 %v3091_v10, 16  ;;  %v752_v18 = vshrl.u32 %v3071_v41, 16 }
  0xb4   : > { %v738_v22 = vor.u32 %v736_v16, %v734_v55  ;;  %v742_v24 = vrot.slane %v740_v17, 1  ;;  %v1285_v26 = vrot.slane %v1283_v19, 1 }
  0xb5   : > { %2101 = vrot.lane.b32.xlu1 %v3352_v23, %s3141_s25  ;;  %v750_v56 = vrot.slane %v748_v49, 1 }
  0xb6   : > { %v746_v55 = vor.u32 %v744_v48, %v742_v24  ;;  %v1289_v58 = vor.u32 %v1287_v50, %v1285_v26 }
  0xb8   : > { %v1410_v30 = vpop.f32.mrf.mxu2  ;;  %v394_v34 = vpop.f32.mrf.mxu0 }
  0xb9   : > { %v1849_v31 = vpop.f32.mrf.mxu3  ;;  %v1525_v33 = vadd.f32 %v1410_v30, %v982_v29  ;;  %v870_v35 = vpop.f32.mrf.mxu1 }
  0xba   : > { %v983_v40 = vadd.f32 %v870_v35, %v394_v34  ;;  %v743_v35 = vsel %vm635_vm1, %v738_v22, %v742_v24  ;;  %v3114_v24 = vld [vmem:[%s3210_s14 + $0x80] sm:$0xff] }
  0xbb   : > { %v3360_v39 = vadd.f32 %v1849_v31, %v1525_v33  ;;  %2700 = vmatmul.msk.bf16.gmra.mxu0 %vm323_vm2, %v3046_v32  ;;  %v3048_v31 = vld [vmem:[%s3210_s14 + $0x60] sm:$0xff] }
  0xbc   : > { %2809 = vmatmul.msk.bf16.gmra.mxu1 %vm323_vm2, %v727_v36  ;;  %v1286_v36 = vsel %vm635_vm1, %v1281_v25, %v1285_v26  ;;  %v754_v26 = vor.u32 %v752_v18, %v750_v56 }
  0xbd   : > { %2918 = vmatmul.msk.bf16.gmra.mxu2 %vm323_vm2, %v1270_v37  ;;  %2103 = vrot.lane.b32.xlu1 %v3360_v39, %s3141_s25  ;;  %v1749_v37 = vsel %vm1722_vm0, %v1746_v59, %v1748_v27  ;;  %v1293_v59 = vrot.slane %v1291_v51, 1 }
  0xbe   : > { %3027 = vmatmul.msk.bf16.gmra.mxu3 %vm323_vm2, %v1745_v38 }
  0xc0   : > { %v1413_v43 = vpop.f32.mrf.mxu2  ;;  %v396_v46 = vpop.f32.mrf.mxu0 }
  0xc1   : > { %v1852_v44 = vpop.f32.mrf.mxu3  ;;  %v1526_v45 = vadd.f32 %v1413_v43, %v983_v40  ;;  %v872_v47 = vpop.f32.mrf.mxu1 }
  0xc2   : > { %v984_v60 = vadd.f32 %v872_v47, %v396_v46 }
  0xc3   : > { %v3371_v53 = vadd.f32 %v1852_v44, %v1526_v45 }
  0xc5   : > { %2105 = vrot.lane.b32.xlu2 %v3371_v53, %s3141_s25 }
  0xc8   : > { %v1415_v61 = vpop.f32.mrf.mxu2  ;;  %v399_v1 = vpop.f32.mrf.mxu0 }
  0xc9   : > { %v1854_v62 = vpop.f32.mrf.mxu3  ;;  %v1527_v0 = vadd.f32 %v1415_v61, %v984_v60  ;;  %v875_v2 = vpop.f32.mrf.mxu1  ;;  %v1750_v60 = vrot.slane %v3113_v52, 1 }
  0xca   : > { %v985_v7 = vadd.f32 %v875_v2, %v399_v1 }
  0xcb   : > { %v3379_v6 = vadd.f32 %v1854_v62, %v1527_v0  ;;  %2701 = vmatmul.msk.bf16.gmra.mxu0 %vm323_vm2, %v3047_v63  ;;  %v3049_v0 = vld [vmem:[%s3210_s14 + $0x68] sm:$0xff] }
  0xcc   : > { %2810 = vmatmul.msk.bf16.gmra.mxu1 %vm323_vm2, %v735_v3 }
  0xcd   : > { %2919 = vmatmul.msk.bf16.gmra.mxu2 %vm323_vm2, %v1278_v4  ;;  %2107 = vrot.lane.b32.xlu2 %v3379_v6, %s3141_s25  ;;  %v751_v4 = vsel %vm635_vm1, %v746_v55, %v750_v56 }
  0xce   : > { %3028 = vmatmul.msk.bf16.gmra.mxu3 %vm323_vm2, %v1747_v5  ;;  %v1294_v5 = vsel %vm635_vm1, %v1289_v58, %v1293_v59 }
  0xd0   : > { %v1418_v11 = vpop.f32.mrf.mxu2  ;;  %v401_v14 = vpop.f32.mrf.mxu0 }
  0xd1   : > { %v1857_v12 = vpop.f32.mrf.mxu3  ;;  %v1528_v13 = vadd.f32 %v1418_v11, %v985_v7  ;;  %v877_v15 = vpop.f32.mrf.mxu1  ;;  %v1751_v7 = vsel %vm1722_vm0, %v1748_v27, %v1750_v60  ;;  %v3072_v11 = vld [vmem:[%s3210_s14 + $0x78] sm:$0xff] }
  0xd2   : > { %v986_v28 = vadd.f32 %v877_v15, %v401_v14  ;;  %v756_v19 = vshll.u32 %v3072_v11, 16  ;;  %v760_v52 = vshrl.u32 %v3072_v11, 16 }
  0xd3   : > { %v3390_v21 = vadd.f32 %v1857_v12, %v1528_v13  ;;  %v3093_v12 = vld [vmem:[%s3210_s14 + $0x80] sm:$0xff] }
  0xd4   : > { %v1299_v22 = vshll.u32 %v3093_v12, 16  ;;  %v758_v27 = vrot.slane %v756_v19, 1  ;;  %v1303_v56 = vshrl.u32 %v3093_v12, 16 }
  0xd5   : > { %2109 = vrot.lane.b32.xlu0 %v3390_v21, %s3141_s25 }
  0xd8   : > { %v1420_v29 = vpop.f32.mrf.mxu2  ;;  %v404_v33 = vpop.f32.mrf.mxu0 }
  0xd9   : > { %v1859_v30 = vpop.f32.mrf.mxu3  ;;  %v1529_v32 = vadd.f32 %v1420_v29, %v986_v28  ;;  %v880_v34 = vpop.f32.mrf.mxu1  ;;  %v1297_v28 = vor.u32 %v1295_v20, %v1293_v59  ;;  %v1301_v29 = vrot.slane %v1299_v22, 1  ;;  %v3447_v59 = vld [vmem:[%s3210_s14 + $0x88] sm:$0xff]  ;;  %v1624_v20 = vld [vmem:[%s3210_s14 + $0x90] sm:$0x1] }
  0xda   : > { %v987_v40 = vadd.f32 %v880_v34, %v404_v33  ;;  %v3050_v34 = vld [vmem:[%s3210_s14 + $0x70] sm:$0xff] }
  0xdb   : > { %v3398_v38 = vadd.f32 %v1859_v30, %v1529_v32  ;;  %2702 = vmatmul.msk.bf16.gmra.mxu0 %vm323_vm2, %v3048_v31  ;;  %v1752_v30 = vrot.slane %v3114_v24, 1  ;;  %v1302_v41 = vsel %vm635_vm1, %v1297_v28, %v1301_v29 }
  0xdc   : > { %2811 = vmatmul.msk.bf16.gmra.mxu1 %vm323_vm2, %v743_v35 }
  0xdd   : > { %2920 = vmatmul.msk.bf16.gmra.mxu2 %vm323_vm2, %v1286_v36  ;;  %2111 = vrot.lane.b32.xlu1 %v3398_v38, %s3141_s25  ;;  %v1753_v42 = vsel %vm1722_vm0, %v1750_v60, %v1752_v30 }
  0xde   : > { %3029 = vmatmul.msk.bf16.gmra.mxu3 %vm323_vm2, %v1749_v37 }
  0xe0   : > { %v1423_v43 = vpop.f32.mrf.mxu2  ;;  %v406_v46 = vpop.f32.mrf.mxu0 }
  0xe1   : > { %v1862_v44 = vpop.f32.mrf.mxu3  ;;  %v1530_v45 = vadd.f32 %v1423_v43, %v987_v40  ;;  %v882_v47 = vpop.f32.mrf.mxu1  ;;  %v759_v40 = vsel %vm635_vm1, %v754_v26, %v758_v27 }
  0xe2   : > { %v988_v61 = vadd.f32 %v882_v47, %v406_v46  ;;  %v3094_v46 = vld [vmem:[%s3210_s14 + $0x88] sm:$0xff] }
  0xe3   : > { %v3409_v54 = vadd.f32 %v1862_v44, %v1530_v45  ;;  %v3073_v45 = vld [vmem:[%s3210_s14 + $0x80] sm:$0xff]  ;;  %v1307_v58 = vshll.u32 %v3094_v46, 16 }
  0xe4   : > { %v764_v55 = vshll.u32 %v3073_v45, 16 }
  0xe5   : > { %2113 = vrot.lane.b32.xlu2 %v3409_v54, %s3141_s25 }
  0xe8   : > { %v1425_v62 = vpop.f32.mrf.mxu2  ;;  %v409_v2 = vpop.f32.mrf.mxu0 }
  0xe9   : > { %v1864_v63 = vpop.f32.mrf.mxu3  ;;  %v1531_v1 = vadd.f32 %v1425_v62, %v988_v61  ;;  %v885_v3 = vpop.f32.mrf.mxu1  ;;  %v762_v61 = vor.u32 %v760_v52, %v758_v27  ;;  %v766_v62 = vrot.slane %v764_v55, 1  ;;  %v1703_v27 = vunpack.c.l.b16 %v1624_v20 }
  0xea   : > { %v989_v10 = vadd.f32 %v885_v3, %v409_v2  ;;  %v537_v2 = vld [vmem:[%s3210_s14 + $0x88] sm:$0x1] }
  0xeb   : > { %v3417_v8 = vadd.f32 %v1864_v63, %v1531_v1  ;;  %2703 = vmatmul.msk.bf16.gmra.mxu0 %vm323_vm2, %v3049_v0  ;;  %v1305_v63 = vor.u32 %v1303_v56, %v1301_v29  ;;  %v1309_v0 = vrot.slane %v1307_v58, 1  ;;  %v1754_v1 = vrot.slane %v3447_v59, 1 }
  0xec   : > { %2812 = vmatmul.msk.bf16.gmra.mxu1 %vm323_vm2, %v751_v4  ;;  %v1081_v4 = vld [vmem:[%s3210_s14 + $0x90] sm:$0x1] }
  0xed   : > { %2921 = vmatmul.msk.bf16.gmra.mxu2 %vm323_vm2, %v1294_v5  ;;  %2115 = vrot.lane.b32.xlu0 %v3417_v8, %s3141_s25  ;;  %v1160_v18 = vunpack.c.l.b16 %v1081_v4 }
  0xee   : > { %3030 = vmatmul.msk.bf16.gmra.mxu3 %vm323_vm2, %v1751_v7 }
  0xef   : > { %v1178_v26 = vpack.c.b16 %v1160_v18, %v1160_v18 }
  0xf0   : > { %v1428_v13 = vpop.f32.mrf.mxu2  ;;  %v411_v16 = vpop.f32.mrf.mxu0 }
  0xf1   : > { %v1867_v14 = vpop.f32.mrf.mxu3  ;;  %v1532_v15 = vadd.f32 %v1428_v13, %v989_v10  ;;  %v887_v17 = vpop.f32.mrf.mxu1  ;;  %v3051_v10 = vld [vmem:[%s3210_s14 + $0x78] sm:$0xff] }
  0xf2   : > { %v990_v31 = vadd.f32 %v887_v17, %v411_v16  ;;  %v1310_v16 = vsel %vm635_vm1, %v1305_v63, %v1309_v0  ;;  %v1755_v17 = vsel %vm1722_vm0, %v1752_v30, %v1754_v1 }
  0xf3   : > { %v3428_v25 = vadd.f32 %v1867_v14, %v1532_v15  ;;  %v767_v14 = vsel %vm635_vm1, %v762_v61, %v766_v62  ;;  %v616_v15 = vunpack.c.l.b16 %v537_v2 }
  0xf5   : > { %2117 = vrot.lane.b32.xlu1 %v3428_v25, %s3141_s25  ;;  %v634_v24 = vpack.c.b16 %v616_v15, %v616_v15 }
  0xf8   : > { %v1430_v32 = vpop.f32.mrf.mxu2  ;;  %v414_v36 = vpop.f32.mrf.mxu0 }
  0xf9   : > { %v1869_v33 = vpop.f32.mrf.mxu3  ;;  %v1533_v35 = vadd.f32 %v1430_v32, %v990_v31  ;;  %v890_v37 = vpop.f32.mrf.mxu1 }
  0xfa   : > { %v991_v44 = vadd.f32 %v890_v37, %v414_v36  ;;  %v1315_v36 = vshll.u32 %v1178_v26, 16  ;;  %v1721_v37 = vpack.c.b16 %v1703_v27, %v1703_v27 }
  0xfb   : > { %v3436_v43 = vadd.f32 %v1869_v33, %v1533_v35  ;;  %2704 = vmatmul.msk.bf16.gmra.mxu0 %vm323_vm2, %v3050_v34  ;;  %v768_v33 = vshrl.u32 %v3073_v45, 16  ;;  %v772_v34 = vshll.u32 %v634_v24, 16  ;;  %v1311_v35 = vshrl.u32 %v3094_v46, 16  ;;  %v3052_v46 = vld [vmem:[%s3210_s14 + $0x80] sm:$0xff] }
  0xfc   : > { %2813 = vmatmul.msk.bf16.gmra.mxu1 %vm323_vm2, %v759_v40 }
  0xfd   : > { %2922 = vmatmul.msk.bf16.gmra.mxu2 %vm323_vm2, %v1302_v41  ;;  %2119 = vrot.lane.b32.xlu2 %v3436_v43, %s3141_s25  ;;  %v770_v41 = vor.u32 %v768_v33, %v766_v62 }
  0xfe   : > { %3031 = vmatmul.msk.bf16.gmra.mxu3 %vm323_vm2, %v1753_v42  ;;  %v774_v42 = vrot.slane %v772_v34, 1 }
 0x100   : > { %v1433_v47 = vpop.f32.mrf.mxu2  ;;  %v416_v50 = vpop.f32.mrf.mxu0  ;;  %v775_v59 = vsel %vm635_vm1, %v770_v41, %v774_v42 }
 0x101   : > { %v1872_v48 = vpop.f32.mrf.mxu3  ;;  %v1534_v49 = vadd.f32 %v1433_v47, %v991_v44  ;;  %v892_v51 = vpop.f32.mrf.mxu1  ;;  %v1313_v44 = vor.u32 %v1311_v35, %v1309_v0  ;;  %v1317_v47 = vrot.slane %v1315_v36, 1 }
 0x102   : > { %v992_v3 = vadd.f32 %v892_v51, %v416_v50 }
 0x103   : > { %v3449_v60 = vadd.f32 %v1872_v48, %v1534_v49  ;;  %v1756_v48 = vrot.slane %v1721_v37, 1  ;;  %v1318_v61 = vsel %vm635_vm1, %v1313_v44, %v1317_v47 }
 0x105   : > { %2121 = vrot.lane.b32.xlu0 %v3449_v60, %s3141_s25  ;;  %v1757_v62 = vsel %vm1722_vm0, %v1754_v1, %v1756_v48 }
 0x108   : > { %v1435_v5 = vpop.f32.mrf.mxu2  ;;  %v419_v12 = vpop.f32.mrf.mxu0 }
 0x109   : > { %v1874_v7 = vpop.f32.mrf.mxu3  ;;  %v1535_v11 = vadd.f32 %v1435_v5, %v992_v3  ;;  %v895_v13 = vpop.f32.mrf.mxu1 }
 0x10a   : > { %v993_v22 = vadd.f32 %v895_v13, %v419_v12 }
 0x10b   : > { %v3460_v19 = vadd.f32 %v1874_v7, %v1535_v11  ;;  %2705 = vmatmul.msk.bf16.gmra.mxu0 %vm323_vm2, %v3051_v10 }
 0x10c   : > { %2814 = vmatmul.msk.bf16.gmra.mxu1 %vm323_vm2, %v767_v14 }
 0x10d   : > { %2923 = vmatmul.msk.bf16.gmra.mxu2 %vm323_vm2, %v1310_v16  ;;  %2123 = vrot.lane.b32.xlu1 %v3460_v19, %s3141_s25 }
 0x10e   : > { %3032 = vmatmul.msk.bf16.gmra.mxu3 %vm323_vm2, %v1755_v17 }
 0x110   : > { %v1438_v28 = vpop.f32.mrf.mxu2  ;;  %v421_v31 = vpop.f32.mrf.mxu0 }
 0x111   : > { %v1877_v29 = vpop.f32.mrf.mxu3  ;;  %v1536_v30 = vadd.f32 %v1438_v28, %v993_v22  ;;  %v897_v32 = vpop.f32.mrf.mxu1 }
 0x112   : > { %v994_v49 = vadd.f32 %v897_v32, %v421_v31 }
 0x113   : > { %v3469_v40 = vadd.f32 %v1877_v29, %v1536_v30 }
 0x115   : > { %2125 = vrot.lane.b32.xlu2 %v3469_v40, %s3141_s25 }
 0x117   : > { %v2098_v50 = vpop.permute.xlu0 %2097 }
 0x118   : > { %v3474_v51 = vmax.f32 %v3333_v57, %v2098_v50  ;;  %v1440_v45 = vpop.f32.mrf.mxu2  ;;  %v424_v58 = vpop.f32.mrf.mxu0 }
 0x119   : > { %v1879_v52 = vpop.f32.mrf.mxu3  ;;  %v1537_v55 = vadd.f32 %v1440_v45, %v994_v49  ;;  %v900_v56 = vpop.f32.mrf.mxu1 }
 0x11a   : > { %2267 = vrot.lane.b32.xlu1 %v3474_v51, %s3142_s26  ;;  %v995_v57 = vadd.f32 %v900_v56, %v424_v58 }
 0x11b   : > { %v3482_v63 = vadd.f32 %v1879_v52, %v1537_v55  ;;  %2706 = vmatmul.msk.bf16.gmra.mxu0 %vm323_vm2, %v3052_v46 }
 0x11c   : > { %2815 = vmatmul.msk.bf16.gmra.mxu1 %vm323_vm2, %v775_v59 }
 0x11d   : > { %2924 = vmatmul.msk.bf16.gmra.mxu2 %vm323_vm2, %v1318_v61  ;;  %2127 = vrot.lane.b32.xlu0 %v3482_v63, %s3141_s25 }
 0x11e   : > { %3033 = vmatmul.msk.bf16.gmra.mxu3 %vm323_vm2, %v1757_v62 }
 0x11f   : > { %v2100_v0 = vpop.permute.xlu0 %2099  ;;  %v2106_v22 = vpop.permute.xlu2 %2105 }
 0x120   : > { %v1443_v2 = vpop.f32.mrf.mxu2  ;;  %v3491_v3 = vmax.f32 %v3341_v9, %v2100_v0  ;;  %v426_v7 = vpop.f32.mrf.mxu0  ;;  %v3512_v31 = vmax.f32 %v3371_v53, %v2106_v22 }
 0x121   : > { %v1538_v1 = vadd.f32 %v1443_v2, %v995_v57  ;;  %v1882_v4 = vpop.f32.mrf.mxu3  ;;  %v902_v5 = vpop.f32.mrf.mxu1 }
 0x122   : > { %2269 = vrot.lane.b32.xlu2 %v3491_v3, %s3142_s26  ;;  %v996_v11 = vadd.f32 %v902_v5, %v426_v7 }
 0x123   : > { %v3493_v10 = vadd.f32 %v1882_v4, %v1538_v1 }
 0x125   : > { %2129 = vrot.lane.b32.xlu1 %v3493_v10, %s3141_s25 }
 0x127   : > { %v2102_v12 = vpop.permute.xlu1 %2101  ;;  %v2108_v33 = vpop.permute.xlu2 %2107 }
 0x128   : > { %v3500_v13 = vmax.f32 %v3352_v23, %v2102_v12  ;;  %v1445_v14 = vpop.f32.mrf.mxu2  ;;  %v429_v17 = vpop.f32.mrf.mxu0  ;;  %v3523_v53 = vmax.f32 %v3379_v6, %v2108_v33 }
 0x129   : > { %v1539_v9 = vadd.f32 %v1445_v14, %v996_v11  ;;  %v1884_v15 = vpop.f32.mrf.mxu3  ;;  %v905_v16 = vpop.f32.mrf.mxu1 }
 0x12a   : > { %2271 = vrot.lane.b32.xlu0 %v3500_v13, %s3142_s26  ;;  %v997_v20 = vadd.f32 %v905_v16, %v429_v17 }
 0x12b   : > { %v3504_v18 = vadd.f32 %v1884_v15, %v1539_v9 }
 0x12d   : > { %2131 = vrot.lane.b32.xlu2 %v3504_v18, %s3141_s25 }
 0x12f   : > { %v2104_v24 = vpop.permute.xlu1 %2103 }
 0x130   : > { %v1448_v26 = vpop.f32.mrf.mxu2  ;;  %v3509_v23 = vmax.f32 %v3360_v39, %v2104_v24  ;;  %v431_v30 = vpop.f32.mrf.mxu0 }
 0x131   : > { %v1540_v27 = vadd.f32 %v1448_v26, %v997_v20  ;;  %v1887_v28 = vpop.f32.mrf.mxu3  ;;  %v907_v29 = vpop.f32.mrf.mxu1 }
 0x132   : > { %2273 = vrot.lane.b32.xlu1 %v3509_v23, %s3142_s26  ;;  %v998_v39 = vadd.f32 %v907_v29, %v431_v30 }
 0x133   : > { %v3514_v32 = vadd.f32 %v1887_v28, %v1540_v27 }
 0x135   : > { %2275 = vrot.lane.b32.xlu2 %v3512_v31, %s3142_s26  ;;  %2133 = vrot.lane.b32.xlu0 %v3514_v32, %s3141_s25 }
 0x138   : > { %v1450_v34 = vpop.f32.mrf.mxu2  ;;  %v434_v41 = vpop.f32.mrf.mxu0 }
 0x139   : > { %v1541_v35 = vadd.f32 %v1450_v34, %v998_v39  ;;  %v1889_v36 = vpop.f32.mrf.mxu3  ;;  %v910_v37 = vpop.f32.mrf.mxu1 }
 0x13a   : > { %v999_v44 = vadd.f32 %v910_v37, %v434_v41 }
 0x13b   : > { %v3525_v42 = vadd.f32 %v1889_v36, %v1541_v35 }
 0x13d   : > { %2277 = vrot.lane.b32.xlu0 %v3523_v53, %s3142_s26  ;;  %2135 = vrot.lane.b32.xlu1 %v3525_v42, %s3141_s25 }
 0x13f   : > { %v2114_v2 = vpop.permute.xlu2 %2113 }
 0x140   : > { %v1453_v47 = vpop.f32.mrf.mxu2  ;;  %v436_v45 = vpop.f32.mrf.mxu0  ;;  %v3548_v14 = vmax.f32 %v3409_v54, %v2114_v2 }
 0x141   : > { %v1542_v48 = vadd.f32 %v1453_v47, %v999_v44  ;;  %v1892_v49 = vpop.f32.mrf.mxu3  ;;  %v912_v50 = vpop.f32.mrf.mxu1 }
 0x142   : > { %v1000_v6 = vadd.f32 %v912_v50, %v436_v45 }
 0x143   : > { %v3531_v52 = vadd.f32 %v1892_v49, %v1542_v48 }
 0x145   : > { %2137 = vrot.lane.b32.xlu2 %v3531_v52, %s3141_s25 }
 0x147   : > { %v2110_v46 = vpop.permute.xlu0 %2109 }
 0x148   : > { %v3536_v55 = vmax.f32 %v3390_v21, %v2110_v46  ;;  %v1455_v56 = vpop.f32.mrf.mxu2  ;;  %v439_v62 = vpop.f32.mrf.mxu0 }
 0x149   : > { %v1543_v58 = vadd.f32 %v1455_v56, %v1000_v6  ;;  %v1894_v59 = vpop.f32.mrf.mxu3  ;;  %v915_v61 = vpop.f32.mrf.mxu1 }
 0x14a   : > { %2279 = vrot.lane.b32.xlu1 %v3536_v55, %s3142_s26  ;;  %v1001_v0 = vadd.f32 %v915_v61, %v439_v62 }
 0x14b   : > { %v3540_v57 = vadd.f32 %v1894_v59, %v1543_v58 }
 0x14d   : > { %2139 = vrot.lane.b32.xlu0 %v3540_v57, %s3141_s25 }
 0x14f   : > { %v2112_v1 = vpop.permute.xlu1 %2111 }
 0x150   : > { %v1458_v4 = vpop.f32.mrf.mxu2  ;;  %v3545_v21 = vmax.f32 %v3398_v38, %v2112_v1  ;;  %v441_v12 = vpop.f32.mrf.mxu0 }
 0x151   : > { %v1544_v5 = vadd.f32 %v1458_v4, %v1001_v0  ;;  %v1897_v7 = vpop.f32.mrf.mxu3  ;;  %v917_v11 = vpop.f32.mrf.mxu1 }
 0x152   : > { %2281 = vrot.lane.b32.xlu2 %v3545_v21, %s3142_s26  ;;  %v1002_v38 = vadd.f32 %v917_v11, %v441_v12 }
 0x153   : > { %v3550_v9 = vadd.f32 %v1897_v7, %v1544_v5 }
 0x155   : > { %2283 = vrot.lane.b32.xlu0 %v3548_v14, %s3142_s26  ;;  %2141 = vrot.lane.b32.xlu1 %v3550_v9, %s3141_s25 }
 0x157   : > { %v2120_v37 = vpop.permute.xlu2 %2119 }
 0x158   : > { %v1460_v15 = vpop.f32.mrf.mxu2  ;;  %v444_v22 = vpop.f32.mrf.mxu0  ;;  %v3577_v50 = vmax.f32 %v3436_v43, %v2120_v37 }
 0x159   : > { %v1545_v16 = vadd.f32 %v1460_v15, %v1002_v38  ;;  %v1899_v17 = vpop.f32.mrf.mxu3  ;;  %v920_v20 = vpop.f32.mrf.mxu1  ;;  %v3599_v38 = vld [vmem:[%s3882_s2] ss:$0 sm:$0xff] }
 0x15a   : > { %v1003_v54 = vadd.f32 %v920_v20, %v444_v22 }
 0x15b   : > { %v3558_v24 = vadd.f32 %v1899_v17, %v1545_v16 }
 0x15d   : > { %2143 = vrot.lane.b32.xlu2 %v3558_v24, %s3141_s25 }
 0x15f   : > { %v2116_v26 = vpop.permute.xlu0 %2115 }
 0x160   : > { %v1463_v27 = vpop.f32.mrf.mxu2  ;;  %v3563_v28 = vmax.f32 %v3417_v8, %v2116_v26  ;;  %v446_v33 = vpop.f32.mrf.mxu0 }
 0x161   : > { %v1546_v29 = vadd.f32 %v1463_v27, %v1003_v54  ;;  %v1902_v30 = vpop.f32.mrf.mxu3  ;;  %v922_v39 = vpop.f32.mrf.mxu1 }
 0x162   : > { %2285 = vrot.lane.b32.xlu1 %v3563_v28, %s3142_s26  ;;  %v1004_v35 = vadd.f32 %v922_v39, %v446_v33 }
 0x163   : > { %v3565_v34 = vadd.f32 %v1902_v30, %v1546_v29 }
 0x165   : > { %2145 = vrot.lane.b32.xlu0 %v3565_v34, %s3141_s25 }
 0x167   : > { %v2118_v36 = vpop.permute.xlu1 %2117 }
 0x168   : > { %v3572_v41 = vmax.f32 %v3428_v25, %v2118_v36  ;;  %v1465_v8 = vpop.f32.mrf.mxu2  ;;  %v449_v49 = vpop.f32.mrf.mxu0 }
 0x169   : > { %v1547_v44 = vadd.f32 %v1465_v8, %v1004_v35  ;;  %v1904_v47 = vpop.f32.mrf.mxu3  ;;  %v925_v48 = vpop.f32.mrf.mxu1 }
 0x16a   : > { %2287 = vrot.lane.b32.xlu2 %v3572_v41, %s3142_s26  ;;  %v1005_v6 = vadd.f32 %v925_v48, %v449_v49 }
 0x16b   : > { %v3579_v45 = vadd.f32 %v1904_v47, %v1547_v44 }
 0x16d   : > { %2289 = vrot.lane.b32.xlu0 %v3577_v50, %s3142_s26  ;;  %2147 = vrot.lane.b32.xlu1 %v3579_v45, %s3141_s25 }
 0x16f   : > { %v2126_v62 = vpop.permute.xlu2 %2125 }
 0x170   : > { %v1468_v25 = vpop.f32.mrf.mxu2  ;;  %v451_v59 = vpop.f32.mrf.mxu0  ;;  %v3610_v33 = vmax.f32 %v3469_v40, %v2126_v62 }
 0x171   : > { %v1548_v46 = vadd.f32 %v1468_v25, %v1005_v6  ;;  %v1907_v56 = vpop.f32.mrf.mxu3  ;;  %v927_v58 = vpop.f32.mrf.mxu1 }
 0x172   : > { %v1006_v43 = vadd.f32 %v927_v58, %v451_v59 }
 0x173   : > { %v3585_v61 = vadd.f32 %v1907_v56, %v1548_v46 }
 0x175   : > { %2149 = vrot.lane.b32.xlu2 %v3585_v61, %s3141_s25 }
 0x177   : > { %v2122_v0 = vpop.permute.xlu0 %2121 }
 0x178   : > { %v3590_v2 = vmax.f32 %v3449_v60, %v2122_v0  ;;  %v1470_v1 = vpop.f32.mrf.mxu2  ;;  %v454_v11 = vpop.f32.mrf.mxu0 }
 0x179   : > { %v1549_v4 = vadd.f32 %v1470_v1, %v1006_v43  ;;  %v1909_v5 = vpop.f32.mrf.mxu3  ;;  %v930_v7 = vpop.f32.mrf.mxu1 }
 0x17a   : > { %2291 = vrot.lane.b32.xlu1 %v3590_v2, %s3142_s26  ;;  %v1007_v15 = vadd.f32 %v930_v7, %v454_v11 }
 0x17b   : > { %v3594_v12 = vadd.f32 %v1909_v5, %v1549_v4 }
 0x17c   : > { %v2270_v16 = vpop.permute.xlu2 %2269 }
 0x17d   : > { %2151 = vrot.lane.b32.xlu0 %v3594_v12, %s3141_s25  ;;  %v2370_v60 = vmax.f32 %v3491_v3, %v2270_v16 }
 0x17f   : > { %v2408_v17 = vadd.f32 %v3599_v38, %v2370_v60  ;;  %v2124_v20 = vpop.permute.xlu1 %2123 }
 0x180   : > { %v1473_v22 = vpop.f32.mrf.mxu2  ;;  %v3607_v54 = vmax.f32 %v3460_v19, %v2124_v20  ;;  %v456_v39 = vpop.f32.mrf.mxu0 }
 0x181   : > { %v1550_v26 = vadd.f32 %v1473_v22, %v1007_v15  ;;  %v1912_v27 = vpop.f32.mrf.mxu3  ;;  %v932_v29 = vpop.f32.mrf.mxu1  ;;  %v2442_v30 = vmax.f32 %v2408_v17, 0.0 }
 0x182   : > { %2293 = vrot.lane.b32.xlu2 %v3607_v54, %s3142_s26  ;;  %v1008_v40 = vadd.f32 %v932_v29, %v456_v39 }
 0x183   : > { %v3617_v3 = vadd.f32 %v1912_v27, %v1550_v26  ;;  %v2476_v19 = vpack.c.bf16 %v2442_v30, %v2442_v30 }
 0x185   : > { %2295 = vrot.lane.b32.xlu0 %v3610_v33, %s3142_s26  ;;  %2153 = vrot.lane.b32.xlu1 %v3617_v3, %s3141_s25  ;;  %2511 = vst.msk [vmem:[%s3615_s5 + $0x4] sm:$0xf] %vm2509_vm3, %v2476_v19 }
 0x187   : > { %v3627_v35 = vpop.permute.xlu2 %2131 }
 0x188   : > { %v1475_v36 = vpop.f32.mrf.mxu2  ;;  %v459_v47 = vpop.f32.mrf.mxu0 }
 0x189   : > { %v1551_v37 = vadd.f32 %v1475_v36, %v1008_v40  ;;  %v1914_v8 = vpop.f32.mrf.mxu3  ;;  %v935_v44 = vpop.f32.mrf.mxu1 }
 0x18a   : > { %v1009_v6 = vadd.f32 %v935_v44, %v459_v47 }
 0x18b   : > { %v3629_v48 = vadd.f32 %v1914_v8, %v1551_v37 }
 0x18c   : > { %v2268_v49 = vpop.permute.xlu1 %2267 }
 0x18d   : > { %v2369_v25 = vmax.f32 %v3474_v51, %v2268_v49  ;;  %2155 = vrot.lane.b32.xlu2 %v3629_v48, %s3141_s25 }
 0x18f   : > { %v2407_v46 = vadd.f32 %v3599_v38, %v2369_v25  ;;  %v2276_v56 = vpop.permute.xlu2 %2275  ;;  %v2128_v58 = vpop.permute.xlu0 %2127 }
 0x190   : > { %v2373_v59 = vmax.f32 %v3512_v31, %v2276_v56  ;;  %v1478_v62 = vpop.f32.mrf.mxu2  ;;  %v3637_v0 = vmax.f32 %v3482_v63, %v2128_v58  ;;  %v461_v7 = vpop.f32.mrf.mxu0 }
 0x191   : > { %v2441_v43 = vmax.f32 %v2407_v46, 0.0  ;;  %v1552_v1 = vadd.f32 %v1478_v62, %v1009_v6  ;;  %v1917_v4 = vpop.f32.mrf.mxu3  ;;  %v937_v5 = vpop.f32.mrf.mxu1 }
 0x192   : > { %v2411_v51 = vadd.f32 %v3599_v38, %v2373_v59  ;;  %2297 = vrot.lane.b32.xlu1 %v3637_v0, %s3142_s26  ;;  %v1010_v31 = vadd.f32 %v937_v5, %v461_v7 }
 0x193   : > { %v2475_v11 = vpack.c.bf16 %v2441_v43, %v2441_v43  ;;  %v3640_v15 = vadd.f32 %v1917_v4, %v1552_v1 }
 0x194   : > { %v2445_v16 = vmax.f32 %v2411_v51, 0.0 }
 0x195   : > { %2510 = vst.msk [vmem:[%s3615_s5] sm:$0xf] %vm2509_vm3, %v2475_v11  ;;  %2157 = vrot.lane.b32.xlu0 %v3640_v15, %s3141_s25 }
 0x196   : > { %v2479_v63 = vpack.c.bf16 %v2445_v16, %v2445_v16 }
 0x197   : > { %v2130_v30 = vpop.permute.xlu1 %2129 }
 0x198   : > { %2514 = vst.msk [vmem:[%s3615_s5 + $0x10] sm:$0xf] %vm2509_vm3, %v2479_v63  ;;  %v1480_v60 = vpop.f32.mrf.mxu2  ;;  %v464_v22 = vpop.f32.mrf.mxu0  ;;  %v3670_v7 = vmax.f32 %v3493_v10, %v2130_v30 }
 0x199   : > { %v1553_v17 = vadd.f32 %v1480_v60, %v1010_v31  ;;  %v1919_v20 = vpop.f32.mrf.mxu3  ;;  %v940_v26 = vpop.f32.mrf.mxu1 }
 0x19a   : > { %v1011_v39 = vadd.f32 %v940_v26, %v464_v22  ;;  %v3686_v22 = vmax.f32 %v3504_v18, %v3627_v35 }
 0x19b   : > { %v3650_v27 = vadd.f32 %v1919_v20, %v1553_v17 }
 0x19c   : > { %v2272_v29 = vpop.permute.xlu0 %2271 }
 0x19d   : > { %v2371_v19 = vmax.f32 %v3500_v13, %v2272_v29  ;;  %2159 = vrot.lane.b32.xlu1 %v3650_v27, %s3141_s25 }
 0x19f   : > { %v2409_v40 = vadd.f32 %v3599_v38, %v2371_v19  ;;  %v2138_v46 = vpop.permute.xlu2 %2137 }
 0x1a0   : > { %v1483_v36 = vpop.f32.mrf.mxu2  ;;  %v466_v6 = vpop.f32.mrf.mxu0  ;;  %v3700_v18 = vmax.f32 %v3531_v52, %v2138_v46 }
 0x1a1   : > { %v2443_v37 = vmax.f32 %v2409_v40, 0.0  ;;  %v1554_v8 = vadd.f32 %v1483_v36, %v1011_v39  ;;  %v1922_v44 = vpop.f32.mrf.mxu3  ;;  %v942_v25 = vpop.f32.mrf.mxu1 }
 0x1a2   : > { %v1012_v58 = vadd.f32 %v942_v25, %v466_v6 }
 0x1a3   : > { %v2477_v47 = vpack.c.bf16 %v2443_v37, %v2443_v37  ;;  %v3656_v49 = vadd.f32 %v1922_v44, %v1554_v8 }
 0x1a4   : > { %v2274_v56 = vpop.permute.xlu1 %2273 }
 0x1a5   : > { %2512 = vst.msk [vmem:[%s3615_s5 + $0x8] sm:$0xf] %vm2509_vm3, %v2477_v47  ;;  %2161 = vrot.lane.b32.xlu2 %v3656_v49, %s3141_s25  ;;  %v2372_v13 = vmax.f32 %v3509_v23, %v2274_v56 }
 0x1a7   : > { %v2134_v59 = vpop.permute.xlu0 %2133  ;;  %v2410_v62 = vadd.f32 %v3599_v38, %v2372_v13 }
 0x1a8   : > { %v3665_v43 = vmax.f32 %v3514_v32, %v2134_v59  ;;  %v1485_v1 = vpop.f32.mrf.mxu2 }
 0x1a9   : > { %v1555_v4 = vadd.f32 %v1485_v1, %v1012_v58  ;;  %v2444_v5 = vmax.f32 %v2410_v62, 0.0  ;;  %v1924_v51 = vpop.f32.mrf.mxu3 }
 0x1aa   : > { %2303 = vrot.lane.b32.xlu1 %v3665_v43, %s3142_s26 }
 0x1ab   : > { %v3672_v11 = vadd.f32 %v1924_v51, %v1555_v4  ;;  %v2478_v23 = vpack.c.bf16 %v2444_v5, %v2444_v5 }
 0x1ac   : > { %v2282_v16 = vpop.permute.xlu2 %2281 }
 0x1ad   : > { %2299 = vrot.lane.b32.xlu2 %v3670_v7, %s3142_s26  ;;  %2163 = vrot.lane.b32.xlu0 %v3672_v11, %s3141_s25  ;;  %2513 = vst.msk [vmem:[%s3615_s5 + $0xc] sm:$0xf] %vm2509_vm3, %v2478_v23  ;;  %v2376_v32 = vmax.f32 %v3545_v21, %v2282_v16 }
 0x1af   : > { %v2278_v63 = vpop.permute.xlu0 %2277  ;;  %v2414_v10 = vadd.f32 %v3599_v38, %v2376_v32  ;;  %v2136_v60 = vpop.permute.xlu1 %2135 }
 0x1b0   : > { %v2374_v31 = vmax.f32 %v3523_v53, %v2278_v63  ;;  %v3689_v26 = vmax.f32 %v3525_v42, %v2136_v60 }
 0x1b1   : > { %v2448_v17 = vmax.f32 %v2414_v10, 0.0 }
 0x1b2   : > { %v2412_v20 = vadd.f32 %v3599_v38, %v2374_v31 }
 0x1b3   : > { %v2482_v29 = vpack.c.bf16 %v2448_v17, %v2448_v17 }
 0x1b4   : > { %v2446_v30 = vmax.f32 %v2412_v20, 0.0 }
 0x1b5   : > { %2305 = vrot.lane.b32.xlu2 %v3689_v26, %s3142_s26  ;;  %2301 = vrot.lane.b32.xlu0 %v3686_v22, %s3142_s26  ;;  %2517 = vst.msk [vmem:[%s3615_s5 + $0x1c] sm:$0xf] %vm2509_vm3, %v2482_v29 }
 0x1b6   : > { %v2480_v53 = vpack.c.bf16 %v2446_v30, %v2446_v30 }
 0x1b7   : > { %v2144_v21 = vpop.permute.xlu2 %2143 }
 0x1b8   : > { %2515 = vst.msk [vmem:[%s3615_s5 + $0x14] sm:$0xf] %vm2509_vm3, %v2480_v53  ;;  %v3712_v52 = vmax.f32 %v3558_v24, %v2144_v21 }
 0x1bc   : > { %v2280_v42 = vpop.permute.xlu1 %2279 }
 0x1bd   : > { %v2375_v35 = vmax.f32 %v3536_v55, %v2280_v42  ;;  %2307 = vrot.lane.b32.xlu0 %v3700_v18, %s3142_s26 }
 0x1bf   : > { %v2413_v39 = vadd.f32 %v3599_v38, %v2375_v35  ;;  %v2140_v19 = vpop.permute.xlu0 %2139 }
 0x1c0   : > { %v3707_v40 = vmax.f32 %v3540_v57, %v2140_v19 }
 0x1c1   : > { %v2447_v36 = vmax.f32 %v2413_v39, 0.0 }
 0x1c2   : > { %2309 = vrot.lane.b32.xlu1 %v3707_v40, %s3142_s26 }
 0x1c3   : > { %v2481_v37 = vpack.c.bf16 %v2447_v36, %v2447_v36 }
 0x1c4   : > { %v2288_v8 = vpop.permute.xlu2 %2287 }
 0x1c5   : > { %2516 = vst.msk [vmem:[%s3615_s5 + $0x18] sm:$0xf] %vm2509_vm3, %v2481_v37  ;;  %v2379_v55 = vmax.f32 %v3572_v41, %v2288_v8  ;;  %2313 = vrot.lane.b32.xlu0 %v3712_v52, %s3142_s26 }
 0x1c7   : > { %v2417_v57 = vadd.f32 %v3599_v38, %v2379_v55  ;;  %v2284_v44 = vpop.permute.xlu0 %2283  ;;  %v2142_v47 = vpop.permute.xlu1 %2141 }
 0x1c8   : > { %v2377_v6 = vmax.f32 %v3548_v14, %v2284_v44  ;;  %v3722_v24 = vmax.f32 %v3550_v9, %v2142_v47 }
 0x1c9   : > { %v2451_v25 = vmax.f32 %v2417_v57, 0.0 }
 0x1ca   : > { %v2415_v46 = vadd.f32 %v3599_v38, %v2377_v6  ;;  %2311 = vrot.lane.b32.xlu2 %v3722_v24, %s3142_s26 }
 0x1cb   : > { %v2485_v56 = vpack.c.bf16 %v2451_v25, %v2451_v25 }
 0x1cc   : > { %v2449_v41 = vmax.f32 %v2415_v46, 0.0 }
 0x1cd   : > { %2520 = vst.msk [vmem:[%s3615_s5 + $0x28] sm:$0xf] %vm2509_vm3, %v2485_v56 }
 0x1ce   : > { %v2483_v13 = vpack.c.bf16 %v2449_v41, %v2449_v41 }
 0x1cf   : > { %v2150_v58 = vpop.permute.xlu2 %2149 }
 0x1d0   : > { %2518 = vst.msk [vmem:[%s3615_s5 + $0x20] sm:$0xf] %vm2509_vm3, %v2483_v13  ;;  %v3732_v14 = vmax.f32 %v3585_v61, %v2150_v58 }
 0x1d2   : > { %2319 = vrot.lane.b32.xlu0 %v3732_v14, %s3142_s26 }
 0x1d4   : > { %v2286_v9 = vpop.permute.xlu1 %2285 }
 0x1d5   : > { %v2378_v59 = vmax.f32 %v3563_v28, %v2286_v9 }
 0x1d7   : > { %v2146_v62 = vpop.permute.xlu0 %2145  ;;  %v2416_v1 = vadd.f32 %v3599_v38, %v2378_v59 }
 0x1d8   : > { %v3739_v4 = vmax.f32 %v3565_v34, %v2146_v62 }
 0x1d9   : > { %v2450_v5 = vmax.f32 %v2416_v1, 0.0 }
 0x1da   : > { %2315 = vrot.lane.b32.xlu1 %v3739_v4, %s3142_s26 }
 0x1db   : > { %v2484_v51 = vpack.c.bf16 %v2450_v5, %v2450_v5 }
 0x1dc   : > { %v2294_v61 = vpop.permute.xlu2 %2293 }
 0x1dd   : > { %2519 = vst.msk [vmem:[%s3615_s5 + $0x24] sm:$0xf] %vm2509_vm3, %v2484_v51  ;;  %v2382_v23 = vmax.f32 %v3607_v54, %v2294_v61 }
 0x1df   : > { %v2290_v16 = vpop.permute.xlu0 %2289  ;;  %v2148_v28 = vpop.permute.xlu1 %2147  ;;  %v2420_v32 = vadd.f32 %v3599_v38, %v2382_v23 }
 0x1e0   : > { %v2380_v63 = vmax.f32 %v3577_v50, %v2290_v16  ;;  %v3749_v34 = vmax.f32 %v3579_v45, %v2148_v28 }
 0x1e1   : > { %v2454_v10 = vmax.f32 %v2420_v32, 0.0 }
 0x1e2   : > { %v2418_v31 = vadd.f32 %v3599_v38, %v2380_v63  ;;  %2317 = vrot.lane.b32.xlu2 %v3749_v34, %s3142_s26 }
 0x1e3   : > { %v2488_v60 = vpack.c.bf16 %v2454_v10, %v2454_v10 }
 0x1e4   : > { %v2452_v17 = vmax.f32 %v2418_v31, 0.0 }
 0x1e5   : > { %2523 = vst.msk [vmem:[%s3615_s5 + $0x34] sm:$0xf] %vm2509_vm3, %v2488_v60 }
 0x1e6   : > { %v2486_v54 = vpack.c.bf16 %v2452_v17, %v2452_v17 }
 0x1e7   : > { %v2156_v20 = vpop.permute.xlu2 %2155 }
 0x1e8   : > { %2521 = vst.msk [vmem:[%s3615_s5 + $0x2c] sm:$0xf] %vm2509_vm3, %v2486_v54  ;;  %v3759_v50 = vmax.f32 %v3629_v48, %v2156_v20 }
 0x1ea   : > { %2325 = vrot.lane.b32.xlu0 %v3759_v50, %s3142_s26 }
 0x1ec   : > { %v2292_v45 = vpop.permute.xlu1 %2291 }
 0x1ed   : > { %v2381_v29 = vmax.f32 %v3590_v2, %v2292_v45 }
 0x1ef   : > { %v2419_v30 = vadd.f32 %v3599_v38, %v2381_v29  ;;  %v2152_v53 = vpop.permute.xlu0 %2151 }
 0x1f0   : > { %v3766_v21 = vmax.f32 %v3594_v12, %v2152_v53 }
 0x1f1   : > { %v2453_v42 = vmax.f32 %v2419_v30, 0.0 }
 0x1f2   : > { %2321 = vrot.lane.b32.xlu1 %v3766_v21, %s3142_s26 }
 0x1f3   : > { %v2487_v35 = vpack.c.bf16 %v2453_v42, %v2453_v42 }
 0x1f5   : > { %2522 = vst.msk [vmem:[%s3615_s5 + $0x30] sm:$0xf] %vm2509_vm3, %v2487_v35 }
 0x1f7   : > { %v2296_v48 = vpop.permute.xlu0 %2295  ;;  %v2154_v39 = vpop.permute.xlu1 %2153 }
 0x1f8   : > { %v2383_v19 = vmax.f32 %v3610_v33, %v2296_v48  ;;  %v3774_v2 = vmax.f32 %v3617_v3, %v2154_v39 }
 0x1fa   : > { %v2421_v36 = vadd.f32 %v3599_v38, %v2383_v19  ;;  %2323 = vrot.lane.b32.xlu2 %v3774_v2, %s3142_s26 }
 0x1fc   : > { %v2455_v12 = vmax.f32 %v2421_v36, 0.0 }
 0x1fe   : > { %v2489_v37 = vpack.c.bf16 %v2455_v12, %v2455_v12 }
 0x1ff   : > { %v2162_v8 = vpop.permute.xlu2 %2161 }
 0x200   : > { %2524 = vst.msk [vmem:[%s3615_s5 + $0x38] sm:$0xf] %vm2509_vm3, %v2489_v37  ;;  %v3782_v55 = vmax.f32 %v3656_v49, %v2162_v8 }
 0x202   : > { %2331 = vrot.lane.b32.xlu0 %v3782_v55, %s3142_s26 }
 0x204   : > { %v2298_v33 = vpop.permute.xlu1 %2297 }
 0x205   : > { %v2384_v3 = vmax.f32 %v3637_v0, %v2298_v33 }
 0x207   : > { %v2158_v57 = vpop.permute.xlu0 %2157  ;;  %v2300_v44 = vpop.permute.xlu2 %2299  ;;  %v2422_v47 = vadd.f32 %v3599_v38, %v2384_v3 }
 0x208   : > { %v3789_v6 = vmax.f32 %v3640_v15, %v2158_v57  ;;  %v2385_v25 = vmax.f32 %v3670_v7, %v2300_v44 }
 0x209   : > { %v2456_v46 = vmax.f32 %v2422_v47, 0.0 }
 0x20a   : > { %v2423_v49 = vadd.f32 %v3599_v38, %v2385_v25  ;;  %2327 = vrot.lane.b32.xlu1 %v3789_v6, %s3142_s26 }
 0x20b   : > { %v2490_v56 = vpack.c.bf16 %v2456_v46, %v2456_v46 }
 0x20c   : > { %v2457_v41 = vmax.f32 %v2423_v49, 0.0 }
 0x20d   : > { %2525 = vst.msk [vmem:[%s3615_s5 + $0x3c] sm:$0xf] %vm2509_vm3, %v2490_v56 }
 0x20e   : > { %v2491_v0 = vpack.c.bf16 %v2457_v41, %v2457_v41 }
 0x20f   : > { %v2160_v13 = vpop.permute.xlu1 %2159  ;;  %v2306_v58 = vpop.permute.xlu2 %2305 }
 0x210   : > { %2526 = vst.msk [vmem:[%s3615_s5 + $0x40] sm:$0xf] %vm2509_vm3, %v2491_v0  ;;  %v3800_v15 = vmax.f32 %v3650_v27, %v2160_v13  ;;  %v2388_v7 = vmax.f32 %v3689_v26, %v2306_v58 }
 0x212   : > { %v2426_v9 = vadd.f32 %v3599_v38, %v2388_v7  ;;  %2329 = vrot.lane.b32.xlu2 %v3800_v15, %s3142_s26 }
 0x214   : > { %v2460_v59 = vmax.f32 %v2426_v9, 0.0 }
 0x216   : > { %v2494_v62 = vpack.c.bf16 %v2460_v59, %v2460_v59 }
 0x218   : > { %2529 = vst.msk [vmem:[%s3615_s5 + $0x4c] sm:$0xf] %vm2509_vm3, %v2494_v62 }
 0x21c   : > { %v2304_v1 = vpop.permute.xlu1 %2303 }
 0x21d   : > { %v2387_v5 = vmax.f32 %v3665_v43, %v2304_v1 }
 0x21f   : > { %v2425_v51 = vadd.f32 %v3599_v38, %v2387_v5  ;;  %v2164_v27 = vpop.permute.xlu0 %2163 }
 0x220   : > { %v3811_v61 = vmax.f32 %v3672_v11, %v2164_v27 }
 0x221   : > { %v2459_v26 = vmax.f32 %v2425_v51, 0.0 }
 0x222   : > { %2333 = vrot.lane.b32.xlu1 %v3811_v61, %s3142_s26 }
 0x223   : > { %v2493_v23 = vpack.c.bf16 %v2459_v26, %v2459_v26 }
 0x224   : > { %v2312_v16 = vpop.permute.xlu2 %2311 }
 0x225   : > { %2528 = vst.msk [vmem:[%s3615_s5 + $0x48] sm:$0xf] %vm2509_vm3, %v2493_v23  ;;  %v2391_v28 = vmax.f32 %v3722_v24, %v2312_v16 }
 0x227   : > { %v2429_v43 = vadd.f32 %v3599_v38, %v2391_v28  ;;  %v2302_v32 = vpop.permute.xlu0 %2301 }
 0x228   : > { %v2386_v63 = vmax.f32 %v3686_v22, %v2302_v32 }
 0x229   : > { %v2463_v10 = vmax.f32 %v2429_v43, 0.0 }
 0x22a   : > { %v2424_v11 = vadd.f32 %v3599_v38, %v2386_v63 }
 0x22b   : > { %v2497_v31 = vpack.c.bf16 %v2463_v10, %v2463_v10 }
 0x22c   : > { %v2458_v60 = vmax.f32 %v2424_v11, 0.0 }
 0x22d   : > { %2532 = vst.msk [vmem:[%s3615_s5 + $0x58] sm:$0xf] %vm2509_vm3, %v2497_v31 }
 0x22e   : > { %v2492_v17 = vpack.c.bf16 %v2458_v60, %v2458_v60 }
 0x22f   : > { %v2308_v54 = vpop.permute.xlu0 %2307 }
 0x230   : > { %2527 = vst.msk [vmem:[%s3615_s5 + $0x44] sm:$0xf] %vm2509_vm3, %v2492_v17  ;;  %v2389_v24 = vmax.f32 %v3700_v18, %v2308_v54 }
 0x232   : > { %v2427_v20 = vadd.f32 %v3599_v38, %v2389_v24 }
 0x234   : > { %v2461_v45 = vmax.f32 %v2427_v20, 0.0  ;;  %v2310_v29 = vpop.permute.xlu1 %2309 }
 0x235   : > { %v2390_v22 = vmax.f32 %v3707_v40, %v2310_v29 }
 0x236   : > { %v2495_v30 = vpack.c.bf16 %v2461_v45, %v2461_v45 }
 0x237   : > { %v2428_v53 = vadd.f32 %v3599_v38, %v2390_v22  ;;  %v2314_v42 = vpop.permute.xlu0 %2313 }
 0x238   : > { %2530 = vst.msk [vmem:[%s3615_s5 + $0x50] sm:$0xf] %vm2509_vm3, %v2495_v30  ;;  %v2392_v35 = vmax.f32 %v3712_v52, %v2314_v42 }
 0x239   : > { %v2462_v48 = vmax.f32 %v2428_v53, 0.0 }
 0x23a   : > { %v2430_v39 = vadd.f32 %v3599_v38, %v2392_v35 }
 0x23b   : > { %v2496_v18 = vpack.c.bf16 %v2462_v48, %v2462_v48 }
 0x23c   : > { %v2464_v19 = vmax.f32 %v2430_v39, 0.0  ;;  %v2318_v36 = vpop.permute.xlu2 %2317 }
 0x23d   : > { %2531 = vst.msk [vmem:[%s3615_s5 + $0x54] sm:$0xf] %vm2509_vm3, %v2496_v18  ;;  %v2394_v40 = vmax.f32 %v3749_v34, %v2318_v36 }
 0x23e   : > { %v2498_v12 = vpack.c.bf16 %v2464_v19, %v2464_v19 }
 0x23f   : > { %v2432_v37 = vadd.f32 %v3599_v38, %v2394_v40 }
 0x240   : > { %2533 = vst.msk [vmem:[%s3615_s5 + $0x5c] sm:$0xf] %vm2509_vm3, %v2498_v12 }
 0x241   : > { %v2466_v8 = vmax.f32 %v2432_v37, 0.0 }
 0x243   : > { %v2500_v33 = vpack.c.bf16 %v2466_v8, %v2466_v8 }
 0x244   : > { %v2320_v52 = vpop.permute.xlu0 %2319 }
 0x245   : > { %2535 = vst.msk [vmem:[%s3615_s5 + $0x64] sm:$0xf] %vm2509_vm3, %v2500_v33  ;;  %v2395_v3 = vmax.f32 %v3732_v14, %v2320_v52 }
 0x247   : > { %v2433_v57 = vadd.f32 %v3599_v38, %v2395_v3 }
 0x249   : > { %v2467_v44 = vmax.f32 %v2433_v57, 0.0 }
 0x24b   : > { %v2501_v47 = vpack.c.bf16 %v2467_v44, %v2467_v44 }
 0x24c   : > { %v2316_v25 = vpop.permute.xlu1 %2315 }
 0x24d   : > { %2536 = vst.msk [vmem:[%s3615_s5 + $0x68] sm:$0xf] %vm2509_vm3, %v2501_v47  ;;  %v2393_v34 = vmax.f32 %v3739_v4, %v2316_v25 }
 0x24f   : > { %v2431_v46 = vadd.f32 %v3599_v38, %v2393_v34 }
 0x251   : > { %v2465_v49 = vmax.f32 %v2431_v46, 0.0 }
 0x253   : > { %v2499_v56 = vpack.c.bf16 %v2465_v49, %v2465_v49 }
 0x254   : > { %v2324_v41 = vpop.permute.xlu2 %2323 }
 0x255   : > { %2534 = vst.msk [vmem:[%s3615_s5 + $0x60] sm:$0xf] %vm2509_vm3, %v2499_v56  ;;  %v2397_v14 = vmax.f32 %v3774_v2, %v2324_v41 }
 0x257   : > { %v2435_v0 = vadd.f32 %v3599_v38, %v2397_v14 }
 0x259   : > { %v2469_v13 = vmax.f32 %v2435_v0, 0.0 }
 0x25b   : > { %v2503_v58 = vpack.c.bf16 %v2469_v13, %v2469_v13 }
 0x25c   : > { %v2326_v7 = vpop.permute.xlu0 %2325 }
 0x25d   : > { %2538 = vst.msk [vmem:[%s3615_s5 + $0x70] sm:$0xf] %vm2509_vm3, %v2503_v58  ;;  %v2398_v4 = vmax.f32 %v3759_v50, %v2326_v7 }
 0x25f   : > { %v2436_v9 = vadd.f32 %v3599_v38, %v2398_v4 }
 0x261   : > { %v2470_v59 = vmax.f32 %v2436_v9, 0.0 }
 0x263   : > { %v2504_v62 = vpack.c.bf16 %v2470_v59, %v2470_v59 }
 0x264   : > { %v2322_v1 = vpop.permute.xlu1 %2321 }
 0x265   : > { %2539 = vst.msk [vmem:[%s3615_s5 + $0x74] sm:$0xf] %vm2509_vm3, %v2504_v62  ;;  %v2396_v2 = vmax.f32 %v3766_v21, %v2322_v1 }
 0x267   : > { %v2434_v5 = vadd.f32 %v3599_v38, %v2396_v2 }
 0x269   : > { %v2468_v51 = vmax.f32 %v2434_v5, 0.0 }
 0x26b   : > { %v2502_v27 = vpack.c.bf16 %v2468_v51, %v2468_v51 }
 0x26c   : > { %v2330_v26 = vpop.permute.xlu2 %2329 }
 0x26d   : > { %2537 = vst.msk [vmem:[%s3615_s5 + $0x6c] sm:$0xf] %vm2509_vm3, %v2502_v27  ;;  %v2400_v50 = vmax.f32 %v3800_v15, %v2330_v26 }
 0x26f   : > { %v2438_v23 = vadd.f32 %v3599_v38, %v2400_v50 }
 0x271   : > { %v2472_v16 = vmax.f32 %v2438_v23, 0.0 }
 0x273   : > { %v2506_v28 = vpack.c.bf16 %v2472_v16, %v2472_v16 }
 0x274   : > { %v2332_v43 = vpop.permute.xlu0 %2331 }
 0x275   : > { %2541 = vst.msk [vmem:[%s3615_s5 + $0x7c] sm:$0xf] %vm2509_vm3, %v2506_v28  ;;  %v2401_v21 = vmax.f32 %v3782_v55, %v2332_v43 }
 0x277   : > { %v2439_v32 = vadd.f32 %v3599_v38, %v2401_v21 }
 0x279   : > { %v2473_v63 = vmax.f32 %v2439_v32, 0.0 }
 0x27b   : > { %v2507_v10 = vpack.c.bf16 %v2473_v63, %v2473_v63 }
 0x27c   : > { %v2328_v11 = vpop.permute.xlu1 %2327 }
 0x27d   : > { %2542 = vst.msk [vmem:[%s3615_s5 + $0x80] sm:$0xf] %vm2509_vm3, %v2507_v10  ;;  %v2399_v15 = vmax.f32 %v3789_v6, %v2328_v11 }
 0x27f   : > { %v2437_v31 = vadd.f32 %v3599_v38, %v2399_v15 }
 0x281   : > { %v2471_v60 = vmax.f32 %v2437_v31, 0.0 }
 0x283   : > { %v2505_v17 = vpack.c.bf16 %v2471_v60, %v2471_v60 }
 0x285   : > { %2540 = vst.msk [vmem:[%s3615_s5 + $0x78] sm:$0xf] %vm2509_vm3, %v2505_v17 }
 0x294   : > { %v2334_v54 = vpop.permute.xlu1 %2333 }
 0x295   : > { %v2402_v24 = vmax.f32 %v3811_v61, %v2334_v54 }
 0x297   : > { %v2440_v55 = vadd.f32 %v3599_v38, %v2402_v24 }
 0x299   : > { %v2474_v20 = vmax.f32 %v2440_v55, 0.0 }
 0x29b   : > { %v2508_v45 = vpack.c.bf16 %v2474_v20, %v2474_v20 }
 0x29d   : > { %2543 = vst.msk [vmem:[%s3615_s5 + $0x84] sm:$0xf] %vm2509_vm3, %v2508_v45 }
 0x29e PF: > { %s13_s12 = sadd.s32 1, %s3139_s12  }
 0x29f   : > { %p10_p4 = scmp.ge.s32.totalorder %s13_s12, 4  }
 0x2a1   :  { %12 = sbr.rel (!%p10_p4) target bundleno = 1 (0x1), region = 65 }

// kernel: cnn_forward.7
= control target key start
LH: loop header
LB: loop body
LE: loop exit
PB: predicated region body
PF: predicated region fallthrough
CT: control target
= control target key end

     0   :  { %s1448_s12 = smov 0   ;;  %s1643_s0 = inlined_call_operand.vmem [shape: bf16[2,88,128], index: 0, kind: input, shape index: {}]   ;;  %s1644_s1 = inlined_call_operand.vmem [shape: bf16[4,128,128], index: 1, kind: input, shape index: {}]   ;;  %s1645_s2 = inlined_call_operand.vmem [shape: f32[1,32], index: 2, kind: input, shape index: {}]   ;;  %s1646_s3 = inlined_call_operand.vmem [shape: bf16[2,72,32], index: 3, kind: output, shape index: {}]  }
   0x1 LB: > { %s1093_s13 = sadd.s32 4294967295, %s1424_s12   ;;  %p1097_p0 = scmp.ge.s32.totalorder %s1424_s12, 1  ;;  %s1424_s12 = sphi %s1448_s12, %s13_s12  }
   0x2   : > { %p137_p1 = scmp.lt.s32.totalorder %s1424_s12, 3 }
   0x4   : > { %p138_p2 = pnand %p1097_p0, %p137_p1 }
   0x5   : > { %p161_p3 = scmp.lt.s32.totalorder (!%p138_p2), %s1093_s13, 1  ;;  %s1427_s6 = smov (!%p138_p2), 64  }
   0x6   : > { %141 = sbr.rel (%p138_p2) target bundleno = 478 (0x1de), region = 32 }
   0xb   : > { %v1365_v0 = vld [vmem:[%s1644_s1 + $0x38] sm:$0xff]  ;;  %v1364_v4 = vld [vmem:[%s1644_s1 + $0x30] sm:$0xff]  ;;  %s1648_s13 = smov (!%p161_p3, %s1093_s13), 1  ;;  %v1363_v8 = vld [vmem:[%s1644_s1 + $0x28] sm:$0xff]  ;;  %vm366_vm0 = vsmask.f32 7424 }
   0xc   : > { %v1378_v1 = vld [vmem:[%s1644_s1 + $0x78] sm:$0xff]  ;;  %272 = vmatpush.bf16.msra.mxu0 %v1365_v0  ;;  %v1377_v5 = vld [vmem:[%s1644_s1 + $0x70] sm:$0xff]  ;;  %v1376_v9 = vld [vmem:[%s1644_s1 + $0x68] sm:$0xff]  ;;  %s1405_s11 = smul.u32 44, %s1648_s13  ;;  %vm775_vm1 = vcmask 1046528   ;;  %vm1028_vm2 = vcmask 257024  }
   0xd   : > { %v1391_v2 = vld [vmem:[%s1644_s1 + $0xb8] sm:$0xff]  ;;  %459 = vmatpush.bf16.msra.mxu1 %v1378_v1  ;;  %v1390_v6 = vld [vmem:[%s1644_s1 + $0xb0] sm:$0xff]  ;;  %v1389_v10 = vld [vmem:[%s1644_s1 + $0xa8] sm:$0xff]  ;;  %s1406_s9 = smul.u32 36, %s1648_s13 }
   0xe   : > { %v1404_v3 = vld [vmem:[%s1644_s1 + $0xf8] sm:$0xff]  ;;  %663 = vmatpush.bf16.msra.mxu2 %v1391_v2  ;;  %v1403_v7 = vld [vmem:[%s1644_s1 + $0xf0] sm:$0xff]  ;;  %v1402_v11 = vld [vmem:[%s1644_s1 + $0xe8] sm:$0xff]  ;;  %s1510_s24 = scalar_lea.vmem %s1643_s0, %s1405_s11 }
   0xf   : > { %838 = vmatpush.bf16.msra.mxu3 %v1404_v3  ;;  %v1362_v12 = vld [vmem:[%s1644_s1 + $0x20] sm:$0xff]  ;;  %v1361_v16 = vld [vmem:[%s1644_s1 + $0x18] sm:$0xff]  ;;  %v1360_v22 = vld [vmem:[%s1644_s1 + $0x10] sm:$0xff]  ;;  %s1620_s14 = scalar_lea.vmem %s1646_s3, %s1406_s9 }
  0x10   : > { %273 = vmatpush.bf16.msra.mxu0 %v1364_v4  ;;  %v1375_v13 = vld [vmem:[%s1644_s1 + $0x60] sm:$0xff]  ;;  %v1374_v17 = vld [vmem:[%s1644_s1 + $0x58] sm:$0xff]  ;;  %v1373_v23 = vld [vmem:[%s1644_s1 + $0x50] sm:$0xff] }
  0x11   : > { %460 = vmatpush.bf16.msra.mxu1 %v1377_v5  ;;  %v1388_v14 = vld [vmem:[%s1644_s1 + $0xa0] sm:$0xff]  ;;  %v1387_v18 = vld [vmem:[%s1644_s1 + $0x98] sm:$0xff]  ;;  %v1367_v24 = vld [vmem:[%s1510_s24 + $0x8] sm:$0xff] }
  0x12   : > { %664 = vmatpush.bf16.msra.mxu2 %v1390_v6  ;;  %v1401_v15 = vld [vmem:[%s1644_s1 + $0xe0] sm:$0xff]  ;;  %v1400_v20 = vld [vmem:[%s1644_s1 + $0xd8] sm:$0xff]  ;;  %v1386_v26 = vld [vmem:[%s1644_s1 + $0x90] sm:$0xff]  ;;  %v375_v36 = vshll.u32 %v1367_v24, 16  ;;  %v379_v60 = vshrl.u32 %v1367_v24, 16 }
  0x13   : > { %839 = vmatpush.bf16.msra.mxu3 %v1403_v7  ;;  %v1366_v19 = vld [vmem:[%s1510_s24] sm:$0xff]  ;;  %v1399_v27 = vld [vmem:[%s1644_s1 + $0xd0] sm:$0xff]  ;;  %v1392_v31 = vld [vmem:[%s1510_s24 + $0x4] sm:$0xf0] }
  0x14   : > { %274 = vmatpush.bf16.msra.mxu0 %v1363_v8  ;;  %v1379_v21 = vld [vmem:[%s1510_s24 + $0x4] sm:$0xff]  ;;  %v370_v25 = vshll.u32 %v1366_v19, 16  ;;  %v1380_v28 = vld [vmem:[%s1510_s24 + $0xc] sm:$0xff]  ;;  %v368_v34 = vshrl.u32 %v1366_v19, 16  ;;  %v377_v47 = vrot.slane %v375_v36, 1  ;;  %v1381_v59 = vld [vmem:[%s1510_s24 + $0x14] sm:$0xff] }
  0x15   : > { %461 = vmatpush.bf16.msra.mxu1 %v1376_v9  ;;  %v574_v29 = vshll.u32 %v1379_v21, 16  ;;  %v1302_v30 = vld [vmem:[%s1510_s24 + $0x4] sm:$0xe]  ;;  %v1359_v32 = vld [vmem:[%s1644_s1 + $0x8] sm:$0xff]  ;;  %v572_v39 = vshrl.u32 %v1379_v21, 16  ;;  %v579_v41 = vshll.u32 %v1380_v28, 16 }
  0x16   : > { %665 = vmatpush.bf16.msra.mxu2 %v1389_v10  ;;  %v1372_v33 = vld [vmem:[%s1644_s1 + $0x48] sm:$0xff]  ;;  %v372_v35 = vrot.slane %v370_v25, 1  ;;  %v1303_v43 = vor.u32 %v1392_v31, %v1302_v30  ;;  %v1358_v44 = vld [vmem:[%s1644_s1] sm:$0xff]  ;;  %v1368_v58 = vld [vmem:[%s1510_s24 + $0x10] sm:$0xff]  ;;  %v583_v62 = vshrl.u32 %v1380_v28, 16  ;;  %v587_v63 = vshll.u32 %v1381_v59, 16 }
  0x17   : > { %840 = vmatpush.bf16.msra.mxu3 %v1402_v11  ;;  %v1385_v37 = vld [vmem:[%s1644_s1 + $0x88] sm:$0xff]  ;;  %v576_v40 = vrot.slane %v574_v29, 1  ;;  %v1371_v45 = vld [vmem:[%s1644_s1 + $0x40] sm:$0xff]  ;;  %v581_v51 = vrot.slane %v579_v41, 1  ;;  %v383_v61 = vshll.u32 %v1368_v58, 16  ;;  %v1394_v0 = vld [vmem:[%s1510_s24 + $0x14] sm:$0xff]  ;;  %v381_v1 = vor.u32 %v379_v60, %v377_v47 }
  0x18   : > { %275 = vmatpush.bf16.msra.mxu0 %v1362_v12  ;;  %v1398_v38 = vld [vmem:[%s1644_s1 + $0xc8] sm:$0xff]  ;;  %v373_v46 = vor.u32 %v372_v35, %v368_v34  ;;  %v1384_v48 = vld [vmem:[%s1644_s1 + $0x80] sm:$0xff]  ;;  %v776_v52 = vrot.slane %v1303_v43, 1  ;;  %v589_v4 = vrot.slane %v587_v63, 1  ;;  %v779_v5 = vrot.slane %v1394_v0, 1  ;;  %v1369_v10 = vld [vmem:[%s1510_s24 + $0x18] sm:$0xff] }
  0x19   : > { %462 = vmatpush.bf16.msra.mxu1 %v1375_v13  ;;  %v1393_v42 = vld [vmem:[%s1510_s24 + $0xc] sm:$0xff]  ;;  %v1397_v49 = vld [vmem:[%s1644_s1 + $0xc0] sm:$0xff]  ;;  %v577_v50 = vor.u32 %v576_v40, %v572_v39  ;;  %v385_v2 = vrot.slane %v383_v61, 1  ;;  %v585_v3 = vor.u32 %v583_v62, %v581_v51  ;;  %v387_v12 = vshrl.u32 %v1368_v58, 16  ;;  %v1383_v29 = vld [vmem:[%s1510_s24 + $0x24] sm:$0x10] }
  0x1a   : > { %666 = vmatpush.bf16.msra.mxu2 %v1388_v14  ;;  %v777_v53 = vrot.slane %v1393_v42, 1  ;;  %v1354_v54 = vld [vmem:[%s1510_s24] sm:$0xff]  ;;  %v378_v55 = vsel %vm366_vm0, %v373_v46, %v377_v47  ;;  %v1355_v6 = vld [vmem:[%s1510_s24 + $0x8] sm:$0xff]  ;;  %v391_v13 = vshll.u32 %v1369_v10, 16  ;;  %v591_v14 = vshrl.u32 %v1381_v59, 16 }
  0x1b   : > { %841 = vmatpush.bf16.msra.mxu3 %v1401_v15  ;;  %v582_v56 = vsel %vm366_vm0, %v577_v50, %v581_v51  ;;  %v386_v7 = vsel %vm366_vm0, %v381_v1, %v385_v2  ;;  %v590_v8 = vsel %vm366_vm0, %v585_v3, %v589_v4  ;;  %v1382_v11 = vld [vmem:[%s1510_s24 + $0x1c] sm:$0xff]  ;;  %v1250_v28 = vld [vmem:[%s1510_s24 + $0x24] sm:$0xf]  ;;  %v395_v34 = vshrl.u32 %v1369_v10, 16 }
  0x1c   : > { %276 = vmatpush.bf16.msra.mxu0 %v1361_v16  ;;  %v778_v57 = vsel %vm775_vm1, %v776_v52, %v777_v53  ;;  %v780_v9 = vsel %vm775_vm1, %v777_v53, %v779_v5  ;;  %v595_v15 = vshll.u32 %v1382_v11, 16  ;;  %v1395_v16 = vld [vmem:[%s1510_s24 + $0x1c] sm:$0xff]  ;;  %v593_v19 = vor.u32 %v591_v14, %v589_v4 }
  0x1d   : > { %463 = vmatpush.bf16.msra.mxu1 %v1374_v17  ;;  %v389_v17 = vor.u32 %v387_v12, %v385_v2  ;;  %v781_v21 = vrot.slane %v1395_v16, 1  ;;  %v1251_v31 = vor.u32 %v1383_v29, %v1250_v28  ;;  %v599_v36 = vshrl.u32 %v1382_v11, 16 }
  0x1e   : > { %667 = vmatpush.bf16.msra.mxu2 %v1387_v18  ;;  %v393_v18 = vrot.slane %v391_v13, 1 }
  0x1f   : > { %842 = vmatpush.bf16.msra.mxu3 %v1400_v20  ;;  %v597_v20 = vrot.slane %v595_v15, 1  ;;  %v782_v25 = vsel %vm775_vm1, %v779_v5, %v781_v21  ;;  %v607_v51 = vshrl.u32 %v1251_v31, 16 }
  0x20   : > { %277 = vmatpush.bf16.msra.mxu0 %v1360_v22  ;;  %v1356_v22 = vld [vmem:[%s1510_s24 + $0x10] sm:$0xff]  ;;  %v397_v39 = vor.u32 %v395_v34, %v393_v18 }
  0x21   : > { %464 = vmatpush.bf16.msra.mxu1 %v1373_v23  ;;  %v394_v23 = vsel %vm366_vm0, %v389_v17, %v393_v18  ;;  %v598_v24 = vsel %vm366_vm0, %v593_v19, %v597_v20  ;;  %v601_v41 = vor.u32 %v599_v36, %v597_v20 }
  0x22   : > { %668 = vmatpush.bf16.msra.mxu2 %v1386_v26  ;;  %v1182_v26 = vld [vmem:[%s1510_s24 + $0x20] sm:$0xf] }
  0x23   : > { %843 = vmatpush.bf16.msra.mxu3 %v1399_v27  ;;  %v1370_v27 = vld [vmem:[%s1510_s24 + $0x20] sm:$0x10] }
  0x24   : > { %278 = vmatpush.bf16.msra.mxu0 %v1359_v32  ;;  %v1183_v30 = vor.u32 %v1370_v27, %v1182_v26  ;;  %v1318_v32 = vld [vmem:[%s1510_s24 + $0x24] sm:$0xf] }
  0x25   : > { %465 = vmatpush.bf16.msra.mxu1 %v1372_v33  ;;  %v1396_v33 = vld [vmem:[%s1510_s24 + $0x24] sm:$0x10] }
  0x26   : > { %669 = vmatpush.bf16.msra.mxu2 %v1385_v37  ;;  %v399_v35 = vshll.u32 %v1183_v30, 16  ;;  %v603_v37 = vshll.u32 %v1251_v31, 16  ;;  %v403_v50 = vshrl.u32 %v1183_v30, 16 }
  0x27   : > { %844 = vmatpush.bf16.msra.mxu3 %v1398_v38  ;;  %v1319_v38 = vor.u32 %v1396_v33, %v1318_v32 }
  0x28   : > { %279 = vmatpush.bf16.msra.mxu0 %v1358_v44  ;;  %v401_v40 = vrot.slane %v399_v35, 1  ;;  %v605_v42 = vrot.slane %v603_v37, 1  ;;  %v1357_v44 = vld [vmem:[%s1510_s24 + $0x18] sm:$0xff] }
  0x29   : > { %466 = vmatpush.bf16.msra.mxu1 %v1371_v45  ;;  %v783_v43 = vrot.slane %v1319_v38, 1 }
  0x2a   : > { %670 = vmatpush.bf16.msra.mxu2 %v1384_v48  ;;  %v402_v45 = vsel %vm366_vm0, %v397_v39, %v401_v40  ;;  %v606_v46 = vsel %vm366_vm0, %v601_v41, %v605_v42  ;;  %v179_v48 = vld [vmem:[%s1510_s24 + $0x20] sm:$0xf]  ;;  %v405_v53 = vor.u32 %v403_v50, %v401_v40  ;;  %s1426_s24 = smov 96  }
  0x2b   : > { %845 = vmatpush.bf16.msra.mxu3 %v1397_v49  ;;  %280 = vmatmul.bf16.vlgmr.msra.gmra.mxu0 %v1354_v54  ;;  %v784_v47 = vsel %vm775_vm1, %v781_v21, %v783_v43  ;;  %v213_v49 = vunpack.c.l.b16 %v179_v48  ;;  %v609_v54 = vor.u32 %v607_v51, %v605_v42 }
  0x2c   : > { %467 = vmatmul.bf16.vlgmr.msra.gmra.mxu1 %v378_v55 }
  0x2d   : > { %671 = vmatmul.bf16.vlgmr.msra.gmra.mxu2 %v582_v56  ;;  %v218_v52 = vpack.c.b16 %v213_v49, %v213_v49 }
  0x2e   : > { %846 = vmatmul.bf16.vlgmr.msra.gmra.mxu3 %v778_v57 }
  0x3b   : > { %285 = vmatmul.bf16.gmra.mxu0 %v1355_v6 }
  0x3c   : > { %472 = vmatmul.bf16.gmra.mxu1 %v386_v7 }
  0x3d   : > { %676 = vmatmul.bf16.gmra.mxu2 %v590_v8 }
  0x3e   : > { %851 = vmatmul.bf16.gmra.mxu3 %v780_v9 }
  0x4b   : > { %290 = vmatmul.bf16.gmra.mxu0 %v1356_v22 }
  0x4c   : > { %477 = vmatmul.bf16.gmra.mxu1 %v394_v23 }
  0x4d   : > { %681 = vmatmul.bf16.gmra.mxu2 %v598_v24 }
  0x4e   : > { %856 = vmatmul.bf16.gmra.mxu3 %v782_v25 }
  0x5b   : > { %295 = vmatmul.bf16.gmra.mxu0 %v1357_v44 }
  0x5c   : > { %482 = vmatmul.bf16.gmra.mxu1 %v402_v45 }
  0x5d   : > { %686 = vmatmul.bf16.gmra.mxu2 %v606_v46 }
  0x5e   : > { %861 = vmatmul.bf16.gmra.mxu3 %v784_v47 }
  0x6b   : > { %300 = vmatmul.bf16.gmra.mxu0 %v218_v52 }
  0x6c   : > { %487 = vmatmul.bf16.gmra.mxu1 %v405_v53 }
  0x6d   : > { %691 = vmatmul.bf16.gmra.mxu2 %v609_v54 }
  0x6e   : > { %866 = vmatmul.bf16.gmra.mxu3 %v783_v43 }
  0xa8   : > { %v281_v55 = vpop.f32.mrf.mxu0 }
  0xa9   : > { %v468_v56 = vpop.f32.mrf.mxu1 }
  0xaa   : > { %v501_v57 = vadd.f32 %v468_v56, %v281_v55 }
  0xb0   : > { %v672_v58 = vpop.f32.mrf.mxu2  ;;  %v283_v61 = vpop.f32.mrf.mxu0 }
  0xb1   : > { %v847_v59 = vpop.f32.mrf.mxu3  ;;  %v705_v60 = vadd.f32 %v672_v58, %v501_v57  ;;  %v470_v62 = vpop.f32.mrf.mxu1 }
  0xb2   : > { %v502_v0 = vadd.f32 %v470_v62, %v283_v61 }
  0xb3   : > { %v1596_v63 = vadd.f32 %v847_v59, %v705_v60 }
  0xb5   : > { %916 = vrot.lane.b32.xlu0 %v1596_v63, %s1426_s24 }
  0xb8   : > { %v674_v1 = vpop.f32.mrf.mxu2  ;;  %v286_v4 = vpop.f32.mrf.mxu0 }
  0xb9   : > { %v849_v2 = vpop.f32.mrf.mxu3  ;;  %v706_v3 = vadd.f32 %v674_v1, %v502_v0  ;;  %v473_v5 = vpop.f32.mrf.mxu1 }
  0xba   : > { %v503_v7 = vadd.f32 %v473_v5, %v286_v4 }
  0xbb   : > { %v1600_v6 = vadd.f32 %v849_v2, %v706_v3 }
  0xbd   : > { %918 = vrot.lane.b32.xlu0 %v1600_v6, %s1426_s24 }
  0xc0   : > { %v677_v8 = vpop.f32.mrf.mxu2  ;;  %v288_v11 = vpop.f32.mrf.mxu0 }
  0xc1   : > { %v852_v9 = vpop.f32.mrf.mxu3  ;;  %v707_v10 = vadd.f32 %v677_v8, %v503_v7  ;;  %v475_v12 = vpop.f32.mrf.mxu1 }
  0xc2   : > { %v504_v14 = vadd.f32 %v475_v12, %v288_v11  ;;  %v1417_v12 = vld [vmem:[%s1645_s2] ss:$0 sm:$0xff] }
  0xc3   : > { %v882_v13 = vadd.f32 %v852_v9, %v707_v10 }
  0xc5   : > { %920 = vrot.lane.b32.xlu1 %v882_v13, %s1426_s24 }
  0xc8   : > { %v679_v15 = vpop.f32.mrf.mxu2  ;;  %v291_v18 = vpop.f32.mrf.mxu0 }
  0xc9   : > { %v854_v16 = vpop.f32.mrf.mxu3  ;;  %v708_v17 = vadd.f32 %v679_v15, %v504_v14  ;;  %v478_v19 = vpop.f32.mrf.mxu1 }
  0xca   : > { %v505_v21 = vadd.f32 %v478_v19, %v291_v18 }
  0xcb   : > { %v883_v20 = vadd.f32 %v854_v16, %v708_v17 }
  0xcd   : > { %922 = vrot.lane.b32.xlu1 %v883_v20, %s1426_s24 }
  0xd0   : > { %v682_v22 = vpop.f32.mrf.mxu2  ;;  %v293_v25 = vpop.f32.mrf.mxu0 }
  0xd1   : > { %v857_v23 = vpop.f32.mrf.mxu3  ;;  %v709_v24 = vadd.f32 %v682_v22, %v505_v21  ;;  %v480_v26 = vpop.f32.mrf.mxu1 }
  0xd2   : > { %v506_v28 = vadd.f32 %v480_v26, %v293_v25 }
  0xd3   : > { %v884_v27 = vadd.f32 %v857_v23, %v709_v24 }
  0xd5   : > { %924 = vrot.lane.b32.xlu2 %v884_v27, %s1426_s24 }
  0xd8   : > { %v684_v29 = vpop.f32.mrf.mxu2  ;;  %v296_v32 = vpop.f32.mrf.mxu0 }
  0xd9   : > { %v859_v30 = vpop.f32.mrf.mxu3  ;;  %v710_v31 = vadd.f32 %v684_v29, %v506_v28  ;;  %v483_v33 = vpop.f32.mrf.mxu1 }
  0xda   : > { %v507_v35 = vadd.f32 %v483_v33, %v296_v32 }
  0xdb   : > { %v885_v34 = vadd.f32 %v859_v30, %v710_v31 }
  0xdd   : > { %926 = vrot.lane.b32.xlu2 %v885_v34, %s1426_s24 }
  0xe0   : > { %v687_v36 = vpop.f32.mrf.mxu2  ;;  %v298_v39 = vpop.f32.mrf.mxu0 }
  0xe1   : > { %v862_v37 = vpop.f32.mrf.mxu3  ;;  %v711_v38 = vadd.f32 %v687_v36, %v507_v35  ;;  %v485_v40 = vpop.f32.mrf.mxu1 }
  0xe2   : > { %v508_v42 = vadd.f32 %v485_v40, %v298_v39 }
  0xe3   : > { %v886_v41 = vadd.f32 %v862_v37, %v711_v38 }
  0xe5   : > { %928 = vrot.lane.b32.xlu0 %v886_v41, %s1426_s24 }
  0xe8   : > { %v689_v43 = vpop.f32.mrf.mxu2  ;;  %v301_v46 = vpop.f32.mrf.mxu0 }
  0xe9   : > { %v864_v44 = vpop.f32.mrf.mxu3  ;;  %v712_v45 = vadd.f32 %v689_v43, %v508_v42  ;;  %v488_v47 = vpop.f32.mrf.mxu1 }
  0xea   : > { %v509_v49 = vadd.f32 %v488_v47, %v301_v46 }
  0xeb   : > { %v887_v48 = vadd.f32 %v864_v44, %v712_v45 }
  0xed   : > { %930 = vrot.lane.b32.xlu1 %v887_v48, %s1426_s24 }
  0xf0   : > { %v692_v50 = vpop.f32.mrf.mxu2  ;;  %v303_v53 = vpop.f32.mrf.mxu0 }
  0xf1   : > { %v867_v51 = vpop.f32.mrf.mxu3  ;;  %v713_v52 = vadd.f32 %v692_v50, %v509_v49  ;;  %v490_v54 = vpop.f32.mrf.mxu1 }
  0xf3   : > { %v888_v55 = vadd.f32 %v867_v51, %v713_v52 }
  0xf5   : > { %932 = vrot.lane.b32.xlu2 %v888_v55, %s1426_s24 }
  0xf8   : > { %v694_v56 = vpop.f32.mrf.mxu2 }
  0xf9   : > { %v869_v57 = vpop.f32.mrf.mxu3 }
 0x127   : > { %v917_v58 = vpop.permute.xlu0 %916 }
 0x128   : > { %v943_v59 = vmax.f32 %v1596_v63, %v917_v58 }
 0x12a   : > { %961 = vrot.lane.b32.xlu0 %v943_v59, %s1427_s6 }
 0x12f   : > { %v919_v60 = vpop.permute.xlu0 %918  ;;  %v925_v62 = vpop.permute.xlu2 %924 }
 0x130   : > { %v944_v61 = vmax.f32 %v1600_v6, %v919_v60  ;;  %v947_v1 = vmax.f32 %v884_v27, %v925_v62 }
 0x132   : > { %963 = vrot.lane.b32.xlu1 %v944_v61, %s1427_s6 }
 0x137   : > { %v921_v0 = vpop.permute.xlu1 %920  ;;  %v927_v3 = vpop.permute.xlu2 %926 }
 0x138   : > { %v945_v2 = vmax.f32 %v882_v13, %v921_v0  ;;  %v948_v5 = vmax.f32 %v885_v34, %v927_v3 }
 0x13a   : > { %969 = vrot.lane.b32.xlu1 %v947_v1, %s1427_s6  ;;  %965 = vrot.lane.b32.xlu2 %v945_v2, %s1427_s6 }
 0x13f   : > { %v923_v4 = vpop.permute.xlu1 %922 }
 0x140   : > { %v946_v7 = vmax.f32 %v883_v20, %v923_v4 }
 0x142   : > { %967 = vrot.lane.b32.xlu0 %v946_v7, %s1427_s6  ;;  %971 = vrot.lane.b32.xlu2 %v948_v5, %s1427_s6 }
 0x14f   : > { %v933_v63 = vpop.permute.xlu2 %932 }
 0x150   : > { %v951_v8 = vmax.f32 %v888_v55, %v933_v63 }
 0x152   : > { %977 = vrot.lane.b32.xlu2 %v951_v8, %s1427_s6 }
 0x157   : > { %v929_v9 = vpop.permute.xlu0 %928 }
 0x158   : > { %v949_v10 = vmax.f32 %v886_v41, %v929_v9 }
 0x15a   : > { %973 = vrot.lane.b32.xlu0 %v949_v10, %s1427_s6 }
 0x15f   : > { %v931_v6 = vpop.permute.xlu1 %930 }
 0x160   : > { %v950_v11 = vmax.f32 %v887_v48, %v931_v6 }
 0x162   : > { %975 = vrot.lane.b32.xlu1 %v950_v11, %s1427_s6 }
 0x194   : > { %v966_v13 = vpop.permute.xlu2 %965 }
 0x195   : > { %v990_v14 = vmax.f32 %v945_v2, %v966_v13 }
 0x197   : > { %v1003_v15 = vadd.f32 %v1417_v12, %v990_v14 }
 0x199   : > { %v1012_v16 = vmax.f32 %v1003_v15, 0.0 }
 0x19b   : > { %v1021_v17 = vpack.c.bf16 %v1012_v16, %v1012_v16 }
 0x19c   : > { %v962_v18 = vpop.permute.xlu0 %961  ;;  %v972_v19 = vpop.permute.xlu2 %971 }
 0x19d   : > { %1031 = vst.msk [vmem:[%s1620_s14 + $0x8] sm:$0xf] %vm1028_vm2, %v1021_v17  ;;  %v988_v20 = vmax.f32 %v943_v59, %v962_v18  ;;  %v993_v21 = vmax.f32 %v948_v5, %v972_v19 }
 0x19f   : > { %v1001_v22 = vadd.f32 %v1417_v12, %v988_v20  ;;  %v1006_v23 = vadd.f32 %v1417_v12, %v993_v21 }
 0x1a1   : > { %v1010_v24 = vmax.f32 %v1001_v22, 0.0  ;;  %v1015_v25 = vmax.f32 %v1006_v23, 0.0 }
 0x1a3   : > { %v1019_v26 = vpack.c.bf16 %v1010_v24, %v1010_v24  ;;  %v1024_v27 = vpack.c.bf16 %v1015_v25, %v1015_v25 }
 0x1a4   : > { %v964_v28 = vpop.permute.xlu1 %963 }
 0x1a5   : > { %1029 = vst.msk [vmem:[%s1620_s14] sm:$0xf] %vm1028_vm2, %v1019_v26  ;;  %v989_v29 = vmax.f32 %v944_v61, %v964_v28 }
 0x1a6   : > { %1034 = vst.msk [vmem:[%s1620_s14 + $0x14] sm:$0xf] %vm1028_vm2, %v1024_v27 }
 0x1a7   : > { %v1002_v30 = vadd.f32 %v1417_v12, %v989_v29 }
 0x1a9   : > { %v1011_v31 = vmax.f32 %v1002_v30, 0.0 }
 0x1ab   : > { %v1020_v32 = vpack.c.bf16 %v1011_v31, %v1011_v31 }
 0x1ac   : > { %v970_v33 = vpop.permute.xlu1 %969  ;;  %v978_v34 = vpop.permute.xlu2 %977 }
 0x1ad   : > { %1030 = vst.msk [vmem:[%s1620_s14 + $0x4] sm:$0xf] %vm1028_vm2, %v1020_v32  ;;  %v992_v35 = vmax.f32 %v947_v1, %v970_v33  ;;  %v996_v36 = vmax.f32 %v951_v8, %v978_v34 }
 0x1af   : > { %v1005_v37 = vadd.f32 %v1417_v12, %v992_v35  ;;  %v1009_v38 = vadd.f32 %v1417_v12, %v996_v36 }
 0x1b1   : > { %v1014_v39 = vmax.f32 %v1005_v37, 0.0  ;;  %v1018_v40 = vmax.f32 %v1009_v38, 0.0 }
 0x1b3   : > { %v1023_v41 = vpack.c.bf16 %v1014_v39, %v1014_v39  ;;  %v1027_v42 = vpack.c.bf16 %v1018_v40, %v1018_v40 }
 0x1b4   : > { %v968_v43 = vpop.permute.xlu0 %967 }
 0x1b5   : > { %1033 = vst.msk [vmem:[%s1620_s14 + $0x10] sm:$0xf] %vm1028_vm2, %v1023_v41  ;;  %v991_v44 = vmax.f32 %v946_v7, %v968_v43 }
 0x1b6   : > { %1037 = vst.msk [vmem:[%s1620_s14 + $0x20] sm:$0xf] %vm1028_vm2, %v1027_v42 }
 0x1b7   : > { %v1004_v45 = vadd.f32 %v1417_v12, %v991_v44 }
 0x1b9   : > { %v1013_v46 = vmax.f32 %v1004_v45, 0.0 }
 0x1bb   : > { %v1022_v47 = vpack.c.bf16 %v1013_v46, %v1013_v46 }
 0x1bd   : > { %1032 = vst.msk [vmem:[%s1620_s14 + $0xc] sm:$0xf] %vm1028_vm2, %v1022_v47 }
 0x1cc   : > { %v974_v48 = vpop.permute.xlu0 %973 }
 0x1cd   : > { %v994_v49 = vmax.f32 %v949_v10, %v974_v48 }
 0x1cf   : > { %v1007_v50 = vadd.f32 %v1417_v12, %v994_v49 }
 0x1d1   : > { %v1016_v51 = vmax.f32 %v1007_v50, 0.0 }
 0x1d3   : > { %v1025_v52 = vpack.c.bf16 %v1016_v51, %v1016_v51 }
 0x1d4   : > { %v976_v53 = vpop.permute.xlu1 %975 }
 0x1d5   : > { %1035 = vst.msk [vmem:[%s1620_s14 + $0x18] sm:$0xf] %vm1028_vm2, %v1025_v52  ;;  %v995_v54 = vmax.f32 %v950_v11, %v976_v53 }
 0x1d7   : > { %v1008_v55 = vadd.f32 %v1417_v12, %v995_v54 }
 0x1d9   : > { %v1017_v56 = vmax.f32 %v1008_v55, 0.0 }
 0x1db   : > { %v1026_v57 = vpack.c.bf16 %v1017_v56, %v1017_v56 }
 0x1dd   : > { %1036 = vst.msk [vmem:[%s1620_s14 + $0x1c] sm:$0xf] %vm1028_vm2, %v1026_v57 }
 0x1de PF: > { %s13_s12 = sadd.s32 1, %s1424_s12  }
 0x1df   : > { %p10_p4 = scmp.ge.s32.totalorder %s13_s12, 4  }
 0x1e1   :  { %12 = sbr.rel (!%p10_p4) target bundleno = 1 (0x1), region = 65 }

// kernel: cnn_forward.8
= control target key start
LH: loop header
LB: loop body
LE: loop exit
PB: predicated region body
PF: predicated region fallthrough
CT: control target
= control target key end

     0   :  { %s1025_s12 = smov 0   ;;  %s1163_s0 = inlined_call_operand.vmem [shape: bf16[2,32,128], index: 0, kind: input, shape index: {}]   ;;  %s1164_s1 = inlined_call_operand.vmem [shape: bf16[4,128,128], index: 1, kind: input, shape index: {}]   ;;  %s1165_s2 = inlined_call_operand.vmem [shape: f32[1,32], index: 2, kind: input, shape index: {}]   ;;  %s1166_s3 = inlined_call_operand.vmem [shape: bf16[2,20,32], index: 3, kind: output, shape index: {}]  }
   0x1 LB: > { %s734_s13 = sadd.s32 4294967295, %s1001_s12   ;;  %p738_p0 = scmp.ge.s32.totalorder %s1001_s12, 1  ;;  %s1001_s12 = sphi %s1025_s12, %s13_s12  }
   0x2   : > { %p137_p1 = scmp.lt.s32.totalorder %s1001_s12, 3 }
   0x4   : > { %p138_p2 = pnand %p738_p0, %p137_p1 }
   0x5   : > { %p161_p3 = scmp.lt.s32.totalorder (!%p138_p2), %s734_s13, 1  ;;  %s1003_s6 = smov (!%p138_p2), 96  }
   0x6   : > { %141 = sbr.rel (%p138_p2) target bundleno = 440 (0x1b8), region = 32 }
   0xb   : > { %v953_v0 = vld [vmem:[%s1164_s1 + $0x38] sm:$0xff]  ;;  %v952_v3 = vld [vmem:[%s1164_s1 + $0x30] sm:$0xff]  ;;  %s1168_s13 = smov (!%p161_p3, %s734_s13), 1  ;;  %v951_v8 = vld [vmem:[%s1164_s1 + $0x28] sm:$0xff]  ;;  %vm297_vm0 = vsmask.f32 7424 }
   0xc   : > { %v962_v1 = vld [vmem:[%s1164_s1 + $0x78] sm:$0xff]  ;;  %248 = vmatpush.bf16.msra.mxu0 %v953_v0  ;;  %v961_v4 = vld [vmem:[%s1164_s1 + $0x70] sm:$0xff]  ;;  %s944_s30 = sshll.u32 %s1168_s13, 4  ;;  %v960_v9 = vld [vmem:[%s1164_s1 + $0x68] sm:$0xff]  ;;  %vm421_vm1 = vsmask.f32 5376 }
   0xd   : > { %v972_v2 = vld [vmem:[%s1164_s1 + $0xb8] sm:$0xff]  ;;  %363 = vmatpush.bf16.msra.mxu1 %v962_v1  ;;  %v971_v5 = vld [vmem:[%s1164_s1 + $0xb0] sm:$0xff]  ;;  %v970_v10 = vld [vmem:[%s1164_s1 + $0xa8] sm:$0xff]  ;;  %s1072_s14 = scalar_lea.vmem %s1163_s0, %s944_s30  ;;  %vm547_vm2 = vcmask 1044480   ;;  %s983_s9 = smul.u32 12, %s1168_s13  ;;  %vm674_vm3 = vcmask 257024  }
   0xe   : > { %489 = vmatpush.bf16.msra.mxu2 %v972_v2  ;;  %v982_v6 = vld [vmem:[%s1164_s1 + $0xf8] sm:$0xff]  ;;  %v981_v7 = vld [vmem:[%s1164_s1 + $0xf0] sm:$0xff]  ;;  %v980_v11 = vld [vmem:[%s1164_s1 + $0xe8] sm:$0xff]  ;;  %vm677_vm4 = vcmask 254976  }
   0xf   : > { %601 = vmatpush.bf16.msra.mxu3 %v982_v6  ;;  %v950_v12 = vld [vmem:[%s1164_s1 + $0x20] sm:$0xff]  ;;  %v271_v15 = vld [vmem:[%s1072_s14 + $0x8] sm:$0x7]  ;;  %v964_v19 = vld [vmem:[%s1072_s14 + $0x8] sm:$0x10]  ;;  %s170_s15 = scalar_lea.vmem %s1166_s3, %s983_s9 }
  0x10   : > { %249 = vmatpush.bf16.msra.mxu0 %v952_v3  ;;  %v959_v13 = vld [vmem:[%s1164_s1 + $0x60] sm:$0xff]  ;;  %v852_v18 = vld [vmem:[%s1072_s14 + $0x8] sm:$0xf]  ;;  %v949_v21 = vld [vmem:[%s1164_s1 + $0x18] sm:$0xff]  ;;  %v294_v24 = vunpack.c.l.b16 %v271_v15 }
  0x11   : > { %364 = vmatpush.bf16.msra.mxu1 %v961_v4  ;;  %v969_v14 = vld [vmem:[%s1164_s1 + $0xa0] sm:$0xff]  ;;  %v958_v22 = vld [vmem:[%s1164_s1 + $0x58] sm:$0xff]  ;;  %v853_v27 = vor.u32 %v964_v19, %v852_v18  ;;  %v948_v29 = vld [vmem:[%s1164_s1 + $0x10] sm:$0xff] }
  0x12   : > { %490 = vmatpush.bf16.msra.mxu2 %v971_v5  ;;  %v848_v16 = vld [vmem:[%s1072_s14] sm:$0xc]  ;;  %v963_v17 = vld [vmem:[%s1072_s14] sm:$0xf0]  ;;  %v968_v25 = vld [vmem:[%s1164_s1 + $0x98] sm:$0xff]  ;;  %v1113_v31 = vpack.c.b16 %v294_v24, %v294_v24 }
  0x13   : > { %602 = vmatpush.bf16.msra.mxu3 %v981_v7  ;;  %v979_v20 = vld [vmem:[%s1164_s1 + $0xe0] sm:$0xff]  ;;  %v849_v26 = vor.u32 %v963_v17, %v848_v16  ;;  %v978_v28 = vld [vmem:[%s1164_s1 + $0xd8] sm:$0xff]  ;;  %v957_v30 = vld [vmem:[%s1164_s1 + $0x50] sm:$0xff]  ;;  %v431_v36 = vshrl.u32 %v853_v27, 16  ;;  %v434_v37 = vshll.u32 %v853_v27, 16 }
  0x14   : > { %250 = vmatpush.bf16.msra.mxu0 %v951_v8  ;;  %v954_v23 = vld [vmem:[%s1072_s14] sm:$0xff]  ;;  %v967_v33 = vld [vmem:[%s1164_s1 + $0x90] sm:$0xff]  ;;  %v947_v38 = vld [vmem:[%s1164_s1 + $0x8] sm:$0xff]  ;;  %v306_v45 = vshll.u32 %v1113_v31, 16  ;;  %v310_v8 = vshrl.u32 %v1113_v31, 16 }
  0x15   : > { %365 = vmatpush.bf16.msra.mxu1 %v960_v9  ;;  %v301_v32 = vshll.u32 %v954_v23, 16  ;;  %v423_v34 = vshrl.u32 %v849_v26, 16  ;;  %v426_v35 = vshll.u32 %v849_v26, 16  ;;  %v956_v39 = vld [vmem:[%s1164_s1 + $0x48] sm:$0xff]  ;;  %v299_v41 = vshrl.u32 %v954_v23, 16  ;;  %v977_v42 = vld [vmem:[%s1164_s1 + $0xd0] sm:$0xff] }
  0x16   : > { %491 = vmatpush.bf16.msra.mxu2 %v970_v10  ;;  %v966_v40 = vld [vmem:[%s1164_s1 + $0x88] sm:$0xff]  ;;  %v904_v43 = vld [vmem:[%s1072_s14] sm:$0x8]  ;;  %v973_v46 = vld [vmem:[%s1072_s14] sm:$0xf0]  ;;  %v433_v50 = vrot.slane %v431_v36, 2 }
  0x17   : > { %603 = vmatpush.bf16.msra.mxu3 %v980_v11  ;;  %v303_v44 = vrot.slane %v301_v32, 1  ;;  %v908_v47 = vld [vmem:[%s1072_s14 + $0x8] sm:$0xf]  ;;  %v425_v48 = vrot.slane %v423_v34, 2  ;;  %v428_v49 = vrot.slane %v426_v35, 3  ;;  %v436_v51 = vrot.slane %v434_v37, 3 }
  0x18   : > { %251 = vmatpush.bf16.msra.mxu0 %v950_v12  ;;  %v974_v52 = vld [vmem:[%s1072_s14 + $0x8] sm:$0x10]  ;;  %v946_v54 = vld [vmem:[%s1164_s1] sm:$0xff]  ;;  %v308_v57 = vrot.slane %v306_v45, 1  ;;  %v905_v58 = vor.u32 %v973_v46, %v904_v43  ;;  %v173_v6 = vld [vmem:[%s1072_s14 + $0x8] sm:$0x3] }
  0x19   : > { %366 = vmatpush.bf16.msra.mxu1 %v959_v13  ;;  %v976_v53 = vld [vmem:[%s1164_s1 + $0xc8] sm:$0xff]  ;;  %v955_v55 = vld [vmem:[%s1164_s1 + $0x40] sm:$0xff]  ;;  %v304_v56 = vor.u32 %v303_v44, %v299_v41  ;;  %v909_v59 = vor.u32 %v974_v52, %v908_v47  ;;  %v429_v61 = vor.u32 %v428_v49, %v425_v48  ;;  %v437_v62 = vor.u32 %v436_v51, %v433_v50 }
  0x1a   : > { %492 = vmatpush.bf16.msra.mxu2 %v969_v14  ;;  %v965_v60 = vld [vmem:[%s1164_s1 + $0x80] sm:$0xff]  ;;  %v548_v2 = vrot.slane %v905_v58, 3  ;;  %v195_v7 = vunpack.c.l.b16 %v173_v6  ;;  %v312_v10 = vor.u32 %v310_v8, %v308_v57 }
  0x1b   : > { %604 = vmatpush.bf16.msra.mxu3 %v979_v20  ;;  %v945_v63 = vld [vmem:[%s1072_s14] sm:$0xff]  ;;  %v309_v0 = vsel %vm297_vm0, %v304_v56, %v308_v57  ;;  %v549_v3 = vrot.slane %v909_v59, 3  ;;  %v438_v4 = vsel %vm421_vm1, %v429_v61, %v437_v62  ;;  %s1004_s14 = smov 64  }
  0x1c   : > { %252 = vmatpush.bf16.msra.mxu0 %v949_v21  ;;  %v975_v1 = vld [vmem:[%s1164_s1 + $0xc0] sm:$0xff]  ;;  %v197_v9 = vpack.c.b16 %v195_v7, %v195_v7 }
  0x1d   : > { %367 = vmatpush.bf16.msra.mxu1 %v958_v22  ;;  %v550_v5 = vsel %vm547_vm2, %v548_v2, %v549_v3  ;;  %v994_v46 = vld [vmem:[%s1165_s2] ss:$0 sm:$0xff] }
  0x1e   : > { %493 = vmatpush.bf16.msra.mxu2 %v968_v25 }
  0x1f   : > { %605 = vmatpush.bf16.msra.mxu3 %v978_v28 }
  0x20   : > { %253 = vmatpush.bf16.msra.mxu0 %v948_v29 }
  0x21   : > { %368 = vmatpush.bf16.msra.mxu1 %v957_v30 }
  0x22   : > { %494 = vmatpush.bf16.msra.mxu2 %v967_v33 }
  0x23   : > { %606 = vmatpush.bf16.msra.mxu3 %v977_v42 }
  0x24   : > { %254 = vmatpush.bf16.msra.mxu0 %v947_v38 }
  0x25   : > { %369 = vmatpush.bf16.msra.mxu1 %v956_v39 }
  0x26   : > { %495 = vmatpush.bf16.msra.mxu2 %v966_v40 }
  0x27   : > { %607 = vmatpush.bf16.msra.mxu3 %v976_v53 }
  0x28   : > { %255 = vmatpush.bf16.msra.mxu0 %v946_v54 }
  0x29   : > { %370 = vmatpush.bf16.msra.mxu1 %v955_v55 }
  0x2a   : > { %496 = vmatpush.bf16.msra.mxu2 %v965_v60 }
  0x2b   : > { %256 = vmatmul.bf16.vlgmr.msra.gmra.mxu0 %v945_v63  ;;  %608 = vmatpush.bf16.msra.mxu3 %v975_v1 }
  0x2c   : > { %371 = vmatmul.bf16.vlgmr.msra.gmra.mxu1 %v309_v0 }
  0x2d   : > { %497 = vmatmul.bf16.vlgmr.msra.gmra.mxu2 %v438_v4 }
  0x2e   : > { %609 = vmatmul.bf16.vlgmr.msra.gmra.mxu3 %v550_v5 }
  0x3b   : > { %261 = vmatmul.bf16.gmra.mxu0 %v197_v9 }
  0x3c   : > { %376 = vmatmul.bf16.gmra.mxu1 %v312_v10 }
  0x3d   : > { %502 = vmatmul.bf16.gmra.mxu2 %v437_v62 }
  0x3e   : > { %614 = vmatmul.bf16.gmra.mxu3 %v549_v3 }
  0xa8   : > { %v257_v11 = vpop.f32.mrf.mxu0 }
  0xa9   : > { %v372_v12 = vpop.f32.mrf.mxu1 }
  0xaa   : > { %v384_v13 = vadd.f32 %v372_v12, %v257_v11 }
  0xb0   : > { %v498_v14 = vpop.f32.mrf.mxu2  ;;  %v259_v15 = vpop.f32.mrf.mxu0 }
  0xb1   : > { %v374_v16 = vpop.f32.mrf.mxu1  ;;  %v510_v17 = vadd.f32 %v498_v14, %v384_v13  ;;  %v610_v18 = vpop.f32.mrf.mxu3 }
  0xb2   : > { %v385_v20 = vadd.f32 %v374_v16, %v259_v15 }
  0xb3   : > { %v622_v19 = vadd.f32 %v610_v18, %v510_v17 }
  0xb5   : > { %634 = vrot.lane.b32.xlu0 %v622_v19, %s1003_s6 }
  0xb8   : > { %v500_v21 = vpop.f32.mrf.mxu2  ;;  %v262_v22 = vpop.f32.mrf.mxu0 }
  0xb9   : > { %v511_v23 = vadd.f32 %v500_v21, %v385_v20  ;;  %v377_v24 = vpop.f32.mrf.mxu1  ;;  %268 = vst [vmem:[#allocation2 + $0x8] sm:$0xf] %v262_v22  ;;  %v612_v25 = vpop.f32.mrf.mxu3 }
  0xbb   : > { %v623_v26 = vadd.f32 %v612_v25, %v511_v23 }
  0xbd   : > { %636 = vrot.lane.b32.xlu0 %v623_v26, %s1003_s6 }
  0xc0   : > { %v503_v27 = vpop.f32.mrf.mxu2  ;;  %v264_v28 = vpop.f32.mrf.mxu0  ;;  %v383_v29 = vld [vmem:[#allocation2 + $0x8] sm:$0xf] }
  0xc1   : > { %v379_v30 = vpop.f32.mrf.mxu1  ;;  %v386_v31 = vadd.f32 %v383_v29, %v377_v24  ;;  %v615_v32 = vpop.f32.mrf.mxu3 }
  0xc3   : > { %389 = vst [vmem:[#allocation2 + $0x8] sm:$0xf] %v386_v31 }
  0xc8   : > { %v505_v33 = vpop.f32.mrf.mxu2 }
  0xc9   : > { %v617_v35 = vpop.f32.mrf.mxu3 }
  0xca   : > { %v509_v34 = vld [vmem:[#allocation2 + $0x8] sm:$0xf] }
  0xcb   : > { %v512_v36 = vadd.f32 %v509_v34, %v503_v27 }
  0xcd   : > { %515 = vst [vmem:[#allocation2 + $0x8] sm:$0xf] %v512_v36 }
  0xd4   : > { %v621_v37 = vld [vmem:[#allocation2 + $0x8] sm:$0xf] }
  0xd5   : > { %v624_v38 = vadd.f32 %v621_v37, %v615_v32 }
  0xd7   : > { %627 = vst [vmem:[#allocation2 + $0x8] sm:$0xf] %v624_v38 }
  0xde   : > { %v630_v39 = vld [vmem:[#allocation2 + $0x8] sm:$0xf] }
  0xdf   : > { %638 = vrot.lane.b32.xlu1 %v630_v39, %s1003_s6 }
 0x127   : > { %v635_v40 = vpop.permute.xlu0 %634 }
 0x128   : > { %v643_v41 = vmax.f32 %v622_v19, %v635_v40 }
 0x12a   : > { %649 = vrot.lane.b32.xlu1 %v643_v41, %s1004_s14 }
 0x12f   : > { %v637_v42 = vpop.permute.xlu0 %636 }
 0x130   : > { %v644_v43 = vmax.f32 %v623_v26, %v637_v42 }
 0x132   : > { %651 = vrot.lane.b32.xlu2 %v644_v43, %s1004_s14 }
 0x151   : > { %v639_v44 = vpop.permute.xlu1 %638 }
 0x152   : > { %v645_v45 = vmax.f32 %v630_v39, %v639_v44 }
 0x154   : > { %653 = vrot.lane.b32.xlu2 %v645_v45, %s1004_s14 }
 0x18c   : > { %v652_v47 = vpop.permute.xlu2 %651 }
 0x18d   : > { %v659_v48 = vmax.f32 %v644_v43, %v652_v47 }
 0x18f   : > { %v666_v49 = vadd.f32 %v994_v46, %v659_v48 }
 0x191   : > { %v669_v50 = vmax.f32 %v666_v49, 0.0 }
 0x193   : > { %v672_v51 = vpack.c.bf16 %v669_v50, %v669_v50 }
 0x195   : > { %676 = vst.msk [vmem:[%s170_s15 + $0x4] sm:$0xf] %vm674_vm3, %v672_v51 }
 0x19c   : > { %v650_v52 = vpop.permute.xlu1 %649 }
 0x19d   : > { %v658_v53 = vmax.f32 %v643_v41, %v650_v52 }
 0x19f   : > { %v665_v54 = vadd.f32 %v994_v46, %v658_v53 }
 0x1a1   : > { %v668_v55 = vmax.f32 %v665_v54, 0.0 }
 0x1a3   : > { %v671_v56 = vpack.c.bf16 %v668_v55, %v668_v55 }
 0x1a5   : > { %675 = vst.msk [vmem:[%s170_s15] sm:$0xf] %vm674_vm3, %v671_v56 }
 0x1ae   : > { %v654_v57 = vpop.permute.xlu2 %653 }
 0x1af   : > { %v660_v58 = vmax.f32 %v645_v45, %v654_v57 }
 0x1b1   : > { %v667_v59 = vadd.f32 %v994_v46, %v660_v58 }
 0x1b3   : > { %v670_v60 = vmax.f32 %v667_v59, 0.0 }
 0x1b5   : > { %v673_v61 = vpack.c.bf16 %v670_v60, %v670_v60 }
 0x1b7   : > { %678 = vst.msk [vmem:[%s170_s15 + $0x8] sm:$0x3] %vm677_vm4, %v673_v61 }
 0x1b8 PF: > { %s13_s12 = sadd.s32 1, %s1001_s12  }
 0x1b9   : > { %p10_p4 = scmp.ge.s32.totalorder %s13_s12, 4  }
 0x1bb   :  { %12 = sbr.rel (!%p10_p4) target bundleno = 1 (0x1), region = 65 }

// kernel: cnn_forward.9
= control target key start
LH: loop header
LB: loop body
LE: loop exit
PB: predicated region body
PF: predicated region fallthrough
CT: control target
= control target key end

     0   :  { %8 = vsyncpa [#allocation5], 0  ;;  %s479_s12 = smov 0   ;;  %s481_s13 = smov 0   ;;  %s530_s0 = inlined_call_operand.vmem [shape: bf16[2,512], index: 0, kind: input, shape index: {}]   ;;  %s531_s1 = inlined_call_operand.vmem [shape: bf16[10,512], index: 1, kind: input, shape index: {}]   ;;  %s532_s2 = inlined_call_operand.vmem [shape: f32[1,10], index: 2, kind: input, shape index: {}]   ;;  %s533_s3 = inlined_call_operand.hbm [shape: f32[2,10], index: 3, kind: output, shape index: {}]  }
   0x1   :  { %s483_s14 = smov 0  }
   0x2 LB: > { %s492_s15 = sadd.s32 4294967295, %s455_s14   ;;  %s494_s16 = sadd.s32 1, %s455_s14   ;;  %s455_s14 = sphi %s483_s14, %s536_s14   ;;  %s451_s13 = sphi %s481_s13, %s535_s13   ;;  %s447_s12 = sphi %s479_s12, %s534_s12  }
   0x3   : > { %s44_s17 = ssub.s32 %s455_s14, %s494_s16  ;;  %s47_s18 = sadd.s32 1, %s451_s13 }
   0x4   : > { %p45_p0 = scmp.eq.s32.totalorder %s44_s17, 0  ;;  %p54_p1 = scmp.ne.s32.totalorder %s451_s13, %s447_s12 }
   0x5   : > { %p55_p2 = scmp.eq.s32.totalorder %s455_s14, 0  ;;  %p345_p4 = scmp.ge.s32.totalorder %s455_s14, 2 }
   0x6   : > { %s501_s19 = scalar_select %p45_p0, %s451_s13, %s47_s18  }
   0x7   : > { %p56_p3 = por %p55_p2, %p54_p1  ;;  %125 = sbr.rel (%p345_p4) target bundleno = 18 (0x12), region = 20 }
   0xc   : > { %136 = sbr.rel (!%p56_p3) target bundleno = 18 (0x12), region = 28  ;;  %s138_s20 = sand.u32 (%p56_p3), 1, %s451_s13  }
   0xd   : > { %s365_s21 = sshll.u32 (%p56_p3), %s455_s14, 3  ;;  %s346_s22 = sshll.u32 (%p56_p3), %s138_s20, 4 }
   0xe   : > { %s143_s25 = scalar_lea.vmem (%p56_p3), %s531_s1, %s365_s21  ;;  %s140_s26 = scalar_lea.vmem (%p56_p3), [#allocation3], %s346_s22 }
   0xf   : > { %v174_v0 = vld [vmem:[%s143_s25] sm:$0xff] (%p56_p3)  ;;  %v176_v1 = vld [vmem:[%s143_s25 + $0x10] sm:$0xff] (%p56_p3) }
  0x10   : > { %175 = vst [vmem:[%s140_s26] sm:$0xff] (%p56_p3), %v174_v0 }
  0x11   : > { %177 = vst [vmem:[%s140_s26 + $0x8] sm:$0xff] %v176_v1 }
  0x12 PF: > { %p349_p5 = scmp.ge.s32.totalorder %s455_s14, 1  ;;  %p182_p6 = scmp.lt.s32.totalorder %s455_s14, 3 }
  0x14   : > { %p183_p7 = pnand %p349_p5, %p182_p6 }
  0x15   : > { %s189_s27 = sand.u32 (!%p183_p7), 1, %s447_s12   ;;  %s351_s28 = sshll.u32 (!%p183_p7), %s492_s15, 1 }
  0x16   : > { %186 = sbr.rel (%p183_p7) target bundleno = 189 (0xbd), region = 66  ;;  %s350_s29 = sshll.u32 (!%p183_p7), %s189_s27, 4 }
  0x17   : > { %p212_p8 = scmp.lt.s32.totalorder (!%p183_p7), %s351_s28, 3  ;;  %s191_s6 = scalar_lea.vmem (!%p183_p7), [#allocation3], %s350_s29 }
  0x18   : > { %p352_p9 = scmp.ne.s32.totalorder (!%p183_p7), %s492_s15, 0 }
  0x1b   : > { %s538_s28 = smov (!%p212_p8, %s351_s28), 3  ;;  %221 = sbr.rel (%p352_p9) target bundleno = 34 (0x22), region = 74 }
  0x1c   : > { %s214_s5 = scalar_lea.vmem %s530_s0, %s538_s28 }
  0x20   : > { %vm222_vm0 = vcmask 74752   ;;  %v457_v2 = vmov 0.0  }
  0x21   : > { %223 = vst.msk [vmem:[#allocation2] sm:$0x3] %vm222_vm0, %v457_v2 }
  0x22 PF: > { %v355_v3 = vld [vmem:[%s191_s6] sm:$0xf]  ;;  %v367_v4 = vld [vmem:[%s191_s6 + $0x4] sm:$0x10]  ;;  %v366_v5 = vld [vmem:[%s191_s6 + $0x4] sm:$0xf] }
  0x23   : > { %v356_v6 = vor.u32 %v367_v4, %v355_v3  ;;  %v357_v7 = vld [vmem:[%s191_s6 + $0x8] sm:$0x10]  ;;  %v225_v8 = vld [vmem:[%s214_s5] sm:$0x3]  ;;  %vm271_vm1 = vcmask 74752   ;;  %s458_s9 = smov [#allocation4]  }
  0x24   : > { %v360_v9 = vor.u32 %v366_v5, %v357_v7  ;;  %229 = vst [vmem:[#allocation1] ss:$9 sm:$0xff] %v225_v8  ;;  %v400_v19 = vld [vmem:[%s532_s2] ss:$0 sm:$0xff]  ;;  %s286_s10 = sshll.u32 %s458_s9, 4  ;;  %s288_s14 = sshll.u32 %s533_s3, 4  ;;  %s287_s10 = int_to_ptr.vmem [resolvable:$true] %s286_s10  ;;  %s289_s14 = int_to_ptr.hbm [resolvable:$true] %s288_s14 }
  0x25   : > { %251 = vmatpush.bf16.xpose.msra.mxu0 %v356_v6  ;;  %p372_p10 = scmp.eq.s32.totalorder %s492_s15, 1 }
  0x26   : > { %264 = vmatpush.bf16.xpose.msra.mxu1 %v360_v9 }
  0x28   : > { %v224_v13 = vld [vmem:[#allocation2] sm:$0x3] }
  0x2b   : > { %v230_v10 = vld [vmem:[#allocation1] sm:$0xff]  ;;  %v231_v11 = vld [vmem:[#allocation1 + $0x9] sm:$0xff] }
  0x2c   : > { %252 = vmatmul.bf16.vlgmr.msra.gmra.mxu0 %v230_v10 }
  0x2d   : > { %265 = vmatmul.bf16.vlgmr.msra.gmra.mxu1 %v231_v11 }
  0xa9   : > { %v253_v12 = vpop.f32.mrf.mxu0 }
  0xaa   : > { %v266_v14 = vpop.f32.mrf.mxu1 }
  0xab   : > { %v267_v15 = vadd.f32 %v266_v14, %v253_v12 }
  0xad   : > { %v270_v16 = vadd.f32 %v267_v15, %v224_v13 }
  0xaf   : > { %272 = vst.msk [vmem:[#allocation2] sm:$0x3] %vm271_vm1, %v270_v16 }
  0xb1   : > { %v255_v17 = vpop.f32.mrf.mxu0 }
  0xb2   : > { %v268_v18 = vpop.f32.mrf.mxu1 }
  0xb6   : > { %v273_v20 = vld [vmem:[#allocation2] sm:$0x3] }
  0xb7   : > { %v278_v21 = vadd.f32 %v400_v19, %v273_v20 }
  0xb9   : > { %279 = vst.msk [vmem:[#allocation4] sm:$0x3] %vm271_vm1, %v278_v21 }
  0xba   : > { %369 = dma.vmem_to_hbm [thread:$0]  (%p372_p10), %s287_s10, 32, %s289_s14, [#allocation5]  }
  0xbb   : > { %442 = dma.done.wait (%p372_p10), [#allocation5], 32  }
  0xbc   : > { %444 = vsyncadd (%p372_p10), [#allocation5], 4294967264 }
  0xbd PF: > { %p11_p11 = scmp.ge.s32.totalorder %s494_s16, 4   ;;  %s534_s12 = smov %s451_s13 }
  0xbe   : > { %s535_s13 = smov %s501_s19  ;;  %s536_s14 = smov %s494_s16 }
  0xbf   :  { %13 = sbr.rel (!%p11_p11) target bundleno = 2 (0x2), region = 109 }
  0xc4   :  { %302 = vsyncpa [#allocation5], 1 }
  0xc5   :  { %304 = vsyncpa [#allocation5 + $0x1], 1 }

</bundles_post_ra>
